<compile_context>
chip_gen: v7x
topology: tpu7x:2x2x1
jax: 0.10.0
libtpu: 0.0.40
codegen_flags: <defaults>
</compile_context>

<pallas_src>
import jax
import jax.numpy as jnp
from jax import lax
from jax.experimental import pallas as pl
from jax.experimental.pallas import tpu as pltpu


ENCODER_DIM = 512     # encoder_dim == encoder_dim_a in GDT.__init__
NUM_CLASSES = 256     # num_classes default


def _pick_tile(total, cap, quantum):
    """Largest multiple of `quantum` <= cap that evenly divides `total`;
    falls back to the full extent (block == full array dim is always legal)."""
    t = (min(cap, total) // quantum) * quantum
    while t >= quantum:
        if total % t == 0:
            return t
        t -= quantum
    return total


def _make_head_kernel(s_total):
    """Fused pool + linear + L2-normalize for one modality.

    Per grid step the kernel sees:
      x_ref : (TB, D, TS)  channels-first pre-pool activation tile
      w_ref : (D, C)       Linear weight, pre-transposed (PyTorch weight.T)
      b_ref : (1, C)       Linear bias
      o_ref : (TB, C)      L2-normalized projection (written on last S step)
      acc   : (TB, D) f32  running spatial sum (VMEM scratch)
    """
    inv_s = 1.0 / float(s_total)

    def kernel(x_ref, w_ref, b_ref, o_ref, acc_ref):
        s_idx = pl.program_id(1)

        @pl.when(s_idx == 0)
        def _():
            acc_ref[...] = jnp.zeros_like(acc_ref)

        # AdaptiveAvgPool((1,..)) + squeeze: accumulate the spatial sum.
        # Lane-axis reduce goes to the XLU; accumulate in f32.
        acc_ref[...] += jnp.sum(x_ref[...].astype(jnp.float32), axis=-1)

        @pl.when(s_idx == pl.num_programs(1) - 1)
        def _():
            pooled = acc_ref[...] * inv_s                       # (TB, D) mean
            # nn.Linear(D, C):  y = pooled @ W^T + b   (MXU)
            y = jnp.dot(pooled, w_ref[...],
                        preferred_element_type=jnp.float32)
            y = y + b_ref[...]                                   # (TB, C)
            # F.normalize(y, p=2, dim=1) == y / max(||y||_2, 1e-12)
            nsq = jnp.sum(y * y, axis=1, keepdims=True)
            inv_norm = lax.rsqrt(jnp.maximum(nsq, 1e-24))        # EUP rsqrt
            o_ref[...] = (y * inv_norm).astype(o_ref.dtype)

    return kernel


def gdt_head(x_bds, weight, bias, *, max_b_tile=256, max_s_tile=512):
    """x_bds: (B, D, S) channels-first, weight: (C, D) PyTorch-style, bias: (C,)."""
    B, D, S = x_bds.shape
    C = weight.shape[0]
    w_t = jnp.asarray(weight).T                  # (D, C) — MXU RHS layout
    b2 = jnp.asarray(bias).reshape(1, C)         # (1, C)

    # Batch tile (output sublane axis): multiple of 8 dividing B, else full B.
    TB = _pick_tile(B, max_b_tile, 8)
    # Pooled-dim tile (x lane axis): multiple of 128 dividing S, else full S
    # (full-extent block is always legal and keeps the mean exact — no ragged tile).
    TS = _pick_tile(S, max_s_tile, 128)
    grid = (B // TB, S // TS)

    # Explicit VMEM budget: double-buffered x tiles + resident weight/bias +
    # double-buffered output + accumulator, with headroom; capped under v7x's
    # 64 MiB physical VMEM.
    x_bytes = 2 * TB * D * TS * x_bds.dtype.itemsize
    fixed_bytes = (D * C + C) * 4 + 2 * TB * C * 4 + TB * D * 4
    vmem_limit = int(min(max(x_bytes + fixed_bytes + (4 << 20), 16 << 20), 48 << 20))

    kernel = _make_head_kernel(S)

    return pl.pallas_call(
        kernel,
        out_shape=jax.ShapeDtypeStruct((B, C), jnp.float32),
        grid_spec=pltpu.PrefetchScalarGridSpec(
            num_scalar_prefetch=0,
            grid=grid,
            in_specs=[
                pl.BlockSpec((TB, D, TS), lambda b, s: (b, 0, s)),
                pl.BlockSpec((D, C), lambda b, s: (0, 0)),   # grid-invariant
                pl.BlockSpec((1, C), lambda b, s: (0, 0)),   # grid-invariant
            ],
            out_specs=pl.BlockSpec((TB, C), lambda b, s: (b, 0)),
            scratch_shapes=[pltpu.VMEM((TB, D), jnp.float32)],
        ),
        compiler_params=pltpu.CompilerParams(
            dimension_semantics=("parallel", "arbitrary"),
            vmem_limit_bytes=vmem_limit,
        ),
    )(x_bds, w_t, b2)


def gdt_forward(img_prepool, spec_prepool, params):
    """GDT.forward from the backbones' pre-pool activations onward.

    img_prepool  : (B, 512, T, H, W)   video backbone pre-pool activation (NCTHW)
    spec_prepool : (B, 512, F, Tm)     audio backbone pre-pool activation (NCHW)
    returns (nce_img_features, nce_aud_features), each (B, 256), L2-normalized.
    """
    B, D, T, H, W = img_prepool.shape
    v = img_prepool.reshape(B, D, T * H * W)          # (B, D, S_v) — no transpose
    Ba, Da, Hf, Wf = spec_prepool.shape
    a = spec_prepool.reshape(Ba, Da, Hf * Wf)         # (B, D, S_a) — no transpose

    # NOTE: the PyTorch squeeze()/unsqueeze(0) dance only handles B == 1;
    # keeping the batch dim explicit here gives identical semantics for any B.
    nce_img = gdt_head(v, params["w_v"], params["b_v"])   # mlp_v
    nce_aud = gdt_head(a, params["w_a"], params["b_a"])   # mlp_a
    return nce_img, nce_aud


def _reference_forward(img_prepool, spec_prepool, params):
    """Pure-JAX reference mirroring the PyTorch forward (norm_feat=True)."""
    def head(x_bds, w, b):
        pooled = jnp.mean(x_bds.astype(jnp.float32), axis=-1)   # (B, D)
        y = pooled @ w.T + b                                    # (B, C)
        n = jnp.sqrt(jnp.sum(y * y, axis=1, keepdims=True))
        return y / jnp.maximum(n, 1e-12)

    B, D = img_prepool.shape[:2]
    v = img_prepool.reshape(B, D, -1)
    a = spec_prepool.reshape(B, D, -1)
    return head(v, params["w_v"], params["b_v"]), head(a, params["w_a"], params["b_a"])


def init_params(key):
    """Deterministic nn.Linear-style init: U(-1/sqrt(fan_in), 1/sqrt(fan_in))."""
    k1, k2, k3, k4 = jax.random.split(key, 4)
    bound = 1.0 / jnp.sqrt(ENCODER_DIM)
    return {
        "w_v": jax.random.uniform(k1, (NUM_CLASSES, ENCODER_DIM), jnp.float32, -bound, bound),
        "b_v": jax.random.uniform(k2, (NUM_CLASSES,), jnp.float32, -bound, bound),
        "w_a": jax.random.uniform(k3, (NUM_CLASSES, ENCODER_DIM), jnp.float32, -bound, bound),
        "b_a": jax.random.uniform(k4, (NUM_CLASSES,), jnp.float32, -bound, bound),
    }


if __name__ == "__main__":
    key = jax.random.PRNGKey(0)
    k_img, k_spec, k_par = jax.random.split(key, 3)

    B = 2
    # Small pre-pool activation shapes (real r2plus1d_18 on 16x112x112 clips
    # would give (B, 512, 2, 7, 7); resnet9 on a spectrogram gives (B, 512, f, t)).
    img_prepool = jax.random.normal(k_img, (B, ENCODER_DIM, 2, 4, 4), jnp.float32)
    spec_prepool = jax.random.normal(k_spec, (B, ENCODER_DIM, 4, 4), jnp.float32)
    params = init_params(k_par)

    nce_img, nce_aud = jax.jit(gdt_forward)(img_prepool, spec_prepool, params)
    jax.block_until_ready((nce_img, nce_aud))

    ref_img, ref_aud = _reference_forward(img_prepool, spec_prepool, params)
    assert nce_img.shape == (B, NUM_CLASSES) and nce_aud.shape == (B, NUM_CLASSES)
    assert jnp.allclose(nce_img, ref_img, atol=2e-5, rtol=2e-5)
    assert jnp.allclose(nce_aud, ref_aud, atol=2e-5, rtol=2e-5)
    # L2 norms should be 1 after F.normalize semantics.
    assert jnp.allclose(jnp.linalg.norm(nce_img, axis=1), 1.0, atol=1e-4)
    assert jnp.allclose(jnp.linalg.norm(nce_aud, axis=1), 1.0, atol=1e-4)

    print("KERNEL_OK")
</pallas_src>

<mosaic_0001>
module attributes {stable_mosaic.version = 11 : i64} {
  func.func @kernel(%arg0: i32, %arg1: i32, %arg2: memref<2x512x32xf32, #tpu.memory_space<vmem>>, %arg3: memref<512x256xf32, #tpu.memory_space<vmem>>, %arg4: memref<1x256xf32, #tpu.memory_space<vmem>>, %arg5: memref<2x256xf32, #tpu.memory_space<vmem>>, %arg6: memref<2x512xf32, #tpu.memory_space<vmem>>) attributes {dimension_semantics = [#tpu.dimension_semantics<parallel>, #tpu.dimension_semantics<arbitrary>], iteration_bounds = array<i64: 1, 1>, scalar_prefetch = 0 : i64, scratch_operands = 1 : i64, tpu.core_type = #tpu.core_type<tc>, window_params = [{transform_indices = @transform_0, window_bounds = array<i64: 2, 512, 32>}, {pipeline_mode = #tpu.pipeline_mode<synchronous>, transform_indices = @transform_1, window_bounds = array<i64: 512, 256>}, {pipeline_mode = #tpu.pipeline_mode<synchronous>, transform_indices = @transform_2, window_bounds = array<i64: 1, 256>}, {transform_indices = @transform_3, window_bounds = array<i64: 2, 256>}]} {
    %c0_i32 = arith.constant 0 : i32
    %0 = arith.cmpi eq, %arg1, %c0_i32 : i32
    %1 = arith.extui %0 : i1 to i32
    %c0_i32_0 = arith.constant 0 : i32
    %2 = arith.cmpi ne, %1, %c0_i32_0 : i32
    scf.if %2 {
      %cst_9 = arith.constant 0.000000e+00 : f32
      %11 = vector.broadcast %cst_9 : f32 to vector<2x512xf32>
      %c0_10 = arith.constant 0 : index
      %c0_11 = arith.constant 0 : index
      %12 = vector.load %arg6[%c0_10, %c0_11] : memref<2x512xf32, #tpu.memory_space<vmem>>, vector<2x512xf32>
      tpu.vector_store %arg6[%c0_10, %c0_11], %11 {strides = array<i32>} : memref<2x512xf32, #tpu.memory_space<vmem>>, vector<2x512xf32>,
    } else {
    }
    %c0 = arith.constant 0 : index
    %c0_1 = arith.constant 0 : index
    %3 = vector.load %arg6[%c0, %c0_1] : memref<2x512xf32, #tpu.memory_space<vmem>>, vector<2x512xf32>
    %c0_2 = arith.constant 0 : index
    %c0_3 = arith.constant 0 : index
    %c0_4 = arith.constant 0 : index
    %4 = vector.load %arg2[%c0_2, %c0_3, %c0_4] : memref<2x512x32xf32, #tpu.memory_space<vmem>>, vector<2x512x32xf32>
    %cst = arith.constant dense<0.000000e+00> : vector<2x512xf32>
    %5 = vector.multi_reduction <add>, %4, %cst [2] : vector<2x512x32xf32> to vector<2x512xf32>
    %6 = arith.addf %3, %5 : vector<2x512xf32>
    %c0_5 = arith.constant 0 : index
    %c0_6 = arith.constant 0 : index
    %7 = vector.load %arg6[%c0_5, %c0_6] : memref<2x512xf32, #tpu.memory_space<vmem>>, vector<2x512xf32>
    tpu.vector_store %arg6[%c0_5, %c0_6], %6 {strides = array<i32>} : memref<2x512xf32, #tpu.memory_space<vmem>>, vector<2x512xf32>,
    %c0_i32_7 = arith.constant 0 : i32
    %8 = arith.cmpi eq, %arg1, %c0_i32_7 : i32
    %9 = arith.extui %8 : i1 to i32
    %c0_i32_8 = arith.constant 0 : i32
    %10 = arith.cmpi ne, %9, %c0_i32_8 : i32
    scf.if %10 {
      %c0_9 = arith.constant 0 : index
      %c0_10 = arith.constant 0 : index
      %11 = vector.load %arg6[%c0_9, %c0_10] : memref<2x512xf32, #tpu.memory_space<vmem>>, vector<2x512xf32>
      %cst_11 = arith.constant 3.125000e-02 : f32
      %12 = vector.broadcast %cst_11 : f32 to vector<2x512xf32>
      %13 = arith.mulf %11, %12 : vector<2x512xf32>
      %c0_12 = arith.constant 0 : index
      %c0_13 = arith.constant 0 : index
      %14 = vector.load %arg3[%c0_12, %c0_13] : memref<512x256xf32, #tpu.memory_space<vmem>>, vector<512x256xf32>
      %cst_14 = arith.constant dense<0.000000e+00> : vector<2x256xf32>
      %15 = tpu.matmul %13, %14, %cst_14 {dimension_numbers = #tpu.dot_dimension_numbers<[1], [0], [0], [1], [0, 0, 1, 1], [], []>} : vector<2x512xf32>, vector<512x256xf32>, vector<2x256xf32> -> vector<2x256xf32>
      %c0_15 = arith.constant 0 : index
      %c0_16 = arith.constant 0 : index
      %16 = vector.load %arg4[%c0_15, %c0_16] : memref<1x256xf32, #tpu.memory_space<vmem>>, vector<1x256xf32>
      %17 = vector.broadcast %16 : vector<1x256xf32> to vector<2x256xf32>
      %18 = arith.addf %15, %17 : vector<2x256xf32>
      %19 = arith.mulf %18, %18 : vector<2x256xf32>
      %cst_17 = arith.constant dense<0.000000e+00> : vector<2xf32>
      %20 = vector.multi_reduction <add>, %19, %cst_17 [1] : vector<2x256xf32> to vector<2xf32>
      %21 = vector.shape_cast %20 : vector<2xf32> to vector<2x1xf32>
      %cst_18 = arith.constant 1.000000e-24 : f32
      %22 = vector.broadcast %cst_18 : f32 to vector<2x1xf32>
      %23 = arith.maximumf %21, %22 : vector<2x1xf32>
      %24 = math.rsqrt %23 : vector<2x1xf32>
      %25 = vector.broadcast %24 : vector<2x1xf32> to vector<2x256xf32>
      %26 = arith.mulf %18, %25 : vector<2x256xf32>
      %c0_19 = arith.constant 0 : index
      %c0_20 = arith.constant 0 : index
      %27 = vector.load %arg5[%c0_19, %c0_20] : memref<2x256xf32, #tpu.memory_space<vmem>>, vector<2x256xf32>
      tpu.vector_store %arg5[%c0_19, %c0_20], %26 {strides = array<i32>} : memref<2x256xf32, #tpu.memory_space<vmem>>, vector<2x256xf32>,
    } else {
    }
    return
  }
  func.func @transform_0(%arg0: i32, %arg1: i32) -> (i32, i32, i32) {
    %c0_i32 = arith.constant 0 : i32
    %c0_i32_0 = arith.constant 0 : i32
    return %arg0, %c0_i32, %arg1 : i32, i32, i32
  }
  func.func @transform_1(%arg0: i32, %arg1: i32) -> (i32, i32) {
    %c0_i32 = arith.constant 0 : i32
    %c0_i32_0 = arith.constant 0 : i32
    %c0_i32_1 = arith.constant 0 : i32
    return %c0_i32, %c0_i32_0 : i32, i32
  }
  func.func @transform_2(%arg0: i32, %arg1: i32) -> (i32, i32) {
    %c0_i32 = arith.constant 0 : i32
    %c0_i32_0 = arith.constant 0 : i32
    %c0_i32_1 = arith.constant 0 : i32
    return %c0_i32, %c0_i32_0 : i32, i32
  }
  func.func @transform_3(%arg0: i32, %arg1: i32) -> (i32, i32) {
    %c0_i32 = arith.constant 0 : i32
    %c0_i32_0 = arith.constant 0 : i32
    return %arg0, %c0_i32 : i32, i32
  }
}

module attributes {stable_mosaic.version = 11 : i64} {
  func.func @kernel(%arg0: i32, %arg1: i32, %arg2: memref<2x512x16xf32, #tpu.memory_space<vmem>>, %arg3: memref<512x256xf32, #tpu.memory_space<vmem>>, %arg4: memref<1x256xf32, #tpu.memory_space<vmem>>, %arg5: memref<2x256xf32, #tpu.memory_space<vmem>>, %arg6: memref<2x512xf32, #tpu.memory_space<vmem>>) attributes {dimension_semantics = [#tpu.dimension_semantics<parallel>, #tpu.dimension_semantics<arbitrary>], iteration_bounds = array<i64: 1, 1>, scalar_prefetch = 0 : i64, scratch_operands = 1 : i64, tpu.core_type = #tpu.core_type<tc>, window_params = [{transform_indices = @transform_0, window_bounds = array<i64: 2, 512, 16>}, {pipeline_mode = #tpu.pipeline_mode<synchronous>, transform_indices = @transform_1, window_bounds = array<i64: 512, 256>}, {pipeline_mode = #tpu.pipeline_mode<synchronous>, transform_indices = @transform_2, window_bounds = array<i64: 1, 256>}, {transform_indices = @transform_3, window_bounds = array<i64: 2, 256>}]} {
    %c0_i32 = arith.constant 0 : i32
    %0 = arith.cmpi eq, %arg1, %c0_i32 : i32
    %1 = arith.extui %0 : i1 to i32
    %c0_i32_0 = arith.constant 0 : i32
    %2 = arith.cmpi ne, %1, %c0_i32_0 : i32
    scf.if %2 {
      %cst_9 = arith.constant 0.000000e+00 : f32
      %11 = vector.broadcast %cst_9 : f32 to vector<2x512xf32>
      %c0_10 = arith.constant 0 : index
      %c0_11 = arith.constant 0 : index
      %12 = vector.load %arg6[%c0_10, %c0_11] : memref<2x512xf32, #tpu.memory_space<vmem>>, vector<2x512xf32>
      tpu.vector_store %arg6[%c0_10, %c0_11], %11 {strides = array<i32>} : memref<2x512xf32, #tpu.memory_space<vmem>>, vector<2x512xf32>,
    } else {
    }
    %c0 = arith.constant 0 : index
    %c0_1 = arith.constant 0 : index
    %3 = vector.load %arg6[%c0, %c0_1] : memref<2x512xf32, #tpu.memory_space<vmem>>, vector<2x512xf32>
    %c0_2 = arith.constant 0 : index
    %c0_3 = arith.constant 0 : index
    %c0_4 = arith.constant 0 : index
    %4 = vector.load %arg2[%c0_2, %c0_3, %c0_4] : memref<2x512x16xf32, #tpu.memory_space<vmem>>, vector<2x512x16xf32>
    %cst = arith.constant dense<0.000000e+00> : vector<2x512xf32>
    %5 = vector.multi_reduction <add>, %4, %cst [2] : vector<2x512x16xf32> to vector<2x512xf32>
    %6 = arith.addf %3, %5 : vector<2x512xf32>
    %c0_5 = arith.constant 0 : index
    %c0_6 = arith.constant 0 : index
    %7 = vector.load %arg6[%c0_5, %c0_6] : memref<2x512xf32, #tpu.memory_space<vmem>>, vector<2x512xf32>
    tpu.vector_store %arg6[%c0_5, %c0_6], %6 {strides = array<i32>} : memref<2x512xf32, #tpu.memory_space<vmem>>, vector<2x512xf32>,
    %c0_i32_7 = arith.constant 0 : i32
    %8 = arith.cmpi eq, %arg1, %c0_i32_7 : i32
    %9 = arith.extui %8 : i1 to i32
    %c0_i32_8 = arith.constant 0 : i32
    %10 = arith.cmpi ne, %9, %c0_i32_8 : i32
    scf.if %10 {
      %c0_9 = arith.constant 0 : index
      %c0_10 = arith.constant 0 : index
      %11 = vector.load %arg6[%c0_9, %c0_10] : memref<2x512xf32, #tpu.memory_space<vmem>>, vector<2x512xf32>
      %cst_11 = arith.constant 6.250000e-02 : f32
      %12 = vector.broadcast %cst_11 : f32 to vector<2x512xf32>
      %13 = arith.mulf %11, %12 : vector<2x512xf32>
      %c0_12 = arith.constant 0 : index
      %c0_13 = arith.constant 0 : index
      %14 = vector.load %arg3[%c0_12, %c0_13] : memref<512x256xf32, #tpu.memory_space<vmem>>, vector<512x256xf32>
      %cst_14 = arith.constant dense<0.000000e+00> : vector<2x256xf32>
      %15 = tpu.matmul %13, %14, %cst_14 {dimension_numbers = #tpu.dot_dimension_numbers<[1], [0], [0], [1], [0, 0, 1, 1], [], []>} : vector<2x512xf32>, vector<512x256xf32>, vector<2x256xf32> -> vector<2x256xf32>
      %c0_15 = arith.constant 0 : index
      %c0_16 = arith.constant 0 : index
      %16 = vector.load %arg4[%c0_15, %c0_16] : memref<1x256xf32, #tpu.memory_space<vmem>>, vector<1x256xf32>
      %17 = vector.broadcast %16 : vector<1x256xf32> to vector<2x256xf32>
      %18 = arith.addf %15, %17 : vector<2x256xf32>
      %19 = arith.mulf %18, %18 : vector<2x256xf32>
      %cst_17 = arith.constant dense<0.000000e+00> : vector<2xf32>
      %20 = vector.multi_reduction <add>, %19, %cst_17 [1] : vector<2x256xf32> to vector<2xf32>
      %21 = vector.shape_cast %20 : vector<2xf32> to vector<2x1xf32>
      %cst_18 = arith.constant 1.000000e-24 : f32
      %22 = vector.broadcast %cst_18 : f32 to vector<2x1xf32>
      %23 = arith.maximumf %21, %22 : vector<2x1xf32>
      %24 = math.rsqrt %23 : vector<2x1xf32>
      %25 = vector.broadcast %24 : vector<2x1xf32> to vector<2x256xf32>
      %26 = arith.mulf %18, %25 : vector<2x256xf32>
      %c0_19 = arith.constant 0 : index
      %c0_20 = arith.constant 0 : index
      %27 = vector.load %arg5[%c0_19, %c0_20] : memref<2x256xf32, #tpu.memory_space<vmem>>, vector<2x256xf32>
      tpu.vector_store %arg5[%c0_19, %c0_20], %26 {strides = array<i32>} : memref<2x256xf32, #tpu.memory_space<vmem>>, vector<2x256xf32>,
    } else {
    }
    return
  }
  func.func @transform_0(%arg0: i32, %arg1: i32) -> (i32, i32, i32) {
    %c0_i32 = arith.constant 0 : i32
    %c0_i32_0 = arith.constant 0 : i32
    return %arg0, %c0_i32, %arg1 : i32, i32, i32
  }
  func.func @transform_1(%arg0: i32, %arg1: i32) -> (i32, i32) {
    %c0_i32 = arith.constant 0 : i32
    %c0_i32_0 = arith.constant 0 : i32
    %c0_i32_1 = arith.constant 0 : i32
    return %c0_i32, %c0_i32_0 : i32, i32
  }
  func.func @transform_2(%arg0: i32, %arg1: i32) -> (i32, i32) {
    %c0_i32 = arith.constant 0 : i32
    %c0_i32_0 = arith.constant 0 : i32
    %c0_i32_1 = arith.constant 0 : i32
    return %c0_i32, %c0_i32_0 : i32, i32
  }
  func.func @transform_3(%arg0: i32, %arg1: i32) -> (i32, i32) {
    %c0_i32 = arith.constant 0 : i32
    %c0_i32_0 = arith.constant 0 : i32
    return %arg0, %c0_i32 : i32, i32
  }
}

</mosaic_0001>

<bundles_post_ra>
// kernel: gdt_forward.2
= control target key start
LH: loop header
LB: loop body
LE: loop exit
PB: predicated region body
PF: predicated region fallthrough
CT: control target
= control target key end

     0   :  { %vm149_vm0 = vcmask 261120   ;;  %s11733_s0 = inlined_call_operand.vmem [shape: f32[2,512,32], index: 0, kind: input, shape index: {}]   ;;  %s11734_s1 = inlined_call_operand.vmem [shape: f32[512,256], index: 1, kind: input, shape index: {}]   ;;  %s11735_s2 = inlined_call_operand.vmem [shape: f32[1,256], index: 2, kind: input, shape index: {}]   ;;  %s11736_s3 = inlined_call_operand.hbm [shape: f32[2,256], index: 3, kind: output, shape index: {}]  }
   0x1   :  { %v23_v0 = vld [vmem:[%s11733_s0 + $0x10] sm:$0xff]  ;;  %v21_v1 = vld [vmem:[%s11733_s0] sm:$0xff]  ;;  %v24_v2 = vld [vmem:[%s11733_s0 + $0x18] sm:$0xff] }
   0x2   :  { %v156_v3 = vsel %vm149_vm0, %v23_v0, 0.0  ;;  %v150_v4 = vsel %vm149_vm0, %v21_v1, 0.0  ;;  %v22_v5 = vld [vmem:[%s11733_s0 + $0x8] sm:$0xff]  ;;  %v159_v6 = vsel %vm149_vm0, %v24_v2, 0.0  ;;  %v25_v9 = vld [vmem:[%s11733_s0 + $0x20] sm:$0xff]  ;;  %v28_v12 = vld [vmem:[%s11733_s0 + $0x38] sm:$0xff] }
   0x3   :  { %157 = vadd.xlane.f32.xlu1 %v156_v3  ;;  %151 = vadd.xlane.f32.xlu0 %v150_v4  ;;  %v153_v7 = vsel %vm149_vm0, %v22_v5, 0.0  ;;  %v26_v8 = vld [vmem:[%s11733_s0 + $0x28] sm:$0xff]  ;;  %v162_v11 = vsel %vm149_vm0, %v25_v9, 0.0  ;;  %v27_v13 = vld [vmem:[%s11733_s0 + $0x30] sm:$0xff]  ;;  %v171_v14 = vsel %vm149_vm0, %v28_v12, 0.0  ;;  %v29_v17 = vld [vmem:[%s11733_s0 + $0x40] sm:$0xff] }
   0x4   :  { %v165_v10 = vsel %vm149_vm0, %v26_v8, 0.0  ;;  %v168_v15 = vsel %vm149_vm0, %v27_v13, 0.0  ;;  %v30_v16 = vld [vmem:[%s11733_s0 + $0x48] sm:$0xff]  ;;  %v174_v19 = vsel %vm149_vm0, %v29_v17, 0.0  ;;  %v32_v20 = vld [vmem:[%s11733_s0 + $0x58] sm:$0xff]  ;;  %v31_v21 = vld [vmem:[%s11733_s0 + $0x50] sm:$0xff] }
   0x5   :  { %v177_v18 = vsel %vm149_vm0, %v30_v16, 0.0  ;;  %v183_v22 = vsel %vm149_vm0, %v32_v20, 0.0  ;;  %v180_v23 = vsel %vm149_vm0, %v31_v21, 0.0  ;;  %v34_v24 = vld [vmem:[%s11733_s0 + $0x68] sm:$0xff]  ;;  %v33_v25 = vld [vmem:[%s11733_s0 + $0x60] sm:$0xff]  ;;  %v36_v28 = vld [vmem:[%s11733_s0 + $0x78] sm:$0xff] }
   0x6   :  { %v189_v26 = vsel %vm149_vm0, %v34_v24, 0.0  ;;  %v186_v27 = vsel %vm149_vm0, %v33_v25, 0.0  ;;  %v35_v29 = vld [vmem:[%s11733_s0 + $0x70] sm:$0xff]  ;;  %v195_v30 = vsel %vm149_vm0, %v36_v28, 0.0 }
   0x7   :  { %160 = vadd.xlane.f32.xlu1 %v159_v6  ;;  %154 = vadd.xlane.f32.xlu0 %v153_v7  ;;  %v192_v31 = vsel %vm149_vm0, %v35_v29, 0.0 }
   0xb   :  { %166 = vadd.xlane.f32.xlu1 %v165_v10  ;;  %163 = vadd.xlane.f32.xlu0 %v162_v11 }
   0xf   :  { %172 = vadd.xlane.f32.xlu1 %v171_v14  ;;  %169 = vadd.xlane.f32.xlu0 %v168_v15 }
  0x13   :  { %178 = vadd.xlane.f32.xlu1 %v177_v18  ;;  %175 = vadd.xlane.f32.xlu0 %v174_v19 }
  0x17   :  { %184 = vadd.xlane.f32.xlu1 %v183_v22  ;;  %181 = vadd.xlane.f32.xlu0 %v180_v23 }
  0x1b   :  { %190 = vadd.xlane.f32.xlu1 %v189_v26  ;;  %187 = vadd.xlane.f32.xlu0 %v186_v27 }
  0x1c   :  { %8 = vsyncpa [#allocation4], 0  ;;  %v38_v32 = vld [vmem:[%s11733_s0 + $0x88] sm:$0xff]  ;;  %v37_v33 = vld [vmem:[%s11733_s0 + $0x80] sm:$0xff]  ;;  %vm6817_vm1 = vcmask 130112   ;;  %vm6824_vm2 = vcmask 195712  }
  0x1d   :  { %v201_v34 = vsel %vm149_vm0, %v38_v32, 0.0  ;;  %v198_v35 = vsel %vm149_vm0, %v37_v33, 0.0  ;;  %v40_v36 = vld [vmem:[%s11733_s0 + $0x98] sm:$0xff]  ;;  %v39_v37 = vld [vmem:[%s11733_s0 + $0x90] sm:$0xff]  ;;  %v42_v40 = vld [vmem:[%s11733_s0 + $0xa8] sm:$0xff]  ;;  %vm6831_vm3 = vcmask 261312  }
  0x1e   :  { %v207_v38 = vsel %vm149_vm0, %v40_v36, 0.0  ;;  %v204_v39 = vsel %vm149_vm0, %v39_v37, 0.0  ;;  %v41_v41 = vld [vmem:[%s11733_s0 + $0xa0] sm:$0xff]  ;;  %v213_v42 = vsel %vm149_vm0, %v42_v40, 0.0  ;;  %v44_v44 = vld [vmem:[%s11733_s0 + $0xb8] sm:$0xff]  ;;  %v43_v45 = vld [vmem:[%s11733_s0 + $0xb0] sm:$0xff] }
  0x1f   :  { %196 = vadd.xlane.f32.xlu1 %v195_v30  ;;  %193 = vadd.xlane.f32.xlu0 %v192_v31  ;;  %v210_v43 = vsel %vm149_vm0, %v41_v41, 0.0  ;;  %v219_v46 = vsel %vm149_vm0, %v44_v44, 0.0  ;;  %v216_v47 = vsel %vm149_vm0, %v43_v45, 0.0  ;;  %v46_v48 = vld [vmem:[%s11733_s0 + $0xc8] sm:$0xff]  ;;  %v45_v49 = vld [vmem:[%s11733_s0 + $0xc0] sm:$0xff]  ;;  %v48_v52 = vld [vmem:[%s11733_s0 + $0xd8] sm:$0xff] }
  0x20   :  { %v225_v50 = vsel %vm149_vm0, %v46_v48, 0.0  ;;  %v222_v51 = vsel %vm149_vm0, %v45_v49, 0.0  ;;  %v47_v53 = vld [vmem:[%s11733_s0 + $0xd0] sm:$0xff]  ;;  %v231_v54 = vsel %vm149_vm0, %v48_v52, 0.0  ;;  %v50_v56 = vld [vmem:[%s11733_s0 + $0xe8] sm:$0xff]  ;;  %v49_v57 = vld [vmem:[%s11733_s0 + $0xe0] sm:$0xff] }
  0x21   :  { %v228_v55 = vsel %vm149_vm0, %v47_v53, 0.0  ;;  %v237_v58 = vsel %vm149_vm0, %v50_v56, 0.0  ;;  %v234_v59 = vsel %vm149_vm0, %v49_v57, 0.0  ;;  %v52_v60 = vld [vmem:[%s11733_s0 + $0xf8] sm:$0xff]  ;;  %v51_v61 = vld [vmem:[%s11733_s0 + $0xf0] sm:$0xff]  ;;  %v54_v0 = vld [vmem:[%s11733_s0 + $0x108] sm:$0xff] }
  0x22   :  { %v243_v62 = vsel %vm149_vm0, %v52_v60, 0.0  ;;  %v240_v63 = vsel %vm149_vm0, %v51_v61, 0.0  ;;  %v53_v1 = vld [vmem:[%s11733_s0 + $0x100] sm:$0xff]  ;;  %v249_v2 = vsel %vm149_vm0, %v54_v0, 0.0  ;;  %v56_v4 = vld [vmem:[%s11733_s0 + $0x118] sm:$0xff]  ;;  %v55_v5 = vld [vmem:[%s11733_s0 + $0x110] sm:$0xff] }
  0x23   :  { %202 = vadd.xlane.f32.xlu1 %v201_v34  ;;  %199 = vadd.xlane.f32.xlu0 %v198_v35  ;;  %v246_v3 = vsel %vm149_vm0, %v53_v1, 0.0  ;;  %v255_v6 = vsel %vm149_vm0, %v56_v4, 0.0  ;;  %v252_v7 = vsel %vm149_vm0, %v55_v5, 0.0  ;;  %v58_v8 = vld [vmem:[%s11733_s0 + $0x128] sm:$0xff]  ;;  %v57_v9 = vld [vmem:[%s11733_s0 + $0x120] sm:$0xff]  ;;  %v60_v12 = vld [vmem:[%s11733_s0 + $0x138] sm:$0xff] }
  0x24   :  { %v261_v10 = vsel %vm149_vm0, %v58_v8, 0.0  ;;  %v258_v11 = vsel %vm149_vm0, %v57_v9, 0.0  ;;  %v59_v13 = vld [vmem:[%s11733_s0 + $0x130] sm:$0xff]  ;;  %v267_v14 = vsel %vm149_vm0, %v60_v12, 0.0  ;;  %v62_v16 = vld [vmem:[%s11733_s0 + $0x148] sm:$0xff]  ;;  %v61_v17 = vld [vmem:[%s11733_s0 + $0x140] sm:$0xff] }
  0x25   :  { %v264_v15 = vsel %vm149_vm0, %v59_v13, 0.0  ;;  %v273_v18 = vsel %vm149_vm0, %v62_v16, 0.0  ;;  %v270_v19 = vsel %vm149_vm0, %v61_v17, 0.0  ;;  %v64_v20 = vld [vmem:[%s11733_s0 + $0x158] sm:$0xff]  ;;  %v63_v21 = vld [vmem:[%s11733_s0 + $0x150] sm:$0xff]  ;;  %v66_v24 = vld [vmem:[%s11733_s0 + $0x168] sm:$0xff] }
  0x26   :  { %v279_v22 = vsel %vm149_vm0, %v64_v20, 0.0  ;;  %v276_v23 = vsel %vm149_vm0, %v63_v21, 0.0  ;;  %v65_v25 = vld [vmem:[%s11733_s0 + $0x160] sm:$0xff]  ;;  %v285_v26 = vsel %vm149_vm0, %v66_v24, 0.0  ;;  %v68_v28 = vld [vmem:[%s11733_s0 + $0x178] sm:$0xff]  ;;  %v67_v29 = vld [vmem:[%s11733_s0 + $0x170] sm:$0xff] }
  0x27   :  { %208 = vadd.xlane.f32.xlu1 %v207_v38  ;;  %205 = vadd.xlane.f32.xlu0 %v204_v39  ;;  %v282_v27 = vsel %vm149_vm0, %v65_v25, 0.0  ;;  %v291_v30 = vsel %vm149_vm0, %v68_v28, 0.0  ;;  %v288_v31 = vsel %vm149_vm0, %v67_v29, 0.0  ;;  %v70_v32 = vld [vmem:[%s11733_s0 + $0x188] sm:$0xff]  ;;  %v69_v33 = vld [vmem:[%s11733_s0 + $0x180] sm:$0xff]  ;;  %v72_v36 = vld [vmem:[%s11733_s0 + $0x198] sm:$0xff] }
  0x28   :  { %v297_v34 = vsel %vm149_vm0, %v70_v32, 0.0  ;;  %v294_v35 = vsel %vm149_vm0, %v69_v33, 0.0  ;;  %v71_v37 = vld [vmem:[%s11733_s0 + $0x190] sm:$0xff]  ;;  %v303_v38 = vsel %vm149_vm0, %v72_v36, 0.0  ;;  %v74_v40 = vld [vmem:[%s11733_s0 + $0x1a8] sm:$0xff]  ;;  %v73_v41 = vld [vmem:[%s11733_s0 + $0x1a0] sm:$0xff] }
  0x29   :  { %v300_v39 = vsel %vm149_vm0, %v71_v37, 0.0  ;;  %v76_v44 = vld [vmem:[%s11733_s0 + $0x1b8] sm:$0xff]  ;;  %v75_v45 = vld [vmem:[%s11733_s0 + $0x1b0] sm:$0xff]  ;;  %v78_v48 = vld [vmem:[%s11733_s0 + $0x1c8] sm:$0xff]  ;;  %vm6838_vm4 = vcmask 326912   ;;  %vm6845_vm5 = vcmask 392512  }
  0x2a   :  { %v77_v49 = vld [vmem:[%s11733_s0 + $0x1c0] sm:$0xff]  ;;  %v80_v52 = vld [vmem:[%s11733_s0 + $0x1d8] sm:$0xff]  ;;  %v79_v53 = vld [vmem:[%s11733_s0 + $0x1d0] sm:$0xff]  ;;  %vm6852_vm6 = vcmask 458112   ;;  %vm6859_vm7 = vcmask 523712   ;;  %vm6866_vm8 = vcmask 589312  }
  0x2b   :  { %214 = vadd.xlane.f32.xlu1 %v213_v42  ;;  %211 = vadd.xlane.f32.xlu0 %v210_v43  ;;  %v309_v42 = vsel %vm149_vm0, %v74_v40, 0.0  ;;  %v306_v43 = vsel %vm149_vm0, %v73_v41, 0.0  ;;  %v82_v56 = vld [vmem:[%s11733_s0 + $0x1e8] sm:$0xff]  ;;  %v81_v57 = vld [vmem:[%s11733_s0 + $0x1e0] sm:$0xff]  ;;  %v84_v60 = vld [vmem:[%s11733_s0 + $0x1f8] sm:$0xff]  ;;  %vm6873_vm9 = vcmask 654912  }
  0x2c   :  { %v83_v61 = vld [vmem:[%s11733_s0 + $0x1f0] sm:$0xff]  ;;  %v86_v0 = vld [vmem:[%s11733_s0 + $0x208] sm:$0xff]  ;;  %v85_v1 = vld [vmem:[%s11733_s0 + $0x200] sm:$0xff]  ;;  %vm6880_vm10 = vcmask 720512   ;;  %vm6887_vm11 = vcmask 786112   ;;  %vm6894_vm12 = vcmask 851712  }
  0x2d   :  { %v88_v4 = vld [vmem:[%s11733_s0 + $0x218] sm:$0xff]  ;;  %v87_v5 = vld [vmem:[%s11733_s0 + $0x210] sm:$0xff]  ;;  %v90_v8 = vld [vmem:[%s11733_s0 + $0x228] sm:$0xff]  ;;  %vm6901_vm13 = vcmask 917312   ;;  %vm6908_vm14 = vcmask 982912   ;;  %vm6915_vm15 = vcmask 1048512  }
  0x2e   :  { %v89_v9 = vld [vmem:[%s11733_s0 + $0x220] sm:$0xff]  ;;  %v92_v12 = vld [vmem:[%s11733_s0 + $0x238] sm:$0xff]  ;;  %v91_v13 = vld [vmem:[%s11733_s0 + $0x230] sm:$0xff] }
  0x2f   :  { %220 = vadd.xlane.f32.xlu1 %v219_v46  ;;  %217 = vadd.xlane.f32.xlu0 %v216_v47  ;;  %v315_v46 = vsel %vm149_vm0, %v76_v44, 0.0  ;;  %v312_v47 = vsel %vm149_vm0, %v75_v45, 0.0  ;;  %v94_v16 = vld [vmem:[%s11733_s0 + $0x248] sm:$0xff]  ;;  %v93_v17 = vld [vmem:[%s11733_s0 + $0x240] sm:$0xff]  ;;  %v95_v24 = vld [vmem:[%s11733_s0 + $0x250] sm:$0xff] }
  0x30   :  { %v369_v20 = vsel %vm149_vm0, %v94_v16, 0.0  ;;  %v366_v21 = vsel %vm149_vm0, %v93_v17, 0.0  ;;  %v372_v28 = vsel %vm149_vm0, %v95_v24, 0.0  ;;  %v98_v29 = vld [vmem:[%s11733_s0 + $0x268] sm:$0xff]  ;;  %v99_v36 = vld [vmem:[%s11733_s0 + $0x270] sm:$0xff] }
  0x31   :  { %v381_v33 = vsel %vm149_vm0, %v98_v29, 0.0  ;;  %v384_v40 = vsel %vm149_vm0, %v99_v36, 0.0  ;;  %v102_v41 = vld [vmem:[%s11733_s0 + $0x288] sm:$0xff] }
  0x32   :  { %v393_v45 = vsel %vm149_vm0, %v102_v41, 0.0  ;;  %v118_v29 = vld [vmem:[%s11733_s0 + $0x308] sm:$0xff] }
  0x33   :  { %226 = vadd.xlane.f32.xlu1 %v225_v50  ;;  %223 = vadd.xlane.f32.xlu0 %v222_v51  ;;  %v321_v50 = vsel %vm149_vm0, %v78_v48, 0.0  ;;  %v318_v51 = vsel %vm149_vm0, %v77_v49, 0.0  ;;  %v103_v48 = vld [vmem:[%s11733_s0 + $0x290] sm:$0xff] }
  0x37   :  { %232 = vadd.xlane.f32.xlu1 %v231_v54  ;;  %229 = vadd.xlane.f32.xlu0 %v228_v55  ;;  %v327_v54 = vsel %vm149_vm0, %v80_v52, 0.0  ;;  %v324_v55 = vsel %vm149_vm0, %v79_v53, 0.0  ;;  %v396_v52 = vsel %vm149_vm0, %v103_v48, 0.0  ;;  %v106_v53 = vld [vmem:[%s11733_s0 + $0x2a8] sm:$0xff]  ;;  %v121_v48 = vld [vmem:[%s11733_s0 + $0x320] sm:$0xff] }
  0x3b   :  { %238 = vadd.xlane.f32.xlu1 %v237_v58  ;;  %235 = vadd.xlane.f32.xlu0 %v234_v59  ;;  %v333_v58 = vsel %vm149_vm0, %v82_v56, 0.0  ;;  %v330_v59 = vsel %vm149_vm0, %v81_v57, 0.0  ;;  %v405_v57 = vsel %vm149_vm0, %v106_v53, 0.0 }
  0x3f   :  { %244 = vadd.xlane.f32.xlu1 %v243_v62  ;;  %241 = vadd.xlane.f32.xlu0 %v240_v63  ;;  %v339_v62 = vsel %vm149_vm0, %v84_v60, 0.0  ;;  %v336_v63 = vsel %vm149_vm0, %v83_v61, 0.0  ;;  %v107_v60 = vld [vmem:[%s11733_s0 + $0x2b0] sm:$0xff] }
  0x43   :  { %250 = vadd.xlane.f32.xlu1 %v249_v2  ;;  %247 = vadd.xlane.f32.xlu0 %v246_v3  ;;  %v345_v2 = vsel %vm149_vm0, %v86_v0, 0.0  ;;  %v342_v3 = vsel %vm149_vm0, %v85_v1, 0.0  ;;  %v408_v0 = vsel %vm149_vm0, %v107_v60, 0.0  ;;  %v110_v1 = vld [vmem:[%s11733_s0 + $0x2c8] sm:$0xff]  ;;  %v8011_v60 = vmov 269488144  }
  0x47   :  { %256 = vadd.xlane.f32.xlu1 %v255_v6  ;;  %253 = vadd.xlane.f32.xlu0 %v252_v7  ;;  %v351_v6 = vsel %vm149_vm0, %v88_v4, 0.0  ;;  %v348_v7 = vsel %vm149_vm0, %v87_v5, 0.0  ;;  %v417_v5 = vsel %vm149_vm0, %v110_v1, 0.0 }
  0x4b   :  { %262 = vadd.xlane.f32.xlu1 %v261_v10  ;;  %259 = vadd.xlane.f32.xlu0 %v258_v11  ;;  %v357_v10 = vsel %vm149_vm0, %v90_v8, 0.0  ;;  %v354_v11 = vsel %vm149_vm0, %v89_v9, 0.0  ;;  %v111_v8 = vld [vmem:[%s11733_s0 + $0x2d0] sm:$0xff] }
  0x4f   :  { %268 = vadd.xlane.f32.xlu1 %v267_v14  ;;  %265 = vadd.xlane.f32.xlu0 %v264_v15  ;;  %v363_v14 = vsel %vm149_vm0, %v92_v12, 0.0  ;;  %v360_v15 = vsel %vm149_vm0, %v91_v13, 0.0  ;;  %v420_v12 = vsel %vm149_vm0, %v111_v8, 0.0  ;;  %v114_v13 = vld [vmem:[%s11733_s0 + $0x2e8] sm:$0xff] }
  0x50   :  { %v429_v17 = vsel %vm149_vm0, %v114_v13, 0.0  ;;  %v126_v8 = vld [vmem:[%s11733_s0 + $0x348] sm:$0xff] }
  0x53   :  { %274 = vadd.xlane.f32.xlu1 %v273_v18  ;;  %271 = vadd.xlane.f32.xlu0 %v270_v19 }
  0x57   :  { %280 = vadd.xlane.f32.xlu1 %v279_v22  ;;  %277 = vadd.xlane.f32.xlu0 %v276_v23  ;;  %v8010_v22 = vmov 0   ;;  %v96_v23 = vld [vmem:[%s11733_s0 + $0x258] sm:$0xff] }
  0x58   :  { %7983 = vset.pattern.permute.xlu1 %v8010_v22  ;;  %7982 = vset.pattern.permute.xlu0 %v8010_v22  ;;  %v115_v22 = vld [vmem:[%s11733_s0 + $0x2f0] sm:$0xff] }
  0x5b   :  { %286 = vadd.xlane.f32.xlu1 %v285_v26  ;;  %283 = vadd.xlane.f32.xlu0 %v282_v27  ;;  %v375_v27 = vsel %vm149_vm0, %v96_v23, 0.0 }
  0x5f   :  { %292 = vadd.xlane.f32.xlu1 %v291_v30  ;;  %289 = vadd.xlane.f32.xlu0 %v288_v31  ;;  %v97_v30 = vld [vmem:[%s11733_s0 + $0x260] sm:$0xff] }
  0x63   :  { %298 = vadd.xlane.f32.xlu1 %v297_v34  ;;  %295 = vadd.xlane.f32.xlu0 %v294_v35  ;;  %v378_v34 = vsel %vm149_vm0, %v97_v30, 0.0  ;;  %v100_v35 = vld [vmem:[%s11733_s0 + $0x278] sm:$0xff]  ;;  %v117_v30 = vld [vmem:[%s11733_s0 + $0x300] sm:$0xff] }
  0x64   :  { %v438_v36 = vsel %vm149_vm0, %v117_v30, 0.0 }
  0x67   :  { %304 = vadd.xlane.f32.xlu1 %v303_v38  ;;  %301 = vadd.xlane.f32.xlu0 %v300_v39  ;;  %v387_v39 = vsel %vm149_vm0, %v100_v35, 0.0  ;;  %v441_v35 = vsel %vm149_vm0, %v118_v29, 0.0  ;;  %v465_v29 = vsel %vm149_vm0, %v126_v8, 0.0 }
  0x6b   :  { %310 = vadd.xlane.f32.xlu1 %v309_v42  ;;  %307 = vadd.xlane.f32.xlu0 %v306_v43  ;;  %v101_v42 = vld [vmem:[%s11733_s0 + $0x280] sm:$0xff] }
  0x6f   :  { %316 = vadd.xlane.f32.xlu1 %v315_v46  ;;  %313 = vadd.xlane.f32.xlu0 %v312_v47  ;;  %v390_v46 = vsel %vm149_vm0, %v101_v42, 0.0  ;;  %v104_v47 = vld [vmem:[%s11733_s0 + $0x298] sm:$0xff] }
  0x73   :  { %322 = vadd.xlane.f32.xlu1 %v321_v50  ;;  %319 = vadd.xlane.f32.xlu0 %v318_v51  ;;  %v399_v51 = vsel %vm149_vm0, %v104_v47, 0.0  ;;  %v122_v47 = vld [vmem:[%s11733_s0 + $0x328] sm:$0xff] }
  0x74   :  { %v453_v53 = vsel %vm149_vm0, %v122_v47, 0.0 }
  0x77   :  { %328 = vadd.xlane.f32.xlu1 %v327_v54  ;;  %325 = vadd.xlane.f32.xlu0 %v324_v55  ;;  %v105_v54 = vld [vmem:[%s11733_s0 + $0x2a0] sm:$0xff] }
  0x7b   :  { %334 = vadd.xlane.f32.xlu1 %v333_v58  ;;  %331 = vadd.xlane.f32.xlu0 %v330_v59  ;;  %v402_v58 = vsel %vm149_vm0, %v105_v54, 0.0  ;;  %v108_v59 = vld [vmem:[%s11733_s0 + $0x2b8] sm:$0xff]  ;;  %v450_v54 = vsel %vm149_vm0, %v121_v48, 0.0 }
  0x7f   :  { %340 = vadd.xlane.f32.xlu1 %v339_v62  ;;  %337 = vadd.xlane.f32.xlu0 %v336_v63  ;;  %v411_v63 = vsel %vm149_vm0, %v108_v59, 0.0  ;;  %v11737_v59 = vlaneseq }
  0x83   :  { %346 = vadd.xlane.f32.xlu1 %v345_v2  ;;  %343 = vadd.xlane.f32.xlu0 %v342_v3  ;;  %v109_v2 = vld [vmem:[%s11733_s0 + $0x2c0] sm:$0xff] }
  0x87   :  { %352 = vadd.xlane.f32.xlu1 %v351_v6  ;;  %349 = vadd.xlane.f32.xlu0 %v348_v7  ;;  %v414_v6 = vsel %vm149_vm0, %v109_v2, 0.0  ;;  %v112_v7 = vld [vmem:[%s11733_s0 + $0x2d8] sm:$0xff] }
  0x8b   :  { %358 = vadd.xlane.f32.xlu1 %v357_v10  ;;  %355 = vadd.xlane.f32.xlu0 %v354_v11  ;;  %v423_v11 = vsel %vm149_vm0, %v112_v7, 0.0 }
  0x8f   :  { %364 = vadd.xlane.f32.xlu1 %v363_v14  ;;  %361 = vadd.xlane.f32.xlu0 %v360_v15  ;;  %v113_v14 = vld [vmem:[%s11733_s0 + $0x2e0] sm:$0xff] }
  0x90   :  { %v8331_v18 = vpop.xlane.xlu1 %157  ;;  %v8333_v19 = vpop.xlane.xlu0 %151 }
  0x93   :  { %370 = vadd.xlane.f32.xlu1 %v369_v20  ;;  %367 = vadd.xlane.f32.xlu0 %v366_v21  ;;  %v426_v20 = vsel %vm149_vm0, %v113_v14, 0.0  ;;  %v116_v21 = vld [vmem:[%s11733_s0 + $0x2f8] sm:$0xff]  ;;  %v8014_v14 = vmov 1987475062  }
  0x94   :  { %v8343_v25 = vpop.xlane.xlu1 %160  ;;  %v8345_v26 = vpop.xlane.xlu0 %154 }
  0x97   :  { %376 = vadd.xlane.f32.xlu1 %v375_v27  ;;  %373 = vadd.xlane.f32.xlu0 %v372_v28  ;;  %v435_v27 = vsel %vm149_vm0, %v116_v21, 0.0  ;;  %v432_v28 = vsel %vm149_vm0, %v115_v22, 0.0 }
  0x98   :  { %v8355_v31 = vpop.xlane.xlu1 %166  ;;  %v8357_v32 = vpop.xlane.xlu0 %163 }
  0x9b   :  { %382 = vadd.xlane.f32.xlu1 %v381_v33  ;;  %379 = vadd.xlane.f32.xlu0 %v378_v34 }
  0x9c   :  { %v8367_v37 = vpop.xlane.xlu1 %172  ;;  %v8369_v38 = vpop.xlane.xlu0 %169 }
  0x9f   :  { %388 = vadd.xlane.f32.xlu1 %v387_v39  ;;  %385 = vadd.xlane.f32.xlu0 %v384_v40  ;;  %v120_v39 = vld [vmem:[%s11733_s0 + $0x318] sm:$0xff]  ;;  %v119_v40 = vld [vmem:[%s11733_s0 + $0x310] sm:$0xff] }
  0xa0   :  { %v8379_v43 = vpop.xlane.xlu1 %178  ;;  %v8381_v44 = vpop.xlane.xlu0 %175 }
  0xa3   :  { %394 = vadd.xlane.f32.xlu1 %v393_v45  ;;  %391 = vadd.xlane.f32.xlu0 %v390_v46  ;;  %v447_v45 = vsel %vm149_vm0, %v120_v39, 0.0  ;;  %v444_v46 = vsel %vm149_vm0, %v119_v40, 0.0  ;;  %v8015_v39 = vmov 1983009808  }
  0xa4   :  { %v8391_v49 = vpop.xlane.xlu1 %184  ;;  %v8393_v50 = vpop.xlane.xlu0 %181  ;;  %v4249_v40 = vunpack.c.l.s4 %v8015_v39 }
  0xa7   :  { %400 = vadd.xlane.f32.xlu1 %v399_v51  ;;  %397 = vadd.xlane.f32.xlu0 %v396_v52 }
  0xa8   :  { %v8403_v55 = vpop.xlane.xlu1 %190  ;;  %v8405_v56 = vpop.xlane.xlu0 %187 }
  0xab   :  { %406 = vadd.xlane.f32.xlu1 %v405_v57  ;;  %403 = vadd.xlane.f32.xlu0 %v402_v58  ;;  %v124_v57 = vld [vmem:[%s11733_s0 + $0x338] sm:$0xff]  ;;  %v123_v58 = vld [vmem:[%s11733_s0 + $0x330] sm:$0xff] }
  0xac   :  { %v8415_v61 = vpop.xlane.xlu1 %196  ;;  %v8417_v62 = vpop.xlane.xlu0 %193  ;;  %v456_v7 = vsel %vm149_vm0, %v123_v58, 0.0 }
  0xaf   :  { %412 = vadd.xlane.f32.xlu1 %v411_v63  ;;  %409 = vadd.xlane.f32.xlu0 %v408_v0  ;;  %v663_v63 = vunpack.c.l.s4 %v8011_v60  ;;  %v8012_v0 = vmov 842150450   ;;  %v130_v60 = vld [vmem:[%s11733_s0 + $0x368] sm:$0xff] }
  0xb0   :  { %v8427_v3 = vpop.xlane.xlu1 %202  ;;  %v8429_v4 = vpop.xlane.xlu0 %199  ;;  %v670_v1 = vunpack.c.l.s4 %v8012_v0  ;;  %v4250_v0 = vunpack.c.0.s8 %v4249_v40 }
  0xb1   :  { %v664_v21 = vunpack.c.0.s8 %v663_v63  ;;  %v129_v63 = vld [vmem:[%s11733_s0 + $0x360] sm:$0xff] }
  0xb2   :  { %v671_v22 = vunpack.c.0.s8 %v670_v1 }
  0xb3   :  { %418 = vadd.xlane.f32.xlu1 %v417_v5  ;;  %415 = vadd.xlane.f32.xlu0 %v414_v6  ;;  %v459_v6 = vsel %vm149_vm0, %v124_v57, 0.0 }
  0xb4   :  { %v8439_v9 = vpop.xlane.xlu1 %208  ;;  %v8441_v10 = vpop.xlane.xlu0 %205 }
  0xb7   :  { %424 = vadd.xlane.f32.xlu1 %v423_v11  ;;  %421 = vadd.xlane.f32.xlu0 %v420_v12  ;;  %v125_v11 = vld [vmem:[%s11733_s0 + $0x340] sm:$0xff]  ;;  %v8013_v12 = vmov 1414812756  }
  0xb8   :  { %v8451_v15 = vpop.xlane.xlu1 %214  ;;  %v8453_v16 = vpop.xlane.xlu0 %211  ;;  %v677_v13 = vunpack.c.l.s4 %v8013_v12  ;;  %v462_v30 = vsel %vm149_vm0, %v125_v11, 0.0 }
  0xbb   :  { %430 = vadd.xlane.f32.xlu1 %v429_v17  ;;  %427 = vadd.xlane.f32.xlu0 %v426_v20  ;;  %v684_v17 = vunpack.c.l.s4 %v8014_v14  ;;  %v8524_v20 = vshrl.u32 %v11737_v59, 7  ;;  %v474_v14 = vsel %vm149_vm0, %v129_v63, 0.0 }
  0xbc   :  { %v8463_v23 = vpop.xlane.xlu1 %220  ;;  %v8465_v24 = vpop.xlane.xlu0 %217 }
  0xbd   :  { %11819 = vst [vmem:[#allocation6_spill] sm:$0xff] %v8463_v23  ;;  %11820 = vst [vmem:[#allocation7_spill] sm:$0xff] %v8465_v24  ;;  %v8539_v47 = vsub.s32 %v664_v21, %v8524_v20  ;;  %v8542_v48 = vsub.s32 %v671_v22, %v8524_v20  ;;  %v131_v21 = vld [vmem:[%s11733_s0 + $0x370] sm:$0xff]  ;;  %v134_v22 = vld [vmem:[%s11733_s0 + $0x388] sm:$0xff] }
  0xbe   :  { %11829 = vst [vmem:[#allocation16_spill] sm:$0xff] %v8524_v20 }
  0xbf   :  { %436 = vadd.xlane.f32.xlu1 %v435_v27  ;;  %433 = vadd.xlane.f32.xlu0 %v432_v28  ;;  %v731_v8 = vrot.slane %v8331_v18, %v8542_v48  ;;  %v675_v39 = vrot.slane %v8333_v19, %v8542_v48 }
  0xc0   :  { %v8475_v33 = vpop.xlane.xlu1 %226  ;;  %v8477_v34 = vpop.xlane.xlu0 %223 }
  0xc1   :  { %11821 = vst [vmem:[#allocation8_spill] sm:$0xff] %v8475_v33  ;;  %11822 = vst [vmem:[#allocation9_spill] sm:$0xff] %v8477_v34 }
  0xc3   :  { %442 = vadd.xlane.f32.xlu1 %v441_v35  ;;  %439 = vadd.xlane.f32.xlu0 %v438_v36  ;;  %v128_v35 = vld [vmem:[%s11733_s0 + $0x358] sm:$0xff]  ;;  %v127_v36 = vld [vmem:[%s11733_s0 + $0x350] sm:$0xff] }
  0xc4   :  { %v8487_v41 = vpop.xlane.xlu1 %232  ;;  %v8489_v42 = vpop.xlane.xlu0 %229  ;;  %v471_v57 = vsel %vm149_vm0, %v128_v35, 0.0  ;;  %v468_v58 = vsel %vm149_vm0, %v127_v36, 0.0  ;;  %v668_v36 = vrot.slane %v8333_v19, %v8539_v47 }
  0xc5   :  { %11823 = vst [vmem:[#allocation10_spill] sm:$0xff] %v8487_v41  ;;  %11824 = vst [vmem:[#allocation11_spill] sm:$0xff] %v8489_v42 }
  0xc7   :  { %448 = vadd.xlane.f32.xlu1 %v447_v45  ;;  %445 = vadd.xlane.f32.xlu0 %v444_v46  ;;  %v678_v45 = vunpack.c.0.s8 %v677_v13  ;;  %v685_v46 = vunpack.c.0.s8 %v684_v17  ;;  %v477_v13 = vsel %vm149_vm0, %v130_v60, 0.0  ;;  %v132_v17 = vld [vmem:[%s11733_s0 + $0x378] sm:$0xff] }
  0xc8   :  { %v8499_v51 = vpop.xlane.xlu1 %238  ;;  %v8501_v52 = vpop.xlane.xlu0 %235 }
  0xc9   :  { %11825 = vst [vmem:[#allocation12_spill] sm:$0xff] %v8499_v51  ;;  %11826 = vst [vmem:[#allocation13_spill] sm:$0xff] %v8501_v52  ;;  %v8557_v1 = vsub.s32 %v678_v45, %v8524_v20  ;;  %v483_v45 = vsel %vm149_vm0, %v132_v17, 0.0 }
  0xcb   :  { %454 = vadd.xlane.f32.xlu1 %v453_v53  ;;  %451 = vadd.xlane.f32.xlu0 %v450_v54  ;;  %v682_v40 = vrot.slane %v8333_v19, %v8557_v1  ;;  %v710_v59 = vrot.slane %v8345_v26, %v8557_v1  ;;  %v934_v52 = vrot.slane %v8379_v43, %v8557_v1 }
  0xcc   :  { %v8511_v2 = vpop.xlane.xlu1 %244  ;;  %v8513_v5 = vpop.xlane.xlu0 %241 }
  0xcd   :  { %11827 = vst [vmem:[#allocation14_spill] sm:$0xff] %v8511_v2  ;;  %11828 = vst [vmem:[#allocation15_spill] sm:$0xff] %v8513_v5 }
  0xcf   :  { %460 = vadd.xlane.f32.xlu1 %v459_v6  ;;  %457 = vadd.xlane.f32.xlu0 %v456_v7  ;;  %v8560_v6 = vsub.s32 %v685_v46, %v8524_v20  ;;  %v724_v7 = vrot.slane %v8331_v18, %v8539_v47  ;;  %v480_v46 = vsel %vm149_vm0, %v131_v21, 0.0  ;;  %v135_v21 = vld [vmem:[%s11733_s0 + $0x390] sm:$0xff] }
  0xd0   :  { %v8526_v27 = vpop.xlane.xlu1 %250  ;;  %v8528_v28 = vpop.xlane.xlu0 %247  ;;  %v492_v5 = vsel %vm149_vm0, %v135_v21, 0.0 }
  0xd1   :  { %11830 = vst [vmem:[#allocation17_spill] sm:$0xff] %v8526_v27  ;;  %11831 = vst [vmem:[#allocation18_spill] sm:$0xff] %v8528_v28  ;;  %v745_v35 = vrot.slane %v8331_v18, %v8560_v6  ;;  %v8603_v60 = vcombine.low %v724_v7, %v731_v8  ;;  %v689_v63 = vrot.slane %v8333_v19, %v8560_v6  ;;  %v138_v7 = vld [vmem:[%s11733_s0 + $0x3a8] sm:$0xff]  ;;  %v137_v19 = vld [vmem:[%s11733_s0 + $0x3a0] sm:$0xff] }
  0xd2   :  { %v696_v8 = vrot.slane %v8345_v26, %v8539_v47  ;;  %v501_v2 = vsel %vm149_vm0, %v138_v7, 0.0  ;;  %v941_v51 = vrot.slane %v8379_v43, %v8560_v6 }
  0xd3   :  { %466 = vadd.xlane.f32.xlu1 %v465_v29  ;;  %463 = vadd.xlane.f32.xlu0 %v462_v30  ;;  %v8582_v29 = vsub.s32 %v4250_v0, %v8524_v20  ;;  %v738_v30 = vrot.slane %v8331_v18, %v8557_v1  ;;  %v133_v18 = vld [vmem:[%s11733_s0 + $0x380] sm:$0xff]  ;;  %v752_v0 = vrot.slane %v8343_v25, %v8539_v47 }
  0xd4   :  { %v8544_v53 = vpop.xlane.xlu1 %256  ;;  %v8546_v54 = vpop.xlane.xlu0 %253  ;;  %v717_v20 = vrot.slane %v8345_v26, %v8560_v6  ;;  %v486_v28 = vsel %vm149_vm0, %v133_v18, 0.0  ;;  %v8670_v18 = vcombine.low %v682_v40, %v689_v63  ;;  %v815_v40 = vrot.slane %v8355_v31, %v8542_v48 }
  0xd5   :  { %11832 = vst [vmem:[#allocation19_spill] sm:$0xff] %v8544_v53  ;;  %11833 = vst [vmem:[#allocation20_spill] sm:$0xff] %v8546_v54  ;;  %v8643_v54 = vcombine.low %v668_v36, %v675_v39  ;;  %v766_v53 = vrot.slane %v8343_v25, %v8557_v1  ;;  %v498_v36 = vsel %vm149_vm0, %v137_v19, 0.0 }
  0xd6   :  { %v4264_v7 = vcombine.low %v710_v59, %v717_v20  ;;  %v822_v59 = vrot.slane %v8355_v31, %v8557_v1  ;;  %v4261_v34 = vrot.slane %v8670_v18, %v8582_v29  ;;  %v4400_v18 = vcombine.low %v934_v52, %v941_v51 }
  0xd7   :  { %472 = vadd.xlane.f32.xlu1 %v471_v57  ;;  %469 = vadd.xlane.f32.xlu0 %v468_v58  ;;  %v489_v57 = vsel %vm149_vm0, %v134_v22, 0.0  ;;  %v136_v58 = vld [vmem:[%s11733_s0 + $0x398] sm:$0xff]  ;;  %v703_v22 = vrot.slane %v8345_v26, %v8542_v48  ;;  %v773_v26 = vrot.slane %v8343_v25, %v8560_v6  ;;  %v906_v51 = vrot.slane %v8381_v44, %v8557_v1 }
  0xd8   :  { %v8566_v11 = vpop.xlane.xlu1 %262  ;;  %v8568_v12 = vpop.xlane.xlu0 %259  ;;  %v495_v27 = vsel %vm149_vm0, %v136_v58, 0.0  ;;  %v913_v52 = vrot.slane %v8381_v44, %v8560_v6 }
  0xd9   :  { %11834 = vst [vmem:[#allocation21_spill] sm:$0xff] %v8566_v11  ;;  %11835 = vst [vmem:[#allocation22_spill] sm:$0xff] %v8568_v12  ;;  %v142_v12 = vld [vmem:[%s11733_s0 + $0x3c8] sm:$0xff]  ;;  %v8641_v11 = vcombine.low %v738_v30, %v745_v35  ;;  %v4263_v21 = vcombine.low %v696_v8, %v703_v22  ;;  %v8674_v19 = vcombine.low %v766_v53, %v773_v26 }
  0xda   :  { %v829_v53 = vrot.slane %v8355_v31, %v8560_v6  ;;  %v4278_v8 = vrot.slane %v4264_v7, %v8582_v29  ;;  %v871_v22 = vrot.slane %v8367_v37, %v8542_v48  ;;  %v878_v26 = vrot.slane %v8367_v37, %v8557_v1 }
  0xdb   :  { %478 = vadd.xlane.f32.xlu1 %v477_v13  ;;  %475 = vadd.xlane.f32.xlu0 %v474_v14  ;;  %v759_v13 = vrot.slane %v8343_v25, %v8542_v48  ;;  %v857_v7 = vrot.slane %v8369_v38, %v8560_v6 }
  0xdc   :  { %v8611_v14 = vpop.xlane.xlu1 %268  ;;  %v8613_v17 = vpop.xlane.xlu0 %265 }
  0xdd   :  { %11836 = vst [vmem:[#allocation23_spill] sm:$0xff] %v8611_v14  ;;  %11837 = vst [vmem:[#allocation24_spill] sm:$0xff] %v8613_v17  ;;  %v140_v17 = vld [vmem:[%s11733_s0 + $0x3b8] sm:$0xff]  ;;  %v139_v14 = vld [vmem:[%s11733_s0 + $0x3b0] sm:$0xff]  ;;  %v8672_v58 = vcombine.low %v752_v0, %v759_v13  ;;  %v4271_v13 = vrot.slane %v4263_v21, %v8582_v29  ;;  %v850_v21 = vrot.slane %v8369_v38, %v8557_v1 }
  0xde   :  { %v8659_v39 = vsel %vm149_vm0, %v140_v17, 0.0  ;;  %v8662_v25 = vsel %vm149_vm0, %v139_v14, 0.0  ;;  %v4288_v17 = vrot.slane %v8603_v60, %v8582_v29  ;;  %v4295_v14 = vrot.slane %v8641_v11, %v8582_v29 }
  0xdf   :  { %484 = vadd.xlane.f32.xlu1 %v483_v45  ;;  %481 = vadd.xlane.f32.xlu0 %v480_v46  ;;  %v8665_v45 = vsel %vm149_vm0, %v142_v12, 0.0  ;;  %v141_v46 = vld [vmem:[%s11733_s0 + $0x3c0] sm:$0xff]  ;;  %v4254_v12 = vrot.slane %v8643_v54, %v8582_v29  ;;  %v780_v54 = vrot.slane %v8357_v32, %v8539_v47  ;;  %v787_v11 = vrot.slane %v8357_v32, %v8542_v48 }
  0xe0   :  { %v8653_v30 = vpop.xlane.xlu1 %274  ;;  %v8655_v35 = vpop.xlane.xlu0 %271  ;;  %v8689_v20 = vsel %vm149_vm0, %v141_v46, 0.0  ;;  %v794_v60 = vrot.slane %v8357_v32, %v8557_v1  ;;  %v885_v46 = vrot.slane %v8367_v37, %v8560_v6  ;;  %v8762_v23 = vcombine.low %v850_v21, %v857_v7 }
  0xe1   :  { %11838 = vst [vmem:[#allocation25_spill] sm:$0xff] %v8653_v30  ;;  %11839 = vst [vmem:[#allocation26_spill] sm:$0xff] %v8655_v35  ;;  %v808_v35 = vrot.slane %v8355_v31, %v8539_v47  ;;  %v801_v31 = vrot.slane %v8357_v32, %v8560_v6  ;;  %v843_v32 = vrot.slane %v8369_v38, %v8542_v48 }
  0xe2   :  { %v927_v30 = vrot.slane %v8379_v43, %v8542_v48  ;;  %v8748_v41 = vcombine.low %v780_v54, %v787_v11  ;;  %v8826_v21 = vcombine.low %v906_v51, %v913_v52 }
  0xe3   :  { %490 = vadd.xlane.f32.xlu1 %v489_v57  ;;  %487 = vadd.xlane.f32.xlu0 %v486_v28  ;;  %v144_v28 = vld [vmem:[%s11733_s0 + $0x3d8] sm:$0xff]  ;;  %v864_v57 = vrot.slane %v8367_v37, %v8539_v47  ;;  %v920_v37 = vrot.slane %v8379_v43, %v8539_v47  ;;  %v8752_v33 = vcombine.low %v794_v60, %v801_v31 }
  0xe4   :  { %v8699_v63 = vpop.xlane.xlu1 %280  ;;  %v8701_v0 = vpop.xlane.xlu0 %277  ;;  %v983_v60 = vrot.slane %v8391_v49, %v8542_v48  ;;  %v997_v31 = vrot.slane %v8391_v49, %v8560_v6 }
  0xe5   :  { %11840 = vst [vmem:[#allocation27_spill] sm:$0xff] %v8699_v63  ;;  %11841 = vst [vmem:[#allocation28_spill] sm:$0xff] %v8701_v0  ;;  %v836_v0 = vrot.slane %v8369_v38, %v8539_v47  ;;  %v8727_v63 = vsel %vm149_vm0, %v144_v28, 0.0  ;;  %v8746_v28 = vcombine.low %v822_v59, %v829_v53  ;;  %v8754_v43 = vcombine.low %v864_v57, %v871_v22 }
  0xe6   :  { %v4399_v59 = vcombine.low %v920_v37, %v927_v30  ;;  %v892_v53 = vrot.slane %v8381_v44, %v8539_v47  ;;  %v8784_v30 = vcombine.low %v4254_v12, %v4261_v34  ;;  %v955_v34 = vrot.slane %v8393_v50, %v8542_v48 }
  0xe7   :  { %496 = vadd.xlane.f32.xlu1 %v495_v27  ;;  %493 = vadd.xlane.f32.xlu0 %v492_v5  ;;  %v143_v5 = vld [vmem:[%s11733_s0 + $0x3d0] sm:$0xff]  ;;  %v8744_v27 = vcombine.low %v808_v35, %v815_v40  ;;  %v8760_v24 = vcombine.low %v836_v0, %v843_v32  ;;  %v8765_v40 = vcombine.low %v4271_v13, %v4278_v8  ;;  %v145_v8 = vld [vmem:[%s11733_s0 + $0x3e0] sm:$0xff] }
  0xe8   :  { %v8737_v42 = vpop.xlane.xlu1 %286  ;;  %v8739_v38 = vpop.xlane.xlu0 %283  ;;  %v516_v35 = vsel %vm149_vm0, %v143_v5, 0.0  ;;  %v4312_v0 = vrot.slane %v8674_v19, %v8582_v29  ;;  %v962_v57 = vrot.slane %v8393_v50, %v8557_v1  ;;  %v969_v19 = vrot.slane %v8393_v50, %v8560_v6 }
  0xe9   :  { %11842 = vst [vmem:[#allocation29_spill] sm:$0xff] %v8737_v42  ;;  %11843 = vst [vmem:[#allocation30_spill] sm:$0xff] %v8739_v38  ;;  %v8756_v42 = vcombine.low %v878_v26, %v885_v46  ;;  %v8758_v38 = vcombine.low %v4288_v17, %v4295_v14  ;;  %v146_v17 = vld [vmem:[%s11733_s0 + $0x3e8] sm:$0xff]  ;;  %v976_v14 = vrot.slane %v8391_v49, %v8539_v47 }
  0xea   :  { %v525_v12 = vsel %vm149_vm0, %v146_v17, 0.0  ;;  %v1032_v22 = vrot.slane %v8403_v55, %v8539_v47  ;;  %v1039_v26 = vrot.slane %v8403_v55, %v8542_v48  ;;  %v1053_v46 = vrot.slane %v8403_v55, %v8560_v6 }
  0xeb   :  { %502 = vadd.xlane.f32.xlu1 %v501_v2  ;;  %499 = vadd.xlane.f32.xlu0 %v498_v36  ;;  %v4305_v2 = vrot.slane %v8672_v58, %v8582_v29  ;;  %v899_v36 = vrot.slane %v8381_v44, %v8542_v48  ;;  %v990_v58 = vrot.slane %v8391_v49, %v8557_v1 }
  0xec   :  { %v8769_v54 = vpop.xlane.xlu1 %292  ;;  %v8771_v11 = vpop.xlane.xlu0 %289  ;;  %v948_v44 = vrot.slane %v8393_v50, %v8539_v47  ;;  %v1046_v50 = vrot.slane %v8403_v55, %v8557_v1  ;;  %v4433_v7 = vcombine.low %v976_v14, %v983_v60  ;;  %v4322_v37 = vrot.slane %v8748_v41, %v8582_v29 }
  0xed   :  { %11844 = vst [vmem:[#allocation31_spill] sm:$0xff] %v8769_v54  ;;  %11845 = vst [vmem:[#allocation32_spill] sm:$0xff] %v8771_v11  ;;  %v8824_v32 = vcombine.low %v892_v53, %v899_v36  ;;  %v4434_v5 = vcombine.low %v990_v58, %v997_v31  ;;  %v8835_v17 = vcombine.low %v4305_v2, %v4312_v0 }
  0xee   :  { %v8837_v55 = vcombine.low %v962_v57, %v969_v19  ;;  %v1004_v53 = vrot.slane %v8405_v56, %v8539_v47  ;;  %v1011_v36 = vrot.slane %v8405_v56, %v8542_v48  ;;  %v1018_v41 = vrot.slane %v8405_v56, %v8557_v1 }
  0xef   :  { %508 = vadd.xlane.f32.xlu1 %v8659_v39  ;;  %505 = vadd.xlane.f32.xlu0 %v8662_v25  ;;  %v4407_v39 = vrot.slane %v4399_v59, %v8582_v29  ;;  %v4414_v25 = vrot.slane %v4400_v18, %v8582_v29  ;;  %v8830_v59 = vcombine.low %v948_v44, %v955_v34  ;;  %v522_v18 = vsel %vm149_vm0, %v145_v8, 0.0 }
  0xf0   :  { %v8807_v13 = vpop.xlane.xlu1 %298  ;;  %v8809_v49 = vpop.xlane.xlu0 %295  ;;  %v8852_v2 = vcombine.low %v1032_v22, %v1039_v26  ;;  %v8854_v52 = vcombine.low %v1046_v50, %v1053_v46  ;;  %v1025_v14 = vrot.slane %v8405_v56, %v8560_v6  ;;  %v1088_v58 = vrot.slane %v8415_v61, %v8539_v47 }
  0xf1   :  { %11846 = vst [vmem:[#allocation33_spill] sm:$0xff] %v8807_v13  ;;  %11847 = vst [vmem:[#allocation34_spill] sm:$0xff] %v8809_v49  ;;  %v8858_v60 = vcombine.low %v4407_v39, %v4414_v25  ;;  %v1095_v0 = vrot.slane %v8415_v61, %v8542_v48  ;;  %v4329_v31 = vrot.slane %v8752_v33, %v8582_v29 }
  0xf2   :  { %v4441_v44 = vrot.slane %v4433_v7, %v8582_v29  ;;  %v1102_v34 = vrot.slane %v8415_v61, %v8557_v1  ;;  %v1109_v57 = vrot.slane %v8415_v61, %v8560_v6  ;;  %v1060_v56 = vrot.slane %v8417_v62, %v8539_v47 }
  0xf3   :  { %514 = vadd.xlane.f32.xlu1 %v8665_v45  ;;  %511 = vadd.xlane.f32.xlu0 %v8689_v20  ;;  %v148_v20 = vld [vmem:[%s11733_s0 + $0x3f8] sm:$0xff]  ;;  %v1067_v8 = vrot.slane %v8417_v62, %v8542_v48  ;;  %v1074_v33 = vrot.slane %v8417_v62, %v8557_v1  ;;  %v1081_v39 = vrot.slane %v8417_v62, %v8560_v6 }
  0xf4   :  { %v8845_v51 = vpop.xlane.xlu1 %304  ;;  %v8847_v45 = vpop.xlane.xlu0 %301  ;;  %v531_v19 = vsel %vm149_vm0, %v148_v20, 0.0  ;;  %v1144_v22 = vrot.slane %v8427_v3, %v8539_v47  ;;  %v1151_v26 = vrot.slane %v8427_v3, %v8542_v48  ;;  %v1158_v50 = vrot.slane %v8427_v3, %v8557_v1 }
  0xf5   :  { %11848 = vst [vmem:[#allocation35_spill] sm:$0xff] %v8845_v51  ;;  %11849 = vst [vmem:[#allocation36_spill] sm:$0xff] %v8847_v45  ;;  %v1165_v62 = vrot.slane %v8427_v3, %v8560_v6  ;;  %v1116_v46 = vrot.slane %v8429_v4, %v8539_v47  ;;  %v1123_v7 = vrot.slane %v8429_v4, %v8542_v48 }
  0xf6   :  { %v1137_v20 = vrot.slane %v8429_v4, %v8560_v6  ;;  %v8909_v45 = vcombine.low %v1088_v58, %v1095_v0  ;;  %v8912_v51 = vcombine.low %v1102_v34, %v1109_v57  ;;  %v8914_v49 = vcombine.low %v1060_v56, %v1067_v8 }
  0xf7   :  { %520 = vadd.xlane.f32.xlu1 %v8727_v63  ;;  %517 = vadd.xlane.f32.xlu0 %v516_v35  ;;  %v147_v63 = vld [vmem:[%s11733_s0 + $0x3f0] sm:$0xff]  ;;  %v4448_v35 = vrot.slane %v4434_v5, %v8582_v29  ;;  %v1130_v5 = vrot.slane %v8429_v4, %v8557_v1  ;;  %v8916_v13 = vcombine.low %v1074_v33, %v1081_v39 }
  0xf8   :  { %v8881_v25 = vpop.xlane.xlu1 %310  ;;  %v8883_v61 = vpop.xlane.xlu0 %307  ;;  %v528_v3 = vsel %vm149_vm0, %v147_v63, 0.0  ;;  %v8922_v4 = vcombine.low %v4322_v37, %v4329_v31  ;;  %v1200_v58 = vrot.slane %v8439_v9, %v8539_v47  ;;  %v4346_v37 = vrot.slane %v8746_v28, %v8582_v29 }
  0xf9   :  { %11850 = vst [vmem:[#allocation37_spill] sm:$0xff] %v8881_v25  ;;  %11851 = vst [vmem:[#allocation38_spill] sm:$0xff] %v8883_v61  ;;  %v8905_v61 = vcombine.low %v1004_v53, %v1011_v36  ;;  %v8907_v25 = vcombine.low %v1018_v41, %v1025_v14  ;;  %v8924_v53 = vcombine.low %v1144_v22, %v1151_v26  ;;  %vm7470_vm0 = vcmask 1041409  }
  0xfa   :  { %v8926_v36 = vcombine.low %v1158_v50, %v1165_v62  ;;  %v8932_v41 = vcombine.low %v1116_v46, %v1123_v7  ;;  %v8934_v14 = vcombine.low %v1130_v5, %v1137_v20  ;;  %v1207_v0 = vrot.slane %v8439_v9, %v8542_v48 }
  0xfb   :  { %526 = vadd.xlane.f32.xlu1 %v525_v12  ;;  %523 = vadd.xlane.f32.xlu0 %v522_v18  ;;  %v8928_v12 = vcombine.low %v4441_v44, %v4448_v35  ;;  %v4339_v18 = vrot.slane %v8744_v27, %v8582_v29  ;;  %v1214_v31 = vrot.slane %v8439_v9, %v8557_v1 }
  0xfc   :  { %v8918_v11 = vpop.xlane.xlu1 %316  ;;  %v8920_v54 = vpop.xlane.xlu0 %313  ;;  %11854 = vst [vmem:[#allocation41_spill] sm:$0xff] %v8934_v14  ;;  %v1221_v44 = vrot.slane %v8439_v9, %v8560_v6  ;;  %v1172_v27 = vrot.slane %v8441_v10, %v8539_v47  ;;  %v1179_v34 = vrot.slane %v8441_v10, %v8542_v48  ;;  %v1186_v28 = vrot.slane %v8441_v10, %v8557_v1 }
  0xfd   :  { %11852 = vst [vmem:[#allocation39_spill] sm:$0xff] %v8918_v11  ;;  %11853 = vst [vmem:[#allocation40_spill] sm:$0xff] %v8920_v54  ;;  %v4475_v8 = vrot.slane %v8852_v2, %v8582_v29  ;;  %v1193_v9 = vrot.slane %v8441_v10, %v8560_v6  ;;  %v1263_v33 = vrot.slane %v8451_v15, %v8542_v48 }
  0xfe   :  { %v4482_v39 = vrot.slane %v8854_v52, %v8582_v29  ;;  %v1270_v63 = vrot.slane %v8451_v15, %v8557_v1  ;;  %v1277_v35 = vrot.slane %v8451_v15, %v8560_v6  ;;  %v1228_v2 = vrot.slane %v8453_v16, %v8539_v47 }
  0xff   :  { %532 = vadd.xlane.f32.xlu1 %v531_v19  ;;  %529 = vadd.xlane.f32.xlu0 %v528_v3  ;;  %v1256_v19 = vrot.slane %v8451_v15, %v8539_v47  ;;  %v1235_v10 = vrot.slane %v8453_v16, %v8542_v48  ;;  %v8974_v22 = vcombine.low %v1200_v58, %v1207_v0  ;;  %v11858_v15 = vld [vmem:[#allocation6_spill] sm:$0xff] }
 0x100   :  { %v8952_v57 = vpop.xlane.xlu1 %322  ;;  %v8954_v56 = vpop.xlane.xlu0 %319  ;;  %v8976_v26 = vcombine.low %v1214_v31, %v1221_v44  ;;  %v1242_v50 = vrot.slane %v8453_v16, %v8557_v1  ;;  %v1249_v52 = vrot.slane %v8453_v16, %v8560_v6  ;;  %v8982_v62 = vcombine.low %v1172_v27, %v1179_v34 }
 0x101   :  { %11855 = vst [vmem:[#allocation42_spill] sm:$0xff] %v8952_v57  ;;  %11856 = vst [vmem:[#allocation43_spill] sm:$0xff] %v8954_v56  ;;  %v1312_v46 = vrot.slane %v11858_v15, %v8539_v47  ;;  %v1319_v7 = vrot.slane %v11858_v15, %v8542_v48  ;;  %v8992_v3 = vcombine.low %v4339_v18, %v4346_v37  ;;  %v11864_v37 = vld [vmem:[#allocation7_spill] sm:$0xff] }
 0x102   :  { %11857 = vst [vmem:[#allocation44_spill] sm:$0xff] %v8982_v62  ;;  %v8994_v58 = vcombine.low %v1186_v28, %v1193_v9  ;;  %v1326_v0 = vrot.slane %v11858_v15, %v8557_v1  ;;  %v1333_v16 = vrot.slane %v11858_v15, %v8560_v6  ;;  %v4356_v31 = vrot.slane %v8760_v24, %v8582_v29 }
 0x103   :  { %v9002_v44 = vcombine.low %v1256_v19, %v1263_v33  ;;  %v9004_v27 = vcombine.low %v1270_v63, %v1277_v35  ;;  %v9006_v34 = vcombine.low %v1228_v2, %v1235_v10  ;;  %v9010_v18 = vcombine.low %v1242_v50, %v1249_v52 }
 0x104   :  { %v8988_v5 = vpop.xlane.xlu1 %328  ;;  %v8990_v20 = vpop.xlane.xlu0 %325  ;;  %11861 = vst [vmem:[#allocation46_spill] sm:$0xff] %v8994_v58  ;;  %v1284_v28 = vrot.slane %v11864_v37, %v8539_v47  ;;  %v4363_v9 = vrot.slane %v8762_v23, %v8582_v29  ;;  %v4509_v15 = vrot.slane %v8909_v45, %v8582_v29  ;;  %v9018_v24 = vcombine.low %v1312_v46, %v1319_v7  ;;  %v11867_v23 = vld [vmem:[#allocation8_spill] sm:$0xff]  ;;  %v11868_v7 = vld [vmem:[#allocation9_spill] sm:$0xff] }
 0x105   :  { %11859 = vst [vmem:[#allocation6_spill] sm:$0xff] %v8988_v5  ;;  %11860 = vst [vmem:[#allocation45_spill] sm:$0xff] %v8990_v20  ;;  %v9008_v20 = vcombine.low %v4475_v8, %v4482_v39  ;;  %v1291_v19 = vrot.slane %v11864_v37, %v8542_v48  ;;  %v1298_v8 = vrot.slane %v11864_v37, %v8557_v1 }
 0x106   :  { %11862 = vst [vmem:[#allocation47_spill] sm:$0xff] %v9006_v34  ;;  %11863 = vst [vmem:[#allocation48_spill] sm:$0xff] %v9010_v18  ;;  %v1305_v33 = vrot.slane %v11864_v37, %v8560_v6  ;;  %v9030_v35 = vcombine.low %v1326_v0, %v1333_v16  ;;  %v1368_v45 = vrot.slane %v11867_v23, %v8539_v47 }
 0x107   :  { %v4516_v2 = vrot.slane %v8912_v51, %v8582_v29  ;;  %v4373_v10 = vrot.slane %v8754_v43, %v8582_v29  ;;  %v1375_v50 = vrot.slane %v11867_v23, %v8542_v48  ;;  %v1382_v52 = vrot.slane %v11867_v23, %v8557_v1 }
 0x108   :  { %v9026_v39 = vpop.xlane.xlu1 %334  ;;  %v9028_v63 = vpop.xlane.xlu0 %331  ;;  %v1389_v46 = vrot.slane %v11867_v23, %v8560_v6  ;;  %v1340_v0 = vrot.slane %v11868_v7, %v8539_v47  ;;  %v1347_v16 = vrot.slane %v11868_v7, %v8542_v48  ;;  %v1354_v51 = vrot.slane %v11868_v7, %v8557_v1 }
 0x109   :  { %11865 = vst [vmem:[#allocation7_spill] sm:$0xff] %v9026_v39  ;;  %11866 = vst [vmem:[#allocation49_spill] sm:$0xff] %v9028_v63  ;;  %v1361_v43 = vrot.slane %v11868_v7, %v8560_v6  ;;  %v4380_v37 = vrot.slane %v8756_v42, %v8582_v29  ;;  %v11869_v63 = vld [vmem:[#allocation10_spill] sm:$0xff]  ;;  %v9066_v7 = vcombine.low %v1284_v28, %v1291_v19  ;;  %v11873_v42 = vld [vmem:[#allocation11_spill] sm:$0xff] }
 0x10a   :  { %v1424_v39 = vrot.slane %v11869_v63, %v8539_v47  ;;  %v1431_v23 = vrot.slane %v11869_v63, %v8542_v48  ;;  %v1438_v5 = vrot.slane %v11869_v63, %v8557_v1  ;;  %v1445_v56 = vrot.slane %v11869_v63, %v8560_v6 }
 0x10b   :  { %11872 = vst [vmem:[#allocation10_spill] sm:$0xff] %v9066_v7  ;;  %v1396_v11 = vrot.slane %v11873_v42, %v8539_v47  ;;  %v1403_v18 = vrot.slane %v11873_v42, %v8542_v48  ;;  %v9072_v34 = vcombine.low %v4356_v31, %v4363_v9  ;;  %v9074_v58 = vcombine.low %v1298_v8, %v1305_v33 }
 0x10c   :  { %v9062_v57 = vpop.xlane.xlu1 %340  ;;  %v9064_v54 = vpop.xlane.xlu0 %337  ;;  %v9076_v62 = vcombine.low %v1368_v45, %v1375_v50  ;;  %v9078_v14 = vcombine.low %v1382_v52, %v1389_v46  ;;  %v9080_v63 = vcombine.low %v4509_v15, %v4516_v2  ;;  %v9084_v28 = vcombine.low %v1354_v51, %v1361_v43  ;;  %v11880_v50 = vld [vmem:[#allocation12_spill] sm:$0xff] }
 0x10d   :  { %11870 = vst [vmem:[#allocation8_spill] sm:$0xff] %v9062_v57  ;;  %11871 = vst [vmem:[#allocation9_spill] sm:$0xff] %v9064_v54  ;;  %v9082_v57 = vcombine.low %v1340_v0, %v1347_v16  ;;  %v1410_v19 = vrot.slane %v11873_v42, %v8557_v1  ;;  %v4543_v54 = vrot.slane %v8924_v53, %v8582_v29  ;;  %v11882_v0 = vld [vmem:[#allocation14_spill] sm:$0xff] }
 0x10e   :  { %11874 = vst [vmem:[#allocation11_spill] sm:$0xff] %v9074_v58  ;;  %11876 = vst [vmem:[#allocation51_spill] sm:$0xff] %v9084_v28  ;;  %v9090_v31 = vcombine.low %v1424_v39, %v1431_v23  ;;  %v9092_v9 = vcombine.low %v1438_v5, %v1445_v56  ;;  %v1417_v8 = vrot.slane %v11873_v42, %v8560_v6  ;;  %v11887_v58 = vld [vmem:[#allocation17_spill] sm:$0xff] }
 0x10f   :  { %11875 = vst [vmem:[#allocation50_spill] sm:$0xff] %v9082_v57  ;;  %v9101_v45 = vcombine.low %v4373_v10, %v4380_v37  ;;  %v9103_v2 = vcombine.low %v1396_v11, %v1403_v18  ;;  %v1480_v53 = vrot.slane %v11880_v50, %v8539_v47  ;;  %v4550_v56 = vrot.slane %v8926_v36, %v8582_v29  ;;  %v11881_v11 = vld [vmem:[#allocation13_spill] sm:$0xff] }
 0x110   :  { %v9096_v33 = vpop.xlane.xlu1 %346  ;;  %6426 = vperm.xlu1 %7983, %v8765_v40   ;;  %v9099_v15 = vpop.xlane.xlu0 %343  ;;  %v4390_v5 = vrot.slane %v8824_v32, %v8582_v29  ;;  %v1487_v39 = vrot.slane %v11880_v50, %v8542_v48  ;;  %v1494_v40 = vrot.slane %v11880_v50, %v8557_v1  ;;  %v1501_v10 = vrot.slane %v11880_v50, %v8560_v6 }
 0x111   :  { %11877 = vst [vmem:[#allocation52_spill] sm:$0xff] %v9096_v33  ;;  %11878 = vst [vmem:[#allocation53_spill] sm:$0xff] %v9099_v15  ;;  %v1452_v18 = vrot.slane %v11881_v11, %v8539_v47  ;;  %v1459_v52 = vrot.slane %v11881_v11, %v8542_v48  ;;  %v1466_v36 = vrot.slane %v11881_v11, %v8557_v1 }
 0x112   :  { %11879 = vst [vmem:[#allocation54_spill] sm:$0xff] %v9103_v2  ;;  %v1473_v32 = vrot.slane %v11881_v11, %v8560_v6  ;;  %v4397_v46 = vrot.slane %v8826_v21, %v8582_v29  ;;  %v1536_v16 = vrot.slane %v11882_v0, %v8539_v47  ;;  %v1543_v51 = vrot.slane %v11882_v0, %v8542_v48  ;;  %v11885_v21 = vld [vmem:[#allocation15_spill] sm:$0xff] }
 0x113   :  { %v1550_v43 = vrot.slane %v11882_v0, %v8557_v1  ;;  %v1557_v37 = vrot.slane %v11882_v0, %v8560_v6  ;;  %v1508_v50 = vrot.slane %v11885_v21, %v8539_v47  ;;  %v1515_v11 = vrot.slane %v11885_v21, %v8542_v48 }
 0x114   :  { %v9135_v23 = vpop.xlane.xlu1 %352  ;;  %6429 = vperm.xlu1 %7983, %v8758_v38   ;;  %v9138_v42 = vpop.xlane.xlu0 %349  ;;  %v1522_v15 = vrot.slane %v11885_v21, %v8557_v1  ;;  %v1529_v2 = vrot.slane %v11885_v21, %v8560_v6  ;;  %v9149_v0 = vcombine.low %v1410_v19, %v1417_v8  ;;  %v9153_v38 = vcombine.low %v1494_v40, %v1501_v10 }
 0x115   :  { %11883 = vst [vmem:[#allocation12_spill] sm:$0xff] %v9135_v23  ;;  %11884 = vst [vmem:[#allocation13_spill] sm:$0xff] %v9138_v42  ;;  %6423 = vperm.xlu0 %7982, %v8784_v30   ;;  %v9151_v23 = vcombine.low %v1480_v53, %v1487_v39  ;;  %v9155_v42 = vcombine.low %v4543_v54, %v4550_v56  ;;  %v9157_v28 = vcombine.low %v1452_v18, %v1459_v52  ;;  %v11895_v52 = vld [vmem:[#allocation19_spill] sm:$0xff] }
 0x116   :  { %v9159_v57 = vcombine.low %v1466_v36, %v1473_v32  ;;  %v1592_v7 = vrot.slane %v11887_v58, %v8539_v47  ;;  %v1599_v21 = vrot.slane %v11887_v58, %v8542_v48  ;;  %v9165_v33 = vcombine.low %v1536_v16, %v1543_v51  ;;  %v11898_v51 = vld [vmem:[#allocation20_spill] sm:$0xff] }
 0x117   :  { %v9167_v30 = vcombine.low %v1550_v43, %v1557_v37  ;;  %v9174_v8 = vcombine.low %v4390_v5, %v4397_v46  ;;  %v4577_v53 = vrot.slane %v8974_v22, %v8582_v29  ;;  %v9178_v56 = vcombine.low %v1508_v50, %v1515_v11  ;;  %v11894_v22 = vld [vmem:[#allocation18_spill] sm:$0xff]  ;;  %v11899_v11 = vld [vmem:[#allocation21_spill] sm:$0xff] }
 0x118   :  { %11886 = vst [vmem:[#allocation14_spill] sm:$0xff] %v9159_v57  ;;  %11888 = vst [vmem:[#allocation15_spill] sm:$0xff] %v9165_v33  ;;  %v9169_v19 = vpop.xlane.xlu1 %358  ;;  %6432 = vperm.xlu1 %7983, %v8835_v17   ;;  %v9172_v54 = vpop.xlane.xlu0 %355  ;;  %v9180_v39 = vcombine.low %v1522_v15, %v1529_v2  ;;  %v4584_v40 = vrot.slane %v8976_v26, %v8582_v29  ;;  %v4424_v10 = vrot.slane %v8830_v59, %v8582_v29 }
 0x119   :  { %11889 = vst [vmem:[#allocation17_spill] sm:$0xff] %v9167_v30  ;;  %11890 = vst [vmem:[#allocation55_spill] sm:$0xff] %v9169_v19  ;;  %6450 = vperm.xlu0 %7982, %v8858_v60   ;;  %v1606_v17 = vrot.slane %v11887_v58, %v8557_v1  ;;  %v1613_v5 = vrot.slane %v11887_v58, %v8560_v6  ;;  %v1564_v18 = vrot.slane %v11894_v22, %v8539_v47 }
 0x11a   :  { %11891 = vst [vmem:[#allocation56_spill] sm:$0xff] %v9172_v54  ;;  %11892 = vst [vmem:[#allocation57_spill] sm:$0xff] %v9178_v56  ;;  %v1571_v15 = vrot.slane %v11894_v22, %v8542_v48  ;;  %v9195_v2 = vcombine.low %v1592_v7, %v1599_v21  ;;  %v1578_v60 = vrot.slane %v11894_v22, %v8557_v1 }
 0x11b   :  { %11893 = vst [vmem:[#allocation58_spill] sm:$0xff] %v9180_v39  ;;  %v1585_v59 = vrot.slane %v11894_v22, %v8560_v6  ;;  %v4431_v26 = vrot.slane %v8837_v55, %v8582_v29  ;;  %v1648_v58 = vrot.slane %v11895_v52, %v8539_v47  ;;  %v1655_v36 = vrot.slane %v11895_v52, %v8542_v48 }
 0x11c   :  { %v1662_v32 = vrot.slane %v11895_v52, %v8557_v1  ;;  %v9209_v7 = vpop.xlane.xlu1 %364  ;;  %6435 = vperm.xlu1 %7983, %v8922_v4   ;;  %v9212_v46 = vpop.xlane.xlu0 %361  ;;  %v4611_v16 = vrot.slane %v9002_v44, %v8582_v29  ;;  %v1669_v55 = vrot.slane %v11895_v52, %v8560_v6  ;;  %v1620_v43 = vrot.slane %v11898_v51, %v8539_v47 }
 0x11d   :  { %11896 = vst [vmem:[#allocation18_spill] sm:$0xff] %v9209_v7  ;;  %11897 = vst [vmem:[#allocation19_spill] sm:$0xff] %v9212_v46  ;;  %v1627_v37 = vrot.slane %v11898_v51, %v8542_v48  ;;  %v1634_v50 = vrot.slane %v11898_v51, %v8557_v1  ;;  %6456 = vperm.xlu0 %7982, %v8928_v12   ;;  %v1641_v4 = vrot.slane %v11898_v51, %v8560_v6  ;;  %v11900_v12 = vld [vmem:[#allocation22_spill] sm:$0xff] }
 0x11e   :  { %v1704_v44 = vrot.slane %v11899_v11, %v8539_v47  ;;  %v1711_v21 = vrot.slane %v11899_v11, %v8542_v48  ;;  %v4618_v22 = vrot.slane %v9004_v27, %v8582_v29  ;;  %v1718_v52 = vrot.slane %v11899_v11, %v8557_v1 }
 0x11f   :  { %v1725_v30 = vrot.slane %v11899_v11, %v8560_v6  ;;  %v1676_v33 = vrot.slane %v11900_v12, %v8539_v47  ;;  %v1683_v51 = vrot.slane %v11900_v12, %v8542_v48  ;;  %v9241_v39 = vcombine.low %v1606_v17, %v1613_v5 }
 0x120   :  { %v1690_v56 = vrot.slane %v11900_v12, %v8557_v1  ;;  %v1697_v27 = vrot.slane %v11900_v12, %v8560_v6  ;;  %v9247_v46 = vpop.xlane.xlu1 %370  ;;  %6438 = vperm.xlu1 %7983, %v8992_v3   ;;  %v9250_v7 = vpop.xlane.xlu0 %367  ;;  %v9252_v11 = vcombine.low %v4577_v53, %v4584_v40  ;;  %v9254_v54 = vcombine.low %v1564_v18, %v1571_v15 }
 0x121   :  { %11901 = vst [vmem:[#allocation20_spill] sm:$0xff] %v9247_v46  ;;  %v9256_v19 = vcombine.low %v1578_v60, %v1585_v59  ;;  %v9258_v17 = vcombine.low %v1648_v58, %v1655_v36  ;;  %v9260_v5 = vcombine.low %v1662_v32, %v1669_v55  ;;  %6462 = vperm.xlu0 %7982, %v9008_v20   ;;  %v11905_v20 = vld [vmem:[#allocation23_spill] sm:$0xff]  ;;  %v11906_v58 = vld [vmem:[#allocation24_spill] sm:$0xff] }
 0x122   :  { %v9263_v57 = vcombine.low %v1620_v43, %v1627_v37  ;;  %v9265_v12 = vcombine.low %v1634_v50, %v1641_v4  ;;  %v9267_v46 = vcombine.low %v4424_v10, %v4431_v26  ;;  %v4458_v3 = vrot.slane %v8905_v61, %v8582_v29  ;;  %v11907_v43 = vld [vmem:[#allocation25_spill] sm:$0xff] }
 0x123   :  { %v9271_v53 = vcombine.low %v1704_v44, %v1711_v21  ;;  %v9273_v40 = vcombine.low %v1718_v52, %v1725_v30  ;;  %v9275_v18 = vcombine.low %v1676_v33, %v1683_v51  ;;  %v9277_v15 = vcombine.low %v4611_v16, %v4618_v22  ;;  %v11908_v44 = vld [vmem:[#allocation26_spill] sm:$0xff] }
 0x124   :  { %v9279_v60 = vcombine.low %v1690_v56, %v1697_v27  ;;  %v1760_v59 = vrot.slane %v11905_v20, %v8539_v47  ;;  %v1767_v10 = vrot.slane %v11905_v20, %v8542_v48  ;;  %v9285_v26 = vpop.xlane.xlu1 %376  ;;  %6441 = vperm.xlu1 %7983, %v9072_v34   ;;  %v9288_v61 = vpop.xlane.xlu0 %373  ;;  %v4465_v33 = vrot.slane %v8907_v25, %v8582_v29 }
 0x125   :  { %11902 = vst [vmem:[#allocation21_spill] sm:$0xff] %v9271_v53  ;;  %11903 = vst [vmem:[#allocation22_spill] sm:$0xff] %v9273_v40  ;;  %v1774_v30 = vrot.slane %v11905_v20, %v8557_v1  ;;  %v1781_v56 = vrot.slane %v11905_v20, %v8560_v6  ;;  %v1732_v36 = vrot.slane %v11906_v58, %v8539_v47  ;;  %6468 = vperm.xlu0 %7982, %v9080_v63   ;;  %v11913_v53 = vld [vmem:[#allocation27_spill] sm:$0xff] }
 0x126   :  { %11904 = vst [vmem:[#allocation59_spill] sm:$0xff] %v9279_v60  ;;  %v1739_v32 = vrot.slane %v11906_v58, %v8542_v48  ;;  %v1746_v34 = vrot.slane %v11906_v58, %v8557_v1  ;;  %v1753_v25 = vrot.slane %v11906_v58, %v8560_v6  ;;  %v4645_v16 = vrot.slane %v9018_v24, %v8582_v29 }
 0x127   :  { %v4652_v55 = vrot.slane %v9030_v35, %v8582_v29  ;;  %v1816_v37 = vrot.slane %v11907_v43, %v8539_v47  ;;  %v1823_v50 = vrot.slane %v11907_v43, %v8542_v48  ;;  %v1830_v63 = vrot.slane %v11907_v43, %v8557_v1 }
 0x128   :  { %v1837_v4 = vrot.slane %v11907_v43, %v8560_v6  ;;  %v1788_v21 = vrot.slane %v11908_v44, %v8539_v47  ;;  %v1795_v24 = vrot.slane %v11908_v44, %v8542_v48  ;;  %v1802_v35 = vrot.slane %v11908_v44, %v8557_v1  ;;  %v9325_v52 = vpop.xlane.xlu1 %382  ;;  %6444 = vperm.xlu1 %7983, %v9101_v45   ;;  %v9328_v51 = vpop.xlane.xlu0 %379 }
 0x129   :  { %v1809_v22 = vrot.slane %v11908_v44, %v8560_v6  ;;  %v9330_v27 = vcombine.low %v1760_v59, %v1767_v10  ;;  %v9332_v20 = vcombine.low %v1774_v30, %v1781_v56  ;;  %v9334_v58 = vcombine.low %v1732_v36, %v1739_v32  ;;  %6474 = vperm.xlu0 %7982, %v9155_v42  }
 0x12a   :  { %v4466_v43 = vcombine.low %v4458_v3, %v4465_v33  ;;  %v9337_v40 = vcombine.low %v1746_v34, %v1753_v25  ;;  %v1872_v44 = vrot.slane %v11913_v53, %v8539_v47  ;;  %v1879_v60 = vrot.slane %v11913_v53, %v8542_v48  ;;  %v11920_v34 = vld [vmem:[#allocation28_spill] sm:$0xff] }
 0x12b   :  { %11909 = vst [vmem:[#allocation23_spill] sm:$0xff] %v9330_v27  ;;  %11910 = vst [vmem:[#allocation24_spill] sm:$0xff] %v9332_v20  ;;  %v4492_v45 = vrot.slane %v8914_v49, %v8582_v29  ;;  %v9345_v59 = vcombine.low %v1816_v37, %v1823_v50  ;;  %v9347_v10 = vcombine.low %v1830_v63, %v1837_v4 }
 0x12c   :  { %11911 = vst [vmem:[#allocation25_spill] sm:$0xff] %v9334_v58  ;;  %11912 = vst [vmem:[#allocation26_spill] sm:$0xff] %v9337_v40  ;;  %v1886_v30 = vrot.slane %v11913_v53, %v8557_v1  ;;  %v1893_v42 = vrot.slane %v11913_v53, %v8560_v6  ;;  %v9353_v3 = vcombine.low %v1788_v21, %v1795_v24  ;;  %v9357_v56 = vpop.xlane.xlu1 %388  ;;  %6447 = vperm.xlu1 %7983, %v9174_v8   ;;  %v9360_v36 = vpop.xlane.xlu0 %385 }
 0x12d   :  { %11914 = vst [vmem:[#allocation27_spill] sm:$0xff] %v9345_v59  ;;  %11915 = vst [vmem:[#allocation60_spill] sm:$0xff] %v9347_v10  ;;  %v9355_v33 = vcombine.low %v1802_v35, %v1809_v22  ;;  %v4653_v49 = vcombine.low %v4645_v16, %v4652_v55  ;;  %v4499_v32 = vrot.slane %v8916_v13, %v8582_v29  ;;  %6480 = vperm.xlu0 %7982, %v9252_v11   ;;  %v11922_v16 = vld [vmem:[#allocation29_spill] sm:$0xff] }
 0x12e   :  { %11916 = vst [vmem:[#allocation61_spill] sm:$0xff] %v9353_v3  ;;  %11918 = vst [vmem:[#allocation63_spill] sm:$0xff] %v9357_v56  ;;  %v1844_v25 = vrot.slane %v11920_v34, %v8539_v47  ;;  %v1851_v53 = vrot.slane %v11920_v34, %v8542_v48  ;;  %v1858_v37 = vrot.slane %v11920_v34, %v8557_v1  ;;  %v11929_v59 = vld [vmem:[#allocation41_spill] sm:$0xff] }
 0x12f   :  { %11917 = vst [vmem:[#allocation62_spill] sm:$0xff] %v9355_v33  ;;  %11919 = vst [vmem:[#allocation64_spill] sm:$0xff] %v9360_v36  ;;  %v1865_v50 = vrot.slane %v11920_v34, %v8560_v6  ;;  %v9373_v8 = vcombine.low %v1872_v44, %v1879_v60  ;;  %v1928_v55 = vrot.slane %v11922_v16, %v8539_v47  ;;  %v11924_v60 = vld [vmem:[#allocation30_spill] sm:$0xff] }
 0x130   :  { %v1935_v13 = vrot.slane %v11922_v16, %v8542_v48  ;;  %v4679_v63 = vrot.slane %v9076_v62, %v8582_v29  ;;  %v9381_v4 = vcombine.low %v1886_v30, %v1893_v42  ;;  %v1942_v21 = vrot.slane %v11922_v16, %v8557_v1  ;;  %v9397_v30 = vpop.xlane.xlu1 %394  ;;  %6453 = vperm.xlu1 %7983, %v9267_v46   ;;  %v9400_v42 = vpop.xlane.xlu0 %391 }
 0x131   :  { %11921 = vst [vmem:[#allocation28_spill] sm:$0xff] %v9373_v8  ;;  %v1949_v24 = vrot.slane %v11922_v16, %v8560_v6  ;;  %v4686_v11 = vrot.slane %v9078_v14, %v8582_v29  ;;  %v1900_v35 = vrot.slane %v11924_v60, %v8539_v47  ;;  %v1907_v22 = vrot.slane %v11924_v60, %v8542_v48 }
 0x132   :  { %11923 = vst [vmem:[#allocation29_spill] sm:$0xff] %v9381_v4  ;;  %v1914_v62 = vrot.slane %v11924_v60, %v8557_v1  ;;  %v1921_v44 = vrot.slane %v11924_v60, %v8560_v6  ;;  %v9402_v34 = vcombine.low %v1844_v25, %v1851_v53  ;;  %v9404_v14 = vcombine.low %v1858_v37, %v1865_v50  ;;  %v11928_v60 = vld [vmem:[#allocation31_spill] sm:$0xff] }
 0x133   :  { %6486 = vperm.xlu0 %7982, %v9277_v15   ;;  %v4500_v16 = vcombine.low %v4492_v45, %v4499_v32  ;;  %v4526_v4 = vrot.slane %v8932_v41, %v8582_v29  ;;  %v9409_v8 = vcombine.low %v1928_v55, %v1935_v13  ;;  %v1984_v10 = vrot.slane %v11928_v60, %v8539_v47  ;;  %v11930_v45 = vld [vmem:[#allocation32_spill] sm:$0xff] }
 0x134   :  { %11925 = vst [vmem:[#allocation30_spill] sm:$0xff] %v9402_v34  ;;  %11926 = vst [vmem:[#allocation65_spill] sm:$0xff] %v9404_v14  ;;  %v1991_v46 = vrot.slane %v11928_v60, %v8542_v48  ;;  %v4533_v25 = vrot.slane %v11929_v59, %v8582_v29  ;;  %v1998_v53 = vrot.slane %v11928_v60, %v8557_v1  ;;  %v9431_v13 = vpop.xlane.xlu1 %400  ;;  %6459 = vperm.xlu1 %7983, %v4466_v43   ;;  %v9433_v59 = vpop.xlane.xlu0 %397 }
 0x135   :  { %11927 = vst [vmem:[#allocation66_spill] sm:$0xff] %v9409_v8  ;;  %v2005_v15 = vrot.slane %v11928_v60, %v8560_v6  ;;  %v1956_v41 = vrot.slane %v11930_v45, %v8539_v47  ;;  %v1963_v32 = vrot.slane %v11930_v45, %v8542_v48  ;;  %v9425_v37 = vcombine.low %v1942_v21, %v1949_v24  ;;  %v11934_v60 = vld [vmem:[#allocation33_spill] sm:$0xff] }
 0x136   :  { %v9427_v50 = vcombine.low %v1900_v35, %v1907_v22  ;;  %v9429_v55 = vcombine.low %v1914_v62, %v1921_v44  ;;  %v4687_v8 = vcombine.low %v4679_v63, %v4686_v11  ;;  %v2040_v14 = vrot.slane %v11934_v60, %v8539_v47 }
 0x137   :  { %11931 = vst [vmem:[#allocation31_spill] sm:$0xff] %v9425_v37  ;;  %v2047_v34 = vrot.slane %v11934_v60, %v8542_v48  ;;  %v2054_v21 = vrot.slane %v11934_v60, %v8557_v1  ;;  %v2061_v24 = vrot.slane %v11934_v60, %v8560_v6  ;;  %6492 = vperm.xlu0 %7982, %v4653_v49   ;;  %v11938_v49 = vld [vmem:[#allocation34_spill] sm:$0xff] }
 0x138   :  { %11932 = vst [vmem:[#allocation41_spill] sm:$0xff] %v9427_v50  ;;  %11933 = vst [vmem:[#allocation32_spill] sm:$0xff] %v9429_v55  ;;  %v1970_v35 = vrot.slane %v11930_v45, %v8557_v1  ;;  %v1977_v43 = vrot.slane %v11930_v45, %v8560_v6  ;;  %v4713_v63 = vrot.slane %v9090_v31, %v8582_v29  ;;  %v9461_v45 = vpop.xlane.xlu1 %406  ;;  %6465 = vperm.xlu1 %7983, %v4500_v16   ;;  %v9463_v31 = vpop.xlane.xlu0 %403  ;;  %v11942_v16 = vld [vmem:[#allocation35_spill] sm:$0xff] }
 0x139   :  { %v4720_v11 = vrot.slane %v9092_v9, %v8582_v29  ;;  %v9451_v22 = vcombine.low %v1984_v10, %v1991_v46  ;;  %v9453_v62 = vcombine.low %v1998_v53, %v2005_v15  ;;  %v9455_v44 = vcombine.low %v1956_v41, %v1963_v32  ;;  %11939 = vst [vmem:[#allocation34_spill] sm:$0xff] %v9461_v45  ;;  %v11940_v9 = vld [vmem:[#allocation44_spill] sm:$0xff]  ;;  %v11941_v46 = vld [vmem:[#allocation46_spill] sm:$0xff] }
 0x13a   :  { %v4534_v60 = vcombine.low %v4526_v4, %v4533_v25  ;;  %v2012_v37 = vrot.slane %v11938_v49, %v8539_v47  ;;  %v2019_v55 = vrot.slane %v11938_v49, %v8542_v48  ;;  %v4560_v10 = vrot.slane %v11940_v9, %v8582_v29 }
 0x13b   :  { %11935 = vst [vmem:[#allocation33_spill] sm:$0xff] %v9451_v22  ;;  %11936 = vst [vmem:[#allocation67_spill] sm:$0xff] %v9453_v62  ;;  %v4567_v53 = vrot.slane %v11941_v46, %v8582_v29  ;;  %v9469_v15 = vcombine.low %v2040_v14, %v2047_v34  ;;  %v9471_v4 = vcombine.low %v2054_v21, %v2061_v24  ;;  %6498 = vperm.xlu0 %7982, %v4687_v8   ;;  %v11943_v24 = vld [vmem:[#allocation36_spill] sm:$0xff] }
 0x13c   :  { %11937 = vst [vmem:[#allocation68_spill] sm:$0xff] %v9455_v44  ;;  %v2026_v25 = vrot.slane %v11938_v49, %v8557_v1  ;;  %v2033_v41 = vrot.slane %v11938_v49, %v8560_v6  ;;  %v2096_v32 = vrot.slane %v11942_v16, %v8539_v47  ;;  %v2103_v9 = vrot.slane %v11942_v16, %v8542_v48  ;;  %v9499_v22 = vpop.xlane.xlu0 %409  ;;  %v11946_v44 = vld [vmem:[#allocation47_spill] sm:$0xff] }
 0x13d   :  { %v4721_v62 = vcombine.low %v4713_v63, %v4720_v11  ;;  %v4747_v34 = vrot.slane %v9151_v23, %v8582_v29  ;;  %v2110_v14 = vrot.slane %v11942_v16, %v8557_v1  ;;  %v2117_v21 = vrot.slane %v11942_v16, %v8560_v6  ;;  %v9497_v11 = vpop.xlane.xlu1 %412  ;;  %6471 = vperm.xlu1 %7983, %v4534_v60  }
 0x13e   :  { %v2068_v49 = vrot.slane %v11943_v24, %v8539_v47  ;;  %v4754_v8 = vrot.slane %v9153_v38, %v8582_v29  ;;  %v2075_v46 = vrot.slane %v11943_v24, %v8542_v48  ;;  %v2082_v63 = vrot.slane %v11943_v24, %v8557_v1  ;;  %11944 = vst [vmem:[#allocation44_spill] sm:$0xff] %v9497_v11  ;;  %v11947_v38 = vld [vmem:[#allocation48_spill] sm:$0xff] }
 0x13f   :  { %v2089_v23 = vrot.slane %v11943_v24, %v8560_v6  ;;  %11945 = vst [vmem:[#allocation46_spill] sm:$0xff] %v9499_v22  ;;  %v4568_v16 = vcombine.low %v4560_v10, %v4567_v53  ;;  %6504 = vperm.xlu0 %7982, %v4721_v62   ;;  %v4594_v50 = vrot.slane %v11946_v44, %v8582_v29  ;;  %v11948_v24 = vld [vmem:[#allocation52_spill] sm:$0xff] }
 0x140   :  { %v4601_v33 = vrot.slane %v11947_v38, %v8582_v29  ;;  %v4815_v3 = vrot.slane %v9195_v2, %v8582_v29  ;;  %v4822_v20 = vrot.slane %v9241_v39, %v8582_v29  ;;  %v2488_v27 = vrot.slane %v11948_v24, %v8539_v47  ;;  %v9533_v36 = vpop.xlane.xlu0 %415 }
 0x141   :  { %v2495_v60 = vrot.slane %v11948_v24, %v8542_v48  ;;  %v2502_v62 = vrot.slane %v11948_v24, %v8557_v1  ;;  %v2509_v44 = vrot.slane %v11948_v24, %v8560_v6  ;;  %v9517_v10 = vcombine.low %v1970_v35, %v1977_v43  ;;  %v9531_v22 = vpop.xlane.xlu1 %418  ;;  %6477 = vperm.xlu1 %7983, %v4568_v16  }
 0x142   :  { %v9519_v53 = vcombine.low %v2012_v37, %v2019_v55  ;;  %v9521_v2 = vcombine.low %v2026_v25, %v2033_v41  ;;  %v4755_v38 = vcombine.low %v4747_v34, %v4754_v8  ;;  %v9523_v39 = vcombine.low %v2096_v32, %v2103_v9  ;;  %11950 = vst [vmem:[#allocation36_spill] sm:$0xff] %v9531_v22  ;;  %v11952_v55 = vld [vmem:[#allocation10_spill] sm:$0xff]  ;;  %v11953_v25 = vld [vmem:[#allocation11_spill] sm:$0xff] }
 0x143   :  { %11949 = vst [vmem:[#allocation35_spill] sm:$0xff] %v9517_v10  ;;  %v9525_v40 = vcombine.low %v2110_v14, %v2117_v21  ;;  %v9527_v58 = vcombine.low %v2068_v49, %v2075_v46  ;;  %v9529_v11 = vcombine.low %v2082_v63, %v2089_v23  ;;  %11951 = vst [vmem:[#allocation47_spill] sm:$0xff] %v9533_v36  ;;  %v11957_v63 = vld [vmem:[#allocation38_spill] sm:$0xff] }
 0x144   :  { %6510 = vperm.xlu0 %7982, %v4755_v38   ;;  %v4602_v35 = vcombine.low %v4594_v50, %v4601_v33  ;;  %v4823_v37 = vcombine.low %v4815_v3, %v4822_v20  ;;  %v4628_v43 = vrot.slane %v11952_v55, %v8582_v29  ;;  %v4635_v41 = vrot.slane %v11953_v25, %v8582_v29  ;;  %v9561_v46 = vpop.xlane.xlu0 %421 }
 0x145   :  { %v5351_v32 = vcombine.low %v2488_v27, %v2495_v60  ;;  %v5352_v9 = vcombine.low %v2502_v62, %v2509_v44  ;;  %v5087_v34 = vrot.slane %v9469_v15, %v8582_v29  ;;  %v5094_v14 = vrot.slane %v9471_v4, %v8582_v29  ;;  %v11954_v27 = vld [vmem:[#allocation37_spill] sm:$0xff]  ;;  %v9559_v8 = vpop.xlane.xlu1 %424  ;;  %11956 = vst [vmem:[#allocation52_spill] sm:$0xff] %v9561_v46  ;;  %v11958_v44 = vld [vmem:[#allocation50_spill] sm:$0xff] }
 0x146   :  { %v2936_v21 = vrot.slane %v9397_v30, %v8539_v47  ;;  %v2943_v20 = vrot.slane %v9397_v30, %v8542_v48  ;;  %v2950_v3 = vrot.slane %v9397_v30, %v8557_v1  ;;  %v2957_v33 = vrot.slane %v9397_v30, %v8560_v6  ;;  %11955 = vst [vmem:[#allocation48_spill] sm:$0xff] %v9559_v8  ;;  %v11960_v8 = vld [vmem:[#allocation39_spill] sm:$0xff] }
 0x147   :  { %v2152_v50 = vrot.slane %v11954_v27, %v8539_v47  ;;  %v2159_v15 = vrot.slane %v11954_v27, %v8542_v48  ;;  %v2166_v4 = vrot.slane %v11954_v27, %v8557_v1  ;;  %v2173_v49 = vrot.slane %v11954_v27, %v8560_v6  ;;  %6483 = vperm.xlu1 %7983, %v4602_v35   ;;  %v11959_v35 = vld [vmem:[#allocation51_spill] sm:$0xff] }
 0x148   :  { %v2124_v30 = vrot.slane %v11957_v63, %v8539_v47  ;;  %v2131_v23 = vrot.slane %v11957_v63, %v8542_v48  ;;  %v2138_v16 = vrot.slane %v11957_v63, %v8557_v1  ;;  %v2145_v24 = vrot.slane %v11957_v63, %v8560_v6  ;;  %6522 = vperm.xlu0 %7982, %v4823_v37  }
 0x149   :  { %v4636_v60 = vcombine.low %v4628_v43, %v4635_v41  ;;  %v5095_v62 = vcombine.low %v5087_v34, %v5094_v14  ;;  %v4662_v38 = vrot.slane %v11958_v44, %v8582_v29  ;;  %v4669_v55 = vrot.slane %v11959_v35, %v8582_v29  ;;  %v9585_v34 = vpop.xlane.xlu1 %430  ;;  %v9587_v14 = vpop.xlane.xlu0 %427 }
 0x14a   :  { %v5623_v25 = vcombine.low %v2936_v21, %v2943_v20  ;;  %v5624_v27 = vcombine.low %v2950_v3, %v2957_v33  ;;  %v5359_v10 = vrot.slane %v5351_v32, %v8582_v29  ;;  %v5366_v46 = vrot.slane %v5352_v9, %v8582_v29  ;;  %11961 = vst [vmem:[#allocation10_spill] sm:$0xff] %v9585_v34  ;;  %v11965_v21 = vld [vmem:[#allocation40_spill] sm:$0xff] }
 0x14b   :  { %v2208_v36 = vrot.slane %v11960_v8, %v8539_v47  ;;  %v2215_v37 = vrot.slane %v11960_v8, %v8542_v48  ;;  %v2222_v43 = vrot.slane %v11960_v8, %v8557_v1  ;;  %v2229_v41 = vrot.slane %v11960_v8, %v8560_v6  ;;  %6489 = vperm.xlu1 %7983, %v4636_v60   ;;  %v11966_v8 = vld [vmem:[#allocation54_spill] sm:$0xff] }
 0x14c   :  { %11962 = vst [vmem:[#allocation11_spill] sm:$0xff] %v9587_v14  ;;  %v9589_v32 = vcombine.low %v2152_v50, %v2159_v15  ;;  %v9591_v9 = vcombine.low %v2166_v4, %v2173_v49  ;;  %v2180_v20 = vrot.slane %v11965_v21, %v8539_v47  ;;  %v2187_v3 = vrot.slane %v11965_v21, %v8542_v48 }
 0x14d   :  { %6570 = vperm.xlu0 %7982, %v5095_v62   ;;  %v9597_v33 = vcombine.low %v2124_v30, %v2131_v23  ;;  %v4670_v63 = vcombine.low %v4662_v38, %v4669_v55  ;;  %v4696_v44 = vrot.slane %v11966_v8, %v8582_v29  ;;  %v4703_v60 = vrot.slane %v9149_v0, %v8582_v29  ;;  %v9615_v62 = vpop.xlane.xlu1 %436  ;;  %v9617_v0 = vpop.xlane.xlu0 %433 }
 0x14e   :  { %11963 = vst [vmem:[#allocation37_spill] sm:$0xff] %v9589_v32  ;;  %11964 = vst [vmem:[#allocation38_spill] sm:$0xff] %v9591_v9  ;;  %v9603_v50 = vcombine.low %v2138_v16, %v2145_v24  ;;  %v5367_v15 = vcombine.low %v5359_v10, %v5366_v46  ;;  %v5631_v4 = vrot.slane %v5623_v25, %v8582_v29  ;;  %v11972_v46 = vld [vmem:[#allocation42_spill] sm:$0xff] }
 0x14f   :  { %v5638_v49 = vrot.slane %v5624_v27, %v8582_v29  ;;  %v9607_v35 = vcombine.low %v2208_v36, %v2215_v37  ;;  %v9609_v14 = vcombine.low %v2222_v43, %v2229_v41  ;;  %v2194_v30 = vrot.slane %v11965_v21, %v8557_v1  ;;  %11969 = vst [vmem:[#allocation39_spill] sm:$0xff] %v9615_v62  ;;  %v11973_v27 = vld [vmem:[#allocation14_spill] sm:$0xff]  ;;  %v11974_v43 = vld [vmem:[#allocation43_spill] sm:$0xff] }
 0x150   :  { %v2201_v23 = vrot.slane %v11965_v21, %v8560_v6  ;;  %6495 = vperm.xlu1 %7983, %v4670_v63   ;;  %11970 = vst [vmem:[#allocation40_spill] sm:$0xff] %v9617_v0  ;;  %v9619_v10 = vcombine.low %v2180_v20, %v2187_v3  ;;  %v2264_v16 = vrot.slane %v11972_v46, %v8539_v47  ;;  %v11975_v63 = vld [vmem:[#allocation53_spill] sm:$0xff] }
 0x151   :  { %11967 = vst [vmem:[#allocation50_spill] sm:$0xff] %v9607_v35  ;;  %11968 = vst [vmem:[#allocation51_spill] sm:$0xff] %v9609_v14  ;;  %v2271_v36 = vrot.slane %v11972_v46, %v8542_v48  ;;  %v2278_v24 = vrot.slane %v11972_v46, %v8557_v1  ;;  %6618 = vperm.xlu0 %7982, %v5367_v15   ;;  %v2285_v38 = vrot.slane %v11972_v46, %v8560_v6  ;;  %v443_v15 = vpop.xlane.xlu1 %442  ;;  %v9647_v46 = vpop.xlane.xlu0 %439 }
 0x152   :  { %11971 = vst [vmem:[#allocation54_spill] sm:$0xff] %v9619_v10  ;;  %v4704_v55 = vcombine.low %v4696_v44, %v4703_v60  ;;  %v4730_v25 = vrot.slane %v9157_v28, %v8582_v29  ;;  %v4737_v37 = vrot.slane %v11973_v27, %v8582_v29  ;;  %v2236_v41 = vrot.slane %v11974_v43, %v8539_v47 }
 0x153   :  { %v2243_v21 = vrot.slane %v11974_v43, %v8542_v48  ;;  %v2250_v20 = vrot.slane %v11974_v43, %v8557_v1  ;;  %v5639_v3 = vcombine.low %v5631_v4, %v5638_v49  ;;  %v2460_v8 = vrot.slane %v11975_v63, %v8539_v47 }
 0x154   :  { %v2467_v44 = vrot.slane %v11975_v63, %v8542_v48  ;;  %v2474_v28 = vrot.slane %v11975_v63, %v8557_v1  ;;  %v2481_v60 = vrot.slane %v11975_v63, %v8560_v6  ;;  %6501 = vperm.xlu1 %7983, %v4704_v55   ;;  %v3384_v27 = vrot.slane %v443_v15, %v8539_v47 }
 0x155   :  { %v3391_v4 = vrot.slane %v443_v15, %v8542_v48  ;;  %v3398_v49 = vrot.slane %v443_v15, %v8557_v1  ;;  %v3405_v0 = vrot.slane %v443_v15, %v8560_v6  ;;  %6666 = vperm.xlu0 %7982, %v5639_v3   ;;  %v2257_v62 = vrot.slane %v11974_v43, %v8560_v6  ;;  %v9663_v15 = vpop.xlane.xlu1 %448  ;;  %v9665_v3 = vpop.xlane.xlu0 %445 }
 0x156   :  { %v4738_v34 = vcombine.low %v4730_v25, %v4737_v37  ;;  %v4798_v63 = vrot.slane %v9254_v54, %v8582_v29  ;;  %v4805_v55 = vrot.slane %v9256_v19, %v8582_v29  ;;  %v9659_v14 = vcombine.low %v2194_v30, %v2201_v23 }
 0x157   :  { %v9661_v35 = vcombine.low %v2264_v16, %v2271_v36  ;;  %v5895_v22 = vcombine.low %v3384_v27, %v3391_v4  ;;  %v5896_v10 = vcombine.low %v3398_v49, %v3405_v0  ;;  %v5334_v9 = vcombine.low %v2460_v8, %v2467_v44 }
 0x158   :  { %11976 = vst [vmem:[#allocation42_spill] sm:$0xff] %v9659_v14  ;;  %v5335_v32 = vcombine.low %v2474_v28, %v2481_v60  ;;  %6507 = vperm.xlu1 %7983, %v4738_v34   ;;  %v5070_v25 = vrot.slane %v9519_v53, %v8582_v29  ;;  %v5077_v54 = vrot.slane %v9521_v2, %v8582_v29  ;;  %v11981_v2 = vld [vmem:[#allocation6_spill] sm:$0xff] }
 0x159   :  { %11977 = vst [vmem:[#allocation14_spill] sm:$0xff] %v9661_v35  ;;  %v2908_v19 = vrot.slane %v9400_v42, %v8539_v47  ;;  %v2915_v30 = vrot.slane %v9400_v42, %v8542_v48  ;;  %v2922_v23 = vrot.slane %v9400_v42, %v8557_v1  ;;  %v2929_v34 = vrot.slane %v9400_v42, %v8560_v6 }
 0x15a   :  { %v9679_v0 = vcombine.low %v2278_v24, %v2285_v38  ;;  %v9681_v16 = vcombine.low %v2236_v41, %v2243_v21  ;;  %v9683_v53 = vcombine.low %v2250_v20, %v2257_v62  ;;  %v4806_v36 = vcombine.low %v4798_v63, %v4805_v55  ;;  %v11982_v62 = vld [vmem:[#allocation45_spill] sm:$0xff]  ;;  %v9697_v41 = vpop.xlane.xlu1 %454  ;;  %v9699_v21 = vpop.xlane.xlu0 %451 }
 0x15b   :  { %v2320_v37 = vrot.slane %v11981_v2, %v8539_v47  ;;  %v2327_v43 = vrot.slane %v11981_v2, %v8542_v48  ;;  %v5903_v8 = vrot.slane %v5895_v22, %v8582_v29  ;;  %v5910_v44 = vrot.slane %v5896_v10, %v8582_v29  ;;  %11983 = vst [vmem:[#allocation6_spill] sm:$0xff] %v9697_v41 }
 0x15c   :  { %11978 = vst [vmem:[#allocation43_spill] sm:$0xff] %v9679_v0  ;;  %11979 = vst [vmem:[#allocation53_spill] sm:$0xff] %v9681_v16  ;;  %v2334_v42 = vrot.slane %v11981_v2, %v8557_v1  ;;  %v2341_v24 = vrot.slane %v11981_v2, %v8560_v6  ;;  %v2292_v38 = vrot.slane %v11982_v62, %v8539_v47  ;;  %6519 = vperm.xlu1 %7983, %v4806_v36  }
 0x15d   :  { %11980 = vst [vmem:[#allocation69_spill] sm:$0xff] %v9683_v53  ;;  %v5078_v20 = vcombine.low %v5070_v25, %v5077_v54  ;;  %v5606_v28 = vcombine.low %v2908_v19, %v2915_v30  ;;  %v5607_v60 = vcombine.low %v2922_v23, %v2929_v34  ;;  %v5342_v22 = vrot.slane %v5334_v9, %v8582_v29  ;;  %v11985_v19 = vld [vmem:[#allocation7_spill] sm:$0xff]  ;;  %v11989_v53 = vld [vmem:[#allocation8_spill] sm:$0xff] }
 0x15e   :  { %v5349_v10 = vrot.slane %v5335_v32, %v8582_v29  ;;  %v3356_v27 = vrot.slane %v9647_v46, %v8539_v47  ;;  %v3363_v4 = vrot.slane %v9647_v46, %v8542_v48  ;;  %v3370_v49 = vrot.slane %v9647_v46, %v8557_v1  ;;  %v9725_v34 = vpop.xlane.xlu1 %460  ;;  %v9727_v36 = vpop.xlane.xlu0 %457 }
 0x15f   :  { %v3377_v63 = vrot.slane %v9647_v46, %v8560_v6  ;;  %v2299_v55 = vrot.slane %v11982_v62, %v8542_v48  ;;  %v2306_v9 = vrot.slane %v11982_v62, %v8557_v1  ;;  %v2313_v32 = vrot.slane %v11982_v62, %v8560_v6  ;;  %11986 = vst [vmem:[#allocation7_spill] sm:$0xff] %v9725_v34 }
 0x160   :  { %v5911_v25 = vcombine.low %v5903_v8, %v5910_v44  ;;  %v9717_v54 = vcombine.low %v2320_v37, %v2327_v43  ;;  %v2376_v30 = vrot.slane %v11985_v19, %v8539_v47  ;;  %v2383_v23 = vrot.slane %v11985_v19, %v8542_v48  ;;  %6567 = vperm.xlu1 %7983, %v5078_v20   ;;  %v11988_v37 = vld [vmem:[#allocation49_spill] sm:$0xff] }
 0x161   :  { %v2390_v46 = vrot.slane %v11985_v19, %v8557_v1  ;;  %11987 = vst [vmem:[#allocation70_spill] sm:$0xff] %v9727_v36  ;;  %v2397_v2 = vrot.slane %v11985_v19, %v8560_v6  ;;  %v2348_v43 = vrot.slane %v11988_v37, %v8539_v47  ;;  %v2355_v8 = vrot.slane %v11988_v37, %v8542_v48 }
 0x162   :  { %11984 = vst [vmem:[#allocation45_spill] sm:$0xff] %v9717_v54  ;;  %6714 = vperm.xlu0 %7982, %v5911_v25   ;;  %v5350_v44 = vcombine.low %v5342_v22, %v5349_v10  ;;  %v5878_v62 = vcombine.low %v3356_v27, %v3363_v4  ;;  %v5879_v54 = vcombine.low %v3370_v49, %v3377_v63  ;;  %v9753_v4 = vpop.xlane.xlu1 %466  ;;  %v9755_v49 = vpop.xlane.xlu0 %463 }
 0x163   :  { %v5614_v0 = vrot.slane %v5606_v28, %v8582_v29  ;;  %v5621_v35 = vrot.slane %v5607_v60, %v8582_v29  ;;  %v2362_v20 = vrot.slane %v11988_v37, %v8557_v1  ;;  %v2369_v19 = vrot.slane %v11988_v37, %v8560_v6  ;;  %v11990_v60 = vld [vmem:[#allocation9_spill] sm:$0xff]  ;;  %11991 = vst [vmem:[#allocation49_spill] sm:$0xff] %v9753_v4 }
 0x164   :  { %v2432_v16 = vrot.slane %v11989_v53, %v8539_v47  ;;  %v2439_v34 = vrot.slane %v11989_v53, %v8542_v48  ;;  %v2446_v22 = vrot.slane %v11989_v53, %v8557_v1  ;;  %v2453_v28 = vrot.slane %v11989_v53, %v8560_v6  ;;  %6615 = vperm.xlu1 %7983, %v5350_v44  }
 0x165   :  { %v2404_v10 = vrot.slane %v11990_v60, %v8539_v47  ;;  %v2411_v27 = vrot.slane %v11990_v60, %v8542_v48  ;;  %11992 = vst [vmem:[#allocation8_spill] sm:$0xff] %v9755_v49  ;;  %v9757_v63 = vcombine.low %v2334_v42, %v2341_v24  ;;  %v9759_v25 = vcombine.low %v2292_v38, %v2299_v55 }
 0x166   :  { %v9761_v37 = vcombine.low %v2306_v9, %v2313_v32  ;;  %v9763_v14 = vcombine.low %v2376_v30, %v2383_v23  ;;  %v9765_v53 = vcombine.low %v2390_v46, %v2397_v2  ;;  %v5622_v36 = vcombine.low %v5614_v0, %v5621_v35  ;;  %v12003_v35 = vld [vmem:[#allocation12_spill] sm:$0xff]  ;;  %v9785_v32 = vpop.xlane.xlu1 %472  ;;  %v12006_v46 = vld [vmem:[#allocation13_spill] sm:$0xff] }
 0x167   :  { %11993 = vst [vmem:[#allocation9_spill] sm:$0xff] %v9757_v63  ;;  %11994 = vst [vmem:[#allocation71_spill] sm:$0xff] %v9759_v25  ;;  %v5886_v41 = vrot.slane %v5878_v62, %v8582_v29  ;;  %v5893_v56 = vrot.slane %v5879_v54, %v8582_v29  ;;  %v9769_v45 = vcombine.low %v2348_v43, %v2355_v8  ;;  %v9787_v54 = vpop.xlane.xlu0 %469  ;;  %v12007_v62 = vld [vmem:[#allocation55_spill] sm:$0xff] }
 0x168   :  { %11995 = vst [vmem:[#allocation72_spill] sm:$0xff] %v9761_v37  ;;  %11996 = vst [vmem:[#allocation73_spill] sm:$0xff] %v9763_v14  ;;  %v9771_v44 = vcombine.low %v2362_v20, %v2369_v19  ;;  %v2418_v42 = vrot.slane %v11990_v60, %v8557_v1  ;;  %v2425_v24 = vrot.slane %v11990_v60, %v8560_v6  ;;  %6663 = vperm.xlu1 %7983, %v5622_v36   ;;  %v12008_v60 = vld [vmem:[#allocation56_spill] sm:$0xff] }
 0x169   :  { %11997 = vst [vmem:[#allocation74_spill] sm:$0xff] %v9765_v53  ;;  %11998 = vst [vmem:[#allocation75_spill] sm:$0xff] %v9769_v45  ;;  %v9777_v38 = vcombine.low %v2432_v16, %v2439_v34  ;;  %v9779_v55 = vcombine.low %v2446_v22, %v2453_v28  ;;  %v9781_v9 = vcombine.low %v2404_v10, %v2411_v27 }
 0x16a   :  { %11999 = vst [vmem:[#allocation76_spill] sm:$0xff] %v9771_v44  ;;  %v2544_v0 = vrot.slane %v12003_v35, %v8539_v47  ;;  %12004 = vst [vmem:[#allocation12_spill] sm:$0xff] %v9785_v32  ;;  %v2551_v30 = vrot.slane %v12003_v35, %v8542_v48  ;;  %v2558_v23 = vrot.slane %v12003_v35, %v8557_v1 }
 0x16b   :  { %12000 = vst [vmem:[#allocation77_spill] sm:$0xff] %v9777_v38  ;;  %12001 = vst [vmem:[#allocation78_spill] sm:$0xff] %v9779_v55  ;;  %v2565_v16 = vrot.slane %v12003_v35, %v8560_v6  ;;  %v2516_v34 = vrot.slane %v12006_v46, %v8539_v47  ;;  %v2523_v2 = vrot.slane %v12006_v46, %v8542_v48  ;;  %v9819_v35 = vpop.xlane.xlu1 %478  ;;  %v12012_v38 = vld [vmem:[#allocation18_spill] sm:$0xff] }
 0x16c   :  { %12002 = vst [vmem:[#allocation79_spill] sm:$0xff] %v9781_v9  ;;  %12005 = vst [vmem:[#allocation80_spill] sm:$0xff] %v9787_v54  ;;  %v2530_v36 = vrot.slane %v12006_v46, %v8557_v1  ;;  %v2537_v43 = vrot.slane %v12006_v46, %v8560_v6  ;;  %v5894_v8 = vcombine.low %v5886_v41, %v5893_v56  ;;  %v9821_v46 = vpop.xlane.xlu0 %475 }
 0x16d   :  { %v2600_v20 = vrot.slane %v12007_v62, %v8539_v47  ;;  %v2607_v19 = vrot.slane %v12007_v62, %v8542_v48  ;;  %v2614_v22 = vrot.slane %v12007_v62, %v8557_v1  ;;  %v2621_v28 = vrot.slane %v12007_v62, %v8560_v6  ;;  %12009 = vst [vmem:[#allocation13_spill] sm:$0xff] %v9819_v35 }
 0x16e   :  { %v2572_v10 = vrot.slane %v12008_v60, %v8539_v47  ;;  %v2579_v27 = vrot.slane %v12008_v60, %v8542_v48  ;;  %v2586_v56 = vrot.slane %v12008_v60, %v8557_v1  ;;  %v2593_v41 = vrot.slane %v12008_v60, %v8560_v6  ;;  %6711 = vperm.xlu1 %7983, %v5894_v8  }
 0x16f   :  { %12010 = vst [vmem:[#allocation55_spill] sm:$0xff] %v9821_v46  ;;  %v9823_v55 = vcombine.low %v2418_v42, %v2425_v24  ;;  %v9825_v62 = vcombine.low %v2544_v0, %v2551_v30  ;;  %v2656_v9 = vrot.slane %v12012_v38, %v8539_v47  ;;  %v2663_v53 = vrot.slane %v12012_v38, %v8542_v48  ;;  %v9855_v46 = vpop.xlane.xlu1 %484 }
 0x170   :  { %v2670_v14 = vrot.slane %v12012_v38, %v8557_v1  ;;  %v2677_v60 = vrot.slane %v12012_v38, %v8560_v6  ;;  %v5104_v8 = vrot.slane %v9527_v58, %v8582_v29  ;;  %v5111_v42 = vrot.slane %v9529_v11, %v8582_v29  ;;  %v12015_v38 = vld [vmem:[#allocation19_spill] sm:$0xff]  ;;  %v9857_v11 = vpop.xlane.xlu0 %481 }
 0x171   :  { %12011 = vst [vmem:[#allocation56_spill] sm:$0xff] %v9823_v55  ;;  %v9839_v24 = vcombine.low %v2558_v23, %v2565_v16  ;;  %v9841_v0 = vcombine.low %v2516_v34, %v2523_v2  ;;  %v9843_v30 = vcombine.low %v2530_v36, %v2537_v43  ;;  %v9845_v55 = vcombine.low %v2600_v20, %v2607_v19 }
 0x172   :  { %v9847_v44 = vcombine.low %v2614_v22, %v2621_v28  ;;  %v9849_v45 = vcombine.low %v2572_v10, %v2579_v27  ;;  %v9851_v63 = vcombine.low %v2586_v56, %v2593_v41  ;;  %v2628_v58 = vrot.slane %v12015_v38, %v8539_v47  ;;  %12016 = vst [vmem:[#allocation19_spill] sm:$0xff] %v9855_v46 }
 0x173   :  { %12013 = vst [vmem:[#allocation18_spill] sm:$0xff] %v9845_v55  ;;  %12017 = vst [vmem:[#allocation82_spill] sm:$0xff] %v9857_v11  ;;  %v9859_v23 = vcombine.low %v2656_v9, %v2663_v53  ;;  %v2635_v16 = vrot.slane %v12015_v38, %v8542_v48  ;;  %v2642_v34 = vrot.slane %v12015_v38, %v8557_v1  ;;  %v12020_v9 = vld [vmem:[#allocation20_spill] sm:$0xff]  ;;  %v491_v56 = vpop.xlane.xlu1 %490 }
 0x174   :  { %12014 = vst [vmem:[#allocation81_spill] sm:$0xff] %v9847_v44  ;;  %v2649_v2 = vrot.slane %v12015_v38, %v8560_v6  ;;  %v9867_v36 = vcombine.low %v2670_v14, %v2677_v60  ;;  %v9869_v43 = vcombine.low %v5104_v8, %v5111_v42  ;;  %v4832_v20 = vrot.slane %v9263_v57, %v8582_v29  ;;  %v488_v41 = vpop.xlane.xlu0 %487 }
 0x175   :  { %12018 = vst [vmem:[#allocation83_spill] sm:$0xff] %v9859_v23  ;;  %v4839_v53 = vrot.slane %v9265_v12, %v8582_v29  ;;  %v2712_v19 = vrot.slane %v12020_v9, %v8539_v47  ;;  %v2719_v22 = vrot.slane %v12020_v9, %v8542_v48  ;;  %v2726_v28 = vrot.slane %v12020_v9, %v8557_v1 }
 0x176   :  { %12019 = vst [vmem:[#allocation84_spill] sm:$0xff] %v9867_v36  ;;  %v2733_v14 = vrot.slane %v12020_v9, %v8560_v6  ;;  %v2684_v10 = vrot.slane %v9250_v7, %v8539_v47  ;;  %v2691_v57 = vrot.slane %v9250_v7, %v8542_v48  ;;  %v2698_v12 = vrot.slane %v9250_v7, %v8557_v1 }
 0x177   :  { %v2705_v27 = vrot.slane %v9250_v7, %v8560_v6  ;;  %v3832_v60 = vrot.slane %v491_v56, %v8539_v47  ;;  %v3839_v8 = vrot.slane %v491_v56, %v8542_v48  ;;  %v3846_v42 = vrot.slane %v491_v56, %v8557_v1  ;;  %v9907_v36 = vpop.xlane.xlu1 %496 }
 0x178   :  { %v3853_v38 = vrot.slane %v491_v56, %v8560_v6  ;;  %v3804_v9 = vrot.slane %v488_v41, %v8539_v47  ;;  %v3811_v11 = vrot.slane %v488_v41, %v8542_v48  ;;  %v3818_v46 = vrot.slane %v488_v41, %v8557_v1  ;;  %v494_v23 = vpop.xlane.xlu0 %493 }
 0x179   :  { %v3825_v35 = vrot.slane %v488_v41, %v8560_v6  ;;  %v9899_v37 = vcombine.low %v2628_v58, %v2635_v16  ;;  %v9901_v7 = vcombine.low %v2642_v34, %v2649_v2  ;;  %v6167_v25 = vcombine.low %v3832_v60, %v3839_v8 }
 0x17a   :  { %v6168_v54 = vcombine.low %v3846_v42, %v3853_v38  ;;  %v9903_v32 = vcombine.low %v2712_v19, %v2719_v22  ;;  %v9905_v4 = vcombine.low %v2726_v28, %v2733_v14  ;;  %v6150_v49 = vcombine.low %v3804_v9, %v3811_v11 }
 0x17b   :  { %v6151_v56 = vcombine.low %v3818_v46, %v3825_v35  ;;  %v9909_v44 = vcombine.low %v2684_v10, %v2691_v57  ;;  %v9911_v55 = vcombine.low %v2698_v12, %v2705_v27  ;;  %v4840_v41 = vcombine.low %v4832_v20, %v4839_v53  ;;  %v9927_v53 = vpop.xlane.xlu1 %502 }
 0x17c   :  { %12021 = vst [vmem:[#allocation20_spill] sm:$0xff] %v9905_v4  ;;  %v5376_v58 = vrot.slane %v9841_v0, %v8582_v29  ;;  %v2964_v16 = vrot.slane %v9433_v59, %v8539_v47  ;;  %v2971_v34 = vrot.slane %v9433_v59, %v8542_v48  ;;  %v2978_v35 = vrot.slane %v9433_v59, %v8557_v1  ;;  %v9933_v10 = vpop.xlane.xlu0 %499 }
 0x17d   :  { %v2985_v46 = vrot.slane %v9433_v59, %v8560_v6  ;;  %v3860_v11 = vrot.slane %v494_v23, %v8539_v47  ;;  %v3867_v2 = vrot.slane %v494_v23, %v8542_v48  ;;  %v6175_v20 = vrot.slane %v6167_v25, %v8582_v29 }
 0x17e   :  { %v6182_v0 = vrot.slane %v6168_v54, %v8582_v29  ;;  %v3874_v19 = vrot.slane %v494_v23, %v8557_v1  ;;  %v3881_v22 = vrot.slane %v494_v23, %v8560_v6  ;;  %v6158_v28 = vrot.slane %v6150_v49, %v8582_v29 }
 0x17f   :  { %v6165_v14 = vrot.slane %v6151_v56, %v8582_v29  ;;  %v3412_v59 = vrot.slane %v9665_v3, %v8539_v47  ;;  %v3419_v25 = vrot.slane %v9665_v3, %v8542_v48  ;;  %v3426_v54 = vrot.slane %v9665_v3, %v8557_v1 }
 0x180   :  { %v3433_v57 = vrot.slane %v9665_v3, %v8560_v6  ;;  %v5640_v12 = vcombine.low %v2964_v16, %v2971_v34  ;;  %v5641_v23 = vcombine.low %v2978_v35, %v2985_v46  ;;  %v6183_v27 = vcombine.low %v6175_v20, %v6182_v0  ;;  %v9953_v16 = vpop.xlane.xlu1 %508  ;;  %v9955_v34 = vpop.xlane.xlu0 %505 }
 0x181   :  { %v6166_v49 = vcombine.low %v6158_v28, %v6165_v14  ;;  %v2768_v60 = vrot.slane %v9285_v26, %v8539_v47  ;;  %v2775_v8 = vrot.slane %v9285_v26, %v8542_v48  ;;  %v5383_v42 = vrot.slane %v9843_v30, %v8582_v29 }
 0x182   :  { %v2782_v9 = vrot.slane %v9285_v26, %v8557_v1  ;;  %v6184_v3 = vcombine.low %v3860_v11, %v3867_v2  ;;  %v6185_v56 = vcombine.low %v3874_v19, %v3881_v22  ;;  %6762 = vperm.xlu0 %7982, %v6183_v27   ;;  %v2789_v35 = vrot.slane %v9285_v26, %v8560_v6 }
 0x183   :  { %6759 = vperm.xlu1 %7983, %v6166_v49   ;;  %v2740_v30 = vrot.slane %v9288_v61, %v8539_v47  ;;  %v5912_v46 = vcombine.low %v3412_v59, %v3419_v25  ;;  %v5913_v20 = vcombine.low %v3426_v54, %v3433_v57  ;;  %v2747_v0 = vrot.slane %v9288_v61, %v8542_v48 }
 0x184   :  { %v2754_v11 = vrot.slane %v9288_v61, %v8557_v1  ;;  %v5648_v2 = vrot.slane %v5640_v12, %v8582_v29  ;;  %v5655_v19 = vrot.slane %v5641_v23, %v8582_v29  ;;  %v2761_v22 = vrot.slane %v9288_v61, %v8560_v6  ;;  %v9978_v25 = vpop.xlane.xlu1 %514  ;;  %v9980_v54 = vpop.xlane.xlu0 %511 }
 0x185   :  { %v2992_v26 = vrot.slane %v9431_v13, %v8539_v47  ;;  %v2999_v28 = vrot.slane %v9431_v13, %v8542_v48  ;;  %v3006_v14 = vrot.slane %v9431_v13, %v8557_v1  ;;  %v3013_v59 = vrot.slane %v9431_v13, %v8560_v6 }
 0x186   :  { %6573 = vperm.xlu0 %7982, %v9869_v43   ;;  %v6192_v61 = vrot.slane %v6184_v3, %v8582_v29  ;;  %v6199_v57 = vrot.slane %v6185_v56, %v8582_v29  ;;  %v9984_v12 = vcombine.low %v2768_v60, %v2775_v8  ;;  %v9986_v23 = vcombine.low %v2782_v9, %v2789_v35 }
 0x187   :  { %6525 = vperm.xlu1 %7983, %v4840_v41   ;;  %v5920_v27 = vrot.slane %v5912_v46, %v8582_v29  ;;  %v5927_v49 = vrot.slane %v5913_v20, %v8582_v29  ;;  %v9990_v13 = vcombine.low %v2740_v30, %v2747_v0  ;;  %v5656_v43 = vcombine.low %v5648_v2, %v5655_v19 }
 0x188   :  { %v5384_v41 = vcombine.low %v5376_v58, %v5383_v42  ;;  %v4856_v38 = vrot.slane %v9260_v5, %v8582_v29  ;;  %v9994_v4 = vcombine.low %v2754_v11, %v2761_v22  ;;  %v5657_v3 = vcombine.low %v2992_v26, %v2999_v28  ;;  %v10002_v35 = vpop.xlane.xlu1 %520  ;;  %v10004_v42 = vpop.xlane.xlu0 %517 }
 0x189   :  { %v5121_v60 = vrot.slane %v9523_v39, %v8582_v29  ;;  %v5128_v8 = vrot.slane %v9525_v40, %v8582_v29  ;;  %v5658_v9 = vcombine.low %v3006_v14, %v3013_v59  ;;  %v3440_v56 = vrot.slane %v9663_v15, %v8539_v47 }
 0x18a   :  { %6669 = vperm.xlu0 %7982, %v5656_v43   ;;  %v6200_v58 = vcombine.low %v6192_v61, %v6199_v57  ;;  %v3447_v5 = vrot.slane %v9663_v15, %v8542_v48  ;;  %v3454_v39 = vrot.slane %v9663_v15, %v8557_v1  ;;  %v3461_v40 = vrot.slane %v9663_v15, %v8560_v6 }
 0x18b   :  { %6621 = vperm.xlu1 %7983, %v5384_v41   ;;  %v5928_v30 = vcombine.low %v5920_v27, %v5927_v49  ;;  %v3888_v46 = vrot.slane %v9907_v36, %v8539_v47  ;;  %v3895_v20 = vrot.slane %v9907_v36, %v8542_v48  ;;  %v3902_v0 = vrot.slane %v9907_v36, %v8557_v1 }
 0x18c   :  { %v3909_v11 = vrot.slane %v9907_v36, %v8560_v6  ;;  %v2824_v2 = vrot.slane %v9325_v52, %v8539_v47  ;;  %v2831_v19 = vrot.slane %v9325_v52, %v8542_v48  ;;  %v2838_v15 = vrot.slane %v9325_v52, %v8557_v1  ;;  %v10030_v28 = vpop.xlane.xlu1 %526  ;;  %v10032_v36 = vpop.xlane.xlu0 %523 }
 0x18d   :  { %v2845_v22 = vrot.slane %v9325_v52, %v8560_v6  ;;  %v2796_v26 = vrot.slane %v9328_v51, %v8539_v47  ;;  %12022 = vst [vmem:[#allocation85_spill] sm:$0xff] %v10030_v28  ;;  %v5393_v14 = vrot.slane %v9825_v62, %v8582_v29  ;;  %v5400_v59 = vrot.slane %v9839_v24, %v8582_v29 }
 0x18e   :  { %6765 = vperm.xlu0 %7982, %v6200_v58   ;;  %v12023_v61 = vrot.slane %v9258_v17, %v8582_v29  ;;  %v5129_v52 = vcombine.low %v5121_v60, %v5128_v8  ;;  %v5665_v27 = vrot.slane %v5657_v3, %v8582_v29  ;;  %v5672_v49 = vrot.slane %v5658_v9, %v8582_v29 }
 0x18f   :  { %6717 = vperm.xlu1 %7983, %v5928_v30   ;;  %v5929_v43 = vcombine.low %v3440_v56, %v3447_v5  ;;  %v5930_v41 = vcombine.low %v3454_v39, %v3461_v40  ;;  %v6201_v58 = vcombine.low %v3888_v46, %v3895_v20  ;;  %v6202_v30 = vcombine.low %v3902_v0, %v3909_v11 }
 0x190   :  { %v4857_v57 = vcombine.low %v12023_v61, %v4856_v38  ;;  %v10043_v28 = vcombine.low %v2824_v2, %v2831_v19  ;;  %v2803_v62 = vrot.slane %v9328_v51, %v8542_v48  ;;  %v2810_v24 = vrot.slane %v9328_v51, %v8557_v1  ;;  %v10055_v60 = vpop.xlane.xlu1 %532  ;;  %v10063_v39 = vpop.xlane.xlu0 %529 }
 0x191   :  { %v2817_v17 = vrot.slane %v9328_v51, %v8560_v6  ;;  %v3020_v38 = vrot.slane %v9463_v31, %v8539_v47  ;;  %v3027_v3 = vrot.slane %v9463_v31, %v8542_v48  ;;  %12025 = vst [vmem:[#allocation87_spill] sm:$0xff] %v10055_v60  ;;  %v5401_v8 = vcombine.low %v5393_v14, %v5400_v59 }
 0x192   :  { %12024 = vst [vmem:[#allocation86_spill] sm:$0xff] %v10043_v28  ;;  %6576 = vperm.xlu0 %7982, %v5129_v52   ;;  %v3034_v9 = vrot.slane %v9463_v31, %v8557_v1  ;;  %v3041_v56 = vrot.slane %v9463_v31, %v8560_v6  ;;  %v3468_v51 = vrot.slane %v9699_v21, %v8539_v47  ;;  %12026 = vst [vmem:[#allocation88_spill] sm:$0xff] %v10063_v39 }
 0x193   :  { %6528 = vperm.xlu1 %7983, %v4857_v57   ;;  %v5673_v5 = vcombine.low %v5665_v27, %v5672_v49  ;;  %v5937_v40 = vrot.slane %v5929_v43, %v8582_v29  ;;  %v5944_v46 = vrot.slane %v5930_v41, %v8582_v29  ;;  %v6209_v20 = vrot.slane %v6201_v58, %v8582_v29 }
 0x194   :  { %v6216_v0 = vrot.slane %v6202_v30, %v8582_v29  ;;  %v3475_v11 = vrot.slane %v9699_v21, %v8542_v48  ;;  %v3482_v31 = vrot.slane %v9699_v21, %v8557_v1  ;;  %v3489_v2 = vrot.slane %v9699_v21, %v8560_v6  ;;  %v10083_v57 = vpop.permute.xlu1 %6426  ;;  %v12028_v21 = vld [vmem:[#allocation59_spill] sm:$0xff]  ;;  %v10101_v39 = vpop.permute.xlu0 %6423 }
 0x195   :  { %v3916_v19 = vrot.slane %v9933_v10, %v8539_v47  ;;  %v3923_v14 = vrot.slane %v9933_v10, %v8542_v48  ;;  %v3930_v59 = vrot.slane %v9933_v10, %v8557_v1  ;;  %v3937_v61 = vrot.slane %v9933_v10, %v8560_v6  ;;  %12027 = vst [vmem:[#allocation89_spill] sm:$0xff] %v10083_v57 }
 0x196   :  { %6672 = vperm.xlu0 %7982, %v5673_v5   ;;  %v4866_v52 = vrot.slane %v9275_v18, %v8582_v29  ;;  %v4873_v27 = vrot.slane %v12028_v21, %v8582_v29  ;;  %v5138_v49 = vrot.slane %v9597_v33, %v8582_v29  ;;  %v5145_v43 = vrot.slane %v9603_v50, %v8582_v29  ;;  %v12034_v50 = vld [vmem:[#allocation34_spill] sm:$0xff] }
 0x197   :  { %6624 = vperm.xlu1 %7983, %v5401_v8   ;;  %v5674_v41 = vcombine.low %v3020_v38, %v3027_v3  ;;  %v5675_v58 = vcombine.low %v3034_v9, %v3041_v56  ;;  %v5945_v30 = vcombine.low %v5937_v40, %v5944_v46  ;;  %v6217_v10 = vcombine.low %v6209_v20, %v6216_v0  ;;  %v12035_v9 = vld [vmem:[#allocation63_spill] sm:$0xff] }
 0x198   :  { %v10093_v8 = vcombine.low %v2838_v15, %v2845_v22  ;;  %v10095_v5 = vcombine.low %v2796_v26, %v2803_v62  ;;  %v10097_v57 = vcombine.low %v2810_v24, %v2817_v17  ;;  %v5946_v18 = vcombine.low %v3468_v51, %v3475_v11  ;;  %v10099_v33 = vpop.permute.xlu1 %6429  ;;  %12033 = vst [vmem:[#allocation93_spill] sm:$0xff] %v10101_v39 }
 0x199   :  { %v5947_v28 = vcombine.low %v3482_v31, %v3489_v2  ;;  %v6218_v60 = vcombine.low %v3916_v19, %v3923_v14  ;;  %v6219_v21 = vcombine.low %v3930_v59, %v3937_v61  ;;  %12032 = vst [vmem:[#allocation92_spill] sm:$0xff] %v10099_v33  ;;  %v3048_v38 = vrot.slane %v12034_v50, %v8539_v47  ;;  %v12038_v14 = vld [vmem:[#allocation64_spill] sm:$0xff] }
 0x19a   :  { %12029 = vst [vmem:[#allocation59_spill] sm:$0xff] %v10093_v8  ;;  %12030 = vst [vmem:[#allocation90_spill] sm:$0xff] %v10095_v5  ;;  %6768 = vperm.xlu0 %7982, %v6217_v10   ;;  %v3055_v15 = vrot.slane %v12034_v50, %v8542_v48  ;;  %v4874_v22 = vcombine.low %v4866_v52, %v4873_v27  ;;  %v5146_v26 = vcombine.low %v5138_v49, %v5145_v43  ;;  %v12039_v49 = vld [vmem:[#allocation6_spill] sm:$0xff] }
 0x19b   :  { %12031 = vst [vmem:[#allocation91_spill] sm:$0xff] %v10097_v57  ;;  %6720 = vperm.xlu1 %7983, %v5945_v30   ;;  %v5410_v62 = vrot.slane %v9849_v45, %v8582_v29  ;;  %v5417_v24 = vrot.slane %v9851_v63, %v8582_v29  ;;  %v5682_v17 = vrot.slane %v5674_v41, %v8582_v29  ;;  %v10122_v63 = vpop.permute.xlu0 %6450 }
 0x19c   :  { %v5689_v3 = vrot.slane %v5675_v58, %v8582_v29  ;;  %v2880_v56 = vrot.slane %v12035_v9, %v8539_v47  ;;  %v3062_v51 = vrot.slane %v12034_v50, %v8557_v1  ;;  %v3069_v40 = vrot.slane %v12034_v50, %v8560_v6  ;;  %v10120_v45 = vpop.permute.xlu1 %6432  ;;  %12037 = vst [vmem:[#allocation63_spill] sm:$0xff] %v10122_v63 }
 0x19d   :  { %v5954_v46 = vrot.slane %v5946_v18, %v8582_v29  ;;  %12036 = vst [vmem:[#allocation34_spill] sm:$0xff] %v10120_v45  ;;  %v5961_v20 = vrot.slane %v5947_v28, %v8582_v29  ;;  %v6226_v0 = vrot.slane %v6218_v60, %v8582_v29  ;;  %v6233_v11 = vrot.slane %v6219_v21, %v8582_v29 }
 0x19e   :  { %6579 = vperm.xlu0 %7982, %v5146_v26   ;;  %v2887_v31 = vrot.slane %v12035_v9, %v8542_v48  ;;  %v2894_v2 = vrot.slane %v12035_v9, %v8557_v1  ;;  %v2901_v19 = vrot.slane %v12035_v9, %v8560_v6  ;;  %v2852_v59 = vrot.slane %v12038_v14, %v8539_v47 }
 0x19f   :  { %6531 = vperm.xlu1 %7983, %v4874_v22   ;;  %v2859_v61 = vrot.slane %v12038_v14, %v8542_v48  ;;  %v5691_v28 = vcombine.low %v3048_v38, %v3055_v15  ;;  %v5418_v52 = vcombine.low %v5410_v62, %v5417_v24  ;;  %v5690_v60 = vcombine.low %v5682_v17, %v5689_v3  ;;  %v10147_v18 = vpop.permute.xlu0 %6456  ;;  %v12042_v38 = vld [vmem:[#allocation21_spill] sm:$0xff]  ;;  %v12043_v22 = vld [vmem:[#allocation22_spill] sm:$0xff] }
 0x1a0   :  { %v5692_v27 = vcombine.low %v3062_v51, %v3069_v40  ;;  %v3496_v43 = vrot.slane %v12039_v49, %v8539_v47  ;;  %v3503_v41 = vrot.slane %v12039_v49, %v8542_v48  ;;  %v3510_v58 = vrot.slane %v12039_v49, %v8557_v1  ;;  %v10145_v10 = vpop.permute.xlu1 %6435  ;;  %12041 = vst [vmem:[#allocation6_spill] sm:$0xff] %v10147_v18  ;;  %v12044_v62 = vld [vmem:[#allocation37_spill] sm:$0xff]  ;;  %v12045_v17 = vld [vmem:[#allocation38_spill] sm:$0xff] }
 0x1a1   :  { %v3517_v30 = vrot.slane %v12039_v49, %v8560_v6  ;;  %12040 = vst [vmem:[#allocation64_spill] sm:$0xff] %v10145_v10  ;;  %v5962_v21 = vcombine.low %v5954_v46, %v5961_v20  ;;  %v6234_v50 = vcombine.low %v6226_v0, %v6233_v11  ;;  %v4883_v15 = vrot.slane %v12042_v38, %v8582_v29  ;;  %v12052_v10 = vld [vmem:[#allocation81_spill] sm:$0xff] }
 0x1a2   :  { %6675 = vperm.xlu0 %7982, %v5690_v60   ;;  %v4890_v26 = vrot.slane %v12043_v22, %v8582_v29  ;;  %v5155_v24 = vrot.slane %v12044_v62, %v8582_v29  ;;  %v5162_v3 = vrot.slane %v12045_v17, %v8582_v29  ;;  %v3944_v9 = vrot.slane %v9927_v53, %v8539_v47 }
 0x1a3   :  { %6627 = vperm.xlu1 %7983, %v5418_v52   ;;  %v3951_v51 = vrot.slane %v9927_v53, %v8542_v48  ;;  %v3958_v40 = vrot.slane %v9927_v53, %v8557_v1  ;;  %v3965_v46 = vrot.slane %v9927_v53, %v8560_v6  ;;  %v10165_v20 = vcombine.low %v2880_v56, %v2887_v31  ;;  %v12047_v52 = vld [vmem:[#allocation46_spill] sm:$0xff]  ;;  %v10180_v56 = vpop.permute.xlu0 %6462 }
 0x1a4   :  { %v2866_v0 = vrot.slane %v12038_v14, %v8557_v1  ;;  %v2873_v11 = vrot.slane %v12038_v14, %v8560_v6  ;;  %v3076_v60 = vrot.slane %v12047_v52, %v8539_v47  ;;  %v3083_v49 = vrot.slane %v12047_v52, %v8542_v48  ;;  %v10178_v53 = vpop.permute.xlu1 %6438  ;;  %12050 = vst [vmem:[#allocation37_spill] sm:$0xff] %v10180_v56  ;;  %v12051_v14 = vld [vmem:[#allocation18_spill] sm:$0xff] }
 0x1a5   :  { %12046 = vst [vmem:[#allocation21_spill] sm:$0xff] %v10165_v20  ;;  %v5963_v38 = vcombine.low %v3496_v43, %v3503_v41  ;;  %v5964_v22 = vcombine.low %v3510_v58, %v3517_v30  ;;  %v12048_v62 = vlaneseq  ;;  %12049 = vst [vmem:[#allocation22_spill] sm:$0xff] %v10178_v53  ;;  %v4891_v31 = vcombine.low %v4883_v15, %v4890_v26  ;;  %v12093_v20 = vld [vmem:[#allocation53_spill] sm:$0xff] }
 0x1a6   :  { %6771 = vperm.xlu0 %7982, %v6234_v50   ;;  %v5163_v18 = vcombine.low %v5155_v24, %v5162_v3  ;;  %v5427_v63 = vrot.slane %v12051_v14, %v8582_v29  ;;  %v5434_v45 = vrot.slane %v12052_v10, %v8582_v29  ;;  %v6235_v33 = vcombine.low %v3944_v9, %v3951_v51  ;;  %v12056_v10 = vld [vmem:[#allocation44_spill] sm:$0xff] }
 0x1a7   :  { %v10176_v17 = vand.u32 127, %v12048_v62  ;;  %6723 = vperm.xlu1 %7983, %v5962_v21   ;;  %v6236_v43 = vcombine.low %v3958_v40, %v3965_v46  ;;  %v5699_v41 = vrot.slane %v5691_v28, %v8582_v29  ;;  %v5706_v58 = vrot.slane %v5692_v27, %v8582_v29  ;;  %v12057_v3 = vld [vmem:[#allocation16_spill] sm:$0xff] }
 0x1a8   :  { %v10188_v30 = vcombine.low %v2894_v2, %v2901_v19  ;;  %v10190_v21 = vcombine.low %v2852_v59, %v2859_v61  ;;  %v3090_v50 = vrot.slane %v12047_v52, %v8557_v1  ;;  %v3097_v15 = vrot.slane %v12047_v52, %v8560_v6  ;;  %v10204_v2 = vpop.permute.xlu1 %6441  ;;  %v10206_v19 = vpop.permute.xlu0 %6468 }
 0x1a9   :  { %v10196_v26 = vcombine.low %v2866_v0, %v2873_v11  ;;  %v3104_v24 = vrot.slane %v12056_v10, %v8539_v47  ;;  %v10202_v28 = vsub.s32 %v10176_v17, %v12057_v3  ;;  %12058 = vst [vmem:[#allocation81_spill] sm:$0xff] %v10204_v2  ;;  %12059 = vst [vmem:[#allocation44_spill] sm:$0xff] %v10206_v19  ;;  %v12060_v11 = vld [vmem:[#allocation70_spill] sm:$0xff] }
 0x1aa   :  { %12053 = vst [vmem:[#allocation38_spill] sm:$0xff] %v10188_v30  ;;  %12054 = vst [vmem:[#allocation46_spill] sm:$0xff] %v10190_v21  ;;  %6582 = vperm.xlu0 %7982, %v5163_v18   ;;  %v3111_v59 = vrot.slane %v12056_v10, %v8542_v48  ;;  %v10210_v61 = vcombine.low %v3076_v60, %v3083_v49  ;;  %v5435_v27 = vcombine.low %v5427_v63, %v5434_v45  ;;  %v12066_v19 = vld [vmem:[#allocation42_spill] sm:$0xff]  ;;  %v12095_v21 = vld [vmem:[#allocation11_spill] sm:$0xff] }
 0x1ab   :  { %12055 = vst [vmem:[#allocation18_spill] sm:$0xff] %v10196_v26  ;;  %6534 = vperm.xlu1 %7983, %v4891_v31   ;;  %v5971_v9 = vrot.slane %v5963_v38, %v8582_v29  ;;  %v5707_v51 = vcombine.low %v5699_v41, %v5706_v58  ;;  %v5978_v40 = vrot.slane %v5964_v22, %v8582_v29  ;;  %v6812_v49 = vadd.s32 4294967288, %v10176_v17  ;;  %v12064_v58 = vld [vmem:[#allocation26_spill] sm:$0xff] }
 0x1ac   :  { %v6243_v46 = vrot.slane %v6235_v33, %v8582_v29  ;;  %v6250_v0 = vrot.slane %v6236_v43, %v8582_v29  ;;  %v5709_v18 = vcombine.low %v3090_v50, %v3097_v15  ;;  %v3524_v52 = vrot.slane %v12060_v11, %v8539_v47  ;;  %v10229_v38 = vpop.permute.xlu1 %6444  ;;  %v10231_v22 = vpop.permute.xlu0 %6474  ;;  %v12063_v43 = vld [vmem:[#allocation25_spill] sm:$0xff] }
 0x1ad   :  { %v3531_v62 = vrot.slane %v12060_v11, %v8542_v48  ;;  %v3538_v60 = vrot.slane %v12060_v11, %v8557_v1  ;;  %v3545_v45 = vrot.slane %v12060_v11, %v8560_v6  ;;  %v3972_v63 = vrot.slane %v9955_v34, %v8539_v47  ;;  %12061 = vst [vmem:[#allocation16_spill] sm:$0xff] %v10229_v38 }
 0x1ae   :  { %v3979_v33 = vrot.slane %v9955_v34, %v8542_v48  ;;  %6678 = vperm.xlu0 %7982, %v5707_v51   ;;  %12062 = vst [vmem:[#allocation70_spill] sm:$0xff] %v10231_v22  ;;  %v3986_v31 = vrot.slane %v9955_v34, %v8557_v1  ;;  %v3993_v14 = vrot.slane %v9955_v34, %v8560_v6 }
 0x1af   :  { %6630 = vperm.xlu1 %7983, %v5435_v27   ;;  %v4900_v41 = vrot.slane %v12063_v43, %v8582_v29  ;;  %v4907_v50 = vrot.slane %v12064_v58, %v8582_v29  ;;  %v5979_v15 = vcombine.low %v5971_v9, %v5978_v40  ;;  %v6251_v11 = vcombine.low %v6243_v46, %v6250_v0  ;;  %v12065_v27 = vld [vmem:[#allocation54_spill] sm:$0xff]  ;;  %v12067_v43 = vld [vmem:[#allocation36_spill] sm:$0xff] }
 0x1b0   :  { %v5172_v51 = vrot.slane %v12065_v27, %v8582_v29  ;;  %v5179_v56 = vrot.slane %v12066_v19, %v8582_v29  ;;  %v3118_v38 = vrot.slane %v12056_v10, %v8557_v1  ;;  %v3125_v34 = vrot.slane %v12056_v10, %v8560_v6  ;;  %v10255_v0 = vpop.permute.xlu1 %6447  ;;  %v10257_v19 = vpop.permute.xlu0 %6480 }
 0x1b1   :  { %v10249_v2 = vcombine.low %v3104_v24, %v3111_v59  ;;  %v3160_v53 = vrot.slane %v12067_v43, %v8539_v47  ;;  %v3167_v9 = vrot.slane %v12067_v43, %v8542_v48  ;;  %v5980_v40 = vcombine.low %v3524_v52, %v3531_v62  ;;  %12068 = vst [vmem:[#allocation25_spill] sm:$0xff] %v10255_v0 }
 0x1b2   :  { %v5981_v46 = vcombine.low %v3538_v60, %v3545_v45  ;;  %6774 = vperm.xlu0 %7982, %v6251_v11   ;;  %12069 = vst [vmem:[#allocation26_spill] sm:$0xff] %v10257_v19  ;;  %v6252_v58 = vcombine.low %v3972_v63, %v3979_v33  ;;  %v6253_v27 = vcombine.low %v3986_v31, %v3993_v14 }
 0x1b3   :  { %6726 = vperm.xlu1 %7983, %v5979_v15   ;;  %v4908_v22 = vcombine.low %v4900_v41, %v4907_v50  ;;  %v5444_v10 = vrot.slane %v9899_v37, %v8582_v29  ;;  %v5180_v24 = vcombine.low %v5172_v51, %v5179_v56  ;;  %v5451_v59 = vrot.slane %v9901_v7, %v8582_v29  ;;  %v12070_v37 = vld [vmem:[#allocation47_spill] sm:$0xff] }
 0x1b4   :  { %v5716_v52 = vrot.slane %v10210_v61, %v8582_v29  ;;  %v5723_v62 = vrot.slane %v5709_v18, %v8582_v29  ;;  %v10266_v60 = vcombine.low %v3118_v38, %v3125_v34  ;;  %v3174_v45 = vrot.slane %v12067_v43, %v8557_v1  ;;  %v10282_v38 = vpop.permute.xlu1 %6453  ;;  %v10290_v50 = vpop.permute.xlu0 %6486 }
 0x1b5   :  { %v3181_v63 = vrot.slane %v12067_v43, %v8560_v6  ;;  %v10273_v33 = vsub.s32 %v6812_v49, %v12057_v3  ;;  %v3132_v56 = vrot.slane %v12070_v37, %v8539_v47  ;;  %v3139_v7 = vrot.slane %v12070_v37, %v8542_v48  ;;  %12071 = vst [vmem:[#allocation54_spill] sm:$0xff] %v10282_v38  ;;  %v12077_v38 = vld [vmem:[#allocation50_spill] sm:$0xff] }
 0x1b6   :  { %v3146_v61 = vrot.slane %v12070_v37, %v8557_v1  ;;  %v6819_v18 = vadd.s32 4294967280, %v10176_v17  ;;  %6585 = vperm.xlu0 %7982, %v5180_v24   ;;  %v10284_v31 = vcombine.low %v3160_v53, %v3167_v9  ;;  %v3153_v49 = vrot.slane %v12070_v37, %v8560_v6  ;;  %12072 = vst [vmem:[#allocation42_spill] sm:$0xff] %v10290_v50  ;;  %v12073_v53 = vld [vmem:[#allocation7_spill] sm:$0xff]  ;;  %v12076_v37 = vld [vmem:[#allocation24_spill] sm:$0xff] }
 0x1b7   :  { %6537 = vperm.xlu1 %7983, %v4908_v22   ;;  %v5988_v14 = vrot.slane %v5980_v40, %v8582_v29  ;;  %v5995_v41 = vrot.slane %v5981_v46, %v8582_v29  ;;  %v5452_v15 = vcombine.low %v5444_v10, %v5451_v59  ;;  %v5724_v11 = vcombine.low %v5716_v52, %v5723_v62  ;;  %v12075_v62 = vld [vmem:[#allocation23_spill] sm:$0xff] }
 0x1b8   :  { %v6260_v51 = vrot.slane %v6252_v58, %v8582_v29  ;;  %v6267_v22 = vrot.slane %v6253_v27, %v8582_v29  ;;  %v10294_v34 = vcombine.low %v3174_v45, %v3181_v63  ;;  %v3552_v43 = vrot.slane %v12073_v53, %v8539_v47  ;;  %v10308_v27 = vpop.permute.xlu1 %6459 }
 0x1b9   :  { %v3559_v9 = vrot.slane %v12073_v53, %v8542_v48  ;;  %v3566_v40 = vrot.slane %v12073_v53, %v8557_v1  ;;  %v3573_v46 = vrot.slane %v12073_v53, %v8560_v6  ;;  %v4000_v10 = vrot.slane %v9953_v16, %v8539_v47  ;;  %12074 = vst [vmem:[#allocation36_spill] sm:$0xff] %v10308_v27 }
 0x1ba   :  { %v4007_v58 = vrot.slane %v9953_v16, %v8542_v48  ;;  %6681 = vperm.xlu0 %7982, %v5724_v11   ;;  %v4014_v24 = vrot.slane %v9953_v16, %v8557_v1  ;;  %v4021_v59 = vrot.slane %v9953_v16, %v8560_v6  ;;  %v5996_v52 = vcombine.low %v5988_v14, %v5995_v41  ;;  %v12078_v11 = vld [vmem:[#allocation51_spill] sm:$0xff]  ;;  %v12079_v16 = vld [vmem:[#allocation48_spill] sm:$0xff] }
 0x1bb   :  { %6633 = vperm.xlu1 %7983, %v5452_v15   ;;  %v4917_v45 = vrot.slane %v12075_v62, %v8582_v29  ;;  %v6268_v63 = vcombine.low %v6260_v51, %v6267_v22  ;;  %v4924_v53 = vrot.slane %v12076_v37, %v8582_v29  ;;  %v5189_v15 = vrot.slane %v12077_v38, %v8582_v29  ;;  %v10333_v37 = vpop.permute.xlu0 %6492 }
 0x1bc   :  { %v5196_v27 = vrot.slane %v12078_v11, %v8582_v29  ;;  %v10322_v50 = vcombine.low %v3132_v56, %v3139_v7  ;;  %v10324_v0 = vcombine.low %v3146_v61, %v3153_v49  ;;  %v3216_v14 = vrot.slane %v12079_v16, %v8539_v47  ;;  %12081 = vst [vmem:[#allocation7_spill] sm:$0xff] %v10333_v37  ;;  %v10335_v38 = vpop.permute.xlu1 %6465  ;;  %v12083_v61 = vld [vmem:[#allocation83_spill] sm:$0xff]  ;;  %v12084_v11 = vld [vmem:[#allocation84_spill] sm:$0xff] }
 0x1bd   :  { %v10329_v41 = vsub.s32 %v6819_v18, %v12057_v3  ;;  %v3223_v51 = vrot.slane %v12079_v16, %v8542_v48  ;;  %v5997_v22 = vcombine.low %v3552_v43, %v3559_v9  ;;  %v5998_v62 = vcombine.low %v3566_v40, %v3573_v46  ;;  %12082 = vst [vmem:[#allocation23_spill] sm:$0xff] %v10335_v38  ;;  %v12091_v38 = vld [vmem:[#allocation61_spill] sm:$0xff] }
 0x1be   :  { %6777 = vperm.xlu0 %7982, %v6268_v63   ;;  %v6269_v56 = vcombine.low %v4000_v10, %v4007_v58  ;;  %v6270_v7 = vcombine.low %v4014_v24, %v4021_v59  ;;  %v5461_v49 = vrot.slane %v12083_v61, %v8582_v29  ;;  %v5468_v18 = vrot.slane %v12084_v11, %v8582_v29  ;;  %v12085_v10 = vld [vmem:[#allocation52_spill] sm:$0xff] }
 0x1bf   :  { %12080 = vst [vmem:[#allocation47_spill] sm:$0xff] %v10329_v41  ;;  %6729 = vperm.xlu1 %7983, %v5996_v52   ;;  %v4925_v19 = vcombine.low %v4917_v45, %v4924_v53  ;;  %v5197_v39 = vcombine.low %v5189_v15, %v5196_v27  ;;  %v5733_v43 = vrot.slane %v10249_v2, %v8582_v29  ;;  %v12087_v52 = vld [vmem:[#allocation10_spill] sm:$0xff]  ;;  %v12089_v11 = vld [vmem:[#allocation8_spill] sm:$0xff] }
 0x1c0   :  { %v5740_v9 = vrot.slane %v10266_v60, %v8582_v29  ;;  %v3230_v40 = vrot.slane %v12079_v16, %v8557_v1  ;;  %v3237_v46 = vrot.slane %v12079_v16, %v8560_v6  ;;  %v3188_v58 = vrot.slane %v12085_v10, %v8539_v47  ;;  %v10359_v27 = vpop.permute.xlu1 %6471  ;;  %v10366_v16 = vpop.permute.xlu0 %6498 }
 0x1c1   :  { %v3195_v24 = vrot.slane %v12085_v10, %v8542_v48  ;;  %v10353_v59 = vcombine.low %v3216_v14, %v3223_v51  ;;  %v3202_v2 = vrot.slane %v12085_v10, %v8557_v1  ;;  %v3209_v60 = vrot.slane %v12085_v10, %v8560_v6  ;;  %12086 = vst [vmem:[#allocation24_spill] sm:$0xff] %v10359_v27 }
 0x1c2   :  { %6588 = vperm.xlu0 %7982, %v5197_v39   ;;  %v3272_v45 = vrot.slane %v12087_v52, %v8539_v47  ;;  %v3279_v63 = vrot.slane %v12087_v52, %v8542_v48  ;;  %v5469_v53 = vcombine.low %v5461_v49, %v5468_v18  ;;  %v6005_v15 = vrot.slane %v5997_v22, %v8582_v29 }
 0x1c3   :  { %6540 = vperm.xlu1 %7983, %v4925_v19   ;;  %12088 = vst [vmem:[#allocation50_spill] sm:$0xff] %v10366_v16  ;;  %v5741_v14 = vcombine.low %v5733_v43, %v5740_v9  ;;  %v6012_v51 = vrot.slane %v5998_v62, %v8582_v29  ;;  %v6277_v61 = vrot.slane %v6269_v56, %v8582_v29 }
 0x1c4   :  { %v6284_v39 = vrot.slane %v6270_v7, %v8582_v29  ;;  %v3286_v19 = vrot.slane %v12087_v52, %v8557_v1  ;;  %v3580_v10 = vrot.slane %v12089_v11, %v8539_v47  ;;  %v3587_v49 = vrot.slane %v12089_v11, %v8542_v48  ;;  %v10385_v7 = vpop.permute.xlu1 %6477 }
 0x1c5   :  { %v3594_v22 = vrot.slane %v12089_v11, %v8557_v1  ;;  %v3601_v18 = vrot.slane %v12089_v11, %v8560_v6  ;;  %v4028_v62 = vrot.slane %v9980_v54, %v8539_v47  ;;  %v4035_v56 = vrot.slane %v9980_v54, %v8542_v48  ;;  %12090 = vst [vmem:[#allocation51_spill] sm:$0xff] %v10385_v7  ;;  %v12092_v11 = vld [vmem:[#allocation62_spill] sm:$0xff] }
 0x1c6   :  { %6684 = vperm.xlu0 %7982, %v5741_v14   ;;  %v4042_v43 = vrot.slane %v9980_v54, %v8557_v1  ;;  %v4049_v9 = vrot.slane %v9980_v54, %v8560_v6  ;;  %v4934_v16 = vrot.slane %v12091_v38, %v8582_v29  ;;  %v4941_v37 = vrot.slane %v12092_v11, %v8582_v29  ;;  %v12094_v14 = vld [vmem:[#allocation69_spill] sm:$0xff] }
 0x1c7   :  { %6636 = vperm.xlu1 %7983, %v5469_v53   ;;  %v6013_v27 = vcombine.low %v6005_v15, %v6012_v51  ;;  %v6285_v30 = vcombine.low %v6277_v61, %v6284_v39  ;;  %v5206_v53 = vrot.slane %v12093_v20, %v8582_v29  ;;  %v5213_v7 = vrot.slane %v12094_v14, %v8582_v29  ;;  %v10410_v39 = vpop.permute.xlu0 %6504 }
 0x1c8   :  { %v3293_v26 = vrot.slane %v12087_v52, %v8560_v6  ;;  %v3244_v54 = vrot.slane %v12095_v21, %v8539_v47  ;;  %v3251_v38 = vrot.slane %v12095_v21, %v8542_v48  ;;  %v3258_v11 = vrot.slane %v12095_v21, %v8557_v1  ;;  %12096 = vst [vmem:[#allocation48_spill] sm:$0xff] %v10410_v39  ;;  %v10412_v52 = vpop.permute.xlu1 %6483 }
 0x1c9   :  { %v3265_v15 = vrot.slane %v12095_v21, %v8560_v6  ;;  %v6014_v51 = vcombine.low %v3580_v10, %v3587_v49  ;;  %v6015_v20 = vcombine.low %v3594_v22, %v3601_v18  ;;  %v6826_v61 = vadd.s32 4294967272, %v10176_v17  ;;  %12097 = vst [vmem:[#allocation83_spill] sm:$0xff] %v10412_v52 }
 0x1ca   :  { %6780 = vperm.xlu0 %7982, %v6285_v30   ;;  %v6286_v14 = vcombine.low %v4028_v62, %v4035_v56  ;;  %v6287_v41 = vcombine.low %v4042_v43, %v4049_v9  ;;  %v4942_v8 = vcombine.low %v4934_v16, %v4941_v37  ;;  %v5478_v57 = vrot.slane %v9909_v44, %v8582_v29 }
 0x1cb   :  { %6732 = vperm.xlu1 %7983, %v6013_v27   ;;  %v5214_v5 = vcombine.low %v5206_v53, %v5213_v7  ;;  %v5485_v21 = vrot.slane %v9911_v55, %v8582_v29  ;;  %v5750_v10 = vrot.slane %v10322_v50, %v8582_v29  ;;  %v5757_v49 = vrot.slane %v10324_v0, %v8582_v29 }
 0x1cc   :  { %v10422_v27 = vcombine.low %v3230_v40, %v3237_v46  ;;  %v10424_v30 = vcombine.low %v3188_v58, %v3195_v24  ;;  %v10426_v22 = vcombine.low %v3202_v2, %v3209_v60  ;;  %v10428_v37 = vcombine.low %v3272_v45, %v3279_v63  ;;  %v10437_v50 = vpop.permute.xlu1 %6489  ;;  %v12099_v40 = vld [vmem:[#allocation39_spill] sm:$0xff]  ;;  %v12101_v63 = vld [vmem:[#allocation49_spill] sm:$0xff] }
 0x1cd   :  { %v10430_v16 = vcombine.low %v3286_v19, %v3293_v26  ;;  %v10432_v44 = vcombine.low %v3244_v54, %v3251_v38  ;;  %v10435_v55 = vsub.s32 %v6826_v61, %v12057_v3  ;;  %12098 = vst [vmem:[#allocation84_spill] sm:$0xff] %v10437_v50  ;;  %v10439_v0 = vcombine.low %v3258_v11, %v3265_v15  ;;  %v10445_v26 = vpop.permute.xlu0 %6510  ;;  %v12103_v54 = vld [vmem:[#allocation27_spill] sm:$0xff]  ;;  %v12104_v15 = vld [vmem:[#allocation60_spill] sm:$0xff]  ;;  %v12118_v50 = vld [vmem:[#allocation13_spill] sm:$0xff] }
 0x1ce   :  { %6591 = vperm.xlu0 %7982, %v5214_v5   ;;  %v3328_v46 = vrot.slane %v12099_v40, %v8539_v47  ;;  %v6022_v58 = vrot.slane %v6014_v51, %v8582_v29  ;;  %v6029_v24 = vrot.slane %v6015_v20, %v8582_v29  ;;  %12100 = vst [vmem:[#allocation52_spill] sm:$0xff] %v10445_v26  ;;  %v12105_v20 = vld [vmem:[#allocation14_spill] sm:$0xff] }
 0x1cf   :  { %6543 = vperm.xlu1 %7983, %v4942_v8   ;;  %v5486_v2 = vcombine.low %v5478_v57, %v5485_v21  ;;  %v5758_v60 = vcombine.low %v5750_v10, %v5757_v49  ;;  %v6294_v45 = vrot.slane %v6286_v14, %v8582_v29  ;;  %v6301_v8 = vrot.slane %v6287_v41, %v8582_v29  ;;  %v12106_v14 = vld [vmem:[#allocation43_spill] sm:$0xff]  ;;  %v12107_v49 = vld [vmem:[#allocation40_spill] sm:$0xff] }
 0x1d0   :  { %v3335_v5 = vrot.slane %v12099_v40, %v8542_v48  ;;  %v3608_v19 = vrot.slane %v12101_v63, %v8539_v47  ;;  %v3615_v18 = vrot.slane %v12101_v63, %v8542_v48  ;;  %v3622_v62 = vrot.slane %v12101_v63, %v8557_v1  ;;  %v10463_v7 = vpop.permute.xlu1 %6495 }
 0x1d1   :  { %v3629_v57 = vrot.slane %v12101_v63, %v8560_v6  ;;  %v4056_v56 = vrot.slane %v9978_v25, %v8539_v47  ;;  %v4063_v41 = vrot.slane %v9978_v25, %v8542_v48  ;;  %12102 = vst [vmem:[#allocation10_spill] sm:$0xff] %v10463_v7  ;;  %v4070_v43 = vrot.slane %v9978_v25, %v8557_v1 }
 0x1d2   :  { %6687 = vperm.xlu0 %7982, %v5758_v60   ;;  %v4077_v9 = vrot.slane %v9978_v25, %v8560_v6  ;;  %v6030_v53 = vcombine.low %v6022_v58, %v6029_v24  ;;  %v4951_v38 = vrot.slane %v12103_v54, %v8582_v29  ;;  %v6302_v11 = vcombine.low %v6294_v45, %v6301_v8  ;;  %v10487_v8 = vpop.permute.xlu0 %6522 }
 0x1d3   :  { %6639 = vperm.xlu1 %7983, %v5486_v2   ;;  %v4958_v51 = vrot.slane %v12104_v15, %v8582_v29  ;;  %v5223_v61 = vrot.slane %v12105_v20, %v8582_v29  ;;  %v5230_v21 = vrot.slane %v12106_v14, %v8582_v29  ;;  %v3342_v10 = vrot.slane %v12099_v40, %v8557_v1  ;;  %v12109_v20 = vld [vmem:[#allocation20_spill] sm:$0xff] }
 0x1d4   :  { %v3349_v25 = vrot.slane %v12099_v40, %v8560_v6  ;;  %v3300_v58 = vrot.slane %v12107_v49, %v8539_v47  ;;  %v3307_v24 = vrot.slane %v12107_v49, %v8542_v48  ;;  %v3314_v2 = vrot.slane %v12107_v49, %v8557_v1  ;;  %v10489_v63 = vpop.permute.xlu1 %6501 }
 0x1d5   :  { %v6031_v60 = vcombine.low %v3608_v19, %v3615_v18  ;;  %v6032_v45 = vcombine.low %v3622_v62, %v3629_v57  ;;  %12108 = vst [vmem:[#allocation8_spill] sm:$0xff] %v10489_v63  ;;  %v6303_v54 = vcombine.low %v4056_v56, %v4063_v41  ;;  %v6304_v15 = vcombine.low %v4070_v43, %v4077_v9  ;;  %v12116_v63 = vld [vmem:[#allocation71_spill] sm:$0xff] }
 0x1d6   :  { %6783 = vperm.xlu0 %7982, %v6302_v11   ;;  %v5495_v40 = vrot.slane %v9903_v32, %v8582_v29  ;;  %v5502_v14 = vrot.slane %v12109_v20, %v8582_v29  ;;  %v4959_v26 = vcombine.low %v4951_v38, %v4958_v51  ;;  %v5231_v39 = vcombine.low %v5223_v61, %v5230_v21  ;;  %v12111_v32 = vld [vmem:[#allocation12_spill] sm:$0xff]  ;;  %v6571_v61 = vpop.permute.xlu0 %6570 }
 0x1d7   :  { %6735 = vperm.xlu1 %7983, %v6030_v53   ;;  %v5767_v19 = vrot.slane %v10284_v31, %v8582_v29  ;;  %v5774_v18 = vrot.slane %v10294_v34, %v8582_v29  ;;  %v10499_v62 = vcombine.low %v3328_v46, %v3335_v5  ;;  %v10501_v57 = vcombine.low %v3342_v10, %v3349_v25  ;;  %v12113_v53 = vld [vmem:[#allocation80_spill] sm:$0xff] }
 0x1d8   :  { %v3321_v56 = vrot.slane %v12107_v49, %v8560_v6  ;;  %v10505_v41 = vcombine.low %v3300_v58, %v3307_v24  ;;  %v3664_v43 = vrot.slane %v12111_v32, %v8539_v47  ;;  %v3671_v9 = vrot.slane %v12111_v32, %v8542_v48  ;;  %v10514_v46 = vpop.permute.xlu1 %6507 }
 0x1d9   :  { %12110 = vst [vmem:[#allocation61_spill] sm:$0xff] %v10501_v57  ;;  %v3678_v31 = vrot.slane %v12111_v32, %v8557_v1  ;;  %v6833_v34 = vadd.s32 4294967264, %v10176_v17  ;;  %12112 = vst [vmem:[#allocation62_spill] sm:$0xff] %v10514_v46  ;;  %v3685_v5 = vrot.slane %v12111_v32, %v8560_v6  ;;  %v3636_v38 = vrot.slane %v12113_v53, %v8539_v47 }
 0x1da   :  { %6594 = vperm.xlu0 %7982, %v5231_v39   ;;  %v5503_v11 = vcombine.low %v5495_v40, %v5502_v14  ;;  %v6039_v51 = vrot.slane %v6031_v60, %v8582_v29  ;;  %v5775_v21 = vcombine.low %v5767_v19, %v5774_v18  ;;  %v6046_v10 = vrot.slane %v6032_v45, %v8582_v29  ;;  %v12114_v14 = vld [vmem:[#allocation30_spill] sm:$0xff]  ;;  %v12115_v18 = vld [vmem:[#allocation65_spill] sm:$0xff] }
 0x1db   :  { %6546 = vperm.xlu1 %7983, %v4959_v26   ;;  %v6311_v25 = vrot.slane %v6303_v54, %v8582_v29  ;;  %v6318_v26 = vrot.slane %v6304_v15, %v8582_v29  ;;  %v3643_v39 = vrot.slane %v12113_v53, %v8542_v48  ;;  %v3650_v49 = vrot.slane %v12113_v53, %v8557_v1 }
 0x1dc   :  { %v3657_v58 = vrot.slane %v12113_v53, %v8560_v6  ;;  %v4084_v24 = vrot.slane %v10004_v42, %v8539_v47  ;;  %v4091_v60 = vrot.slane %v10004_v42, %v8542_v48  ;;  %v4098_v45 = vrot.slane %v10004_v42, %v8557_v1  ;;  %v10538_v15 = vpop.permute.xlu1 %6519 }
 0x1dd   :  { %v4105_v54 = vrot.slane %v10004_v42, %v8560_v6  ;;  %v10540_v40 = vcombine.low %v3314_v2, %v3321_v56  ;;  %v10543_v20 = vsub.s32 %v6833_v34, %v12057_v3  ;;  %v4968_v19 = vrot.slane %v12114_v14, %v8582_v29 }
 0x1de   :  { %6690 = vperm.xlu0 %7982, %v5775_v21   ;;  %v4975_v32 = vrot.slane %v12115_v18, %v8582_v29  ;;  %v6047_v53 = vcombine.low %v6039_v51, %v6046_v10  ;;  %v6319_v46 = vcombine.low %v6311_v25, %v6318_v26  ;;  %v5240_v42 = vrot.slane %v12116_v63, %v8582_v29  ;;  %v6619_v51 = vpop.permute.xlu0 %6618 }
 0x1df   :  { %6642 = vperm.xlu1 %7983, %v5503_v11   ;;  %v12117_v11 = vld [vmem:[#allocation72_spill] sm:$0xff]  ;;  %v10553_v7 = vcombine.low %v3664_v43, %v3671_v9  ;;  %v10555_v2 = vcombine.low %v3678_v31, %v3685_v5  ;;  %v6048_v56 = vcombine.low %v3636_v38, %v3643_v39  ;;  %v6049_v34 = vcombine.low %v3650_v49, %v3657_v58 }
 0x1e0   :  { %v5247_v21 = vrot.slane %v12117_v11, %v8582_v29  ;;  %v3720_v14 = vrot.slane %v12118_v50, %v8539_v47  ;;  %v6320_v52 = vcombine.low %v4084_v24, %v4091_v60  ;;  %v6321_v57 = vcombine.low %v4098_v45, %v4105_v54  ;;  %v6568_v10 = vpop.permute.xlu1 %6567 }
 0x1e1   :  { %v7082_v63 = vrot.slane %v6571_v61, %v10273_v33  ;;  %v7078_v25 = vrot.slane %v6568_v10, %v10202_v28  ;;  %v4976_v43 = vcombine.low %v4968_v19, %v4975_v32  ;;  %v5512_v9 = vrot.slane %v9990_v13, %v8582_v29 }
 0x1e2   :  { %6786 = vperm.xlu0 %7982, %v6319_v46   ;;  %v5248_v31 = vcombine.low %v5240_v42, %v5247_v21  ;;  %v5519_v5 = vrot.slane %v9994_v4, %v8582_v29  ;;  %v5784_v38 = vrot.slane %v10424_v30, %v8582_v29  ;;  %v5791_v26 = vrot.slane %v10426_v22, %v8582_v29  ;;  %v12119_v4 = vld [vmem:[#allocation55_spill] sm:$0xff]  ;;  %v6667_v32 = vpop.permute.xlu0 %6666 }
 0x1e3   :  { %6738 = vperm.xlu1 %7983, %v6047_v53   ;;  %v3727_v46 = vrot.slane %v12118_v50, %v8542_v48  ;;  %v3734_v61 = vrot.slane %v12118_v50, %v8557_v1  ;;  %v3741_v39 = vrot.slane %v12118_v50, %v8560_v6  ;;  %v10576_v13 = vsel %vm6817_vm1, %v7082_v63, %v7078_v25 }
 0x1e4   :  { %v3692_v49 = vrot.slane %v12119_v4, %v8539_v47  ;;  %v6840_v30 = vadd.s32 4294967256, %v10176_v17  ;;  %v6616_v22 = vpop.permute.xlu1 %6615  ;;  %v6056_v58 = vrot.slane %v6048_v56, %v8582_v29  ;;  %v6063_v24 = vrot.slane %v6049_v34, %v8582_v29 }
 0x1e5   :  { %v7161_v60 = vrot.slane %v6619_v51, %v10273_v33  ;;  %v7157_v45 = vrot.slane %v6616_v22, %v10202_v28  ;;  %v6328_v50 = vrot.slane %v6320_v52, %v8582_v29  ;;  %v6335_v54 = vrot.slane %v6321_v57, %v8582_v29 }
 0x1e6   :  { %6597 = vperm.xlu0 %7982, %v5248_v31   ;;  %v3699_v19 = vrot.slane %v12119_v4, %v8542_v48  ;;  %v3706_v18 = vrot.slane %v12119_v4, %v8557_v1  ;;  %v5520_v53 = vcombine.low %v5512_v9, %v5519_v5  ;;  %v5792_v42 = vcombine.low %v5784_v38, %v5791_v26  ;;  %v6715_v9 = vpop.permute.xlu0 %6714  ;;  %v12120_v31 = vld [vmem:[#allocation28_spill] sm:$0xff]  ;;  %v12121_v38 = vld [vmem:[#allocation29_spill] sm:$0xff] }
 0x1e7   :  { %6549 = vperm.xlu1 %7983, %v4976_v43   ;;  %v10591_v11 = vcombine.low %v3720_v14, %v3727_v46  ;;  %v3713_v21 = vrot.slane %v12119_v4, %v8560_v6  ;;  %v4112_v56 = vrot.slane %v10002_v35, %v8539_v47  ;;  %v10598_v52 = vsel %vm6817_vm1, %v7161_v60, %v7157_v45  ;;  %v12122_v46 = vld [vmem:[#allocation45_spill] sm:$0xff] }
 0x1e8   :  { %v4119_v57 = vrot.slane %v10002_v35, %v8542_v48  ;;  %v4126_v34 = vrot.slane %v10002_v35, %v8557_v1  ;;  %v4133_v51 = vrot.slane %v10002_v35, %v8560_v6  ;;  %v6664_v14 = vpop.permute.xlu1 %6663  ;;  %v7240_v10 = vrot.slane %v6667_v32, %v10273_v33  ;;  %v12123_v35 = vld [vmem:[#allocation9_spill] sm:$0xff] }
 0x1e9   :  { %v7236_v63 = vrot.slane %v6664_v14, %v10202_v28  ;;  %v6064_v25 = vcombine.low %v6056_v58, %v6063_v24  ;;  %v6336_v43 = vcombine.low %v6328_v50, %v6335_v54  ;;  %v4985_v5 = vrot.slane %v12120_v31, %v8582_v29  ;;  %v12124_v14 = vld [vmem:[#allocation19_spill] sm:$0xff] }
 0x1ea   :  { %6693 = vperm.xlu0 %7982, %v5792_v42   ;;  %v4992_v26 = vrot.slane %v12121_v38, %v8582_v29  ;;  %v5257_v4 = vrot.slane %v12122_v46, %v8582_v29  ;;  %v5264_v22 = vrot.slane %v12123_v35, %v8582_v29  ;;  %v10616_v60 = vcombine.low %v3734_v61, %v3741_v39 }
 0x1eb   :  { %6645 = vperm.xlu1 %7983, %v5520_v53   ;;  %v10618_v45 = vcombine.low %v3692_v49, %v3699_v19  ;;  %v10621_v58 = vsub.s32 %v6840_v30, %v12057_v3  ;;  %v10624_v24 = vsel %vm6817_vm1, %v7240_v10, %v7236_v63  ;;  %v10626_v50 = vcombine.low %v3706_v18, %v3713_v21 }
 0x1ec   :  { %v5529_v32 = vrot.slane %v9984_v12, %v8582_v29  ;;  %v5536_v61 = vrot.slane %v9986_v23, %v8582_v29  ;;  %v7319_v39 = vrot.slane %v6715_v9, %v10273_v33  ;;  %v5801_v30 = vrot.slane %v10353_v59, %v8582_v29 }
 0x1ed   :  { %v6712_v54 = vpop.permute.xlu1 %6711  ;;  %v5808_v19 = vrot.slane %v10422_v27, %v8582_v29  ;;  %v6337_v18 = vcombine.low %v4112_v56, %v4119_v57  ;;  %v6338_v53 = vcombine.low %v4126_v34, %v4133_v51  ;;  %v4993_v42 = vcombine.low %v4985_v5, %v4992_v26  ;;  %v12125_v27 = vld [vmem:[#allocation82_spill] sm:$0xff] }
 0x1ee   :  { %6789 = vperm.xlu0 %7982, %v6336_v43   ;;  %v7315_v49 = vrot.slane %v6712_v54, %v10202_v28  ;;  %v5265_v21 = vcombine.low %v5257_v4, %v5264_v22  ;;  %v3776_v12 = vrot.slane %v12124_v14, %v8539_v47  ;;  %v3783_v23 = vrot.slane %v12124_v14, %v8542_v48 }
 0x1ef   :  { %6741 = vperm.xlu1 %7983, %v6064_v25   ;;  %v3790_v10 = vrot.slane %v12124_v14, %v8557_v1  ;;  %v3797_v59 = vrot.slane %v12124_v14, %v8560_v6  ;;  %v3748_v56 = vrot.slane %v12125_v27, %v8539_v47  ;;  %v3755_v57 = vrot.slane %v12125_v27, %v8542_v48 }
 0x1f0   :  { %v10645_v63 = vsel %vm6817_vm1, %v7319_v39, %v7315_v49  ;;  %v3762_v34 = vrot.slane %v12125_v27, %v8557_v1  ;;  %v3769_v51 = vrot.slane %v12125_v27, %v8560_v6  ;;  %v5537_v25 = vcombine.low %v5529_v32, %v5536_v61  ;;  %v12126_v32 = vld [vmem:[#allocation85_spill] sm:$0xff] }
 0x1f1   :  { %v5809_v43 = vcombine.low %v5801_v30, %v5808_v19  ;;  %v6073_v9 = vrot.slane %v10553_v7, %v8582_v29  ;;  %v6080_v31 = vrot.slane %v10555_v2, %v8582_v29  ;;  %v6345_v5 = vrot.slane %v6337_v18, %v8582_v29  ;;  %v12127_v39 = vld [vmem:[#allocation41_spill] sm:$0xff]  ;;  %v12128_v30 = vld [vmem:[#allocation32_spill] sm:$0xff] }
 0x1f2   :  { %6600 = vperm.xlu0 %7982, %v5265_v21   ;;  %v6352_v38 = vrot.slane %v6338_v53, %v8582_v29  ;;  %v4140_v26 = vrot.slane %v10032_v36, %v8539_v47  ;;  %v4147_v46 = vrot.slane %v10032_v36, %v8542_v48  ;;  %v4154_v4 = vrot.slane %v10032_v36, %v8557_v1  ;;  %v12129_v53 = vld [vmem:[#allocation75_spill] sm:$0xff]  ;;  %v12130_v21 = vld [vmem:[#allocation76_spill] sm:$0xff] }
 0x1f3   :  { %6552 = vperm.xlu1 %7983, %v4993_v42   ;;  %v4161_v35 = vrot.slane %v10032_v36, %v8560_v6  ;;  %v10671_v7 = vcombine.low %v3776_v12, %v3783_v23  ;;  %v10673_v22 = vcombine.low %v3790_v10, %v3797_v59  ;;  %v10675_v2 = vcombine.low %v3748_v56, %v3755_v57  ;;  %v12131_v56 = vld [vmem:[#allocation88_spill] sm:$0xff] }
 0x1f4   :  { %v10677_v54 = vcombine.low %v3762_v34, %v3769_v51  ;;  %v4168_v61 = vrot.slane %v12126_v32, %v8539_v47  ;;  %v5002_v49 = vrot.slane %v12127_v39, %v8582_v29  ;;  %v5009_v19 = vrot.slane %v12128_v30, %v8582_v29  ;;  %v12132_v51 = vld [vmem:[#allocation90_spill] sm:$0xff] }
 0x1f5   :  { %v6081_v36 = vcombine.low %v6073_v9, %v6080_v31  ;;  %v6353_v18 = vcombine.low %v6345_v5, %v6352_v38  ;;  %v5274_v42 = vrot.slane %v12129_v53, %v8582_v29  ;;  %v5281_v14 = vrot.slane %v12130_v21, %v8582_v29  ;;  %v12135_v53 = vld [vmem:[#allocation66_spill] sm:$0xff] }
 0x1f6   :  { %6696 = vperm.xlu0 %7982, %v5809_v43   ;;  %v4175_v12 = vrot.slane %v12126_v32, %v8542_v48  ;;  %v4182_v23 = vrot.slane %v12126_v32, %v8557_v1  ;;  %v6354_v10 = vcombine.low %v4140_v26, %v4147_v46  ;;  %v6355_v59 = vcombine.low %v4154_v4, %v4161_v35  ;;  %v12133_v43 = vld [vmem:[#allocation91_spill] sm:$0xff] }
 0x1f7   :  { %6648 = vperm.xlu1 %7983, %v5537_v25   ;;  %v4189_v27 = vrot.slane %v12126_v32, %v8560_v6  ;;  %v4196_v57 = vrot.slane %v12131_v56, %v8539_v47  ;;  %v4203_v34 = vrot.slane %v12131_v56, %v8542_v48  ;;  %v5546_v25 = vrot.slane %v12132_v51, %v8582_v29 }
 0x1f8   :  { %v5553_v9 = vrot.slane %v12133_v43, %v8582_v29  ;;  %v5818_v31 = vrot.slane %v10432_v44, %v8582_v29  ;;  %v5825_v5 = vrot.slane %v10439_v0, %v8582_v29  ;;  %v4210_v38 = vrot.slane %v12131_v56, %v8557_v1 }
 0x1f9   :  { %v4217_v26 = vrot.slane %v12131_v56, %v8560_v6  ;;  %v5010_v46 = vcombine.low %v5002_v49, %v5009_v19  ;;  %v5282_v4 = vcombine.low %v5274_v42, %v5281_v14  ;;  %v6090_v35 = vrot.slane %v10618_v45, %v8582_v29  ;;  %v12137_v14 = vld [vmem:[#allocation73_spill] sm:$0xff] }
 0x1fa   :  { %6792 = vperm.xlu0 %7982, %v6353_v18   ;;  %v6097_v32 = vrot.slane %v10626_v50, %v8582_v29  ;;  %v6362_v39 = vrot.slane %v6354_v10, %v8582_v29  ;;  %v6369_v44 = vrot.slane %v6355_v59, %v8582_v29  ;;  %v10717_v30 = vcombine.low %v4168_v61, %v4175_v12  ;;  %v12136_v61 = vld [vmem:[#allocation31_spill] sm:$0xff]  ;;  %v7500_v56 = vld [vmem:[%s11734_s1] sm:$0xff] }
 0x1fb   :  { %6744 = vperm.xlu1 %7983, %v6081_v36   ;;  %v10719_v0 = vcombine.low %v4182_v23, %v4189_v27  ;;  %v12134_v36 = vld [vmem:[#allocation87_spill] sm:$0xff]  ;;  %v10725_v45 = vcombine.low %v4196_v57, %v4203_v34  ;;  %v5554_v19 = vcombine.low %v5546_v25, %v5553_v9  ;;  %v5826_v50 = vcombine.low %v5818_v31, %v5825_v5  ;;  %v12138_v23 = vld [vmem:[#allocation74_spill] sm:$0xff]  ;;  %v7503_v27 = vld [vmem:[%s11734_s1 + $0x18] sm:$0xff] }
 0x1fc   :  { %v4224_v18 = vrot.slane %v12134_v36, %v8539_v47  ;;  %v4231_v49 = vrot.slane %v12134_v36, %v8542_v48  ;;  %v5019_v42 = vrot.slane %v12135_v53, %v8582_v29  ;;  %v5026_v21 = vrot.slane %v12136_v61, %v8582_v29  ;;  %v7501_v59 = vld [vmem:[%s11734_s1 + $0x8] sm:$0xff]  ;;  %v7502_v31 = vld [vmem:[%s11734_s1 + $0x10] sm:$0xff] }
 0x1fd   :  { %v5291_v12 = vrot.slane %v12137_v14, %v8582_v29  ;;  %v5298_v10 = vrot.slane %v12138_v23, %v8582_v29  ;;  %v10744_v57 = vcombine.low %v4210_v38, %v4217_v26  ;;  %v6098_v25 = vcombine.low %v6090_v35, %v6097_v32  ;;  %v7565_v5 = vld [vmem:[%s11734_s1 + $0x208] sm:$0xff] }
 0x1fe   :  { %6603 = vperm.xlu0 %7982, %v5282_v4   ;;  %v6370_v43 = vcombine.low %v6362_v39, %v6369_v44  ;;  %v7843_v9 = vpack.c.bf16 %v7503_v27, %v7501_v59  ;;  %v7845_v4 = vpack.c.bf16 %v7502_v31, %v7500_v56  ;;  %v6999_v35 = vrot.slane %v10538_v15, %v10202_v28  ;;  %v12139_v32 = vld [vmem:[#allocation86_spill] sm:$0xff]  ;;  %v12140_v44 = vld [vmem:[#allocation59_spill] sm:$0xff] }
 0x1ff   :  { %6555 = vperm.xlu1 %7983, %v5010_v46   ;;  %v7567_v46 = vld [vmem:[%s11734_s1 + $0x218] sm:$0xff]  ;;  %v5563_v39 = vrot.slane %v12139_v32, %v8582_v29  ;;  %v5570_v53 = vrot.slane %v12140_v44, %v8582_v29  ;;  %v7003_v14 = vrot.slane %v10487_v8, %v10273_v33  ;;  %v7564_v15 = vld [vmem:[%s11734_s1 + $0x200] sm:$0xff]  ;;  %v7566_v59 = vld [vmem:[%s11734_s1 + $0x210] sm:$0xff]  ;;  %v6379_v44 = vrot.slane %v10717_v30, %v8582_v29 }
 0x200   :  { %7844 = vmatprep.subr.bf16.mxu1 %v7843_v9  ;;  %v7907_v61 = vpack.c.bf16 %v7567_v46, %v7565_v5  ;;  %v7505_v27 = vld [vmem:[%s11734_s1 + $0x28] sm:$0xff]  ;;  %v7571_v46 = vld [vmem:[%s11734_s1 + $0x238] sm:$0xff] }
 0x201   :  { %v6763_v51 = vpop.permute.xlu0 %6762  ;;  %7846 = vmatpush1.bf16.msra.mxu1 %v7845_v4  ;;  %v12141_v9 = vld [vmem:[#allocation47_spill] sm:$0xff]  ;;  %v12142_v30 = vld [vmem:[#allocation57_spill] sm:$0xff] }
 0x202   :  { %v6760_v34 = vpop.permute.xlu1 %6759  ;;  %v7398_v26 = vrot.slane %v6763_v51, %v10273_v33  ;;  %6699 = vperm.xlu0 %7982, %v5826_v50   ;;  %v5299_v50 = vcombine.low %v5291_v12, %v5298_v10  ;;  %7908 = vmatprep.subr.bf16.mxu0 %v7907_v61  ;;  %v7909_v12 = vpack.c.bf16 %v7566_v59, %v7564_v15  ;;  %v7507_v10 = vld [vmem:[%s11734_s1 + $0x38] sm:$0xff]  ;;  %v7504_v51 = vld [vmem:[%s11734_s1 + $0x20] sm:$0xff]  ;;  %v7569_v5 = vld [vmem:[%s11734_s1 + $0x228] sm:$0xff] }
 0x203   :  { %v7394_v38 = vrot.slane %v6760_v34, %v10202_v28  ;;  %6651 = vperm.xlu1 %7983, %v5554_v19   ;;  %v5027_v19 = vcombine.low %v5019_v42, %v5026_v21  ;;  %v5835_v34 = vrot.slane %v10428_v37, %v8582_v29  ;;  %v5842_v42 = vrot.slane %v10430_v16, %v8582_v29  ;;  %v7506_v37 = vld [vmem:[%s11734_s1 + $0x30] sm:$0xff] }
 0x204   :  { %v6107_v21 = vrot.slane %v10591_v11, %v8582_v29  ;;  %v7847_v11 = vpack.c.bf16 %v7507_v10, %v7505_v27  ;;  %7910 = vmatpush1.bf16.msra.mxu0 %v7909_v12  ;;  %v7849_v4 = vpack.c.bf16 %v7506_v37, %v7504_v51  ;;  %v7911_v32 = vpack.c.bf16 %v7571_v46, %v7569_v5  ;;  %v7510_v12 = vld [vmem:[%s11734_s1 + $0x50] sm:$0xff]  ;;  %v7573_v51 = vld [vmem:[%s11734_s1 + $0x248] sm:$0xff]  ;;  %v7575_v37 = vld [vmem:[%s11734_s1 + $0x258] sm:$0xff] }
 0x205   :  { %v10766_v23 = vsel %vm6817_vm1, %v7398_v26, %v7394_v38  ;;  %v6574_v8 = vpop.permute.xlu0 %6573  ;;  %v7004_v38 = vsel %vm6817_vm1, %v7003_v14, %v6999_v35  ;;  %v6114_v26 = vrot.slane %v10616_v60, %v8582_v29  ;;  %v6386_v61 = vrot.slane %v10719_v0, %v8582_v29  ;;  %v7568_v60 = vld [vmem:[%s11734_s1 + $0x220] sm:$0xff]  ;;  %v7570_v35 = vld [vmem:[%s11734_s1 + $0x230] sm:$0xff] }
 0x206   :  { %v6526_v56 = vpop.permute.xlu1 %6525  ;;  %v7087_v31 = vrot.slane %v6574_v8, %v12141_v9  ;;  %6795 = vperm.xlu0 %7982, %v6370_v43   ;;  %7848 = vmatprep.subr.bf16.mxu1 %v7847_v11  ;;  %v5571_v59 = vcombine.low %v5563_v39, %v5570_v53  ;;  %v4764_v27 = vrot.slane %v12142_v30, %v8582_v29  ;;  %v7508_v8 = vld [vmem:[%s11734_s1 + $0x40] sm:$0xff] }
 0x207   :  { %v7008_v16 = vrot.slane %v6526_v56, %v12141_v9  ;;  %6747 = vperm.xlu1 %7983, %v6098_v25   ;;  %7850 = vmatpush1.bf16.msra.mxu1 %v7849_v4  ;;  %v7913_v0 = vpack.c.bf16 %v7570_v35, %v7568_v60  ;;  %v7511_v56 = vld [vmem:[%s11734_s1 + $0x58] sm:$0xff]  ;;  %v7853_v5 = vpack.c.bf16 %v7510_v12, %v7508_v8  ;;  %v12146_v12 = vld [vmem:[#allocation79_spill] sm:$0xff] }
 0x208   :  { %v10808_v43 = vsel %vm6824_vm2, %v7087_v31, %v10576_v13  ;;  %v7509_v13 = vld [vmem:[%s11734_s1 + $0x48] sm:$0xff]  ;;  %7912 = vmatprep.subr.bf16.mxu0 %v7911_v32  ;;  %v7915_v46 = vpack.c.bf16 %v7575_v37, %v7573_v51  ;;  %v6387_v4 = vcombine.low %v6379_v44, %v6386_v61  ;;  %v7515_v61 = vld [vmem:[%s11734_s1 + $0x78] sm:$0xff] }
 0x209   :  { %v10804_v25 = vsel %vm6824_vm2, %v7008_v16, %v7004_v38  ;;  %v6670_v15 = vpop.permute.xlu0 %6669  ;;  %v7851_v10 = vpack.c.bf16 %v7511_v56, %v7509_v13  ;;  %v5843_v16 = vcombine.low %v5835_v34, %v5842_v42  ;;  %v12143_v31 = vld [vmem:[#allocation58_spill] sm:$0xff]  ;;  %7914 = vmatpush1.bf16.msra.mxu0 %v7913_v0  ;;  %v6115_v38 = vcombine.low %v6107_v21, %v6114_v26  ;;  %v7574_v42 = vld [vmem:[%s11734_s1 + $0x250] sm:$0xff]  ;;  %v7579_v8 = vld [vmem:[%s11734_s1 + $0x278] sm:$0xff] }
 0x20a   :  { %v6622_v14 = vpop.permute.xlu1 %6621  ;;  %v7245_v53 = vrot.slane %v6670_v15, %v12141_v9  ;;  %6606 = vperm.xlu0 %7982, %v5299_v50   ;;  %v4771_v11 = vrot.slane %v12143_v31, %v8582_v29  ;;  %v7572_v34 = vld [vmem:[%s11734_s1 + $0x240] sm:$0xff]  ;;  %v12145_v21 = vld [vmem:[#allocation35_spill] sm:$0xff]  ;;  %7916 = vmatprep.subr.bf16.mxu0 %v7915_v46 }
 0x20b   :  { %v7166_v39 = vrot.slane %v6622_v14, %v12141_v9  ;;  %6558 = vperm.xlu1 %7983, %v5027_v19   ;;  %7852 = vmatprep.subr.bf16.mxu1 %v7851_v10  ;;  %v5043_v26 = vrot.slane %v12145_v21, %v8582_v29  ;;  %v7917_v44 = vpack.c.bf16 %v7574_v42, %v7572_v34  ;;  %v7512_v13 = vld [vmem:[%s11734_s1 + $0x60] sm:$0xff]  ;;  %v7514_v14 = vld [vmem:[%s11734_s1 + $0x70] sm:$0xff]  ;;  %v7577_v56 = vld [vmem:[%s11734_s1 + $0x268] sm:$0xff] }
 0x20c   :  { %v10850_v50 = vsel %vm6824_vm2, %v7245_v53, %v10624_v24  ;;  %v12144_v24 = vld [vmem:[#allocation68_spill] sm:$0xff]  ;;  %7854 = vmatpush1.bf16.msra.mxu1 %v7853_v5  ;;  %v7857_v51 = vpack.c.bf16 %v7514_v14, %v7512_v13  ;;  %v7919_v37 = vpack.c.bf16 %v7579_v8, %v7577_v56  ;;  %v12148_v31 = vld [vmem:[#allocation46_spill] sm:$0xff] }
 0x20d   :  { %v10846_v19 = vsel %vm6824_vm2, %v7166_v39, %v10598_v52  ;;  %v7513_v52 = vld [vmem:[%s11734_s1 + $0x68] sm:$0xff]  ;;  %v6766_v60 = vpop.permute.xlu0 %6765  ;;  %v5036_v35 = vrot.slane %v12144_v24, %v8582_v29  ;;  %v5308_v39 = vrot.slane %v12146_v12, %v8582_v29  ;;  %v12147_v53 = vld [vmem:[#allocation56_spill] sm:$0xff]  ;;  %7918 = vmatpush1.bf16.msra.mxu0 %v7917_v44  ;;  %v5580_v5 = vrot.slane %v12148_v31, %v8582_v29  ;;  %v7576_v42 = vld [vmem:[%s11734_s1 + $0x260] sm:$0xff] }
 0x20e   :  { %v6718_v32 = vpop.permute.xlu1 %6717  ;;  %v7403_v30 = vrot.slane %v6766_v60, %v12141_v9  ;;  %6702 = vperm.xlu0 %7982, %v5843_v16   ;;  %v7855_v0 = vpack.c.bf16 %v7515_v61, %v7513_v52  ;;  %v5315_v10 = vrot.slane %v12147_v53, %v8582_v29  ;;  %v12149_v46 = vld [vmem:[#allocation18_spill] sm:$0xff]  ;;  %v4772_v60 = vcombine.low %v4764_v27, %v4771_v11  ;;  %v7519_v44 = vld [vmem:[%s11734_s1 + $0x98] sm:$0xff]  ;;  %v7518_v13 = vld [vmem:[%s11734_s1 + $0x90] sm:$0xff] }
 0x20f   :  { %v7324_v15 = vrot.slane %v6718_v32, %v12141_v9  ;;  %6654 = vperm.xlu1 %7983, %v5571_v59   ;;  %v5587_v34 = vrot.slane %v12149_v46, %v8582_v29  ;;  %v5852_v24 = vrot.slane %v10505_v41, %v8582_v29  ;;  %7920 = vmatprep.subr.bf16.mxu0 %v7919_v37  ;;  %v7516_v61 = vld [vmem:[%s11734_s1 + $0x80] sm:$0xff]  ;;  %v7523_v31 = vld [vmem:[%s11734_s1 + $0xb8] sm:$0xff]  ;;  %v7522_v46 = vld [vmem:[%s11734_s1 + $0xb0] sm:$0xff] }
 0x210   :  { %v10892_v16 = vsel %vm6824_vm2, %v7403_v30, %v10766_v23  ;;  %7856 = vmatprep.subr.bf16.mxu1 %v7855_v0  ;;  %v7517_v23 = vld [vmem:[%s11734_s1 + $0x88] sm:$0xff]  ;;  %v7583_v30 = vld [vmem:[%s11734_s1 + $0x298] sm:$0xff]  ;;  %v5044_v0 = vcombine.low %v5036_v35, %v5043_v26  ;;  %v5316_v56 = vcombine.low %v5308_v39, %v5315_v10  ;;  %v7861_v8 = vpack.c.bf16 %v7518_v13, %v7516_v61  ;;  %v7580_v35 = vld [vmem:[%s11734_s1 + $0x280] sm:$0xff] }
 0x211   :  { %v10888_v59 = vsel %vm6824_vm2, %v7324_v15, %v10645_v63  ;;  %v7578_v63 = vld [vmem:[%s11734_s1 + $0x270] sm:$0xff]  ;;  %v6577_v32 = vpop.permute.xlu0 %6576  ;;  %7858 = vmatpush1.bf16.msra.mxu1 %v7857_v51  ;;  %v7859_v14 = vpack.c.bf16 %v7519_v44, %v7517_v23  ;;  %v7581_v15 = vld [vmem:[%s11734_s1 + $0x288] sm:$0xff]  ;;  %v5859_v51 = vrot.slane %v10540_v40, %v8582_v29  ;;  %v6124_v10 = vrot.slane %v10675_v2, %v8582_v29  ;;  %v7588_v41 = vld [vmem:[%s11734_s1 + $0x2c0] sm:$0xff] }
 0x212   :  { %v6529_v52 = vpop.permute.xlu1 %6528  ;;  %v7921_v21 = vpack.c.bf16 %v7578_v63, %v7576_v42  ;;  %v7092_v11 = vrot.slane %v6577_v32, %v10435_v55  ;;  %6798 = vperm.xlu0 %7982, %v6387_v4   ;;  %v7923_v12 = vpack.c.bf16 %v7583_v30, %v7581_v15  ;;  %v5588_v4 = vcombine.low %v5580_v5, %v5587_v34  ;;  %v7582_v26 = vld [vmem:[%s11734_s1 + $0x290] sm:$0xff]  ;;  %v7520_v5 = vld [vmem:[%s11734_s1 + $0xa0] sm:$0xff]  ;;  %v7585_v42 = vld [vmem:[%s11734_s1 + $0x2a8] sm:$0xff] }
 0x213   :  { %v7013_v27 = vrot.slane %v6529_v52, %v10435_v55  ;;  %6750 = vperm.xlu1 %7983, %v6115_v38   ;;  %7860 = vmatprep.subr.bf16.mxu1 %v7859_v14  ;;  %v6131_v40 = vrot.slane %v10677_v54, %v8582_v29  ;;  %v7925_v37 = vpack.c.bf16 %v7582_v26, %v7580_v35  ;;  %v7587_v63 = vld [vmem:[%s11734_s1 + $0x2b8] sm:$0xff]  ;;  %v12150_v61 = vld [vmem:[#allocation15_spill] sm:$0xff] }
 0x214   :  { %7922 = vmatpush1.bf16.msra.mxu0 %v7921_v21  ;;  %v10932_v38 = vsel %vm6831_vm3, %v7092_v11, %v10808_v43  ;;  %v6396_v23 = vrot.slane %v10725_v45, %v8582_v29  ;;  %v6403_v52 = vrot.slane %v10744_v57, %v8582_v29  ;;  %v7865_v32 = vpack.c.bf16 %v7522_v46, %v7520_v5  ;;  %v7584_v57 = vld [vmem:[%s11734_s1 + $0x2a0] sm:$0xff]  ;;  %v7526_v35 = vld [vmem:[%s11734_s1 + $0xd0] sm:$0xff] }
 0x215   :  { %v10928_v53 = vsel %vm6831_vm3, %v7013_v27, %v10804_v25  ;;  %v7521_v25 = vld [vmem:[%s11734_s1 + $0xa8] sm:$0xff]  ;;  %v6673_v43 = vpop.permute.xlu0 %6672  ;;  %7862 = vmatpush1.bf16.msra.mxu1 %v7861_v8  ;;  %7924 = vmatprep.subr.bf16.mxu0 %v7923_v12  ;;  %v7927_v21 = vpack.c.bf16 %v7587_v63, %v7585_v42  ;;  %v4781_v13 = vrot.slane %v12150_v61, %v8582_v29  ;;  %v12151_v27 = vld [vmem:[#allocation17_spill] sm:$0xff] }
 0x216   :  { %v6625_v39 = vpop.permute.xlu1 %6624  ;;  %v7250_v34 = vrot.slane %v6673_v43, %v10435_v55  ;;  %6561 = vperm.xlu0 %7982, %v5044_v0   ;;  %v7863_v54 = vpack.c.bf16 %v7523_v31, %v7521_v25  ;;  %v4788_v45 = vrot.slane %v12151_v27, %v8582_v29  ;;  %v4238_v11 = vrot.slane %v12134_v36, %v8557_v1  ;;  %v7527_v8 = vld [vmem:[%s11734_s1 + $0xd8] sm:$0xff]  ;;  %v7524_v12 = vld [vmem:[%s11734_s1 + $0xc0] sm:$0xff]  ;;  %v7589_v43 = vld [vmem:[%s11734_s1 + $0x2c8] sm:$0xff] }
 0x217   :  { %v7171_v2 = vrot.slane %v6625_v39, %v10435_v55  ;;  %6513 = vperm.xlu1 %7983, %v4772_v60   ;;  %v4245_v14 = vrot.slane %v12134_v36, %v8560_v6  ;;  %v5860_v31 = vcombine.low %v5852_v24, %v5859_v51  ;;  %v6132_v5 = vcombine.low %v6124_v10, %v6131_v40  ;;  %v7590_v24 = vld [vmem:[%s11734_s1 + $0x2d0] sm:$0xff]  ;;  %v7596_v1 = vld [vmem:[%s11734_s1 + $0x300] sm:$0xff]  ;;  %v7537_v36 = vld [vmem:[%s11734_s1 + $0x128] sm:$0xff] }
 0x218   :  { %7926 = vmatpush1.bf16.msra.mxu0 %v7925_v37  ;;  %v10976_v44 = vsel %vm6831_vm3, %v7250_v34, %v10850_v50  ;;  %7864 = vmatprep.subr.bf16.mxu1 %v7863_v54  ;;  %v7525_v50 = vld [vmem:[%s11734_s1 + $0xc8] sm:$0xff]  ;;  %v7591_v37 = vld [vmem:[%s11734_s1 + $0x2d8] sm:$0xff]  ;;  %v7869_v46 = vpack.c.bf16 %v7526_v35, %v7524_v12  ;;  %v6404_v34 = vcombine.low %v6396_v23, %v6403_v52  ;;  %v7598_v6 = vld [vmem:[%s11734_s1 + $0x310] sm:$0xff] }
 0x219   :  { %v10972_v60 = vsel %vm6831_vm3, %v7171_v2, %v10846_v19  ;;  %v7586_v19 = vld [vmem:[%s11734_s1 + $0x2b0] sm:$0xff]  ;;  %v6769_v30 = vpop.permute.xlu0 %6768  ;;  %7866 = vmatpush1.bf16.msra.mxu1 %v7865_v32  ;;  %7928 = vmatprep.subr.bf16.mxu0 %v7927_v21  ;;  %v7867_v39 = vpack.c.bf16 %v7527_v8, %v7525_v50  ;;  %v7931_v2 = vpack.c.bf16 %v7591_v37, %v7589_v43  ;;  %v7531_v52 = vld [vmem:[%s11734_s1 + $0xf8] sm:$0xff]  ;;  %v7528_v32 = vld [vmem:[%s11734_s1 + $0xe0] sm:$0xff] }
 0x21a   :  { %v6721_v15 = vpop.permute.xlu1 %6720  ;;  %v7929_v0 = vpack.c.bf16 %v7586_v19, %v7584_v57  ;;  %v7408_v25 = vrot.slane %v6769_v30, %v10435_v55  ;;  %6657 = vperm.xlu0 %7982, %v5588_v4   ;;  %v4789_v54 = vcombine.low %v4781_v13, %v4788_v45  ;;  %v12153_v42 = vld [vmem:[#allocation67_spill] sm:$0xff]  ;;  %v7933_v23 = vpack.c.bf16 %v7590_v24, %v7588_v41  ;;  %v7595_v57 = vld [vmem:[%s11734_s1 + $0x2f8] sm:$0xff]  ;;  %v7592_v37 = vld [vmem:[%s11734_s1 + $0x2e0] sm:$0xff] }
 0x21b   :  { %v7329_v26 = vrot.slane %v6721_v15, %v10435_v55  ;;  %6609 = vperm.xlu1 %7983, %v5316_v56   ;;  %7868 = vmatprep.subr.bf16.mxu1 %v7867_v39  ;;  %v5060_v63 = vrot.slane %v12153_v42, %v8582_v29  ;;  %v7530_v21 = vld [vmem:[%s11734_s1 + $0xf0] sm:$0xff]  ;;  %v7593_v45 = vld [vmem:[%s11734_s1 + $0x2e8] sm:$0xff]  ;;  %v12154_v19 = vld [vmem:[#allocation77_spill] sm:$0xff] }
 0x21c   :  { %7930 = vmatpush1.bf16.msra.mxu0 %v7929_v0  ;;  %v11021_v4 = vsel %vm6831_vm3, %v7408_v25, %v10892_v16  ;;  %v12152_v16 = vld [vmem:[#allocation33_spill] sm:$0xff]  ;;  %v5325_v50 = vrot.slane %v12154_v19, %v8582_v29  ;;  %v12155_v15 = vld [vmem:[#allocation78_spill] sm:$0xff]  ;;  %v7873_v0 = vpack.c.bf16 %v7530_v21, %v7528_v32  ;;  %v7935_v8 = vpack.c.bf16 %v7595_v57, %v7593_v45 }
 0x21d   :  { %v11017_v56 = vsel %vm6831_vm3, %v7329_v26, %v10888_v59  ;;  %v7529_v59 = vld [vmem:[%s11734_s1 + $0xe8] sm:$0xff]  ;;  %v6580_v10 = vpop.permute.xlu0 %6579  ;;  %v5053_v40 = vrot.slane %v12152_v16, %v8582_v29  ;;  %7870 = vmatpush1.bf16.msra.mxu1 %v7869_v46  ;;  %7932 = vmatprep.subr.bf16.mxu0 %v7931_v2  ;;  %v5332_v30 = vrot.slane %v12155_v15, %v8582_v29  ;;  %v12156_v26 = vld [vmem:[#allocation21_spill] sm:$0xff] }
 0x21e   :  { %v6532_v51 = vpop.permute.xlu1 %6531  ;;  %v7097_v13 = vrot.slane %v6580_v10, %v10543_v20  ;;  %6753 = vperm.xlu0 %7982, %v6132_v5   ;;  %v7871_v27 = vpack.c.bf16 %v7531_v52, %v7529_v59  ;;  %v5597_v25 = vrot.slane %v12156_v26, %v8582_v29  ;;  %v12157_v39 = vld [vmem:[#allocation38_spill] sm:$0xff]  ;;  %v5869_v46 = vrot.slane %v10499_v62, %v8582_v29  ;;  %v12158_v2 = vld [vmem:[#allocation61_spill] sm:$0xff]  ;;  %v7534_v10 = vld [vmem:[%s11734_s1 + $0x110] sm:$0xff] }
 0x21f   :  { %v7018_v61 = vrot.slane %v6532_v51, %v10543_v20  ;;  %6705 = vperm.xlu1 %7983, %v5860_v31   ;;  %v5604_v43 = vrot.slane %v12157_v39, %v8582_v29  ;;  %v5876_v41 = vrot.slane %v12158_v2, %v8582_v29  ;;  %v7535_v59 = vld [vmem:[%s11734_s1 + $0x118] sm:$0xff]  ;;  %v7532_v51 = vld [vmem:[%s11734_s1 + $0x100] sm:$0xff]  ;;  %v11105_v32 = vcombine.low %v4224_v18, %v4231_v49  ;;  %v7601_v19 = vld [vmem:[%s11734_s1 + $0x328] sm:$0xff] }
 0x220   :  { %7934 = vmatpush1.bf16.msra.mxu0 %v7933_v23  ;;  %v11063_v35 = vsel %vm6838_vm4, %v7097_v13, %v10932_v38  ;;  %7872 = vmatprep.subr.bf16.mxu1 %v7871_v27  ;;  %v7533_v38 = vld [vmem:[%s11734_s1 + $0x108] sm:$0xff]  ;;  %v7599_v52 = vld [vmem:[%s11734_s1 + $0x318] sm:$0xff]  ;;  %v5061_v48 = vcombine.low %v5053_v40, %v5060_v63  ;;  %v5333_v18 = vcombine.low %v5325_v50, %v5332_v30  ;;  %v7536_v63 = vld [vmem:[%s11734_s1 + $0x120] sm:$0xff] }
 0x221   :  { %v11059_v12 = vsel %vm6838_vm4, %v7018_v61, %v10928_v53  ;;  %v7594_v53 = vld [vmem:[%s11734_s1 + $0x2f0] sm:$0xff]  ;;  %v6676_v5 = vpop.permute.xlu0 %6675  ;;  %7874 = vmatpush1.bf16.msra.mxu1 %v7873_v0  ;;  %7936 = vmatprep.subr.bf16.mxu0 %v7935_v8  ;;  %v7875_v42 = vpack.c.bf16 %v7535_v59, %v7533_v38  ;;  %v7597_v23 = vld [vmem:[%s11734_s1 + $0x308] sm:$0xff]  ;;  %v7539_v40 = vld [vmem:[%s11734_s1 + $0x138] sm:$0xff]  ;;  %v6141_v15 = vrot.slane %v10671_v7, %v8582_v29 }
 0x222   :  { %v6628_v31 = vpop.permute.xlu1 %6627  ;;  %v7937_v24 = vpack.c.bf16 %v7594_v53, %v7592_v37  ;;  %v7255_v16 = vrot.slane %v6676_v5, %v10543_v20  ;;  %6516 = vperm.xlu0 %7982, %v4789_v54   ;;  %v7877_v54 = vpack.c.bf16 %v7534_v10, %v7532_v51  ;;  %v7939_v21 = vpack.c.bf16 %v7599_v52, %v7597_v23  ;;  %v7538_v13 = vld [vmem:[%s11734_s1 + $0x130] sm:$0xff]  ;;  %v7603_v50 = vld [vmem:[%s11734_s1 + $0x338] sm:$0xff] }
 0x223   :  { %v7176_v62 = vrot.slane %v6628_v31, %v10543_v20  ;;  %6801 = vperm.xlu1 %7983, %v6404_v34   ;;  %v11113_v34 = vcombine.low %v4238_v11, %v4245_v14  ;;  %7876 = vmatprep.subr.bf16.mxu1 %v7875_v42  ;;  %v5605_v11 = vcombine.low %v5597_v25, %v5604_v43  ;;  %v7543_v38 = vld [vmem:[%s11734_s1 + $0x158] sm:$0xff]  ;;  %v7540_v31 = vld [vmem:[%s11734_s1 + $0x140] sm:$0xff]  ;;  %v7542_v5 = vld [vmem:[%s11734_s1 + $0x150] sm:$0xff] }
 0x224   :  { %7938 = vmatpush1.bf16.msra.mxu0 %v7937_v24  ;;  %v11121_v47 = vsel %vm6838_vm4, %v7255_v16, %v10976_v44  ;;  %v5877_v44 = vcombine.low %v5869_v46, %v5876_v41  ;;  %v7941_v14 = vpack.c.bf16 %v7598_v6, %v7596_v1  ;;  %v7879_v57 = vpack.c.bf16 %v7539_v40, %v7537_v36  ;;  %v7605_v24 = vld [vmem:[%s11734_s1 + $0x348] sm:$0xff]  ;;  %v7607_v59 = vld [vmem:[%s11734_s1 + $0x358] sm:$0xff]  ;;  %v7544_v6 = vld [vmem:[%s11734_s1 + $0x160] sm:$0xff] }
 0x225   :  { %v11117_v61 = vsel %vm6838_vm4, %v7176_v62, %v10972_v60  ;;  %v6772_v60 = vpop.permute.xlu0 %6771  ;;  %7878 = vmatpush1.bf16.msra.mxu1 %v7877_v54  ;;  %7940 = vmatprep.subr.bf16.mxu0 %v7939_v21  ;;  %v6148_v30 = vrot.slane %v10673_v22, %v8582_v29  ;;  %v7881_v0 = vpack.c.bf16 %v7538_v13, %v7536_v63  ;;  %v7600_v22 = vld [vmem:[%s11734_s1 + $0x320] sm:$0xff]  ;;  %v7545_v21 = vld [vmem:[%s11734_s1 + $0x168] sm:$0xff]  ;;  %v7547_v1 = vld [vmem:[%s11734_s1 + $0x178] sm:$0xff] }
 0x226   :  { %v6724_v49 = vpop.permute.xlu1 %6723  ;;  %v7413_v45 = vrot.slane %v6772_v60, %v10543_v20  ;;  %6612 = vperm.xlu0 %7982, %v5333_v18   ;;  %v7943_v8 = vpack.c.bf16 %v7603_v50, %v7601_v19  ;;  %v6413_v39 = vrot.slane %v11105_v32, %v8582_v29  ;;  %v6420_v7 = vrot.slane %v11113_v34, %v8582_v29  ;;  %v7546_v36 = vld [vmem:[%s11734_s1 + $0x170] sm:$0xff]  ;;  %v7611_v40 = vld [vmem:[%s11734_s1 + $0x378] sm:$0xff]  ;;  %v7549_v19 = vld [vmem:[%s11734_s1 + $0x188] sm:$0xff] }
 0x227   :  { %v7334_v27 = vrot.slane %v6724_v49, %v10543_v20  ;;  %6564 = vperm.xlu1 %7983, %v5061_v48   ;;  %7880 = vmatprep.subr.bf16.mxu1 %v7879_v57  ;;  %v7885_v51 = vpack.c.bf16 %v7542_v5, %v7540_v31  ;;  %v7947_v10 = vpack.c.bf16 %v7607_v59, %v7605_v24  ;;  %v6847_v48 = vadd.s32 4294967248, %v10176_v17  ;;  %v7610_v57 = vld [vmem:[%s11734_s1 + $0x370] sm:$0xff]  ;;  %v7553_v31 = vld [vmem:[%s11734_s1 + $0x1a8] sm:$0xff]  ;;  %v7555_v5 = vld [vmem:[%s11734_s1 + $0x1b8] sm:$0xff] }
 0x228   :  { %7942 = vmatpush1.bf16.msra.mxu0 %v7941_v14  ;;  %v11159_v25 = vsel %vm6838_vm4, %v7413_v45, %v11021_v4  ;;  %v7541_v4 = vld [vmem:[%s11734_s1 + $0x148] sm:$0xff]  ;;  %v6149_v42 = vcombine.low %v6141_v15, %v6148_v30  ;;  %v6421_v23 = vcombine.low %v6413_v39, %v6420_v7  ;;  %v7551_v30 = vld [vmem:[%s11734_s1 + $0x198] sm:$0xff]  ;;  %v7895_v24 = vpack.c.bf16 %v7555_v5, %v7553_v31  ;;  %v7552_v59 = vld [vmem:[%s11734_s1 + $0x1a0] sm:$0xff] }
 0x229   :  { %v11155_v26 = vsel %vm6838_vm4, %v7334_v27, %v11017_v56  ;;  %v7602_v56 = vld [vmem:[%s11734_s1 + $0x330] sm:$0xff]  ;;  %v6583_v37 = vpop.permute.xlu0 %6582  ;;  %7882 = vmatpush1.bf16.msra.mxu1 %v7881_v0  ;;  %7944 = vmatprep.subr.bf16.mxu0 %v7943_v8  ;;  %v7883_v41 = vpack.c.bf16 %v7543_v38, %v7541_v4  ;;  %v7609_v14 = vld [vmem:[%s11734_s1 + $0x368] sm:$0xff]  ;;  %v11246_v50 = vsub.s32 %v6847_v48, %v12057_v3  ;;  %v7548_v0 = vld [vmem:[%s11734_s1 + $0x180] sm:$0xff] }
 0x22a   :  { %v6535_v43 = vpop.permute.xlu1 %6534  ;;  %v7945_v53 = vpack.c.bf16 %v7602_v56, %v7600_v22  ;;  %v7102_v2 = vrot.slane %v6583_v37, %v10621_v58  ;;  %6708 = vperm.xlu0 %7982, %v5877_v44   ;;  %v7889_v44 = vpack.c.bf16 %v7546_v36, %v7544_v6  ;;  %v7951_v27 = vpack.c.bf16 %v7611_v40, %v7609_v14  ;;  %v7550_v8 = vld [vmem:[%s11734_s1 + $0x190] sm:$0xff]  ;;  %v7613_v4 = vld [vmem:[%s11734_s1 + $0x388] sm:$0xff]  ;;  %v7612_v37 = vld [vmem:[%s11734_s1 + $0x380] sm:$0xff] }
 0x22b   :  { %v7023_v46 = vrot.slane %v6535_v43, %v10621_v58  ;;  %6660 = vperm.xlu1 %7983, %v5605_v11   ;;  %7884 = vmatprep.subr.bf16.mxu1 %v7883_v41  ;;  %v7887_v11 = vpack.c.bf16 %v7547_v1, %v7545_v21  ;;  %v7891_v22 = vpack.c.bf16 %v7551_v30, %v7549_v19  ;;  %v7615_v43 = vld [vmem:[%s11734_s1 + $0x398] sm:$0xff]  ;;  %v7556_v48 = vld [vmem:[%s11734_s1 + $0x1c0] sm:$0xff]  ;;  %v7621_v36 = vld [vmem:[%s11734_s1 + $0x3c8] sm:$0xff] }
 0x22c   :  { %7946 = vmatpush1.bf16.msra.mxu0 %v7945_v53  ;;  %v11197_v16 = vsel %vm6845_vm5, %v7102_v2, %v11063_v35  ;;  %v7606_v35 = vld [vmem:[%s11734_s1 + $0x350] sm:$0xff]  ;;  %v7893_v56 = vpack.c.bf16 %v7550_v8, %v7548_v0  ;;  %v7955_v38 = vpack.c.bf16 %v7615_v43, %v7613_v4  ;;  %v7559_v21 = vld [vmem:[%s11734_s1 + $0x1d8] sm:$0xff]  ;;  %v7625_v8 = vld [vmem:[%s11734_s1 + $0x3e8] sm:$0xff] }
 0x22d   :  { %v11193_v62 = vsel %vm6845_vm5, %v7023_v46, %v11059_v12  ;;  %v6679_v32 = vpop.permute.xlu0 %6678  ;;  %7886 = vmatpush1.bf16.msra.mxu1 %v7885_v51  ;;  %7948 = vmatprep.subr.bf16.mxu0 %v7947_v10  ;;  %v7604_v12 = vld [vmem:[%s11734_s1 + $0x340] sm:$0xff]  ;;  %v7554_v51 = vld [vmem:[%s11734_s1 + $0x1b0] sm:$0xff]  ;;  %v7617_v10 = vld [vmem:[%s11734_s1 + $0x3a8] sm:$0xff] }
 0x22e   :  { %v6631_v52 = vpop.permute.xlu1 %6630  ;;  %v7260_v54 = vrot.slane %v6679_v32, %v10621_v58  ;;  %6804 = vperm.xlu0 %7982, %v6421_v23   ;;  %v7949_v18 = vpack.c.bf16 %v7606_v35, %v7604_v12  ;;  %7888 = vmatprep.subr.bf16.mxu1 %v7887_v11  ;;  %v7619_v23 = vld [vmem:[%s11734_s1 + $0x3b8] sm:$0xff]  ;;  %v7618_v32 = vld [vmem:[%s11734_s1 + $0x3b0] sm:$0xff]  ;;  %v7557_v35 = vld [vmem:[%s11734_s1 + $0x1c8] sm:$0xff] }
 0x22f   :  { %v7181_v34 = vrot.slane %v6631_v52, %v10621_v58  ;;  %6756 = vperm.xlu1 %7983, %v6149_v42   ;;  %v7897_v42 = vpack.c.bf16 %v7554_v51, %v7552_v59  ;;  %v7616_v52 = vld [vmem:[%s11734_s1 + $0x3a0] sm:$0xff]  ;;  %v7959_v12 = vpack.c.bf16 %v7619_v23, %v7617_v10  ;;  %v7899_v6 = vpack.c.bf16 %v7559_v21, %v7557_v35  ;;  %v7623_v11 = vld [vmem:[%s11734_s1 + $0x3d8] sm:$0xff]  ;;  %v7562_v0 = vld [vmem:[%s11734_s1 + $0x1f0] sm:$0xff] }
 0x230   :  { %v11226_v60 = vsel %vm6845_vm5, %v7260_v54, %v11121_v47  ;;  %7950 = vmatpush1.bf16.msra.mxu0 %v7949_v18  ;;  %v7608_v47 = vld [vmem:[%s11734_s1 + $0x360] sm:$0xff]  ;;  %v7963_v40 = vpack.c.bf16 %v7623_v11, %v7621_v36 }
 0x231   :  { %v11222_v49 = vsel %vm6845_vm5, %v7181_v34, %v11117_v61  ;;  %v6775_v13 = vpop.permute.xlu0 %6774  ;;  %7890 = vmatpush1.bf16.msra.mxu1 %v7889_v44  ;;  %7952 = vmatprep.subr.bf16.mxu0 %v7951_v27  ;;  %v7953_v15 = vpack.c.bf16 %v7610_v57, %v7608_v47  ;;  %v7561_v27 = vld [vmem:[%s11734_s1 + $0x1e8] sm:$0xff]  ;;  %v7560_v47 = vld [vmem:[%s11734_s1 + $0x1e0] sm:$0xff]  ;;  %v6854_v57 = vadd.s32 4294967240, %v10176_v17 }
 0x232   :  { %v6727_v63 = vpop.permute.xlu1 %6726  ;;  %v7418_v45 = vrot.slane %v6775_v13, %v10621_v58  ;;  %7892 = vmatprep.subr.bf16.mxu1 %v7891_v22  ;;  %v7622_v13 = vld [vmem:[%s11734_s1 + $0x3d0] sm:$0xff]  ;;  %v7627_v22 = vld [vmem:[%s11734_s1 + $0x3f8] sm:$0xff] }
 0x233   :  { %v7339_v61 = vrot.slane %v6727_v63, %v10621_v58  ;;  %v7620_v63 = vld [vmem:[%s11734_s1 + $0x3c0] sm:$0xff] }
 0x234   :  { %v11263_v7 = vsel %vm6845_vm5, %v7418_v45, %v11159_v25  ;;  %7954 = vmatpush1.bf16.msra.mxu0 %v7953_v15  ;;  %v7614_v25 = vld [vmem:[%s11734_s1 + $0x390] sm:$0xff]  ;;  %v7563_v45 = vld [vmem:[%s11734_s1 + $0x1f8] sm:$0xff] }
 0x235   :  { %v11259_v39 = vsel %vm6845_vm5, %v7339_v61, %v11155_v26  ;;  %v6586_v53 = vpop.permute.xlu0 %6585  ;;  %v7957_v41 = vpack.c.bf16 %v7614_v25, %v7612_v37  ;;  %7894 = vmatpush1.bf16.msra.mxu1 %v7893_v56  ;;  %7956 = vmatprep.subr.bf16.mxu0 %v7955_v38  ;;  %v7903_v30 = vpack.c.bf16 %v7563_v45, %v7561_v27  ;;  %v6868_v27 = vadd.s32 4294967224, %v10176_v17 }
 0x236   :  { %v6538_v26 = vpop.permute.xlu1 %6537  ;;  %v7107_v2 = vrot.slane %v6586_v53, %v11246_v50  ;;  %7896 = vmatprep.subr.bf16.mxu1 %v7895_v24  ;;  %v7967_v37 = vpack.c.bf16 %v7627_v22, %v7625_v8  ;;  %v7626_v53 = vld [vmem:[%s11734_s1 + $0x3f0] sm:$0xff]  ;;  %v7905_v38 = vpack.c.bf16 %v7562_v0, %v7560_v47  ;;  %v11365_v25 = vsub.s32 %v6854_v57, %v12057_v3 }
 0x237   :  { %v7028_v46 = vrot.slane %v6538_v26, %v11246_v50  ;;  %v7624_v26 = vld [vmem:[%s11734_s1 + $0x3e0] sm:$0xff] }
 0x238   :  { %v7108_v54 = vsel %vm6852_vm6, %v7107_v2, %v11197_v16  ;;  %7958 = vmatpush1.bf16.msra.mxu0 %v7957_v41  ;;  %v7558_v16 = vld [vmem:[%s11734_s1 + $0x1d0] sm:$0xff]  ;;  %v7969_v41 = vpack.c.bf16 %v7626_v53, %v7624_v26 }
 0x239   :  { %v7029_v34 = vsel %vm6852_vm6, %v7028_v46, %v11193_v62  ;;  %v6682_v1 = vpop.permute.xlu0 %6681  ;;  %v7961_v62 = vpack.c.bf16 %v7618_v32, %v7616_v52  ;;  %7960 = vmatprep.subr.bf16.mxu0 %v7959_v12  ;;  %7898 = vmatpush1.bf16.msra.mxu1 %v7897_v42  ;;  %v7901_v61 = vpack.c.bf16 %v7558_v16, %v7556_v48  ;;  %v6861_v52 = vadd.s32 4294967232, %v10176_v17 }
 0x23a   :  { %v6634_v18 = vpop.permute.xlu1 %6633  ;;  %v7265_v14 = vrot.slane %v6682_v1, %v11246_v50  ;;  %7900 = vmatprep.subr.bf16.mxu1 %v7899_v6 }
 0x23b   :  { %v7186_v44 = vrot.slane %v6634_v18, %v11246_v50 }
 0x23c   :  { %v7266_v15 = vsel %vm6852_vm6, %v7265_v14, %v11226_v60  ;;  %7962 = vmatpush1.bf16.msra.mxu0 %v7961_v62 }
 0x23d   :  { %v7187_v19 = vsel %vm6852_vm6, %v7186_v44, %v11222_v49  ;;  %v6778_v4 = vpop.permute.xlu0 %6777  ;;  %v7965_v49 = vpack.c.bf16 %v7622_v13, %v7620_v63  ;;  %7964 = vmatprep.subr.bf16.mxu0 %v7963_v40  ;;  %7902 = vmatpush1.bf16.msra.mxu1 %v7901_v61 }
 0x23e   :  { %v6730_v56 = vpop.permute.xlu1 %6729  ;;  %v7423_v43 = vrot.slane %v6778_v4, %v11246_v50  ;;  %7904 = vmatprep.subr.bf16.mxu1 %v7903_v30  ;;  %v11399_v30 = vsub.s32 %v6868_v27, %v12057_v3  ;;  %v12160_v27 = vld [vmem:[#allocation24_spill] sm:$0xff] }
 0x23f   :  { %v7344_v60 = vrot.slane %v6730_v56, %v11246_v50 }
 0x240   :  { %v7424_v5 = vsel %vm6852_vm6, %v7423_v43, %v11263_v7  ;;  %7966 = vmatpush1.bf16.msra.mxu0 %v7965_v49 }
 0x241   :  { %v7345_v31 = vsel %vm6852_vm6, %v7344_v60, %v11259_v39  ;;  %v6589_v2 = vpop.permute.xlu0 %6588  ;;  %7968 = vmatprep.subr.bf16.mxu0 %v7967_v37  ;;  %7906 = vmatpush1.bf16.msra.mxu1 %v7905_v38 }
 0x242   :  { %v6541_v46 = vpop.permute.xlu1 %6540  ;;  %v7112_v59 = vrot.slane %v6589_v2, %v11365_v25 }
 0x243   :  { %v7033_v24 = vrot.slane %v6541_v46, %v11365_v25 }
 0x244   :  { %v7113_v10 = vsel %vm6859_vm7, %v7112_v59, %v7108_v54  ;;  %7970 = vmatpush1.bf16.msra.mxu0 %v7969_v41  ;;  %v11383_v54 = vsub.s32 %v6861_v52, %v12057_v3 }
 0x245   :  { %v7034_v51 = vsel %vm6859_vm7, %v7033_v24, %v7029_v34  ;;  %v6685_v42 = vpop.permute.xlu0 %6684 }
 0x246   :  { %v6637_v39 = vpop.permute.xlu1 %6636  ;;  %v7270_v23 = vrot.slane %v6685_v42, %v11365_v25 }
 0x247   :  { %v7191_v7 = vrot.slane %v6637_v39, %v11365_v25 }
 0x248   :  { %v7271_v12 = vsel %vm6859_vm7, %v7270_v23, %v7266_v15 }
 0x249   :  { %v7192_v32 = vsel %vm6859_vm7, %v7191_v7, %v7187_v19  ;;  %v6781_v21 = vpop.permute.xlu0 %6780 }
 0x24a   :  { %v6733_v35 = vpop.permute.xlu1 %6732  ;;  %v7428_v34 = vrot.slane %v6781_v21, %v11365_v25 }
 0x24b   :  { %v7349_v48 = vrot.slane %v6733_v35, %v11365_v25 }
 0x24c   :  { %v7429_v1 = vsel %vm6859_vm7, %v7428_v34, %v7424_v5 }
 0x24d   :  { %v7350_v18 = vsel %vm6859_vm7, %v7349_v48, %v7345_v31  ;;  %v6592_v6 = vpop.permute.xlu0 %6591  ;;  %v6875_v31 = vadd.s32 4294967216, %v10176_v17 }
 0x24e   :  { %v6544_v62 = vpop.permute.xlu1 %6543  ;;  %v7117_v36 = vrot.slane %v6592_v6, %v11383_v54 }
 0x24f   :  { %v7038_v16 = vrot.slane %v6544_v62, %v11383_v54 }
 0x250   :  { %v7118_v44 = vsel %vm6866_vm8, %v7117_v36, %v7113_v10 }
 0x251   :  { %v7039_v11 = vsel %vm6866_vm8, %v7038_v16, %v7034_v51  ;;  %v6688_v40 = vpop.permute.xlu0 %6687  ;;  %v11419_v51 = vsub.s32 %v6875_v31, %v12057_v3 }
 0x252   :  { %v6640_v14 = vpop.permute.xlu1 %6639  ;;  %v7275_v13 = vrot.slane %v6688_v40, %v11383_v54 }
 0x253   :  { %v7196_v63 = vrot.slane %v6640_v14, %v11383_v54 }
 0x254   :  { %v7276_v45 = vsel %vm6866_vm8, %v7275_v13, %v7271_v12 }
 0x255   :  { %v7197_v61 = vsel %vm6866_vm8, %v7196_v63, %v7192_v32  ;;  %v6784_v57 = vpop.permute.xlu0 %6783  ;;  %v12159_v63 = vld [vmem:[#allocation93_spill] sm:$0xff] }
 0x256   :  { %v6736_v47 = vpop.permute.xlu1 %6735  ;;  %v7433_v15 = vrot.slane %v6784_v57, %v11383_v54  ;;  %v6811_v13 = vrot.slane %v12159_v63, %v10202_v28  ;;  %v12162_v57 = vld [vmem:[#allocation51_spill] sm:$0xff]  ;;  %v12171_v63 = vld [vmem:[#allocation16_spill] sm:$0xff] }
 0x257   :  { %v7354_v19 = vrot.slane %v6736_v47, %v11383_v54 }
 0x258   :  { %v7434_v8 = vsel %vm6866_vm8, %v7433_v15, %v7429_v1  ;;  %v12163_v15 = vld [vmem:[#allocation92_spill] sm:$0xff] }
 0x259   :  { %v7355_v0 = vsel %vm6866_vm8, %v7354_v19, %v7350_v18  ;;  %v6595_v56 = vpop.permute.xlu0 %6594  ;;  %v6929_v19 = vrot.slane %v12162_v57, %v12141_v9 }
 0x25a   :  { %v6547_v22 = vpop.permute.xlu1 %6546  ;;  %v7122_v49 = vrot.slane %v6595_v56, %v11399_v30 }
 0x25b   :  { %v7043_v4 = vrot.slane %v6547_v22, %v11399_v30 }
 0x25c   :  { %v7123_v43 = vsel %vm6873_vm9, %v7122_v49, %v7118_v44 }
 0x25d   :  { %v7044_v60 = vsel %vm6873_vm9, %v7043_v4, %v7039_v11  ;;  %v6691_v26 = vpop.permute.xlu0 %6690 }
 0x25e   :  { %v6643_v37 = vpop.permute.xlu1 %6642  ;;  %v7280_v38 = vrot.slane %v6691_v26, %v11399_v30 }
 0x25f   :  { %v7201_v53 = vrot.slane %v6643_v37, %v11399_v30 }
 0x260   :  { %v11414_v46 = vsel %vm6873_vm9, %v7280_v38, %v7276_v45  ;;  %v12161_v45 = vld [vmem:[#allocation89_spill] sm:$0xff] }
 0x261   :  { %v11411_v5 = vsel %vm6873_vm9, %v7201_v53, %v7197_v61  ;;  %v6787_v41 = vpop.permute.xlu0 %6786  ;;  %v6920_v61 = vrot.slane %v12160_v27, %v10202_v28  ;;  %v6816_v47 = vrot.slane %v12161_v45, %v10273_v33  ;;  %v12165_v28 = vld [vmem:[#allocation34_spill] sm:$0xff]  ;;  %v6889_v27 = vadd.s32 4294967200, %v10176_v17 }
 0x262   :  { %v6739_v2 = vpop.permute.xlu1 %6738  ;;  %v7438_v59 = vrot.slane %v6787_v41, %v11399_v30  ;;  %v12167_v53 = vld [vmem:[#allocation22_spill] sm:$0xff]  ;;  %v12169_v41 = vld [vmem:[#allocation81_spill] sm:$0xff] }
 0x263   :  { %v7359_v24 = vrot.slane %v6739_v2, %v11399_v30  ;;  %v6818_v49 = vsel %vm6817_vm1, %v6816_v47, %v6811_v13  ;;  %v6858_v13 = vrot.slane %v12171_v63, %v11365_v25 }
 0x264   :  { %v11425_v39 = vsel %vm6873_vm9, %v7438_v59, %v7434_v8  ;;  %v12164_v8 = vld [vmem:[#allocation70_spill] sm:$0xff] }
 0x265   :  { %v11422_v10 = vsel %vm6873_vm9, %v7359_v24, %v7355_v0  ;;  %v6598_v7 = vpop.permute.xlu0 %6597  ;;  %v6823_v0 = vrot.slane %v12163_v15, %v12141_v9  ;;  %v6924_v22 = vrot.slane %v12164_v8, %v10273_v33  ;;  %v6844_v9 = vrot.slane %v12167_v53, %v10621_v58  ;;  %v12168_v33 = vld [vmem:[#allocation83_spill] sm:$0xff]  ;;  %v12170_v59 = vld [vmem:[#allocation26_spill] sm:$0xff]  ;;  %v12173_v15 = vld [vmem:[#allocation84_spill] sm:$0xff] }
 0x266   :  { %v6550_v42 = vpop.permute.xlu1 %6549  ;;  %v7127_v52 = vrot.slane %v6598_v7, %v11419_v51  ;;  %v6939_v31 = vrot.slane %v12168_v33, %v10543_v20  ;;  %v6851_v24 = vrot.slane %v12169_v41, %v11246_v50  ;;  %v12176_v33 = vld [vmem:[#allocation63_spill] sm:$0xff] }
 0x267   :  { %v7048_v23 = vrot.slane %v6550_v42, %v11419_v51  ;;  %v6925_v26 = vsel %vm6817_vm1, %v6924_v22, %v6920_v61  ;;  %v6825_v2 = vsel %vm6824_vm2, %v6823_v0, %v6818_v49  ;;  %v6934_v42 = vrot.slane %v12170_v59, %v10435_v55  ;;  %v12172_v61 = vld [vmem:[#allocation25_spill] sm:$0xff]  ;;  %v12174_v22 = vld [vmem:[#allocation42_spill] sm:$0xff] }
 0x268   :  { %v11433_v12 = vsel %vm6880_vm10, %v7127_v52, %v7123_v43  ;;  %v12166_v43 = vld [vmem:[#allocation64_spill] sm:$0xff]  ;;  %v6930_v38 = vsel %vm6824_vm2, %v6929_v19, %v6925_v26  ;;  %v6865_v45 = vrot.slane %v12172_v61, %v11383_v54  ;;  %v6949_v0 = vrot.slane %v12173_v15, %v11246_v50  ;;  %v12175_v50 = vld [vmem:[#allocation54_spill] sm:$0xff] }
 0x269   :  { %v11430_v32 = vsel %vm6880_vm10, %v7048_v23, %v7044_v60  ;;  %v11437_v21 = vpop.permute.xlu0 %6693  ;;  %v6830_v60 = vrot.slane %v12165_v28, %v10435_v55  ;;  %v6837_v37 = vrot.slane %v12166_v43, %v10543_v20  ;;  %v6935_v47 = vsel %vm6831_vm3, %v6934_v42, %v6930_v38  ;;  %v12178_v42 = vld [vmem:[#allocation7_spill] sm:$0xff]  ;;  %v12181_v15 = vld [vmem:[#allocation8_spill] sm:$0xff] }
 0x26a   :  { %v11435_v35 = vpop.permute.xlu1 %6645  ;;  %v6882_v55 = vadd.s32 4294967208, %v10176_v17  ;;  %v6940_v19 = vsel %vm6838_vm4, %v6939_v31, %v6935_v47  ;;  %v6944_v49 = vrot.slane %v12174_v22, %v10621_v58  ;;  %v6896_v43 = vadd.s32 4294967192, %v10176_v17  ;;  %v12182_v22 = vld [vmem:[#allocation50_spill] sm:$0xff] }
 0x26b   :  { %v6832_v52 = vsel %vm6831_vm3, %v6830_v60, %v6825_v2  ;;  %v11522_v26 = vsub.s32 %v6889_v27, %v12057_v3  ;;  %v6903_v38 = vadd.s32 4294967184, %v10176_v17  ;;  %v6872_v31 = vrot.slane %v12176_v33, %v11399_v30  ;;  %v12184_v33 = vld [vmem:[#allocation37_spill] sm:$0xff] }
 0x26c   :  { %v6839_v20 = vsel %vm6838_vm4, %v6837_v37, %v6832_v52  ;;  %v6945_v58 = vsel %vm6845_vm5, %v6944_v49, %v6940_v19  ;;  %v11532_v2 = vsub.s32 %v6882_v55, %v12057_v3  ;;  %v6954_v52 = vrot.slane %v12178_v42, %v11365_v25  ;;  %v12180_v55 = vld [vmem:[#allocation6_spill] sm:$0xff] }
 0x26d   :  { %v11441_v34 = vpop.permute.xlu0 %6789  ;;  %v6846_v57 = vsel %vm6845_vm5, %v6844_v9, %v6839_v20  ;;  %v6879_v9 = vrot.slane %v12175_v50, %v11419_v51  ;;  %v6950_v41 = vsel %vm6852_vm6, %v6949_v0, %v6945_v58  ;;  %v11544_v27 = vsub.s32 %v6896_v43, %v12057_v3 }
 0x26e   :  { %v11439_v48 = vpop.permute.xlu1 %6741  ;;  %v6853_v8 = vsel %vm6852_vm6, %v6851_v24, %v6846_v57  ;;  %v12177_v24 = vld [vmem:[#allocation10_spill] sm:$0xff]  ;;  %v6955_v25 = vsel %vm6859_vm7, %v6954_v52, %v6950_v41  ;;  %v6886_v57 = vrot.slane %v12180_v55, %v11532_v2  ;;  %v6969_v0 = vrot.slane %v12181_v15, %v11419_v51  ;;  %v12187_v15 = vld [vmem:[#allocation44_spill] sm:$0xff] }
 0x26f   :  { %v6860_v37 = vsel %vm6859_vm7, %v6858_v13, %v6853_v8  ;;  %v6959_v59 = vrot.slane %v12177_v24, %v11383_v54  ;;  %v11551_v54 = vsub.s32 %v6903_v38, %v12057_v3  ;;  %v6910_v8 = vadd.s32 4294967176, %v10176_v17 }
 0x270   :  { %v6867_v53 = vsel %vm6866_vm8, %v6865_v45, %v6860_v37  ;;  %v12179_v45 = vld [vmem:[#allocation36_spill] sm:$0xff]  ;;  %v6964_v49 = vrot.slane %v12182_v22, %v11399_v30  ;;  %v6900_v17 = vrot.slane %v12184_v33, %v11544_v27  ;;  %v7206_v55 = vrot.slane %v11435_v35, %v11419_v51 }
 0x271   :  { %v11445_v1 = vpop.permute.xlu0 %6600  ;;  %v6874_v20 = vsel %vm6873_vm9, %v6872_v31, %v6867_v53  ;;  %v6893_v47 = vrot.slane %v12179_v45, %v11522_v26  ;;  %v6960_v19 = vsel %vm6866_vm8, %v6959_v59, %v6955_v25  ;;  %v12185_v31 = vld [vmem:[#allocation62_spill] sm:$0xff]  ;;  %v11577_v24 = vsub.s32 %v6910_v8, %v12057_v3  ;;  %v12186_v59 = vld [vmem:[#allocation48_spill] sm:$0xff] }
 0x272   :  { %v11443_v18 = vpop.permute.xlu1 %6552  ;;  %v6881_v61 = vsel %vm6880_vm10, %v6879_v9, %v6874_v20  ;;  %v12183_v9 = vld [vmem:[#allocation23_spill] sm:$0xff]  ;;  %v6965_v58 = vsel %vm6873_vm9, %v6964_v49, %v6960_v19  ;;  %v6979_v41 = vrot.slane %v12185_v31, %v11522_v26  ;;  %v6974_v42 = vrot.slane %v12186_v59, %v11532_v2  ;;  %v12188_v8 = vld [vmem:[#allocation52_spill] sm:$0xff] }
 0x273   :  { %v6888_v53 = vsel %vm6887_vm11, %v6886_v57, %v6881_v61  ;;  %v6907_v38 = vrot.slane %v12183_v9, %v11551_v54  ;;  %v6970_v30 = vsel %vm6880_vm10, %v6969_v0, %v6965_v58  ;;  %v7285_v57 = vrot.slane %v11437_v21, %v11419_v51 }
 0x274   :  { %v6895_v50 = vsel %vm6894_vm12, %v6893_v47, %v6888_v53  ;;  %v6975_v47 = vsel %vm6887_vm11, %v6974_v42, %v6970_v30  ;;  %v7364_v19 = vrot.slane %v11439_v48, %v11419_v51  ;;  %v6914_v0 = vrot.slane %v12187_v15, %v11577_v24 }
 0x275   :  { %v11449_v6 = vpop.permute.xlu0 %6696  ;;  %v6902_v61 = vsel %vm6901_vm13, %v6900_v17, %v6895_v50  ;;  %v6980_v25 = vsel %vm6894_vm12, %v6979_v41, %v6975_v47  ;;  %v6984_v22 = vrot.slane %v12188_v8, %v11544_v27  ;;  %v7443_v49 = vrot.slane %v11441_v34, %v11419_v51 }
 0x276   :  { %v11447_v62 = vpop.permute.xlu1 %6648  ;;  %v6909_v45 = vsel %vm6908_vm14, %v6907_v38, %v6902_v61  ;;  %v7053_v35 = vrot.slane %v11443_v18, %v11532_v2  ;;  %v7132_v48 = vrot.slane %v11445_v1, %v11532_v2  ;;  %v7207_v51 = vsel %vm6880_vm10, %v7206_v55, %v11411_v5 }
 0x277   :  { %v11606_v21 = vsel %vm6915_vm15, %v6914_v0, %v6909_v45  ;;  %v7211_v9 = vrot.slane %v11447_v62, %v11532_v2  ;;  %v6985_v38 = vsel %vm6901_vm13, %v6984_v22, %v6980_v25  ;;  %v7286_v34 = vsel %vm6880_vm10, %v7285_v57, %v11414_v46 }
 0x278   :  { %v7365_v18 = vsel %vm6880_vm10, %v7364_v19, %v11422_v10  ;;  %v7290_v58 = vrot.slane %v11449_v6, %v11532_v2  ;;  %v7444_v1 = vsel %vm6880_vm10, %v7443_v49, %v11425_v39  ;;  %v7054_v10 = vsel %vm6887_vm11, %v7053_v35, %v11430_v32 }
 0x279   :  { %v11453_v36 = vpop.permute.xlu0 %6792  ;;  %vm7806_vm1 = vcmask 1041408  }
 0x27a   :  { %v11451_v16 = vpop.permute.xlu1 %6744  ;;  %v7448_v33 = vrot.slane %v11453_v36, %v11532_v2  ;;  %v7133_v36 = vsel %vm6887_vm11, %v7132_v48, %v11433_v12 }
 0x27b   :  { %v7369_v62 = vrot.slane %v11451_v16, %v11532_v2 }
 0x27c   :  { %v7449_v31 = vsel %vm6887_vm11, %v7448_v33, %v7444_v1 }
 0x27d   :  { %v11457_v44 = vpop.permute.xlu0 %6603  ;;  %v7370_v12 = vsel %vm6887_vm11, %v7369_v62, %v7365_v18 }
 0x27e   :  { %v11455_v11 = vpop.permute.xlu1 %6555  ;;  %v7137_v6 = vrot.slane %v11457_v44, %v11522_v26  ;;  %v7291_v44 = vsel %vm6887_vm11, %v7290_v58, %v7286_v34 }
 0x27f   :  { %v7058_v5 = vrot.slane %v11455_v11, %v11522_v26  ;;  %v7212_v11 = vsel %vm6887_vm11, %v7211_v9, %v7207_v51 }
 0x280   :  { %v7138_v59 = vsel %vm6894_vm12, %v7137_v6, %v7133_v36 }
 0x281   :  { %v11461_v40 = vpop.permute.xlu0 %6699 }
 0x282   :  { %v11459_v14 = vpop.permute.xlu1 %6651  ;;  %v7295_v16 = vrot.slane %v11461_v40, %v11522_v26 }
 0x283   :  { %v7216_v39 = vrot.slane %v11459_v14, %v11522_v26 }
 0x285   :  { %v11477_v4 = vpop.permute.xlu0 %6795 }
 0x286   :  { %v11475_v56 = vpop.permute.xlu1 %6747  ;;  %v7453_v32 = vrot.slane %v11477_v4, %v11522_v26 }
 0x287   :  { %v7374_v2 = vrot.slane %v11475_v56, %v11522_v26  ;;  %v7059_v56 = vsel %vm6894_vm12, %v7058_v5, %v7054_v10 }
 0x288   :  { %v7454_v61 = vsel %vm6894_vm12, %v7453_v32, %v7449_v31 }
 0x289   :  { %v11497_v23 = vpop.permute.xlu0 %6606  ;;  %v7375_v42 = vsel %vm6894_vm12, %v7374_v2, %v7370_v12 }
 0x28a   :  { %v11495_v7 = vpop.permute.xlu1 %6558  ;;  %v7142_v25 = vrot.slane %v11497_v23, %v11544_v27 }
 0x28b   :  { %v7063_v14 = vrot.slane %v11495_v7, %v11544_v27  ;;  %v7217_v7 = vsel %vm6894_vm12, %v7216_v39, %v7212_v11 }
 0x28c   :  { %v7143_v51 = vsel %vm6901_vm13, %v7142_v25, %v7138_v59  ;;  %v7636_v59 = vsub.s32 1, %v12057_v3 }
 0x28d   :  { %v11517_v60 = vpop.permute.xlu0 %6702 }
 0x28e   :  { %v11515_v28 = vpop.permute.xlu1 %6654  ;;  %v7300_v30 = vrot.slane %v11517_v60, %v11544_v27 }
 0x28f   :  { %v7221_v40 = vrot.slane %v11515_v28, %v11544_v27  ;;  %v7296_v28 = vsel %vm6894_vm12, %v7295_v16, %v7291_v44 }
 0x290   :  { %v7301_v57 = vsel %vm6901_vm13, %v7300_v30, %v7296_v28 }
 0x291   :  { %v11541_v13 = vpop.permute.xlu0 %6798  ;;  %v7222_v55 = vsel %vm6901_vm13, %v7221_v40, %v7217_v7 }
 0x292   :  { %v11539_v63 = vpop.permute.xlu1 %6750  ;;  %v7458_v19 = vrot.slane %v11541_v13, %v11544_v27 }
 0x294   :  { %v7459_v1 = vsel %vm6901_vm13, %v7458_v19, %v7454_v61 }
 0x295   :  { %v11564_v37 = vpop.permute.xlu0 %6561 }
 0x296   :  { %v11562_v43 = vpop.permute.xlu1 %6513  ;;  %v7068_v0 = vrot.slane %v11564_v37, %v11551_v54 }
 0x297   :  { %v6989_v4 = vrot.slane %v11562_v43, %v11551_v54  ;;  %v7064_v43 = vsel %vm6901_vm13, %v7063_v14, %v7059_v56 }
 0x299   :  { %v11583_v20 = vpop.permute.xlu0 %6657  ;;  %v6990_v15 = vsel %vm6908_vm14, %v6989_v4, %v6985_v38 }
 0x29a   :  { %v11581_v52 = vpop.permute.xlu1 %6609  ;;  %v7226_v60 = vrot.slane %v11583_v20, %v11551_v54  ;;  %v7379_v20 = vrot.slane %v11539_v63, %v11544_v27 }
 0x29b   :  { %v7147_v23 = vrot.slane %v11581_v52, %v11551_v54 }
 0x29c   :  { %v7227_v49 = vsel %vm6908_vm14, %v7226_v60, %v7222_v55  ;;  %v7380_v34 = vsel %vm6901_vm13, %v7379_v20, %v7375_v42 }
 0x29d   :  { %v11601_v50 = vpop.permute.xlu0 %6753 }
 0x29e   :  { %v6706_v53 = vpop.permute.xlu1 %6705  ;;  %v7384_v13 = vrot.slane %v11601_v50, %v11551_v54 }
 0x29f   :  { %v7305_v45 = vrot.slane %v6706_v53, %v11551_v54 }
 0x2a0   :  { %v7385_v10 = vsel %vm6908_vm14, %v7384_v13, %v7380_v34 }
 0x2a1   :  { %v6517_v46 = vpop.permute.xlu0 %6516  ;;  %v7306_v63 = vsel %vm6908_vm14, %v7305_v45, %v7301_v57 }
 0x2a2   :  { %v11629_v17 = vpop.permute.xlu1 %6801  ;;  %v6994_v47 = vrot.slane %v6517_v46, %v11577_v24  ;;  %v7148_v46 = vsel %vm6908_vm14, %v7147_v23, %v7143_v51 }
 0x2a3   :  { %v7463_v27 = vrot.slane %v11629_v17, %v11551_v54  ;;  %v7069_v17 = vsel %vm6908_vm14, %v7068_v0, %v7064_v43 }
 0x2a4   :  { %v6995_v37 = vsel %vm6915_vm15, %v6994_v47, %v6990_v15 }
 0x2a5   :  { %v6613_v41 = vpop.permute.xlu0 %6612  ;;  %v7464_v6 = vsel %vm6908_vm14, %v7463_v27, %v7459_v1 }
 0x2a6   :  { %v6565_v26 = vpop.permute.xlu1 %6564  ;;  %v7152_v52 = vrot.slane %v6613_v41, %v11577_v24  ;;  %v7628_v41 = vld [vmem:[%s11735_s2] sm:$0x3]  ;;  %s8016_s2 = smov [#allocation3]  }
 0x2a7   :  { %v7073_v48 = vrot.slane %v6565_v26, %v11577_v24  ;;  %v7632_v26 = vsub.s32 0, %v12057_v3  ;;  %v7637_v28 = vrot.slane %v7628_v41, %v7636_v59  ;;  %s7834_s29 = sshll.u32 %s8016_s2, 4  ;;  %s7835_s29 = int_to_ptr.vmem [resolvable:$true] %s7834_s29 }
 0x2a8   :  { %v7153_v39 = vsel %vm6915_vm15, %v7152_v52, %v7148_v46  ;;  %s7986_s30 = scalar_lea.vmem %s7835_s29, 64  ;;  %p7991_p1 = scmp.lt.s32.totalorder %s7835_s29, %s7835_s29 }
 0x2a9   :  { %v6709_v22 = vpop.permute.xlu0 %6708  ;;  %v7633_v7 = vrot.slane %v7628_v41, %v7632_v26  ;;  %p7987_p0 = scmp.ne.s32.totalorder %s7835_s29, %s7986_s30  ;;  %p7992_p2 = scmp.lt.s32.totalorder %s7986_s30, %s7986_s30 }
 0x2aa   :  { %v6661_v8 = vpop.permute.xlu1 %6660  ;;  %v7310_v35 = vrot.slane %v6709_v22, %v11577_v24 }
 0x2ab   :  { %v7231_v53 = vrot.slane %v6661_v8, %v11577_v24  ;;  %p7993_p3 = por %p7992_p2, %p7991_p1 }
 0x2ac   :  { %v7311_v38 = vsel %vm6915_vm15, %v7310_v35, %v7306_v63 }
 0x2ad   :  { %v7232_v9 = vsel %vm6915_vm15, %v7231_v53, %v7227_v49  ;;  %v7472_v18 = vsel %vm7470_vm0, %v7311_v38, %v6995_v37  ;;  %v6805_v58 = vpop.permute.xlu0 %6804  ;;  %p7994_p4 = pnand %p7993_p3, %p7987_p0 }
 0x2ae   :  { %v7471_v50 = vsel %vm7470_vm0, %v7232_v9, %v11606_v21  ;;  %v6757_v54 = vpop.permute.xlu1 %6756  ;;  %v7468_v5 = vrot.slane %v6805_v58, %v11577_v24  ;;  %v7074_v21 = vsel %vm6915_vm15, %v7073_v48, %v7069_v17 }
 0x2af   :  { %v7475_v62 = vcombine.low %v7471_v50, %v7472_v18  ;;  %v7389_v33 = vrot.slane %v6757_v54, %v11577_v24 }
 0x2b0   :  { %v7469_v36 = vsel %vm6915_vm15, %v7468_v5, %v7464_v6 }
 0x2b1   :  { %v7390_v16 = vsel %vm6915_vm15, %v7389_v33, %v7385_v10  ;;  %v7474_v24 = vsel %vm7470_vm0, %v7469_v36, %v7153_v39  ;;  %v7483_v32 = vrot.slane %v7475_v62, %v8582_v29 }
 0x2b2   :  { %v7473_v11 = vsel %vm7470_vm0, %v7390_v16, %v7074_v21 }
 0x2b3   :  { %v7476_v2 = vcombine.low %v7473_v11, %v7474_v24 }
 0x2b5   :  { %v7490_v44 = vrot.slane %v7476_v2, %v8582_v29 }
 0x2b7   :  { %v7491_v14 = vcombine.low %v7483_v32, %v7490_v44 }
 0x2b9   :  { %v7499_v40 = vmul.f32 0.03125, %v7491_v14 }
 0x2bb   :  { %v7648_v30 = vrot.slane %v7499_v40, %v8582_v29  ;;  %v7641_v12 = vcombine.high %v7499_v40, %v7499_v40 }
 0x2bd   :  { %v7656_v31 = vcombine.high %v7648_v30, %v7648_v30  ;;  %v7655_v56 = vrot.slane %v7641_v12, %v8582_v29 }
 0x2bf   :  { %7726 = vmatprep.mubr.f32.mxu1 %v7656_v31  ;;  %v7657_v4 = vcombine.high %v7655_v56, %v7655_v56 }
 0x2c0   :  { %7727 = vmatmul.mubr.f32.vlgmr.msra.gmra.mrb[0].mxu1 %v7648_v30 }
 0x2c1   :  { %7797 = vmatprep.mubr.f32.mxu0 %v7657_v4 }
 0x2c2   :  { %7798 = vmatmul.mubr.f32.vlgmr.msra.gmra.mrb[0].mxu0 %v7655_v56 }
 0x393   :  { %v7728_v60 = vpop.f32.mrb[0].mxu1 }
 0x394   :  { %v7729_v42 = vadd.f32 %v7728_v60, %v7633_v7  ;;  %v7730_v61 = vpop.f32.mrb[1].mxu1 }
 0x395   :  { %v7731_v45 = vadd.f32 %v7730_v61, %v7637_v28  ;;  %v7799_v29 = vpop.f32.mrb[0].mxu0 }
 0x396   :  { %v7800_v47 = vadd.f32 %v7799_v29, %v7729_v42  ;;  %v7801_v43 = vpop.f32.mrb[1].mxu0 }
 0x397   :  { %v7802_v25 = vadd.f32 %v7801_v43, %v7731_v45 }
 0x398   :  { %v7804_v55 = vmul.f32 %v7800_v47, %v7800_v47 }
 0x399   :  { %v7805_v57 = vmul.f32 %v7802_v25, %v7802_v25 }
 0x39a   :  { %v7807_v20 = vsel %vm7806_vm1, %v7804_v55, 0.0 }
 0x39b   :  { %v7808_v19 = vsel %vm7806_vm1, %v7805_v57, 0.0 }
 0x39c   :  { %v7809_v15 = vadd.f32 %v7808_v19, %v7807_v20 }
 0x39e   :  { %7810 = vadd.xlane.f32.xlu1 %v7809_v15 }
 0x42b   :  { %v7811_v0 = vpop.xlane.xlu1 %7810 }
 0x42c   :  { %v7812_v8 = vmax.f32 %v7811_v0, 1e-24 }
 0x42e   :  { %7984 = vrsqrt.f32 %v7812_v8 }
 0x438   :  { %v7985_v3 = vpop.eup %7984 }
 0x439   :  { %v7814_v22 = vmul.f32 %v7985_v3, %v7800_v47  ;;  %v7815_v23 = vmul.f32 %v7985_v3, %v7802_v25 }
 0x43b   :  { %v7818_v49 = vcombine.low %v7814_v22, %v7815_v23 }
 0x43d   :  { %7842 = vst.sshfl [vmem:[#allocation3] sm:$0x33 pattern:$0x76325410] %v7818_v49 }
 0x43e   :  { %7997 = shalt.err (!%p7994_p4)
}
 0x43f   :  { %s7998_s6 = scalar_lea.hbm %s11736_s3, 64 }
 0x440   :  { %p7999_p5 = scmp.ne.s32.totalorder %s11736_s3, %s7998_s6  ;;  %p8002_p6 = scmp.lt.u32.totalorder %s7998_s6, %s11736_s3 }
 0x442   :  { %p8004_p7 = pnand %p8002_p6, %p7999_p5 }
 0x444   :  { %8007 = shalt.err (!%p8004_p7)
}
 0x445   :  { %7837 = dma.vmem_to_hbm [thread:$0]  %s7835_s29, 64, %s11736_s3, [#allocation4]  }
 0x446   :  { %8008 = dma.done.wait [#allocation4], 64  }
 0x447   :  { %8009 = vsyncadd [#allocation4], 4294967232 }
 0x448   :  { %7841 = vsyncpa [#allocation4], 1 }

// kernel: gdt_forward.3
= control target key start
LH: loop header
LB: loop body
LE: loop exit
PB: predicated region body
PF: predicated region fallthrough
CT: control target
= control target key end

     0   :  { %vm149_vm0 = vcmask 130048   ;;  %s11733_s0 = inlined_call_operand.vmem [shape: f32[2,512,16], index: 0, kind: input, shape index: {}]   ;;  %s11734_s1 = inlined_call_operand.vmem [shape: f32[512,256], index: 1, kind: input, shape index: {}]   ;;  %s11735_s2 = inlined_call_operand.vmem [shape: f32[1,256], index: 2, kind: input, shape index: {}]   ;;  %s11736_s3 = inlined_call_operand.hbm [shape: f32[2,256], index: 3, kind: output, shape index: {}]  }
   0x1   :  { %v23_v0 = vld [vmem:[%s11733_s0 + $0x10] sm:$0xff]  ;;  %v21_v1 = vld [vmem:[%s11733_s0] sm:$0xff]  ;;  %v24_v2 = vld [vmem:[%s11733_s0 + $0x18] sm:$0xff] }
   0x2   :  { %v156_v3 = vsel %vm149_vm0, %v23_v0, 0.0  ;;  %v150_v4 = vsel %vm149_vm0, %v21_v1, 0.0  ;;  %v22_v5 = vld [vmem:[%s11733_s0 + $0x8] sm:$0xff]  ;;  %v159_v6 = vsel %vm149_vm0, %v24_v2, 0.0  ;;  %v25_v9 = vld [vmem:[%s11733_s0 + $0x20] sm:$0xff]  ;;  %v28_v12 = vld [vmem:[%s11733_s0 + $0x38] sm:$0xff] }
   0x3   :  { %157 = vadd.xlane.f32.xlu1 %v156_v3  ;;  %151 = vadd.xlane.f32.xlu0 %v150_v4  ;;  %v153_v7 = vsel %vm149_vm0, %v22_v5, 0.0  ;;  %v26_v8 = vld [vmem:[%s11733_s0 + $0x28] sm:$0xff]  ;;  %v162_v11 = vsel %vm149_vm0, %v25_v9, 0.0  ;;  %v27_v13 = vld [vmem:[%s11733_s0 + $0x30] sm:$0xff]  ;;  %v171_v14 = vsel %vm149_vm0, %v28_v12, 0.0  ;;  %v29_v17 = vld [vmem:[%s11733_s0 + $0x40] sm:$0xff] }
   0x4   :  { %v165_v10 = vsel %vm149_vm0, %v26_v8, 0.0  ;;  %v168_v15 = vsel %vm149_vm0, %v27_v13, 0.0  ;;  %v30_v16 = vld [vmem:[%s11733_s0 + $0x48] sm:$0xff]  ;;  %v174_v19 = vsel %vm149_vm0, %v29_v17, 0.0  ;;  %v32_v20 = vld [vmem:[%s11733_s0 + $0x58] sm:$0xff]  ;;  %v31_v21 = vld [vmem:[%s11733_s0 + $0x50] sm:$0xff] }
   0x5   :  { %v177_v18 = vsel %vm149_vm0, %v30_v16, 0.0  ;;  %v183_v22 = vsel %vm149_vm0, %v32_v20, 0.0  ;;  %v180_v23 = vsel %vm149_vm0, %v31_v21, 0.0  ;;  %v34_v24 = vld [vmem:[%s11733_s0 + $0x68] sm:$0xff]  ;;  %v33_v25 = vld [vmem:[%s11733_s0 + $0x60] sm:$0xff]  ;;  %v36_v28 = vld [vmem:[%s11733_s0 + $0x78] sm:$0xff] }
   0x6   :  { %v189_v26 = vsel %vm149_vm0, %v34_v24, 0.0  ;;  %v186_v27 = vsel %vm149_vm0, %v33_v25, 0.0  ;;  %v35_v29 = vld [vmem:[%s11733_s0 + $0x70] sm:$0xff]  ;;  %v195_v30 = vsel %vm149_vm0, %v36_v28, 0.0 }
   0x7   :  { %160 = vadd.xlane.f32.xlu1 %v159_v6  ;;  %154 = vadd.xlane.f32.xlu0 %v153_v7  ;;  %v192_v31 = vsel %vm149_vm0, %v35_v29, 0.0 }
   0xb   :  { %166 = vadd.xlane.f32.xlu1 %v165_v10  ;;  %163 = vadd.xlane.f32.xlu0 %v162_v11 }
   0xf   :  { %172 = vadd.xlane.f32.xlu1 %v171_v14  ;;  %169 = vadd.xlane.f32.xlu0 %v168_v15 }
  0x13   :  { %178 = vadd.xlane.f32.xlu1 %v177_v18  ;;  %175 = vadd.xlane.f32.xlu0 %v174_v19 }
  0x17   :  { %184 = vadd.xlane.f32.xlu1 %v183_v22  ;;  %181 = vadd.xlane.f32.xlu0 %v180_v23 }
  0x1b   :  { %190 = vadd.xlane.f32.xlu1 %v189_v26  ;;  %187 = vadd.xlane.f32.xlu0 %v186_v27 }
  0x1c   :  { %8 = vsyncpa [#allocation4], 0  ;;  %v38_v32 = vld [vmem:[%s11733_s0 + $0x88] sm:$0xff]  ;;  %v37_v33 = vld [vmem:[%s11733_s0 + $0x80] sm:$0xff]  ;;  %vm6817_vm1 = vcmask 130112   ;;  %vm6824_vm2 = vcmask 195712  }
  0x1d   :  { %v201_v34 = vsel %vm149_vm0, %v38_v32, 0.0  ;;  %v198_v35 = vsel %vm149_vm0, %v37_v33, 0.0  ;;  %v40_v36 = vld [vmem:[%s11733_s0 + $0x98] sm:$0xff]  ;;  %v39_v37 = vld [vmem:[%s11733_s0 + $0x90] sm:$0xff]  ;;  %v42_v40 = vld [vmem:[%s11733_s0 + $0xa8] sm:$0xff]  ;;  %vm6831_vm3 = vcmask 261312  }
  0x1e   :  { %v207_v38 = vsel %vm149_vm0, %v40_v36, 0.0  ;;  %v204_v39 = vsel %vm149_vm0, %v39_v37, 0.0  ;;  %v41_v41 = vld [vmem:[%s11733_s0 + $0xa0] sm:$0xff]  ;;  %v213_v42 = vsel %vm149_vm0, %v42_v40, 0.0  ;;  %v44_v44 = vld [vmem:[%s11733_s0 + $0xb8] sm:$0xff]  ;;  %v43_v45 = vld [vmem:[%s11733_s0 + $0xb0] sm:$0xff] }
  0x1f   :  { %196 = vadd.xlane.f32.xlu1 %v195_v30  ;;  %193 = vadd.xlane.f32.xlu0 %v192_v31  ;;  %v210_v43 = vsel %vm149_vm0, %v41_v41, 0.0  ;;  %v219_v46 = vsel %vm149_vm0, %v44_v44, 0.0  ;;  %v216_v47 = vsel %vm149_vm0, %v43_v45, 0.0  ;;  %v46_v48 = vld [vmem:[%s11733_s0 + $0xc8] sm:$0xff]  ;;  %v45_v49 = vld [vmem:[%s11733_s0 + $0xc0] sm:$0xff]  ;;  %v48_v52 = vld [vmem:[%s11733_s0 + $0xd8] sm:$0xff] }
  0x20   :  { %v225_v50 = vsel %vm149_vm0, %v46_v48, 0.0  ;;  %v222_v51 = vsel %vm149_vm0, %v45_v49, 0.0  ;;  %v47_v53 = vld [vmem:[%s11733_s0 + $0xd0] sm:$0xff]  ;;  %v231_v54 = vsel %vm149_vm0, %v48_v52, 0.0  ;;  %v50_v56 = vld [vmem:[%s11733_s0 + $0xe8] sm:$0xff]  ;;  %v49_v57 = vld [vmem:[%s11733_s0 + $0xe0] sm:$0xff] }
  0x21   :  { %v228_v55 = vsel %vm149_vm0, %v47_v53, 0.0  ;;  %v237_v58 = vsel %vm149_vm0, %v50_v56, 0.0  ;;  %v234_v59 = vsel %vm149_vm0, %v49_v57, 0.0  ;;  %v52_v60 = vld [vmem:[%s11733_s0 + $0xf8] sm:$0xff]  ;;  %v51_v61 = vld [vmem:[%s11733_s0 + $0xf0] sm:$0xff]  ;;  %v54_v0 = vld [vmem:[%s11733_s0 + $0x108] sm:$0xff] }
  0x22   :  { %v243_v62 = vsel %vm149_vm0, %v52_v60, 0.0  ;;  %v240_v63 = vsel %vm149_vm0, %v51_v61, 0.0  ;;  %v53_v1 = vld [vmem:[%s11733_s0 + $0x100] sm:$0xff]  ;;  %v249_v2 = vsel %vm149_vm0, %v54_v0, 0.0  ;;  %v56_v4 = vld [vmem:[%s11733_s0 + $0x118] sm:$0xff]  ;;  %v55_v5 = vld [vmem:[%s11733_s0 + $0x110] sm:$0xff] }
  0x23   :  { %202 = vadd.xlane.f32.xlu1 %v201_v34  ;;  %199 = vadd.xlane.f32.xlu0 %v198_v35  ;;  %v246_v3 = vsel %vm149_vm0, %v53_v1, 0.0  ;;  %v255_v6 = vsel %vm149_vm0, %v56_v4, 0.0  ;;  %v252_v7 = vsel %vm149_vm0, %v55_v5, 0.0  ;;  %v58_v8 = vld [vmem:[%s11733_s0 + $0x128] sm:$0xff]  ;;  %v57_v9 = vld [vmem:[%s11733_s0 + $0x120] sm:$0xff]  ;;  %v60_v12 = vld [vmem:[%s11733_s0 + $0x138] sm:$0xff] }
  0x24   :  { %v261_v10 = vsel %vm149_vm0, %v58_v8, 0.0  ;;  %v258_v11 = vsel %vm149_vm0, %v57_v9, 0.0  ;;  %v59_v13 = vld [vmem:[%s11733_s0 + $0x130] sm:$0xff]  ;;  %v267_v14 = vsel %vm149_vm0, %v60_v12, 0.0  ;;  %v62_v16 = vld [vmem:[%s11733_s0 + $0x148] sm:$0xff]  ;;  %v61_v17 = vld [vmem:[%s11733_s0 + $0x140] sm:$0xff] }
  0x25   :  { %v264_v15 = vsel %vm149_vm0, %v59_v13, 0.0  ;;  %v273_v18 = vsel %vm149_vm0, %v62_v16, 0.0  ;;  %v270_v19 = vsel %vm149_vm0, %v61_v17, 0.0  ;;  %v64_v20 = vld [vmem:[%s11733_s0 + $0x158] sm:$0xff]  ;;  %v63_v21 = vld [vmem:[%s11733_s0 + $0x150] sm:$0xff]  ;;  %v66_v24 = vld [vmem:[%s11733_s0 + $0x168] sm:$0xff] }
  0x26   :  { %v279_v22 = vsel %vm149_vm0, %v64_v20, 0.0  ;;  %v276_v23 = vsel %vm149_vm0, %v63_v21, 0.0  ;;  %v65_v25 = vld [vmem:[%s11733_s0 + $0x160] sm:$0xff]  ;;  %v285_v26 = vsel %vm149_vm0, %v66_v24, 0.0  ;;  %v68_v28 = vld [vmem:[%s11733_s0 + $0x178] sm:$0xff]  ;;  %v67_v29 = vld [vmem:[%s11733_s0 + $0x170] sm:$0xff] }
  0x27   :  { %208 = vadd.xlane.f32.xlu1 %v207_v38  ;;  %205 = vadd.xlane.f32.xlu0 %v204_v39  ;;  %v282_v27 = vsel %vm149_vm0, %v65_v25, 0.0  ;;  %v291_v30 = vsel %vm149_vm0, %v68_v28, 0.0  ;;  %v288_v31 = vsel %vm149_vm0, %v67_v29, 0.0  ;;  %v70_v32 = vld [vmem:[%s11733_s0 + $0x188] sm:$0xff]  ;;  %v69_v33 = vld [vmem:[%s11733_s0 + $0x180] sm:$0xff]  ;;  %v72_v36 = vld [vmem:[%s11733_s0 + $0x198] sm:$0xff] }
  0x28   :  { %v297_v34 = vsel %vm149_vm0, %v70_v32, 0.0  ;;  %v294_v35 = vsel %vm149_vm0, %v69_v33, 0.0  ;;  %v71_v37 = vld [vmem:[%s11733_s0 + $0x190] sm:$0xff]  ;;  %v303_v38 = vsel %vm149_vm0, %v72_v36, 0.0  ;;  %v74_v40 = vld [vmem:[%s11733_s0 + $0x1a8] sm:$0xff]  ;;  %v73_v41 = vld [vmem:[%s11733_s0 + $0x1a0] sm:$0xff] }
  0x29   :  { %v300_v39 = vsel %vm149_vm0, %v71_v37, 0.0  ;;  %v76_v44 = vld [vmem:[%s11733_s0 + $0x1b8] sm:$0xff]  ;;  %v75_v45 = vld [vmem:[%s11733_s0 + $0x1b0] sm:$0xff]  ;;  %v78_v48 = vld [vmem:[%s11733_s0 + $0x1c8] sm:$0xff]  ;;  %vm6838_vm4 = vcmask 326912   ;;  %vm6845_vm5 = vcmask 392512  }
  0x2a   :  { %v77_v49 = vld [vmem:[%s11733_s0 + $0x1c0] sm:$0xff]  ;;  %v80_v52 = vld [vmem:[%s11733_s0 + $0x1d8] sm:$0xff]  ;;  %v79_v53 = vld [vmem:[%s11733_s0 + $0x1d0] sm:$0xff]  ;;  %vm6852_vm6 = vcmask 458112   ;;  %vm6859_vm7 = vcmask 523712   ;;  %vm6866_vm8 = vcmask 589312  }
  0x2b   :  { %214 = vadd.xlane.f32.xlu1 %v213_v42  ;;  %211 = vadd.xlane.f32.xlu0 %v210_v43  ;;  %v309_v42 = vsel %vm149_vm0, %v74_v40, 0.0  ;;  %v306_v43 = vsel %vm149_vm0, %v73_v41, 0.0  ;;  %v82_v56 = vld [vmem:[%s11733_s0 + $0x1e8] sm:$0xff]  ;;  %v81_v57 = vld [vmem:[%s11733_s0 + $0x1e0] sm:$0xff]  ;;  %v84_v60 = vld [vmem:[%s11733_s0 + $0x1f8] sm:$0xff]  ;;  %vm6873_vm9 = vcmask 654912  }
  0x2c   :  { %v83_v61 = vld [vmem:[%s11733_s0 + $0x1f0] sm:$0xff]  ;;  %v86_v0 = vld [vmem:[%s11733_s0 + $0x208] sm:$0xff]  ;;  %v85_v1 = vld [vmem:[%s11733_s0 + $0x200] sm:$0xff]  ;;  %vm6880_vm10 = vcmask 720512   ;;  %vm6887_vm11 = vcmask 786112   ;;  %vm6894_vm12 = vcmask 851712  }
  0x2d   :  { %v88_v4 = vld [vmem:[%s11733_s0 + $0x218] sm:$0xff]  ;;  %v87_v5 = vld [vmem:[%s11733_s0 + $0x210] sm:$0xff]  ;;  %v90_v8 = vld [vmem:[%s11733_s0 + $0x228] sm:$0xff]  ;;  %vm6901_vm13 = vcmask 917312   ;;  %vm6908_vm14 = vcmask 982912   ;;  %vm6915_vm15 = vcmask 1048512  }
  0x2e   :  { %v89_v9 = vld [vmem:[%s11733_s0 + $0x220] sm:$0xff]  ;;  %v92_v12 = vld [vmem:[%s11733_s0 + $0x238] sm:$0xff]  ;;  %v91_v13 = vld [vmem:[%s11733_s0 + $0x230] sm:$0xff] }
  0x2f   :  { %220 = vadd.xlane.f32.xlu1 %v219_v46  ;;  %217 = vadd.xlane.f32.xlu0 %v216_v47  ;;  %v315_v46 = vsel %vm149_vm0, %v76_v44, 0.0  ;;  %v312_v47 = vsel %vm149_vm0, %v75_v45, 0.0  ;;  %v94_v16 = vld [vmem:[%s11733_s0 + $0x248] sm:$0xff]  ;;  %v93_v17 = vld [vmem:[%s11733_s0 + $0x240] sm:$0xff]  ;;  %v95_v24 = vld [vmem:[%s11733_s0 + $0x250] sm:$0xff] }
  0x30   :  { %v369_v20 = vsel %vm149_vm0, %v94_v16, 0.0  ;;  %v366_v21 = vsel %vm149_vm0, %v93_v17, 0.0  ;;  %v372_v28 = vsel %vm149_vm0, %v95_v24, 0.0  ;;  %v98_v29 = vld [vmem:[%s11733_s0 + $0x268] sm:$0xff]  ;;  %v99_v36 = vld [vmem:[%s11733_s0 + $0x270] sm:$0xff] }
  0x31   :  { %v381_v33 = vsel %vm149_vm0, %v98_v29, 0.0  ;;  %v384_v40 = vsel %vm149_vm0, %v99_v36, 0.0  ;;  %v102_v41 = vld [vmem:[%s11733_s0 + $0x288] sm:$0xff] }
  0x32   :  { %v393_v45 = vsel %vm149_vm0, %v102_v41, 0.0  ;;  %v118_v29 = vld [vmem:[%s11733_s0 + $0x308] sm:$0xff] }
  0x33   :  { %226 = vadd.xlane.f32.xlu1 %v225_v50  ;;  %223 = vadd.xlane.f32.xlu0 %v222_v51  ;;  %v321_v50 = vsel %vm149_vm0, %v78_v48, 0.0  ;;  %v318_v51 = vsel %vm149_vm0, %v77_v49, 0.0  ;;  %v103_v48 = vld [vmem:[%s11733_s0 + $0x290] sm:$0xff] }
  0x37   :  { %232 = vadd.xlane.f32.xlu1 %v231_v54  ;;  %229 = vadd.xlane.f32.xlu0 %v228_v55  ;;  %v327_v54 = vsel %vm149_vm0, %v80_v52, 0.0  ;;  %v324_v55 = vsel %vm149_vm0, %v79_v53, 0.0  ;;  %v396_v52 = vsel %vm149_vm0, %v103_v48, 0.0  ;;  %v106_v53 = vld [vmem:[%s11733_s0 + $0x2a8] sm:$0xff]  ;;  %v121_v48 = vld [vmem:[%s11733_s0 + $0x320] sm:$0xff] }
  0x3b   :  { %238 = vadd.xlane.f32.xlu1 %v237_v58  ;;  %235 = vadd.xlane.f32.xlu0 %v234_v59  ;;  %v333_v58 = vsel %vm149_vm0, %v82_v56, 0.0  ;;  %v330_v59 = vsel %vm149_vm0, %v81_v57, 0.0  ;;  %v405_v57 = vsel %vm149_vm0, %v106_v53, 0.0 }
  0x3f   :  { %244 = vadd.xlane.f32.xlu1 %v243_v62  ;;  %241 = vadd.xlane.f32.xlu0 %v240_v63  ;;  %v339_v62 = vsel %vm149_vm0, %v84_v60, 0.0  ;;  %v336_v63 = vsel %vm149_vm0, %v83_v61, 0.0  ;;  %v107_v60 = vld [vmem:[%s11733_s0 + $0x2b0] sm:$0xff] }
  0x43   :  { %250 = vadd.xlane.f32.xlu1 %v249_v2  ;;  %247 = vadd.xlane.f32.xlu0 %v246_v3  ;;  %v345_v2 = vsel %vm149_vm0, %v86_v0, 0.0  ;;  %v342_v3 = vsel %vm149_vm0, %v85_v1, 0.0  ;;  %v408_v0 = vsel %vm149_vm0, %v107_v60, 0.0  ;;  %v110_v1 = vld [vmem:[%s11733_s0 + $0x2c8] sm:$0xff]  ;;  %v8011_v60 = vmov 269488144  }
  0x47   :  { %256 = vadd.xlane.f32.xlu1 %v255_v6  ;;  %253 = vadd.xlane.f32.xlu0 %v252_v7  ;;  %v351_v6 = vsel %vm149_vm0, %v88_v4, 0.0  ;;  %v348_v7 = vsel %vm149_vm0, %v87_v5, 0.0  ;;  %v417_v5 = vsel %vm149_vm0, %v110_v1, 0.0 }
  0x4b   :  { %262 = vadd.xlane.f32.xlu1 %v261_v10  ;;  %259 = vadd.xlane.f32.xlu0 %v258_v11  ;;  %v357_v10 = vsel %vm149_vm0, %v90_v8, 0.0  ;;  %v354_v11 = vsel %vm149_vm0, %v89_v9, 0.0  ;;  %v111_v8 = vld [vmem:[%s11733_s0 + $0x2d0] sm:$0xff] }
  0x4f   :  { %268 = vadd.xlane.f32.xlu1 %v267_v14  ;;  %265 = vadd.xlane.f32.xlu0 %v264_v15  ;;  %v363_v14 = vsel %vm149_vm0, %v92_v12, 0.0  ;;  %v360_v15 = vsel %vm149_vm0, %v91_v13, 0.0  ;;  %v420_v12 = vsel %vm149_vm0, %v111_v8, 0.0  ;;  %v114_v13 = vld [vmem:[%s11733_s0 + $0x2e8] sm:$0xff] }
  0x50   :  { %v429_v17 = vsel %vm149_vm0, %v114_v13, 0.0  ;;  %v126_v8 = vld [vmem:[%s11733_s0 + $0x348] sm:$0xff] }
  0x53   :  { %274 = vadd.xlane.f32.xlu1 %v273_v18  ;;  %271 = vadd.xlane.f32.xlu0 %v270_v19 }
  0x57   :  { %280 = vadd.xlane.f32.xlu1 %v279_v22  ;;  %277 = vadd.xlane.f32.xlu0 %v276_v23  ;;  %v8010_v22 = vmov 0   ;;  %v96_v23 = vld [vmem:[%s11733_s0 + $0x258] sm:$0xff] }
  0x58   :  { %7983 = vset.pattern.permute.xlu1 %v8010_v22  ;;  %7982 = vset.pattern.permute.xlu0 %v8010_v22  ;;  %v115_v22 = vld [vmem:[%s11733_s0 + $0x2f0] sm:$0xff] }
  0x5b   :  { %286 = vadd.xlane.f32.xlu1 %v285_v26  ;;  %283 = vadd.xlane.f32.xlu0 %v282_v27  ;;  %v375_v27 = vsel %vm149_vm0, %v96_v23, 0.0 }
  0x5f   :  { %292 = vadd.xlane.f32.xlu1 %v291_v30  ;;  %289 = vadd.xlane.f32.xlu0 %v288_v31  ;;  %v97_v30 = vld [vmem:[%s11733_s0 + $0x260] sm:$0xff] }
  0x63   :  { %298 = vadd.xlane.f32.xlu1 %v297_v34  ;;  %295 = vadd.xlane.f32.xlu0 %v294_v35  ;;  %v378_v34 = vsel %vm149_vm0, %v97_v30, 0.0  ;;  %v100_v35 = vld [vmem:[%s11733_s0 + $0x278] sm:$0xff]  ;;  %v117_v30 = vld [vmem:[%s11733_s0 + $0x300] sm:$0xff] }
  0x64   :  { %v438_v36 = vsel %vm149_vm0, %v117_v30, 0.0 }
  0x67   :  { %304 = vadd.xlane.f32.xlu1 %v303_v38  ;;  %301 = vadd.xlane.f32.xlu0 %v300_v39  ;;  %v387_v39 = vsel %vm149_vm0, %v100_v35, 0.0  ;;  %v441_v35 = vsel %vm149_vm0, %v118_v29, 0.0  ;;  %v465_v29 = vsel %vm149_vm0, %v126_v8, 0.0 }
  0x6b   :  { %310 = vadd.xlane.f32.xlu1 %v309_v42  ;;  %307 = vadd.xlane.f32.xlu0 %v306_v43  ;;  %v101_v42 = vld [vmem:[%s11733_s0 + $0x280] sm:$0xff] }
  0x6f   :  { %316 = vadd.xlane.f32.xlu1 %v315_v46  ;;  %313 = vadd.xlane.f32.xlu0 %v312_v47  ;;  %v390_v46 = vsel %vm149_vm0, %v101_v42, 0.0  ;;  %v104_v47 = vld [vmem:[%s11733_s0 + $0x298] sm:$0xff] }
  0x73   :  { %322 = vadd.xlane.f32.xlu1 %v321_v50  ;;  %319 = vadd.xlane.f32.xlu0 %v318_v51  ;;  %v399_v51 = vsel %vm149_vm0, %v104_v47, 0.0  ;;  %v122_v47 = vld [vmem:[%s11733_s0 + $0x328] sm:$0xff] }
  0x74   :  { %v453_v53 = vsel %vm149_vm0, %v122_v47, 0.0 }
  0x77   :  { %328 = vadd.xlane.f32.xlu1 %v327_v54  ;;  %325 = vadd.xlane.f32.xlu0 %v324_v55  ;;  %v105_v54 = vld [vmem:[%s11733_s0 + $0x2a0] sm:$0xff] }
  0x7b   :  { %334 = vadd.xlane.f32.xlu1 %v333_v58  ;;  %331 = vadd.xlane.f32.xlu0 %v330_v59  ;;  %v402_v58 = vsel %vm149_vm0, %v105_v54, 0.0  ;;  %v108_v59 = vld [vmem:[%s11733_s0 + $0x2b8] sm:$0xff]  ;;  %v450_v54 = vsel %vm149_vm0, %v121_v48, 0.0 }
  0x7f   :  { %340 = vadd.xlane.f32.xlu1 %v339_v62  ;;  %337 = vadd.xlane.f32.xlu0 %v336_v63  ;;  %v411_v63 = vsel %vm149_vm0, %v108_v59, 0.0  ;;  %v11737_v59 = vlaneseq }
  0x83   :  { %346 = vadd.xlane.f32.xlu1 %v345_v2  ;;  %343 = vadd.xlane.f32.xlu0 %v342_v3  ;;  %v109_v2 = vld [vmem:[%s11733_s0 + $0x2c0] sm:$0xff] }
  0x87   :  { %352 = vadd.xlane.f32.xlu1 %v351_v6  ;;  %349 = vadd.xlane.f32.xlu0 %v348_v7  ;;  %v414_v6 = vsel %vm149_vm0, %v109_v2, 0.0  ;;  %v112_v7 = vld [vmem:[%s11733_s0 + $0x2d8] sm:$0xff] }
  0x8b   :  { %358 = vadd.xlane.f32.xlu1 %v357_v10  ;;  %355 = vadd.xlane.f32.xlu0 %v354_v11  ;;  %v423_v11 = vsel %vm149_vm0, %v112_v7, 0.0 }
  0x8f   :  { %364 = vadd.xlane.f32.xlu1 %v363_v14  ;;  %361 = vadd.xlane.f32.xlu0 %v360_v15  ;;  %v113_v14 = vld [vmem:[%s11733_s0 + $0x2e0] sm:$0xff] }
  0x90   :  { %v8331_v18 = vpop.xlane.xlu1 %157  ;;  %v8333_v19 = vpop.xlane.xlu0 %151 }
  0x93   :  { %370 = vadd.xlane.f32.xlu1 %v369_v20  ;;  %367 = vadd.xlane.f32.xlu0 %v366_v21  ;;  %v426_v20 = vsel %vm149_vm0, %v113_v14, 0.0  ;;  %v116_v21 = vld [vmem:[%s11733_s0 + $0x2f8] sm:$0xff]  ;;  %v8014_v14 = vmov 1987475062  }
  0x94   :  { %v8343_v25 = vpop.xlane.xlu1 %160  ;;  %v8345_v26 = vpop.xlane.xlu0 %154 }
  0x97   :  { %376 = vadd.xlane.f32.xlu1 %v375_v27  ;;  %373 = vadd.xlane.f32.xlu0 %v372_v28  ;;  %v435_v27 = vsel %vm149_vm0, %v116_v21, 0.0  ;;  %v432_v28 = vsel %vm149_vm0, %v115_v22, 0.0 }
  0x98   :  { %v8355_v31 = vpop.xlane.xlu1 %166  ;;  %v8357_v32 = vpop.xlane.xlu0 %163 }
  0x9b   :  { %382 = vadd.xlane.f32.xlu1 %v381_v33  ;;  %379 = vadd.xlane.f32.xlu0 %v378_v34 }
  0x9c   :  { %v8367_v37 = vpop.xlane.xlu1 %172  ;;  %v8369_v38 = vpop.xlane.xlu0 %169 }
  0x9f   :  { %388 = vadd.xlane.f32.xlu1 %v387_v39  ;;  %385 = vadd.xlane.f32.xlu0 %v384_v40  ;;  %v120_v39 = vld [vmem:[%s11733_s0 + $0x318] sm:$0xff]  ;;  %v119_v40 = vld [vmem:[%s11733_s0 + $0x310] sm:$0xff] }
  0xa0   :  { %v8379_v43 = vpop.xlane.xlu1 %178  ;;  %v8381_v44 = vpop.xlane.xlu0 %175 }
  0xa3   :  { %394 = vadd.xlane.f32.xlu1 %v393_v45  ;;  %391 = vadd.xlane.f32.xlu0 %v390_v46  ;;  %v447_v45 = vsel %vm149_vm0, %v120_v39, 0.0  ;;  %v444_v46 = vsel %vm149_vm0, %v119_v40, 0.0  ;;  %v8015_v39 = vmov 1983009808  }
  0xa4   :  { %v8391_v49 = vpop.xlane.xlu1 %184  ;;  %v8393_v50 = vpop.xlane.xlu0 %181  ;;  %v4249_v40 = vunpack.c.l.s4 %v8015_v39 }
  0xa7   :  { %400 = vadd.xlane.f32.xlu1 %v399_v51  ;;  %397 = vadd.xlane.f32.xlu0 %v396_v52 }
  0xa8   :  { %v8403_v55 = vpop.xlane.xlu1 %190  ;;  %v8405_v56 = vpop.xlane.xlu0 %187 }
  0xab   :  { %406 = vadd.xlane.f32.xlu1 %v405_v57  ;;  %403 = vadd.xlane.f32.xlu0 %v402_v58  ;;  %v124_v57 = vld [vmem:[%s11733_s0 + $0x338] sm:$0xff]  ;;  %v123_v58 = vld [vmem:[%s11733_s0 + $0x330] sm:$0xff] }
  0xac   :  { %v8415_v61 = vpop.xlane.xlu1 %196  ;;  %v8417_v62 = vpop.xlane.xlu0 %193  ;;  %v456_v7 = vsel %vm149_vm0, %v123_v58, 0.0 }
  0xaf   :  { %412 = vadd.xlane.f32.xlu1 %v411_v63  ;;  %409 = vadd.xlane.f32.xlu0 %v408_v0  ;;  %v663_v63 = vunpack.c.l.s4 %v8011_v60  ;;  %v8012_v0 = vmov 842150450   ;;  %v130_v60 = vld [vmem:[%s11733_s0 + $0x368] sm:$0xff] }
  0xb0   :  { %v8427_v3 = vpop.xlane.xlu1 %202  ;;  %v8429_v4 = vpop.xlane.xlu0 %199  ;;  %v670_v1 = vunpack.c.l.s4 %v8012_v0  ;;  %v4250_v0 = vunpack.c.0.s8 %v4249_v40 }
  0xb1   :  { %v664_v21 = vunpack.c.0.s8 %v663_v63  ;;  %v129_v63 = vld [vmem:[%s11733_s0 + $0x360] sm:$0xff] }
  0xb2   :  { %v671_v22 = vunpack.c.0.s8 %v670_v1 }
  0xb3   :  { %418 = vadd.xlane.f32.xlu1 %v417_v5  ;;  %415 = vadd.xlane.f32.xlu0 %v414_v6  ;;  %v459_v6 = vsel %vm149_vm0, %v124_v57, 0.0 }
  0xb4   :  { %v8439_v9 = vpop.xlane.xlu1 %208  ;;  %v8441_v10 = vpop.xlane.xlu0 %205 }
  0xb7   :  { %424 = vadd.xlane.f32.xlu1 %v423_v11  ;;  %421 = vadd.xlane.f32.xlu0 %v420_v12  ;;  %v125_v11 = vld [vmem:[%s11733_s0 + $0x340] sm:$0xff]  ;;  %v8013_v12 = vmov 1414812756  }
  0xb8   :  { %v8451_v15 = vpop.xlane.xlu1 %214  ;;  %v8453_v16 = vpop.xlane.xlu0 %211  ;;  %v677_v13 = vunpack.c.l.s4 %v8013_v12  ;;  %v462_v30 = vsel %vm149_vm0, %v125_v11, 0.0 }
  0xbb   :  { %430 = vadd.xlane.f32.xlu1 %v429_v17  ;;  %427 = vadd.xlane.f32.xlu0 %v426_v20  ;;  %v684_v17 = vunpack.c.l.s4 %v8014_v14  ;;  %v8524_v20 = vshrl.u32 %v11737_v59, 7  ;;  %v474_v14 = vsel %vm149_vm0, %v129_v63, 0.0 }
  0xbc   :  { %v8463_v23 = vpop.xlane.xlu1 %220  ;;  %v8465_v24 = vpop.xlane.xlu0 %217 }
  0xbd   :  { %11819 = vst [vmem:[#allocation6_spill] sm:$0xff] %v8463_v23  ;;  %11820 = vst [vmem:[#allocation7_spill] sm:$0xff] %v8465_v24  ;;  %v8539_v47 = vsub.s32 %v664_v21, %v8524_v20  ;;  %v8542_v48 = vsub.s32 %v671_v22, %v8524_v20  ;;  %v131_v21 = vld [vmem:[%s11733_s0 + $0x370] sm:$0xff]  ;;  %v134_v22 = vld [vmem:[%s11733_s0 + $0x388] sm:$0xff] }
  0xbe   :  { %11829 = vst [vmem:[#allocation16_spill] sm:$0xff] %v8524_v20 }
  0xbf   :  { %436 = vadd.xlane.f32.xlu1 %v435_v27  ;;  %433 = vadd.xlane.f32.xlu0 %v432_v28  ;;  %v731_v8 = vrot.slane %v8331_v18, %v8542_v48  ;;  %v675_v39 = vrot.slane %v8333_v19, %v8542_v48 }
  0xc0   :  { %v8475_v33 = vpop.xlane.xlu1 %226  ;;  %v8477_v34 = vpop.xlane.xlu0 %223 }
  0xc1   :  { %11821 = vst [vmem:[#allocation8_spill] sm:$0xff] %v8475_v33  ;;  %11822 = vst [vmem:[#allocation9_spill] sm:$0xff] %v8477_v34 }
  0xc3   :  { %442 = vadd.xlane.f32.xlu1 %v441_v35  ;;  %439 = vadd.xlane.f32.xlu0 %v438_v36  ;;  %v128_v35 = vld [vmem:[%s11733_s0 + $0x358] sm:$0xff]  ;;  %v127_v36 = vld [vmem:[%s11733_s0 + $0x350] sm:$0xff] }
  0xc4   :  { %v8487_v41 = vpop.xlane.xlu1 %232  ;;  %v8489_v42 = vpop.xlane.xlu0 %229  ;;  %v471_v57 = vsel %vm149_vm0, %v128_v35, 0.0  ;;  %v468_v58 = vsel %vm149_vm0, %v127_v36, 0.0  ;;  %v668_v36 = vrot.slane %v8333_v19, %v8539_v47 }
  0xc5   :  { %11823 = vst [vmem:[#allocation10_spill] sm:$0xff] %v8487_v41  ;;  %11824 = vst [vmem:[#allocation11_spill] sm:$0xff] %v8489_v42 }
  0xc7   :  { %448 = vadd.xlane.f32.xlu1 %v447_v45  ;;  %445 = vadd.xlane.f32.xlu0 %v444_v46  ;;  %v678_v45 = vunpack.c.0.s8 %v677_v13  ;;  %v685_v46 = vunpack.c.0.s8 %v684_v17  ;;  %v477_v13 = vsel %vm149_vm0, %v130_v60, 0.0  ;;  %v132_v17 = vld [vmem:[%s11733_s0 + $0x378] sm:$0xff] }
  0xc8   :  { %v8499_v51 = vpop.xlane.xlu1 %238  ;;  %v8501_v52 = vpop.xlane.xlu0 %235 }
  0xc9   :  { %11825 = vst [vmem:[#allocation12_spill] sm:$0xff] %v8499_v51  ;;  %11826 = vst [vmem:[#allocation13_spill] sm:$0xff] %v8501_v52  ;;  %v8557_v1 = vsub.s32 %v678_v45, %v8524_v20  ;;  %v483_v45 = vsel %vm149_vm0, %v132_v17, 0.0 }
  0xcb   :  { %454 = vadd.xlane.f32.xlu1 %v453_v53  ;;  %451 = vadd.xlane.f32.xlu0 %v450_v54  ;;  %v682_v40 = vrot.slane %v8333_v19, %v8557_v1  ;;  %v710_v59 = vrot.slane %v8345_v26, %v8557_v1  ;;  %v934_v52 = vrot.slane %v8379_v43, %v8557_v1 }
  0xcc   :  { %v8511_v2 = vpop.xlane.xlu1 %244  ;;  %v8513_v5 = vpop.xlane.xlu0 %241 }
  0xcd   :  { %11827 = vst [vmem:[#allocation14_spill] sm:$0xff] %v8511_v2  ;;  %11828 = vst [vmem:[#allocation15_spill] sm:$0xff] %v8513_v5 }
  0xcf   :  { %460 = vadd.xlane.f32.xlu1 %v459_v6  ;;  %457 = vadd.xlane.f32.xlu0 %v456_v7  ;;  %v8560_v6 = vsub.s32 %v685_v46, %v8524_v20  ;;  %v724_v7 = vrot.slane %v8331_v18, %v8539_v47  ;;  %v480_v46 = vsel %vm149_vm0, %v131_v21, 0.0  ;;  %v135_v21 = vld [vmem:[%s11733_s0 + $0x390] sm:$0xff] }
  0xd0   :  { %v8526_v27 = vpop.xlane.xlu1 %250  ;;  %v8528_v28 = vpop.xlane.xlu0 %247  ;;  %v492_v5 = vsel %vm149_vm0, %v135_v21, 0.0 }
  0xd1   :  { %11830 = vst [vmem:[#allocation17_spill] sm:$0xff] %v8526_v27  ;;  %11831 = vst [vmem:[#allocation18_spill] sm:$0xff] %v8528_v28  ;;  %v745_v35 = vrot.slane %v8331_v18, %v8560_v6  ;;  %v8603_v60 = vcombine.low %v724_v7, %v731_v8  ;;  %v689_v63 = vrot.slane %v8333_v19, %v8560_v6  ;;  %v138_v7 = vld [vmem:[%s11733_s0 + $0x3a8] sm:$0xff]  ;;  %v137_v19 = vld [vmem:[%s11733_s0 + $0x3a0] sm:$0xff] }
  0xd2   :  { %v696_v8 = vrot.slane %v8345_v26, %v8539_v47  ;;  %v501_v2 = vsel %vm149_vm0, %v138_v7, 0.0  ;;  %v941_v51 = vrot.slane %v8379_v43, %v8560_v6 }
  0xd3   :  { %466 = vadd.xlane.f32.xlu1 %v465_v29  ;;  %463 = vadd.xlane.f32.xlu0 %v462_v30  ;;  %v8582_v29 = vsub.s32 %v4250_v0, %v8524_v20  ;;  %v738_v30 = vrot.slane %v8331_v18, %v8557_v1  ;;  %v133_v18 = vld [vmem:[%s11733_s0 + $0x380] sm:$0xff]  ;;  %v752_v0 = vrot.slane %v8343_v25, %v8539_v47 }
  0xd4   :  { %v8544_v53 = vpop.xlane.xlu1 %256  ;;  %v8546_v54 = vpop.xlane.xlu0 %253  ;;  %v717_v20 = vrot.slane %v8345_v26, %v8560_v6  ;;  %v486_v28 = vsel %vm149_vm0, %v133_v18, 0.0  ;;  %v8670_v18 = vcombine.low %v682_v40, %v689_v63  ;;  %v815_v40 = vrot.slane %v8355_v31, %v8542_v48 }
  0xd5   :  { %11832 = vst [vmem:[#allocation19_spill] sm:$0xff] %v8544_v53  ;;  %11833 = vst [vmem:[#allocation20_spill] sm:$0xff] %v8546_v54  ;;  %v8643_v54 = vcombine.low %v668_v36, %v675_v39  ;;  %v766_v53 = vrot.slane %v8343_v25, %v8557_v1  ;;  %v498_v36 = vsel %vm149_vm0, %v137_v19, 0.0 }
  0xd6   :  { %v4264_v7 = vcombine.low %v710_v59, %v717_v20  ;;  %v822_v59 = vrot.slane %v8355_v31, %v8557_v1  ;;  %v4261_v34 = vrot.slane %v8670_v18, %v8582_v29  ;;  %v4400_v18 = vcombine.low %v934_v52, %v941_v51 }
  0xd7   :  { %472 = vadd.xlane.f32.xlu1 %v471_v57  ;;  %469 = vadd.xlane.f32.xlu0 %v468_v58  ;;  %v489_v57 = vsel %vm149_vm0, %v134_v22, 0.0  ;;  %v136_v58 = vld [vmem:[%s11733_s0 + $0x398] sm:$0xff]  ;;  %v703_v22 = vrot.slane %v8345_v26, %v8542_v48  ;;  %v773_v26 = vrot.slane %v8343_v25, %v8560_v6  ;;  %v906_v51 = vrot.slane %v8381_v44, %v8557_v1 }
  0xd8   :  { %v8566_v11 = vpop.xlane.xlu1 %262  ;;  %v8568_v12 = vpop.xlane.xlu0 %259  ;;  %v495_v27 = vsel %vm149_vm0, %v136_v58, 0.0  ;;  %v913_v52 = vrot.slane %v8381_v44, %v8560_v6 }
  0xd9   :  { %11834 = vst [vmem:[#allocation21_spill] sm:$0xff] %v8566_v11  ;;  %11835 = vst [vmem:[#allocation22_spill] sm:$0xff] %v8568_v12  ;;  %v142_v12 = vld [vmem:[%s11733_s0 + $0x3c8] sm:$0xff]  ;;  %v8641_v11 = vcombine.low %v738_v30, %v745_v35  ;;  %v4263_v21 = vcombine.low %v696_v8, %v703_v22  ;;  %v8674_v19 = vcombine.low %v766_v53, %v773_v26 }
  0xda   :  { %v829_v53 = vrot.slane %v8355_v31, %v8560_v6  ;;  %v4278_v8 = vrot.slane %v4264_v7, %v8582_v29  ;;  %v871_v22 = vrot.slane %v8367_v37, %v8542_v48  ;;  %v878_v26 = vrot.slane %v8367_v37, %v8557_v1 }
  0xdb   :  { %478 = vadd.xlane.f32.xlu1 %v477_v13  ;;  %475 = vadd.xlane.f32.xlu0 %v474_v14  ;;  %v759_v13 = vrot.slane %v8343_v25, %v8542_v48  ;;  %v857_v7 = vrot.slane %v8369_v38, %v8560_v6 }
  0xdc   :  { %v8611_v14 = vpop.xlane.xlu1 %268  ;;  %v8613_v17 = vpop.xlane.xlu0 %265 }
  0xdd   :  { %11836 = vst [vmem:[#allocation23_spill] sm:$0xff] %v8611_v14  ;;  %11837 = vst [vmem:[#allocation24_spill] sm:$0xff] %v8613_v17  ;;  %v140_v17 = vld [vmem:[%s11733_s0 + $0x3b8] sm:$0xff]  ;;  %v139_v14 = vld [vmem:[%s11733_s0 + $0x3b0] sm:$0xff]  ;;  %v8672_v58 = vcombine.low %v752_v0, %v759_v13  ;;  %v4271_v13 = vrot.slane %v4263_v21, %v8582_v29  ;;  %v850_v21 = vrot.slane %v8369_v38, %v8557_v1 }
  0xde   :  { %v8659_v39 = vsel %vm149_vm0, %v140_v17, 0.0  ;;  %v8662_v25 = vsel %vm149_vm0, %v139_v14, 0.0  ;;  %v4288_v17 = vrot.slane %v8603_v60, %v8582_v29  ;;  %v4295_v14 = vrot.slane %v8641_v11, %v8582_v29 }
  0xdf   :  { %484 = vadd.xlane.f32.xlu1 %v483_v45  ;;  %481 = vadd.xlane.f32.xlu0 %v480_v46  ;;  %v8665_v45 = vsel %vm149_vm0, %v142_v12, 0.0  ;;  %v141_v46 = vld [vmem:[%s11733_s0 + $0x3c0] sm:$0xff]  ;;  %v4254_v12 = vrot.slane %v8643_v54, %v8582_v29  ;;  %v780_v54 = vrot.slane %v8357_v32, %v8539_v47  ;;  %v787_v11 = vrot.slane %v8357_v32, %v8542_v48 }
  0xe0   :  { %v8653_v30 = vpop.xlane.xlu1 %274  ;;  %v8655_v35 = vpop.xlane.xlu0 %271  ;;  %v8689_v20 = vsel %vm149_vm0, %v141_v46, 0.0  ;;  %v794_v60 = vrot.slane %v8357_v32, %v8557_v1  ;;  %v885_v46 = vrot.slane %v8367_v37, %v8560_v6  ;;  %v8762_v23 = vcombine.low %v850_v21, %v857_v7 }
  0xe1   :  { %11838 = vst [vmem:[#allocation25_spill] sm:$0xff] %v8653_v30  ;;  %11839 = vst [vmem:[#allocation26_spill] sm:$0xff] %v8655_v35  ;;  %v808_v35 = vrot.slane %v8355_v31, %v8539_v47  ;;  %v801_v31 = vrot.slane %v8357_v32, %v8560_v6  ;;  %v843_v32 = vrot.slane %v8369_v38, %v8542_v48 }
  0xe2   :  { %v927_v30 = vrot.slane %v8379_v43, %v8542_v48  ;;  %v8748_v41 = vcombine.low %v780_v54, %v787_v11  ;;  %v8826_v21 = vcombine.low %v906_v51, %v913_v52 }
  0xe3   :  { %490 = vadd.xlane.f32.xlu1 %v489_v57  ;;  %487 = vadd.xlane.f32.xlu0 %v486_v28  ;;  %v144_v28 = vld [vmem:[%s11733_s0 + $0x3d8] sm:$0xff]  ;;  %v864_v57 = vrot.slane %v8367_v37, %v8539_v47  ;;  %v920_v37 = vrot.slane %v8379_v43, %v8539_v47  ;;  %v8752_v33 = vcombine.low %v794_v60, %v801_v31 }
  0xe4   :  { %v8699_v63 = vpop.xlane.xlu1 %280  ;;  %v8701_v0 = vpop.xlane.xlu0 %277  ;;  %v983_v60 = vrot.slane %v8391_v49, %v8542_v48  ;;  %v997_v31 = vrot.slane %v8391_v49, %v8560_v6 }
  0xe5   :  { %11840 = vst [vmem:[#allocation27_spill] sm:$0xff] %v8699_v63  ;;  %11841 = vst [vmem:[#allocation28_spill] sm:$0xff] %v8701_v0  ;;  %v836_v0 = vrot.slane %v8369_v38, %v8539_v47  ;;  %v8727_v63 = vsel %vm149_vm0, %v144_v28, 0.0  ;;  %v8746_v28 = vcombine.low %v822_v59, %v829_v53  ;;  %v8754_v43 = vcombine.low %v864_v57, %v871_v22 }
  0xe6   :  { %v4399_v59 = vcombine.low %v920_v37, %v927_v30  ;;  %v892_v53 = vrot.slane %v8381_v44, %v8539_v47  ;;  %v8784_v30 = vcombine.low %v4254_v12, %v4261_v34  ;;  %v955_v34 = vrot.slane %v8393_v50, %v8542_v48 }
  0xe7   :  { %496 = vadd.xlane.f32.xlu1 %v495_v27  ;;  %493 = vadd.xlane.f32.xlu0 %v492_v5  ;;  %v143_v5 = vld [vmem:[%s11733_s0 + $0x3d0] sm:$0xff]  ;;  %v8744_v27 = vcombine.low %v808_v35, %v815_v40  ;;  %v8760_v24 = vcombine.low %v836_v0, %v843_v32  ;;  %v8765_v40 = vcombine.low %v4271_v13, %v4278_v8  ;;  %v145_v8 = vld [vmem:[%s11733_s0 + $0x3e0] sm:$0xff] }
  0xe8   :  { %v8737_v42 = vpop.xlane.xlu1 %286  ;;  %v8739_v38 = vpop.xlane.xlu0 %283  ;;  %v516_v35 = vsel %vm149_vm0, %v143_v5, 0.0  ;;  %v4312_v0 = vrot.slane %v8674_v19, %v8582_v29  ;;  %v962_v57 = vrot.slane %v8393_v50, %v8557_v1  ;;  %v969_v19 = vrot.slane %v8393_v50, %v8560_v6 }
  0xe9   :  { %11842 = vst [vmem:[#allocation29_spill] sm:$0xff] %v8737_v42  ;;  %11843 = vst [vmem:[#allocation30_spill] sm:$0xff] %v8739_v38  ;;  %v8756_v42 = vcombine.low %v878_v26, %v885_v46  ;;  %v8758_v38 = vcombine.low %v4288_v17, %v4295_v14  ;;  %v146_v17 = vld [vmem:[%s11733_s0 + $0x3e8] sm:$0xff]  ;;  %v976_v14 = vrot.slane %v8391_v49, %v8539_v47 }
  0xea   :  { %v525_v12 = vsel %vm149_vm0, %v146_v17, 0.0  ;;  %v1032_v22 = vrot.slane %v8403_v55, %v8539_v47  ;;  %v1039_v26 = vrot.slane %v8403_v55, %v8542_v48  ;;  %v1053_v46 = vrot.slane %v8403_v55, %v8560_v6 }
  0xeb   :  { %502 = vadd.xlane.f32.xlu1 %v501_v2  ;;  %499 = vadd.xlane.f32.xlu0 %v498_v36  ;;  %v4305_v2 = vrot.slane %v8672_v58, %v8582_v29  ;;  %v899_v36 = vrot.slane %v8381_v44, %v8542_v48  ;;  %v990_v58 = vrot.slane %v8391_v49, %v8557_v1 }
  0xec   :  { %v8769_v54 = vpop.xlane.xlu1 %292  ;;  %v8771_v11 = vpop.xlane.xlu0 %289  ;;  %v948_v44 = vrot.slane %v8393_v50, %v8539_v47  ;;  %v1046_v50 = vrot.slane %v8403_v55, %v8557_v1  ;;  %v4433_v7 = vcombine.low %v976_v14, %v983_v60  ;;  %v4322_v37 = vrot.slane %v8748_v41, %v8582_v29 }
  0xed   :  { %11844 = vst [vmem:[#allocation31_spill] sm:$0xff] %v8769_v54  ;;  %11845 = vst [vmem:[#allocation32_spill] sm:$0xff] %v8771_v11  ;;  %v8824_v32 = vcombine.low %v892_v53, %v899_v36  ;;  %v4434_v5 = vcombine.low %v990_v58, %v997_v31  ;;  %v8835_v17 = vcombine.low %v4305_v2, %v4312_v0 }
  0xee   :  { %v8837_v55 = vcombine.low %v962_v57, %v969_v19  ;;  %v1004_v53 = vrot.slane %v8405_v56, %v8539_v47  ;;  %v1011_v36 = vrot.slane %v8405_v56, %v8542_v48  ;;  %v1018_v41 = vrot.slane %v8405_v56, %v8557_v1 }
  0xef   :  { %508 = vadd.xlane.f32.xlu1 %v8659_v39  ;;  %505 = vadd.xlane.f32.xlu0 %v8662_v25  ;;  %v4407_v39 = vrot.slane %v4399_v59, %v8582_v29  ;;  %v4414_v25 = vrot.slane %v4400_v18, %v8582_v29  ;;  %v8830_v59 = vcombine.low %v948_v44, %v955_v34  ;;  %v522_v18 = vsel %vm149_vm0, %v145_v8, 0.0 }
  0xf0   :  { %v8807_v13 = vpop.xlane.xlu1 %298  ;;  %v8809_v49 = vpop.xlane.xlu0 %295  ;;  %v8852_v2 = vcombine.low %v1032_v22, %v1039_v26  ;;  %v8854_v52 = vcombine.low %v1046_v50, %v1053_v46  ;;  %v1025_v14 = vrot.slane %v8405_v56, %v8560_v6  ;;  %v1088_v58 = vrot.slane %v8415_v61, %v8539_v47 }
  0xf1   :  { %11846 = vst [vmem:[#allocation33_spill] sm:$0xff] %v8807_v13  ;;  %11847 = vst [vmem:[#allocation34_spill] sm:$0xff] %v8809_v49  ;;  %v8858_v60 = vcombine.low %v4407_v39, %v4414_v25  ;;  %v1095_v0 = vrot.slane %v8415_v61, %v8542_v48  ;;  %v4329_v31 = vrot.slane %v8752_v33, %v8582_v29 }
  0xf2   :  { %v4441_v44 = vrot.slane %v4433_v7, %v8582_v29  ;;  %v1102_v34 = vrot.slane %v8415_v61, %v8557_v1  ;;  %v1109_v57 = vrot.slane %v8415_v61, %v8560_v6  ;;  %v1060_v56 = vrot.slane %v8417_v62, %v8539_v47 }
  0xf3   :  { %514 = vadd.xlane.f32.xlu1 %v8665_v45  ;;  %511 = vadd.xlane.f32.xlu0 %v8689_v20  ;;  %v148_v20 = vld [vmem:[%s11733_s0 + $0x3f8] sm:$0xff]  ;;  %v1067_v8 = vrot.slane %v8417_v62, %v8542_v48  ;;  %v1074_v33 = vrot.slane %v8417_v62, %v8557_v1  ;;  %v1081_v39 = vrot.slane %v8417_v62, %v8560_v6 }
  0xf4   :  { %v8845_v51 = vpop.xlane.xlu1 %304  ;;  %v8847_v45 = vpop.xlane.xlu0 %301  ;;  %v531_v19 = vsel %vm149_vm0, %v148_v20, 0.0  ;;  %v1144_v22 = vrot.slane %v8427_v3, %v8539_v47  ;;  %v1151_v26 = vrot.slane %v8427_v3, %v8542_v48  ;;  %v1158_v50 = vrot.slane %v8427_v3, %v8557_v1 }
  0xf5   :  { %11848 = vst [vmem:[#allocation35_spill] sm:$0xff] %v8845_v51  ;;  %11849 = vst [vmem:[#allocation36_spill] sm:$0xff] %v8847_v45  ;;  %v1165_v62 = vrot.slane %v8427_v3, %v8560_v6  ;;  %v1116_v46 = vrot.slane %v8429_v4, %v8539_v47  ;;  %v1123_v7 = vrot.slane %v8429_v4, %v8542_v48 }
  0xf6   :  { %v1137_v20 = vrot.slane %v8429_v4, %v8560_v6  ;;  %v8909_v45 = vcombine.low %v1088_v58, %v1095_v0  ;;  %v8912_v51 = vcombine.low %v1102_v34, %v1109_v57  ;;  %v8914_v49 = vcombine.low %v1060_v56, %v1067_v8 }
  0xf7   :  { %520 = vadd.xlane.f32.xlu1 %v8727_v63  ;;  %517 = vadd.xlane.f32.xlu0 %v516_v35  ;;  %v147_v63 = vld [vmem:[%s11733_s0 + $0x3f0] sm:$0xff]  ;;  %v4448_v35 = vrot.slane %v4434_v5, %v8582_v29  ;;  %v1130_v5 = vrot.slane %v8429_v4, %v8557_v1  ;;  %v8916_v13 = vcombine.low %v1074_v33, %v1081_v39 }
  0xf8   :  { %v8881_v25 = vpop.xlane.xlu1 %310  ;;  %v8883_v61 = vpop.xlane.xlu0 %307  ;;  %v528_v3 = vsel %vm149_vm0, %v147_v63, 0.0  ;;  %v8922_v4 = vcombine.low %v4322_v37, %v4329_v31  ;;  %v1200_v58 = vrot.slane %v8439_v9, %v8539_v47  ;;  %v4346_v37 = vrot.slane %v8746_v28, %v8582_v29 }
  0xf9   :  { %11850 = vst [vmem:[#allocation37_spill] sm:$0xff] %v8881_v25  ;;  %11851 = vst [vmem:[#allocation38_spill] sm:$0xff] %v8883_v61  ;;  %v8905_v61 = vcombine.low %v1004_v53, %v1011_v36  ;;  %v8907_v25 = vcombine.low %v1018_v41, %v1025_v14  ;;  %v8924_v53 = vcombine.low %v1144_v22, %v1151_v26  ;;  %vm7470_vm0 = vcmask 1041409  }
  0xfa   :  { %v8926_v36 = vcombine.low %v1158_v50, %v1165_v62  ;;  %v8932_v41 = vcombine.low %v1116_v46, %v1123_v7  ;;  %v8934_v14 = vcombine.low %v1130_v5, %v1137_v20  ;;  %v1207_v0 = vrot.slane %v8439_v9, %v8542_v48 }
  0xfb   :  { %526 = vadd.xlane.f32.xlu1 %v525_v12  ;;  %523 = vadd.xlane.f32.xlu0 %v522_v18  ;;  %v8928_v12 = vcombine.low %v4441_v44, %v4448_v35  ;;  %v4339_v18 = vrot.slane %v8744_v27, %v8582_v29  ;;  %v1214_v31 = vrot.slane %v8439_v9, %v8557_v1 }
  0xfc   :  { %v8918_v11 = vpop.xlane.xlu1 %316  ;;  %v8920_v54 = vpop.xlane.xlu0 %313  ;;  %11854 = vst [vmem:[#allocation41_spill] sm:$0xff] %v8934_v14  ;;  %v1221_v44 = vrot.slane %v8439_v9, %v8560_v6  ;;  %v1172_v27 = vrot.slane %v8441_v10, %v8539_v47  ;;  %v1179_v34 = vrot.slane %v8441_v10, %v8542_v48  ;;  %v1186_v28 = vrot.slane %v8441_v10, %v8557_v1 }
  0xfd   :  { %11852 = vst [vmem:[#allocation39_spill] sm:$0xff] %v8918_v11  ;;  %11853 = vst [vmem:[#allocation40_spill] sm:$0xff] %v8920_v54  ;;  %v4475_v8 = vrot.slane %v8852_v2, %v8582_v29  ;;  %v1193_v9 = vrot.slane %v8441_v10, %v8560_v6  ;;  %v1263_v33 = vrot.slane %v8451_v15, %v8542_v48 }
  0xfe   :  { %v4482_v39 = vrot.slane %v8854_v52, %v8582_v29  ;;  %v1270_v63 = vrot.slane %v8451_v15, %v8557_v1  ;;  %v1277_v35 = vrot.slane %v8451_v15, %v8560_v6  ;;  %v1228_v2 = vrot.slane %v8453_v16, %v8539_v47 }
  0xff   :  { %532 = vadd.xlane.f32.xlu1 %v531_v19  ;;  %529 = vadd.xlane.f32.xlu0 %v528_v3  ;;  %v1256_v19 = vrot.slane %v8451_v15, %v8539_v47  ;;  %v1235_v10 = vrot.slane %v8453_v16, %v8542_v48  ;;  %v8974_v22 = vcombine.low %v1200_v58, %v1207_v0  ;;  %v11858_v15 = vld [vmem:[#allocation6_spill] sm:$0xff] }
 0x100   :  { %v8952_v57 = vpop.xlane.xlu1 %322  ;;  %v8954_v56 = vpop.xlane.xlu0 %319  ;;  %v8976_v26 = vcombine.low %v1214_v31, %v1221_v44  ;;  %v1242_v50 = vrot.slane %v8453_v16, %v8557_v1  ;;  %v1249_v52 = vrot.slane %v8453_v16, %v8560_v6  ;;  %v8982_v62 = vcombine.low %v1172_v27, %v1179_v34 }
 0x101   :  { %11855 = vst [vmem:[#allocation42_spill] sm:$0xff] %v8952_v57  ;;  %11856 = vst [vmem:[#allocation43_spill] sm:$0xff] %v8954_v56  ;;  %v1312_v46 = vrot.slane %v11858_v15, %v8539_v47  ;;  %v1319_v7 = vrot.slane %v11858_v15, %v8542_v48  ;;  %v8992_v3 = vcombine.low %v4339_v18, %v4346_v37  ;;  %v11864_v37 = vld [vmem:[#allocation7_spill] sm:$0xff] }
 0x102   :  { %11857 = vst [vmem:[#allocation44_spill] sm:$0xff] %v8982_v62  ;;  %v8994_v58 = vcombine.low %v1186_v28, %v1193_v9  ;;  %v1326_v0 = vrot.slane %v11858_v15, %v8557_v1  ;;  %v1333_v16 = vrot.slane %v11858_v15, %v8560_v6  ;;  %v4356_v31 = vrot.slane %v8760_v24, %v8582_v29 }
 0x103   :  { %v9002_v44 = vcombine.low %v1256_v19, %v1263_v33  ;;  %v9004_v27 = vcombine.low %v1270_v63, %v1277_v35  ;;  %v9006_v34 = vcombine.low %v1228_v2, %v1235_v10  ;;  %v9010_v18 = vcombine.low %v1242_v50, %v1249_v52 }
 0x104   :  { %v8988_v5 = vpop.xlane.xlu1 %328  ;;  %v8990_v20 = vpop.xlane.xlu0 %325  ;;  %11861 = vst [vmem:[#allocation46_spill] sm:$0xff] %v8994_v58  ;;  %v1284_v28 = vrot.slane %v11864_v37, %v8539_v47  ;;  %v4363_v9 = vrot.slane %v8762_v23, %v8582_v29  ;;  %v4509_v15 = vrot.slane %v8909_v45, %v8582_v29  ;;  %v9018_v24 = vcombine.low %v1312_v46, %v1319_v7  ;;  %v11867_v23 = vld [vmem:[#allocation8_spill] sm:$0xff]  ;;  %v11868_v7 = vld [vmem:[#allocation9_spill] sm:$0xff] }
 0x105   :  { %11859 = vst [vmem:[#allocation6_spill] sm:$0xff] %v8988_v5  ;;  %11860 = vst [vmem:[#allocation45_spill] sm:$0xff] %v8990_v20  ;;  %v9008_v20 = vcombine.low %v4475_v8, %v4482_v39  ;;  %v1291_v19 = vrot.slane %v11864_v37, %v8542_v48  ;;  %v1298_v8 = vrot.slane %v11864_v37, %v8557_v1 }
 0x106   :  { %11862 = vst [vmem:[#allocation47_spill] sm:$0xff] %v9006_v34  ;;  %11863 = vst [vmem:[#allocation48_spill] sm:$0xff] %v9010_v18  ;;  %v1305_v33 = vrot.slane %v11864_v37, %v8560_v6  ;;  %v9030_v35 = vcombine.low %v1326_v0, %v1333_v16  ;;  %v1368_v45 = vrot.slane %v11867_v23, %v8539_v47 }
 0x107   :  { %v4516_v2 = vrot.slane %v8912_v51, %v8582_v29  ;;  %v4373_v10 = vrot.slane %v8754_v43, %v8582_v29  ;;  %v1375_v50 = vrot.slane %v11867_v23, %v8542_v48  ;;  %v1382_v52 = vrot.slane %v11867_v23, %v8557_v1 }
 0x108   :  { %v9026_v39 = vpop.xlane.xlu1 %334  ;;  %v9028_v63 = vpop.xlane.xlu0 %331  ;;  %v1389_v46 = vrot.slane %v11867_v23, %v8560_v6  ;;  %v1340_v0 = vrot.slane %v11868_v7, %v8539_v47  ;;  %v1347_v16 = vrot.slane %v11868_v7, %v8542_v48  ;;  %v1354_v51 = vrot.slane %v11868_v7, %v8557_v1 }
 0x109   :  { %11865 = vst [vmem:[#allocation7_spill] sm:$0xff] %v9026_v39  ;;  %11866 = vst [vmem:[#allocation49_spill] sm:$0xff] %v9028_v63  ;;  %v1361_v43 = vrot.slane %v11868_v7, %v8560_v6  ;;  %v4380_v37 = vrot.slane %v8756_v42, %v8582_v29  ;;  %v11869_v63 = vld [vmem:[#allocation10_spill] sm:$0xff]  ;;  %v9066_v7 = vcombine.low %v1284_v28, %v1291_v19  ;;  %v11873_v42 = vld [vmem:[#allocation11_spill] sm:$0xff] }
 0x10a   :  { %v1424_v39 = vrot.slane %v11869_v63, %v8539_v47  ;;  %v1431_v23 = vrot.slane %v11869_v63, %v8542_v48  ;;  %v1438_v5 = vrot.slane %v11869_v63, %v8557_v1  ;;  %v1445_v56 = vrot.slane %v11869_v63, %v8560_v6 }
 0x10b   :  { %11872 = vst [vmem:[#allocation10_spill] sm:$0xff] %v9066_v7  ;;  %v1396_v11 = vrot.slane %v11873_v42, %v8539_v47  ;;  %v1403_v18 = vrot.slane %v11873_v42, %v8542_v48  ;;  %v9072_v34 = vcombine.low %v4356_v31, %v4363_v9  ;;  %v9074_v58 = vcombine.low %v1298_v8, %v1305_v33 }
 0x10c   :  { %v9062_v57 = vpop.xlane.xlu1 %340  ;;  %v9064_v54 = vpop.xlane.xlu0 %337  ;;  %v9076_v62 = vcombine.low %v1368_v45, %v1375_v50  ;;  %v9078_v14 = vcombine.low %v1382_v52, %v1389_v46  ;;  %v9080_v63 = vcombine.low %v4509_v15, %v4516_v2  ;;  %v9084_v28 = vcombine.low %v1354_v51, %v1361_v43  ;;  %v11880_v50 = vld [vmem:[#allocation12_spill] sm:$0xff] }
 0x10d   :  { %11870 = vst [vmem:[#allocation8_spill] sm:$0xff] %v9062_v57  ;;  %11871 = vst [vmem:[#allocation9_spill] sm:$0xff] %v9064_v54  ;;  %v9082_v57 = vcombine.low %v1340_v0, %v1347_v16  ;;  %v1410_v19 = vrot.slane %v11873_v42, %v8557_v1  ;;  %v4543_v54 = vrot.slane %v8924_v53, %v8582_v29  ;;  %v11882_v0 = vld [vmem:[#allocation14_spill] sm:$0xff] }
 0x10e   :  { %11874 = vst [vmem:[#allocation11_spill] sm:$0xff] %v9074_v58  ;;  %11876 = vst [vmem:[#allocation51_spill] sm:$0xff] %v9084_v28  ;;  %v9090_v31 = vcombine.low %v1424_v39, %v1431_v23  ;;  %v9092_v9 = vcombine.low %v1438_v5, %v1445_v56  ;;  %v1417_v8 = vrot.slane %v11873_v42, %v8560_v6  ;;  %v11887_v58 = vld [vmem:[#allocation17_spill] sm:$0xff] }
 0x10f   :  { %11875 = vst [vmem:[#allocation50_spill] sm:$0xff] %v9082_v57  ;;  %v9101_v45 = vcombine.low %v4373_v10, %v4380_v37  ;;  %v9103_v2 = vcombine.low %v1396_v11, %v1403_v18  ;;  %v1480_v53 = vrot.slane %v11880_v50, %v8539_v47  ;;  %v4550_v56 = vrot.slane %v8926_v36, %v8582_v29  ;;  %v11881_v11 = vld [vmem:[#allocation13_spill] sm:$0xff] }
 0x110   :  { %v9096_v33 = vpop.xlane.xlu1 %346  ;;  %6426 = vperm.xlu1 %7983, %v8765_v40   ;;  %v9099_v15 = vpop.xlane.xlu0 %343  ;;  %v4390_v5 = vrot.slane %v8824_v32, %v8582_v29  ;;  %v1487_v39 = vrot.slane %v11880_v50, %v8542_v48  ;;  %v1494_v40 = vrot.slane %v11880_v50, %v8557_v1  ;;  %v1501_v10 = vrot.slane %v11880_v50, %v8560_v6 }
 0x111   :  { %11877 = vst [vmem:[#allocation52_spill] sm:$0xff] %v9096_v33  ;;  %11878 = vst [vmem:[#allocation53_spill] sm:$0xff] %v9099_v15  ;;  %v1452_v18 = vrot.slane %v11881_v11, %v8539_v47  ;;  %v1459_v52 = vrot.slane %v11881_v11, %v8542_v48  ;;  %v1466_v36 = vrot.slane %v11881_v11, %v8557_v1 }
 0x112   :  { %11879 = vst [vmem:[#allocation54_spill] sm:$0xff] %v9103_v2  ;;  %v1473_v32 = vrot.slane %v11881_v11, %v8560_v6  ;;  %v4397_v46 = vrot.slane %v8826_v21, %v8582_v29  ;;  %v1536_v16 = vrot.slane %v11882_v0, %v8539_v47  ;;  %v1543_v51 = vrot.slane %v11882_v0, %v8542_v48  ;;  %v11885_v21 = vld [vmem:[#allocation15_spill] sm:$0xff] }
 0x113   :  { %v1550_v43 = vrot.slane %v11882_v0, %v8557_v1  ;;  %v1557_v37 = vrot.slane %v11882_v0, %v8560_v6  ;;  %v1508_v50 = vrot.slane %v11885_v21, %v8539_v47  ;;  %v1515_v11 = vrot.slane %v11885_v21, %v8542_v48 }
 0x114   :  { %v9135_v23 = vpop.xlane.xlu1 %352  ;;  %6429 = vperm.xlu1 %7983, %v8758_v38   ;;  %v9138_v42 = vpop.xlane.xlu0 %349  ;;  %v1522_v15 = vrot.slane %v11885_v21, %v8557_v1  ;;  %v1529_v2 = vrot.slane %v11885_v21, %v8560_v6  ;;  %v9149_v0 = vcombine.low %v1410_v19, %v1417_v8  ;;  %v9153_v38 = vcombine.low %v1494_v40, %v1501_v10 }
 0x115   :  { %11883 = vst [vmem:[#allocation12_spill] sm:$0xff] %v9135_v23  ;;  %11884 = vst [vmem:[#allocation13_spill] sm:$0xff] %v9138_v42  ;;  %6423 = vperm.xlu0 %7982, %v8784_v30   ;;  %v9151_v23 = vcombine.low %v1480_v53, %v1487_v39  ;;  %v9155_v42 = vcombine.low %v4543_v54, %v4550_v56  ;;  %v9157_v28 = vcombine.low %v1452_v18, %v1459_v52  ;;  %v11895_v52 = vld [vmem:[#allocation19_spill] sm:$0xff] }
 0x116   :  { %v9159_v57 = vcombine.low %v1466_v36, %v1473_v32  ;;  %v1592_v7 = vrot.slane %v11887_v58, %v8539_v47  ;;  %v1599_v21 = vrot.slane %v11887_v58, %v8542_v48  ;;  %v9165_v33 = vcombine.low %v1536_v16, %v1543_v51  ;;  %v11898_v51 = vld [vmem:[#allocation20_spill] sm:$0xff] }
 0x117   :  { %v9167_v30 = vcombine.low %v1550_v43, %v1557_v37  ;;  %v9174_v8 = vcombine.low %v4390_v5, %v4397_v46  ;;  %v4577_v53 = vrot.slane %v8974_v22, %v8582_v29  ;;  %v9178_v56 = vcombine.low %v1508_v50, %v1515_v11  ;;  %v11894_v22 = vld [vmem:[#allocation18_spill] sm:$0xff]  ;;  %v11899_v11 = vld [vmem:[#allocation21_spill] sm:$0xff] }
 0x118   :  { %11886 = vst [vmem:[#allocation14_spill] sm:$0xff] %v9159_v57  ;;  %11888 = vst [vmem:[#allocation15_spill] sm:$0xff] %v9165_v33  ;;  %v9169_v19 = vpop.xlane.xlu1 %358  ;;  %6432 = vperm.xlu1 %7983, %v8835_v17   ;;  %v9172_v54 = vpop.xlane.xlu0 %355  ;;  %v9180_v39 = vcombine.low %v1522_v15, %v1529_v2  ;;  %v4584_v40 = vrot.slane %v8976_v26, %v8582_v29  ;;  %v4424_v10 = vrot.slane %v8830_v59, %v8582_v29 }
 0x119   :  { %11889 = vst [vmem:[#allocation17_spill] sm:$0xff] %v9167_v30  ;;  %11890 = vst [vmem:[#allocation55_spill] sm:$0xff] %v9169_v19  ;;  %6450 = vperm.xlu0 %7982, %v8858_v60   ;;  %v1606_v17 = vrot.slane %v11887_v58, %v8557_v1  ;;  %v1613_v5 = vrot.slane %v11887_v58, %v8560_v6  ;;  %v1564_v18 = vrot.slane %v11894_v22, %v8539_v47 }
 0x11a   :  { %11891 = vst [vmem:[#allocation56_spill] sm:$0xff] %v9172_v54  ;;  %11892 = vst [vmem:[#allocation57_spill] sm:$0xff] %v9178_v56  ;;  %v1571_v15 = vrot.slane %v11894_v22, %v8542_v48  ;;  %v9195_v2 = vcombine.low %v1592_v7, %v1599_v21  ;;  %v1578_v60 = vrot.slane %v11894_v22, %v8557_v1 }
 0x11b   :  { %11893 = vst [vmem:[#allocation58_spill] sm:$0xff] %v9180_v39  ;;  %v1585_v59 = vrot.slane %v11894_v22, %v8560_v6  ;;  %v4431_v26 = vrot.slane %v8837_v55, %v8582_v29  ;;  %v1648_v58 = vrot.slane %v11895_v52, %v8539_v47  ;;  %v1655_v36 = vrot.slane %v11895_v52, %v8542_v48 }
 0x11c   :  { %v1662_v32 = vrot.slane %v11895_v52, %v8557_v1  ;;  %v9209_v7 = vpop.xlane.xlu1 %364  ;;  %6435 = vperm.xlu1 %7983, %v8922_v4   ;;  %v9212_v46 = vpop.xlane.xlu0 %361  ;;  %v4611_v16 = vrot.slane %v9002_v44, %v8582_v29  ;;  %v1669_v55 = vrot.slane %v11895_v52, %v8560_v6  ;;  %v1620_v43 = vrot.slane %v11898_v51, %v8539_v47 }
 0x11d   :  { %11896 = vst [vmem:[#allocation18_spill] sm:$0xff] %v9209_v7  ;;  %11897 = vst [vmem:[#allocation19_spill] sm:$0xff] %v9212_v46  ;;  %v1627_v37 = vrot.slane %v11898_v51, %v8542_v48  ;;  %v1634_v50 = vrot.slane %v11898_v51, %v8557_v1  ;;  %6456 = vperm.xlu0 %7982, %v8928_v12   ;;  %v1641_v4 = vrot.slane %v11898_v51, %v8560_v6  ;;  %v11900_v12 = vld [vmem:[#allocation22_spill] sm:$0xff] }
 0x11e   :  { %v1704_v44 = vrot.slane %v11899_v11, %v8539_v47  ;;  %v1711_v21 = vrot.slane %v11899_v11, %v8542_v48  ;;  %v4618_v22 = vrot.slane %v9004_v27, %v8582_v29  ;;  %v1718_v52 = vrot.slane %v11899_v11, %v8557_v1 }
 0x11f   :  { %v1725_v30 = vrot.slane %v11899_v11, %v8560_v6  ;;  %v1676_v33 = vrot.slane %v11900_v12, %v8539_v47  ;;  %v1683_v51 = vrot.slane %v11900_v12, %v8542_v48  ;;  %v9241_v39 = vcombine.low %v1606_v17, %v1613_v5 }
 0x120   :  { %v1690_v56 = vrot.slane %v11900_v12, %v8557_v1  ;;  %v1697_v27 = vrot.slane %v11900_v12, %v8560_v6  ;;  %v9247_v46 = vpop.xlane.xlu1 %370  ;;  %6438 = vperm.xlu1 %7983, %v8992_v3   ;;  %v9250_v7 = vpop.xlane.xlu0 %367  ;;  %v9252_v11 = vcombine.low %v4577_v53, %v4584_v40  ;;  %v9254_v54 = vcombine.low %v1564_v18, %v1571_v15 }
 0x121   :  { %11901 = vst [vmem:[#allocation20_spill] sm:$0xff] %v9247_v46  ;;  %v9256_v19 = vcombine.low %v1578_v60, %v1585_v59  ;;  %v9258_v17 = vcombine.low %v1648_v58, %v1655_v36  ;;  %v9260_v5 = vcombine.low %v1662_v32, %v1669_v55  ;;  %6462 = vperm.xlu0 %7982, %v9008_v20   ;;  %v11905_v20 = vld [vmem:[#allocation23_spill] sm:$0xff]  ;;  %v11906_v58 = vld [vmem:[#allocation24_spill] sm:$0xff] }
 0x122   :  { %v9263_v57 = vcombine.low %v1620_v43, %v1627_v37  ;;  %v9265_v12 = vcombine.low %v1634_v50, %v1641_v4  ;;  %v9267_v46 = vcombine.low %v4424_v10, %v4431_v26  ;;  %v4458_v3 = vrot.slane %v8905_v61, %v8582_v29  ;;  %v11907_v43 = vld [vmem:[#allocation25_spill] sm:$0xff] }
 0x123   :  { %v9271_v53 = vcombine.low %v1704_v44, %v1711_v21  ;;  %v9273_v40 = vcombine.low %v1718_v52, %v1725_v30  ;;  %v9275_v18 = vcombine.low %v1676_v33, %v1683_v51  ;;  %v9277_v15 = vcombine.low %v4611_v16, %v4618_v22  ;;  %v11908_v44 = vld [vmem:[#allocation26_spill] sm:$0xff] }
 0x124   :  { %v9279_v60 = vcombine.low %v1690_v56, %v1697_v27  ;;  %v1760_v59 = vrot.slane %v11905_v20, %v8539_v47  ;;  %v1767_v10 = vrot.slane %v11905_v20, %v8542_v48  ;;  %v9285_v26 = vpop.xlane.xlu1 %376  ;;  %6441 = vperm.xlu1 %7983, %v9072_v34   ;;  %v9288_v61 = vpop.xlane.xlu0 %373  ;;  %v4465_v33 = vrot.slane %v8907_v25, %v8582_v29 }
 0x125   :  { %11902 = vst [vmem:[#allocation21_spill] sm:$0xff] %v9271_v53  ;;  %11903 = vst [vmem:[#allocation22_spill] sm:$0xff] %v9273_v40  ;;  %v1774_v30 = vrot.slane %v11905_v20, %v8557_v1  ;;  %v1781_v56 = vrot.slane %v11905_v20, %v8560_v6  ;;  %v1732_v36 = vrot.slane %v11906_v58, %v8539_v47  ;;  %6468 = vperm.xlu0 %7982, %v9080_v63   ;;  %v11913_v53 = vld [vmem:[#allocation27_spill] sm:$0xff] }
 0x126   :  { %11904 = vst [vmem:[#allocation59_spill] sm:$0xff] %v9279_v60  ;;  %v1739_v32 = vrot.slane %v11906_v58, %v8542_v48  ;;  %v1746_v34 = vrot.slane %v11906_v58, %v8557_v1  ;;  %v1753_v25 = vrot.slane %v11906_v58, %v8560_v6  ;;  %v4645_v16 = vrot.slane %v9018_v24, %v8582_v29 }
 0x127   :  { %v4652_v55 = vrot.slane %v9030_v35, %v8582_v29  ;;  %v1816_v37 = vrot.slane %v11907_v43, %v8539_v47  ;;  %v1823_v50 = vrot.slane %v11907_v43, %v8542_v48  ;;  %v1830_v63 = vrot.slane %v11907_v43, %v8557_v1 }
 0x128   :  { %v1837_v4 = vrot.slane %v11907_v43, %v8560_v6  ;;  %v1788_v21 = vrot.slane %v11908_v44, %v8539_v47  ;;  %v1795_v24 = vrot.slane %v11908_v44, %v8542_v48  ;;  %v1802_v35 = vrot.slane %v11908_v44, %v8557_v1  ;;  %v9325_v52 = vpop.xlane.xlu1 %382  ;;  %6444 = vperm.xlu1 %7983, %v9101_v45   ;;  %v9328_v51 = vpop.xlane.xlu0 %379 }
 0x129   :  { %v1809_v22 = vrot.slane %v11908_v44, %v8560_v6  ;;  %v9330_v27 = vcombine.low %v1760_v59, %v1767_v10  ;;  %v9332_v20 = vcombine.low %v1774_v30, %v1781_v56  ;;  %v9334_v58 = vcombine.low %v1732_v36, %v1739_v32  ;;  %6474 = vperm.xlu0 %7982, %v9155_v42  }
 0x12a   :  { %v4466_v43 = vcombine.low %v4458_v3, %v4465_v33  ;;  %v9337_v40 = vcombine.low %v1746_v34, %v1753_v25  ;;  %v1872_v44 = vrot.slane %v11913_v53, %v8539_v47  ;;  %v1879_v60 = vrot.slane %v11913_v53, %v8542_v48  ;;  %v11920_v34 = vld [vmem:[#allocation28_spill] sm:$0xff] }
 0x12b   :  { %11909 = vst [vmem:[#allocation23_spill] sm:$0xff] %v9330_v27  ;;  %11910 = vst [vmem:[#allocation24_spill] sm:$0xff] %v9332_v20  ;;  %v4492_v45 = vrot.slane %v8914_v49, %v8582_v29  ;;  %v9345_v59 = vcombine.low %v1816_v37, %v1823_v50  ;;  %v9347_v10 = vcombine.low %v1830_v63, %v1837_v4 }
 0x12c   :  { %11911 = vst [vmem:[#allocation25_spill] sm:$0xff] %v9334_v58  ;;  %11912 = vst [vmem:[#allocation26_spill] sm:$0xff] %v9337_v40  ;;  %v1886_v30 = vrot.slane %v11913_v53, %v8557_v1  ;;  %v1893_v42 = vrot.slane %v11913_v53, %v8560_v6  ;;  %v9353_v3 = vcombine.low %v1788_v21, %v1795_v24  ;;  %v9357_v56 = vpop.xlane.xlu1 %388  ;;  %6447 = vperm.xlu1 %7983, %v9174_v8   ;;  %v9360_v36 = vpop.xlane.xlu0 %385 }
 0x12d   :  { %11914 = vst [vmem:[#allocation27_spill] sm:$0xff] %v9345_v59  ;;  %11915 = vst [vmem:[#allocation60_spill] sm:$0xff] %v9347_v10  ;;  %v9355_v33 = vcombine.low %v1802_v35, %v1809_v22  ;;  %v4653_v49 = vcombine.low %v4645_v16, %v4652_v55  ;;  %v4499_v32 = vrot.slane %v8916_v13, %v8582_v29  ;;  %6480 = vperm.xlu0 %7982, %v9252_v11   ;;  %v11922_v16 = vld [vmem:[#allocation29_spill] sm:$0xff] }
 0x12e   :  { %11916 = vst [vmem:[#allocation61_spill] sm:$0xff] %v9353_v3  ;;  %11918 = vst [vmem:[#allocation63_spill] sm:$0xff] %v9357_v56  ;;  %v1844_v25 = vrot.slane %v11920_v34, %v8539_v47  ;;  %v1851_v53 = vrot.slane %v11920_v34, %v8542_v48  ;;  %v1858_v37 = vrot.slane %v11920_v34, %v8557_v1  ;;  %v11929_v59 = vld [vmem:[#allocation41_spill] sm:$0xff] }
 0x12f   :  { %11917 = vst [vmem:[#allocation62_spill] sm:$0xff] %v9355_v33  ;;  %11919 = vst [vmem:[#allocation64_spill] sm:$0xff] %v9360_v36  ;;  %v1865_v50 = vrot.slane %v11920_v34, %v8560_v6  ;;  %v9373_v8 = vcombine.low %v1872_v44, %v1879_v60  ;;  %v1928_v55 = vrot.slane %v11922_v16, %v8539_v47  ;;  %v11924_v60 = vld [vmem:[#allocation30_spill] sm:$0xff] }
 0x130   :  { %v1935_v13 = vrot.slane %v11922_v16, %v8542_v48  ;;  %v4679_v63 = vrot.slane %v9076_v62, %v8582_v29  ;;  %v9381_v4 = vcombine.low %v1886_v30, %v1893_v42  ;;  %v1942_v21 = vrot.slane %v11922_v16, %v8557_v1  ;;  %v9397_v30 = vpop.xlane.xlu1 %394  ;;  %6453 = vperm.xlu1 %7983, %v9267_v46   ;;  %v9400_v42 = vpop.xlane.xlu0 %391 }
 0x131   :  { %11921 = vst [vmem:[#allocation28_spill] sm:$0xff] %v9373_v8  ;;  %v1949_v24 = vrot.slane %v11922_v16, %v8560_v6  ;;  %v4686_v11 = vrot.slane %v9078_v14, %v8582_v29  ;;  %v1900_v35 = vrot.slane %v11924_v60, %v8539_v47  ;;  %v1907_v22 = vrot.slane %v11924_v60, %v8542_v48 }
 0x132   :  { %11923 = vst [vmem:[#allocation29_spill] sm:$0xff] %v9381_v4  ;;  %v1914_v62 = vrot.slane %v11924_v60, %v8557_v1  ;;  %v1921_v44 = vrot.slane %v11924_v60, %v8560_v6  ;;  %v9402_v34 = vcombine.low %v1844_v25, %v1851_v53  ;;  %v9404_v14 = vcombine.low %v1858_v37, %v1865_v50  ;;  %v11928_v60 = vld [vmem:[#allocation31_spill] sm:$0xff] }
 0x133   :  { %6486 = vperm.xlu0 %7982, %v9277_v15   ;;  %v4500_v16 = vcombine.low %v4492_v45, %v4499_v32  ;;  %v4526_v4 = vrot.slane %v8932_v41, %v8582_v29  ;;  %v9409_v8 = vcombine.low %v1928_v55, %v1935_v13  ;;  %v1984_v10 = vrot.slane %v11928_v60, %v8539_v47  ;;  %v11930_v45 = vld [vmem:[#allocation32_spill] sm:$0xff] }
 0x134   :  { %11925 = vst [vmem:[#allocation30_spill] sm:$0xff] %v9402_v34  ;;  %11926 = vst [vmem:[#allocation65_spill] sm:$0xff] %v9404_v14  ;;  %v1991_v46 = vrot.slane %v11928_v60, %v8542_v48  ;;  %v4533_v25 = vrot.slane %v11929_v59, %v8582_v29  ;;  %v1998_v53 = vrot.slane %v11928_v60, %v8557_v1  ;;  %v9431_v13 = vpop.xlane.xlu1 %400  ;;  %6459 = vperm.xlu1 %7983, %v4466_v43   ;;  %v9433_v59 = vpop.xlane.xlu0 %397 }
 0x135   :  { %11927 = vst [vmem:[#allocation66_spill] sm:$0xff] %v9409_v8  ;;  %v2005_v15 = vrot.slane %v11928_v60, %v8560_v6  ;;  %v1956_v41 = vrot.slane %v11930_v45, %v8539_v47  ;;  %v1963_v32 = vrot.slane %v11930_v45, %v8542_v48  ;;  %v9425_v37 = vcombine.low %v1942_v21, %v1949_v24  ;;  %v11934_v60 = vld [vmem:[#allocation33_spill] sm:$0xff] }
 0x136   :  { %v9427_v50 = vcombine.low %v1900_v35, %v1907_v22  ;;  %v9429_v55 = vcombine.low %v1914_v62, %v1921_v44  ;;  %v4687_v8 = vcombine.low %v4679_v63, %v4686_v11  ;;  %v2040_v14 = vrot.slane %v11934_v60, %v8539_v47 }
 0x137   :  { %11931 = vst [vmem:[#allocation31_spill] sm:$0xff] %v9425_v37  ;;  %v2047_v34 = vrot.slane %v11934_v60, %v8542_v48  ;;  %v2054_v21 = vrot.slane %v11934_v60, %v8557_v1  ;;  %v2061_v24 = vrot.slane %v11934_v60, %v8560_v6  ;;  %6492 = vperm.xlu0 %7982, %v4653_v49   ;;  %v11938_v49 = vld [vmem:[#allocation34_spill] sm:$0xff] }
 0x138   :  { %11932 = vst [vmem:[#allocation41_spill] sm:$0xff] %v9427_v50  ;;  %11933 = vst [vmem:[#allocation32_spill] sm:$0xff] %v9429_v55  ;;  %v1970_v35 = vrot.slane %v11930_v45, %v8557_v1  ;;  %v1977_v43 = vrot.slane %v11930_v45, %v8560_v6  ;;  %v4713_v63 = vrot.slane %v9090_v31, %v8582_v29  ;;  %v9461_v45 = vpop.xlane.xlu1 %406  ;;  %6465 = vperm.xlu1 %7983, %v4500_v16   ;;  %v9463_v31 = vpop.xlane.xlu0 %403  ;;  %v11942_v16 = vld [vmem:[#allocation35_spill] sm:$0xff] }
 0x139   :  { %v4720_v11 = vrot.slane %v9092_v9, %v8582_v29  ;;  %v9451_v22 = vcombine.low %v1984_v10, %v1991_v46  ;;  %v9453_v62 = vcombine.low %v1998_v53, %v2005_v15  ;;  %v9455_v44 = vcombine.low %v1956_v41, %v1963_v32  ;;  %11939 = vst [vmem:[#allocation34_spill] sm:$0xff] %v9461_v45  ;;  %v11940_v9 = vld [vmem:[#allocation44_spill] sm:$0xff]  ;;  %v11941_v46 = vld [vmem:[#allocation46_spill] sm:$0xff] }
 0x13a   :  { %v4534_v60 = vcombine.low %v4526_v4, %v4533_v25  ;;  %v2012_v37 = vrot.slane %v11938_v49, %v8539_v47  ;;  %v2019_v55 = vrot.slane %v11938_v49, %v8542_v48  ;;  %v4560_v10 = vrot.slane %v11940_v9, %v8582_v29 }
 0x13b   :  { %11935 = vst [vmem:[#allocation33_spill] sm:$0xff] %v9451_v22  ;;  %11936 = vst [vmem:[#allocation67_spill] sm:$0xff] %v9453_v62  ;;  %v4567_v53 = vrot.slane %v11941_v46, %v8582_v29  ;;  %v9469_v15 = vcombine.low %v2040_v14, %v2047_v34  ;;  %v9471_v4 = vcombine.low %v2054_v21, %v2061_v24  ;;  %6498 = vperm.xlu0 %7982, %v4687_v8   ;;  %v11943_v24 = vld [vmem:[#allocation36_spill] sm:$0xff] }
 0x13c   :  { %11937 = vst [vmem:[#allocation68_spill] sm:$0xff] %v9455_v44  ;;  %v2026_v25 = vrot.slane %v11938_v49, %v8557_v1  ;;  %v2033_v41 = vrot.slane %v11938_v49, %v8560_v6  ;;  %v2096_v32 = vrot.slane %v11942_v16, %v8539_v47  ;;  %v2103_v9 = vrot.slane %v11942_v16, %v8542_v48  ;;  %v9499_v22 = vpop.xlane.xlu0 %409  ;;  %v11946_v44 = vld [vmem:[#allocation47_spill] sm:$0xff] }
 0x13d   :  { %v4721_v62 = vcombine.low %v4713_v63, %v4720_v11  ;;  %v4747_v34 = vrot.slane %v9151_v23, %v8582_v29  ;;  %v2110_v14 = vrot.slane %v11942_v16, %v8557_v1  ;;  %v2117_v21 = vrot.slane %v11942_v16, %v8560_v6  ;;  %v9497_v11 = vpop.xlane.xlu1 %412  ;;  %6471 = vperm.xlu1 %7983, %v4534_v60  }
 0x13e   :  { %v2068_v49 = vrot.slane %v11943_v24, %v8539_v47  ;;  %v4754_v8 = vrot.slane %v9153_v38, %v8582_v29  ;;  %v2075_v46 = vrot.slane %v11943_v24, %v8542_v48  ;;  %v2082_v63 = vrot.slane %v11943_v24, %v8557_v1  ;;  %11944 = vst [vmem:[#allocation44_spill] sm:$0xff] %v9497_v11  ;;  %v11947_v38 = vld [vmem:[#allocation48_spill] sm:$0xff] }
 0x13f   :  { %v2089_v23 = vrot.slane %v11943_v24, %v8560_v6  ;;  %11945 = vst [vmem:[#allocation46_spill] sm:$0xff] %v9499_v22  ;;  %v4568_v16 = vcombine.low %v4560_v10, %v4567_v53  ;;  %6504 = vperm.xlu0 %7982, %v4721_v62   ;;  %v4594_v50 = vrot.slane %v11946_v44, %v8582_v29  ;;  %v11948_v24 = vld [vmem:[#allocation52_spill] sm:$0xff] }
 0x140   :  { %v4601_v33 = vrot.slane %v11947_v38, %v8582_v29  ;;  %v4815_v3 = vrot.slane %v9195_v2, %v8582_v29  ;;  %v4822_v20 = vrot.slane %v9241_v39, %v8582_v29  ;;  %v2488_v27 = vrot.slane %v11948_v24, %v8539_v47  ;;  %v9533_v36 = vpop.xlane.xlu0 %415 }
 0x141   :  { %v2495_v60 = vrot.slane %v11948_v24, %v8542_v48  ;;  %v2502_v62 = vrot.slane %v11948_v24, %v8557_v1  ;;  %v2509_v44 = vrot.slane %v11948_v24, %v8560_v6  ;;  %v9517_v10 = vcombine.low %v1970_v35, %v1977_v43  ;;  %v9531_v22 = vpop.xlane.xlu1 %418  ;;  %6477 = vperm.xlu1 %7983, %v4568_v16  }
 0x142   :  { %v9519_v53 = vcombine.low %v2012_v37, %v2019_v55  ;;  %v9521_v2 = vcombine.low %v2026_v25, %v2033_v41  ;;  %v4755_v38 = vcombine.low %v4747_v34, %v4754_v8  ;;  %v9523_v39 = vcombine.low %v2096_v32, %v2103_v9  ;;  %11950 = vst [vmem:[#allocation36_spill] sm:$0xff] %v9531_v22  ;;  %v11952_v55 = vld [vmem:[#allocation10_spill] sm:$0xff]  ;;  %v11953_v25 = vld [vmem:[#allocation11_spill] sm:$0xff] }
 0x143   :  { %11949 = vst [vmem:[#allocation35_spill] sm:$0xff] %v9517_v10  ;;  %v9525_v40 = vcombine.low %v2110_v14, %v2117_v21  ;;  %v9527_v58 = vcombine.low %v2068_v49, %v2075_v46  ;;  %v9529_v11 = vcombine.low %v2082_v63, %v2089_v23  ;;  %11951 = vst [vmem:[#allocation47_spill] sm:$0xff] %v9533_v36  ;;  %v11957_v63 = vld [vmem:[#allocation38_spill] sm:$0xff] }
 0x144   :  { %6510 = vperm.xlu0 %7982, %v4755_v38   ;;  %v4602_v35 = vcombine.low %v4594_v50, %v4601_v33  ;;  %v4823_v37 = vcombine.low %v4815_v3, %v4822_v20  ;;  %v4628_v43 = vrot.slane %v11952_v55, %v8582_v29  ;;  %v4635_v41 = vrot.slane %v11953_v25, %v8582_v29  ;;  %v9561_v46 = vpop.xlane.xlu0 %421 }
 0x145   :  { %v5351_v32 = vcombine.low %v2488_v27, %v2495_v60  ;;  %v5352_v9 = vcombine.low %v2502_v62, %v2509_v44  ;;  %v5087_v34 = vrot.slane %v9469_v15, %v8582_v29  ;;  %v5094_v14 = vrot.slane %v9471_v4, %v8582_v29  ;;  %v11954_v27 = vld [vmem:[#allocation37_spill] sm:$0xff]  ;;  %v9559_v8 = vpop.xlane.xlu1 %424  ;;  %11956 = vst [vmem:[#allocation52_spill] sm:$0xff] %v9561_v46  ;;  %v11958_v44 = vld [vmem:[#allocation50_spill] sm:$0xff] }
 0x146   :  { %v2936_v21 = vrot.slane %v9397_v30, %v8539_v47  ;;  %v2943_v20 = vrot.slane %v9397_v30, %v8542_v48  ;;  %v2950_v3 = vrot.slane %v9397_v30, %v8557_v1  ;;  %v2957_v33 = vrot.slane %v9397_v30, %v8560_v6  ;;  %11955 = vst [vmem:[#allocation48_spill] sm:$0xff] %v9559_v8  ;;  %v11960_v8 = vld [vmem:[#allocation39_spill] sm:$0xff] }
 0x147   :  { %v2152_v50 = vrot.slane %v11954_v27, %v8539_v47  ;;  %v2159_v15 = vrot.slane %v11954_v27, %v8542_v48  ;;  %v2166_v4 = vrot.slane %v11954_v27, %v8557_v1  ;;  %v2173_v49 = vrot.slane %v11954_v27, %v8560_v6  ;;  %6483 = vperm.xlu1 %7983, %v4602_v35   ;;  %v11959_v35 = vld [vmem:[#allocation51_spill] sm:$0xff] }
 0x148   :  { %v2124_v30 = vrot.slane %v11957_v63, %v8539_v47  ;;  %v2131_v23 = vrot.slane %v11957_v63, %v8542_v48  ;;  %v2138_v16 = vrot.slane %v11957_v63, %v8557_v1  ;;  %v2145_v24 = vrot.slane %v11957_v63, %v8560_v6  ;;  %6522 = vperm.xlu0 %7982, %v4823_v37  }
 0x149   :  { %v4636_v60 = vcombine.low %v4628_v43, %v4635_v41  ;;  %v5095_v62 = vcombine.low %v5087_v34, %v5094_v14  ;;  %v4662_v38 = vrot.slane %v11958_v44, %v8582_v29  ;;  %v4669_v55 = vrot.slane %v11959_v35, %v8582_v29  ;;  %v9585_v34 = vpop.xlane.xlu1 %430  ;;  %v9587_v14 = vpop.xlane.xlu0 %427 }
 0x14a   :  { %v5623_v25 = vcombine.low %v2936_v21, %v2943_v20  ;;  %v5624_v27 = vcombine.low %v2950_v3, %v2957_v33  ;;  %v5359_v10 = vrot.slane %v5351_v32, %v8582_v29  ;;  %v5366_v46 = vrot.slane %v5352_v9, %v8582_v29  ;;  %11961 = vst [vmem:[#allocation10_spill] sm:$0xff] %v9585_v34  ;;  %v11965_v21 = vld [vmem:[#allocation40_spill] sm:$0xff] }
 0x14b   :  { %v2208_v36 = vrot.slane %v11960_v8, %v8539_v47  ;;  %v2215_v37 = vrot.slane %v11960_v8, %v8542_v48  ;;  %v2222_v43 = vrot.slane %v11960_v8, %v8557_v1  ;;  %v2229_v41 = vrot.slane %v11960_v8, %v8560_v6  ;;  %6489 = vperm.xlu1 %7983, %v4636_v60   ;;  %v11966_v8 = vld [vmem:[#allocation54_spill] sm:$0xff] }
 0x14c   :  { %11962 = vst [vmem:[#allocation11_spill] sm:$0xff] %v9587_v14  ;;  %v9589_v32 = vcombine.low %v2152_v50, %v2159_v15  ;;  %v9591_v9 = vcombine.low %v2166_v4, %v2173_v49  ;;  %v2180_v20 = vrot.slane %v11965_v21, %v8539_v47  ;;  %v2187_v3 = vrot.slane %v11965_v21, %v8542_v48 }
 0x14d   :  { %6570 = vperm.xlu0 %7982, %v5095_v62   ;;  %v9597_v33 = vcombine.low %v2124_v30, %v2131_v23  ;;  %v4670_v63 = vcombine.low %v4662_v38, %v4669_v55  ;;  %v4696_v44 = vrot.slane %v11966_v8, %v8582_v29  ;;  %v4703_v60 = vrot.slane %v9149_v0, %v8582_v29  ;;  %v9615_v62 = vpop.xlane.xlu1 %436  ;;  %v9617_v0 = vpop.xlane.xlu0 %433 }
 0x14e   :  { %11963 = vst [vmem:[#allocation37_spill] sm:$0xff] %v9589_v32  ;;  %11964 = vst [vmem:[#allocation38_spill] sm:$0xff] %v9591_v9  ;;  %v9603_v50 = vcombine.low %v2138_v16, %v2145_v24  ;;  %v5367_v15 = vcombine.low %v5359_v10, %v5366_v46  ;;  %v5631_v4 = vrot.slane %v5623_v25, %v8582_v29  ;;  %v11972_v46 = vld [vmem:[#allocation42_spill] sm:$0xff] }
 0x14f   :  { %v5638_v49 = vrot.slane %v5624_v27, %v8582_v29  ;;  %v9607_v35 = vcombine.low %v2208_v36, %v2215_v37  ;;  %v9609_v14 = vcombine.low %v2222_v43, %v2229_v41  ;;  %v2194_v30 = vrot.slane %v11965_v21, %v8557_v1  ;;  %11969 = vst [vmem:[#allocation39_spill] sm:$0xff] %v9615_v62  ;;  %v11973_v27 = vld [vmem:[#allocation14_spill] sm:$0xff]  ;;  %v11974_v43 = vld [vmem:[#allocation43_spill] sm:$0xff] }
 0x150   :  { %v2201_v23 = vrot.slane %v11965_v21, %v8560_v6  ;;  %6495 = vperm.xlu1 %7983, %v4670_v63   ;;  %11970 = vst [vmem:[#allocation40_spill] sm:$0xff] %v9617_v0  ;;  %v9619_v10 = vcombine.low %v2180_v20, %v2187_v3  ;;  %v2264_v16 = vrot.slane %v11972_v46, %v8539_v47  ;;  %v11975_v63 = vld [vmem:[#allocation53_spill] sm:$0xff] }
 0x151   :  { %11967 = vst [vmem:[#allocation50_spill] sm:$0xff] %v9607_v35  ;;  %11968 = vst [vmem:[#allocation51_spill] sm:$0xff] %v9609_v14  ;;  %v2271_v36 = vrot.slane %v11972_v46, %v8542_v48  ;;  %v2278_v24 = vrot.slane %v11972_v46, %v8557_v1  ;;  %6618 = vperm.xlu0 %7982, %v5367_v15   ;;  %v2285_v38 = vrot.slane %v11972_v46, %v8560_v6  ;;  %v443_v15 = vpop.xlane.xlu1 %442  ;;  %v9647_v46 = vpop.xlane.xlu0 %439 }
 0x152   :  { %11971 = vst [vmem:[#allocation54_spill] sm:$0xff] %v9619_v10  ;;  %v4704_v55 = vcombine.low %v4696_v44, %v4703_v60  ;;  %v4730_v25 = vrot.slane %v9157_v28, %v8582_v29  ;;  %v4737_v37 = vrot.slane %v11973_v27, %v8582_v29  ;;  %v2236_v41 = vrot.slane %v11974_v43, %v8539_v47 }
 0x153   :  { %v2243_v21 = vrot.slane %v11974_v43, %v8542_v48  ;;  %v2250_v20 = vrot.slane %v11974_v43, %v8557_v1  ;;  %v5639_v3 = vcombine.low %v5631_v4, %v5638_v49  ;;  %v2460_v8 = vrot.slane %v11975_v63, %v8539_v47 }
 0x154   :  { %v2467_v44 = vrot.slane %v11975_v63, %v8542_v48  ;;  %v2474_v28 = vrot.slane %v11975_v63, %v8557_v1  ;;  %v2481_v60 = vrot.slane %v11975_v63, %v8560_v6  ;;  %6501 = vperm.xlu1 %7983, %v4704_v55   ;;  %v3384_v27 = vrot.slane %v443_v15, %v8539_v47 }
 0x155   :  { %v3391_v4 = vrot.slane %v443_v15, %v8542_v48  ;;  %v3398_v49 = vrot.slane %v443_v15, %v8557_v1  ;;  %v3405_v0 = vrot.slane %v443_v15, %v8560_v6  ;;  %6666 = vperm.xlu0 %7982, %v5639_v3   ;;  %v2257_v62 = vrot.slane %v11974_v43, %v8560_v6  ;;  %v9663_v15 = vpop.xlane.xlu1 %448  ;;  %v9665_v3 = vpop.xlane.xlu0 %445 }
 0x156   :  { %v4738_v34 = vcombine.low %v4730_v25, %v4737_v37  ;;  %v4798_v63 = vrot.slane %v9254_v54, %v8582_v29  ;;  %v4805_v55 = vrot.slane %v9256_v19, %v8582_v29  ;;  %v9659_v14 = vcombine.low %v2194_v30, %v2201_v23 }
 0x157   :  { %v9661_v35 = vcombine.low %v2264_v16, %v2271_v36  ;;  %v5895_v22 = vcombine.low %v3384_v27, %v3391_v4  ;;  %v5896_v10 = vcombine.low %v3398_v49, %v3405_v0  ;;  %v5334_v9 = vcombine.low %v2460_v8, %v2467_v44 }
 0x158   :  { %11976 = vst [vmem:[#allocation42_spill] sm:$0xff] %v9659_v14  ;;  %v5335_v32 = vcombine.low %v2474_v28, %v2481_v60  ;;  %6507 = vperm.xlu1 %7983, %v4738_v34   ;;  %v5070_v25 = vrot.slane %v9519_v53, %v8582_v29  ;;  %v5077_v54 = vrot.slane %v9521_v2, %v8582_v29  ;;  %v11981_v2 = vld [vmem:[#allocation6_spill] sm:$0xff] }
 0x159   :  { %11977 = vst [vmem:[#allocation14_spill] sm:$0xff] %v9661_v35  ;;  %v2908_v19 = vrot.slane %v9400_v42, %v8539_v47  ;;  %v2915_v30 = vrot.slane %v9400_v42, %v8542_v48  ;;  %v2922_v23 = vrot.slane %v9400_v42, %v8557_v1  ;;  %v2929_v34 = vrot.slane %v9400_v42, %v8560_v6 }
 0x15a   :  { %v9679_v0 = vcombine.low %v2278_v24, %v2285_v38  ;;  %v9681_v16 = vcombine.low %v2236_v41, %v2243_v21  ;;  %v9683_v53 = vcombine.low %v2250_v20, %v2257_v62  ;;  %v4806_v36 = vcombine.low %v4798_v63, %v4805_v55  ;;  %v11982_v62 = vld [vmem:[#allocation45_spill] sm:$0xff]  ;;  %v9697_v41 = vpop.xlane.xlu1 %454  ;;  %v9699_v21 = vpop.xlane.xlu0 %451 }
 0x15b   :  { %v2320_v37 = vrot.slane %v11981_v2, %v8539_v47  ;;  %v2327_v43 = vrot.slane %v11981_v2, %v8542_v48  ;;  %v5903_v8 = vrot.slane %v5895_v22, %v8582_v29  ;;  %v5910_v44 = vrot.slane %v5896_v10, %v8582_v29  ;;  %11983 = vst [vmem:[#allocation6_spill] sm:$0xff] %v9697_v41 }
 0x15c   :  { %11978 = vst [vmem:[#allocation43_spill] sm:$0xff] %v9679_v0  ;;  %11979 = vst [vmem:[#allocation53_spill] sm:$0xff] %v9681_v16  ;;  %v2334_v42 = vrot.slane %v11981_v2, %v8557_v1  ;;  %v2341_v24 = vrot.slane %v11981_v2, %v8560_v6  ;;  %v2292_v38 = vrot.slane %v11982_v62, %v8539_v47  ;;  %6519 = vperm.xlu1 %7983, %v4806_v36  }
 0x15d   :  { %11980 = vst [vmem:[#allocation69_spill] sm:$0xff] %v9683_v53  ;;  %v5078_v20 = vcombine.low %v5070_v25, %v5077_v54  ;;  %v5606_v28 = vcombine.low %v2908_v19, %v2915_v30  ;;  %v5607_v60 = vcombine.low %v2922_v23, %v2929_v34  ;;  %v5342_v22 = vrot.slane %v5334_v9, %v8582_v29  ;;  %v11985_v19 = vld [vmem:[#allocation7_spill] sm:$0xff]  ;;  %v11989_v53 = vld [vmem:[#allocation8_spill] sm:$0xff] }
 0x15e   :  { %v5349_v10 = vrot.slane %v5335_v32, %v8582_v29  ;;  %v3356_v27 = vrot.slane %v9647_v46, %v8539_v47  ;;  %v3363_v4 = vrot.slane %v9647_v46, %v8542_v48  ;;  %v3370_v49 = vrot.slane %v9647_v46, %v8557_v1  ;;  %v9725_v34 = vpop.xlane.xlu1 %460  ;;  %v9727_v36 = vpop.xlane.xlu0 %457 }
 0x15f   :  { %v3377_v63 = vrot.slane %v9647_v46, %v8560_v6  ;;  %v2299_v55 = vrot.slane %v11982_v62, %v8542_v48  ;;  %v2306_v9 = vrot.slane %v11982_v62, %v8557_v1  ;;  %v2313_v32 = vrot.slane %v11982_v62, %v8560_v6  ;;  %11986 = vst [vmem:[#allocation7_spill] sm:$0xff] %v9725_v34 }
 0x160   :  { %v5911_v25 = vcombine.low %v5903_v8, %v5910_v44  ;;  %v9717_v54 = vcombine.low %v2320_v37, %v2327_v43  ;;  %v2376_v30 = vrot.slane %v11985_v19, %v8539_v47  ;;  %v2383_v23 = vrot.slane %v11985_v19, %v8542_v48  ;;  %6567 = vperm.xlu1 %7983, %v5078_v20   ;;  %v11988_v37 = vld [vmem:[#allocation49_spill] sm:$0xff] }
 0x161   :  { %v2390_v46 = vrot.slane %v11985_v19, %v8557_v1  ;;  %11987 = vst [vmem:[#allocation70_spill] sm:$0xff] %v9727_v36  ;;  %v2397_v2 = vrot.slane %v11985_v19, %v8560_v6  ;;  %v2348_v43 = vrot.slane %v11988_v37, %v8539_v47  ;;  %v2355_v8 = vrot.slane %v11988_v37, %v8542_v48 }
 0x162   :  { %11984 = vst [vmem:[#allocation45_spill] sm:$0xff] %v9717_v54  ;;  %6714 = vperm.xlu0 %7982, %v5911_v25   ;;  %v5350_v44 = vcombine.low %v5342_v22, %v5349_v10  ;;  %v5878_v62 = vcombine.low %v3356_v27, %v3363_v4  ;;  %v5879_v54 = vcombine.low %v3370_v49, %v3377_v63  ;;  %v9753_v4 = vpop.xlane.xlu1 %466  ;;  %v9755_v49 = vpop.xlane.xlu0 %463 }
 0x163   :  { %v5614_v0 = vrot.slane %v5606_v28, %v8582_v29  ;;  %v5621_v35 = vrot.slane %v5607_v60, %v8582_v29  ;;  %v2362_v20 = vrot.slane %v11988_v37, %v8557_v1  ;;  %v2369_v19 = vrot.slane %v11988_v37, %v8560_v6  ;;  %v11990_v60 = vld [vmem:[#allocation9_spill] sm:$0xff]  ;;  %11991 = vst [vmem:[#allocation49_spill] sm:$0xff] %v9753_v4 }
 0x164   :  { %v2432_v16 = vrot.slane %v11989_v53, %v8539_v47  ;;  %v2439_v34 = vrot.slane %v11989_v53, %v8542_v48  ;;  %v2446_v22 = vrot.slane %v11989_v53, %v8557_v1  ;;  %v2453_v28 = vrot.slane %v11989_v53, %v8560_v6  ;;  %6615 = vperm.xlu1 %7983, %v5350_v44  }
 0x165   :  { %v2404_v10 = vrot.slane %v11990_v60, %v8539_v47  ;;  %v2411_v27 = vrot.slane %v11990_v60, %v8542_v48  ;;  %11992 = vst [vmem:[#allocation8_spill] sm:$0xff] %v9755_v49  ;;  %v9757_v63 = vcombine.low %v2334_v42, %v2341_v24  ;;  %v9759_v25 = vcombine.low %v2292_v38, %v2299_v55 }
 0x166   :  { %v9761_v37 = vcombine.low %v2306_v9, %v2313_v32  ;;  %v9763_v14 = vcombine.low %v2376_v30, %v2383_v23  ;;  %v9765_v53 = vcombine.low %v2390_v46, %v2397_v2  ;;  %v5622_v36 = vcombine.low %v5614_v0, %v5621_v35  ;;  %v12003_v35 = vld [vmem:[#allocation12_spill] sm:$0xff]  ;;  %v9785_v32 = vpop.xlane.xlu1 %472  ;;  %v12006_v46 = vld [vmem:[#allocation13_spill] sm:$0xff] }
 0x167   :  { %11993 = vst [vmem:[#allocation9_spill] sm:$0xff] %v9757_v63  ;;  %11994 = vst [vmem:[#allocation71_spill] sm:$0xff] %v9759_v25  ;;  %v5886_v41 = vrot.slane %v5878_v62, %v8582_v29  ;;  %v5893_v56 = vrot.slane %v5879_v54, %v8582_v29  ;;  %v9769_v45 = vcombine.low %v2348_v43, %v2355_v8  ;;  %v9787_v54 = vpop.xlane.xlu0 %469  ;;  %v12007_v62 = vld [vmem:[#allocation55_spill] sm:$0xff] }
 0x168   :  { %11995 = vst [vmem:[#allocation72_spill] sm:$0xff] %v9761_v37  ;;  %11996 = vst [vmem:[#allocation73_spill] sm:$0xff] %v9763_v14  ;;  %v9771_v44 = vcombine.low %v2362_v20, %v2369_v19  ;;  %v2418_v42 = vrot.slane %v11990_v60, %v8557_v1  ;;  %v2425_v24 = vrot.slane %v11990_v60, %v8560_v6  ;;  %6663 = vperm.xlu1 %7983, %v5622_v36   ;;  %v12008_v60 = vld [vmem:[#allocation56_spill] sm:$0xff] }
 0x169   :  { %11997 = vst [vmem:[#allocation74_spill] sm:$0xff] %v9765_v53  ;;  %11998 = vst [vmem:[#allocation75_spill] sm:$0xff] %v9769_v45  ;;  %v9777_v38 = vcombine.low %v2432_v16, %v2439_v34  ;;  %v9779_v55 = vcombine.low %v2446_v22, %v2453_v28  ;;  %v9781_v9 = vcombine.low %v2404_v10, %v2411_v27 }
 0x16a   :  { %11999 = vst [vmem:[#allocation76_spill] sm:$0xff] %v9771_v44  ;;  %v2544_v0 = vrot.slane %v12003_v35, %v8539_v47  ;;  %12004 = vst [vmem:[#allocation12_spill] sm:$0xff] %v9785_v32  ;;  %v2551_v30 = vrot.slane %v12003_v35, %v8542_v48  ;;  %v2558_v23 = vrot.slane %v12003_v35, %v8557_v1 }
 0x16b   :  { %12000 = vst [vmem:[#allocation77_spill] sm:$0xff] %v9777_v38  ;;  %12001 = vst [vmem:[#allocation78_spill] sm:$0xff] %v9779_v55  ;;  %v2565_v16 = vrot.slane %v12003_v35, %v8560_v6  ;;  %v2516_v34 = vrot.slane %v12006_v46, %v8539_v47  ;;  %v2523_v2 = vrot.slane %v12006_v46, %v8542_v48  ;;  %v9819_v35 = vpop.xlane.xlu1 %478  ;;  %v12012_v38 = vld [vmem:[#allocation18_spill] sm:$0xff] }
 0x16c   :  { %12002 = vst [vmem:[#allocation79_spill] sm:$0xff] %v9781_v9  ;;  %12005 = vst [vmem:[#allocation80_spill] sm:$0xff] %v9787_v54  ;;  %v2530_v36 = vrot.slane %v12006_v46, %v8557_v1  ;;  %v2537_v43 = vrot.slane %v12006_v46, %v8560_v6  ;;  %v5894_v8 = vcombine.low %v5886_v41, %v5893_v56  ;;  %v9821_v46 = vpop.xlane.xlu0 %475 }
 0x16d   :  { %v2600_v20 = vrot.slane %v12007_v62, %v8539_v47  ;;  %v2607_v19 = vrot.slane %v12007_v62, %v8542_v48  ;;  %v2614_v22 = vrot.slane %v12007_v62, %v8557_v1  ;;  %v2621_v28 = vrot.slane %v12007_v62, %v8560_v6  ;;  %12009 = vst [vmem:[#allocation13_spill] sm:$0xff] %v9819_v35 }
 0x16e   :  { %v2572_v10 = vrot.slane %v12008_v60, %v8539_v47  ;;  %v2579_v27 = vrot.slane %v12008_v60, %v8542_v48  ;;  %v2586_v56 = vrot.slane %v12008_v60, %v8557_v1  ;;  %v2593_v41 = vrot.slane %v12008_v60, %v8560_v6  ;;  %6711 = vperm.xlu1 %7983, %v5894_v8  }
 0x16f   :  { %12010 = vst [vmem:[#allocation55_spill] sm:$0xff] %v9821_v46  ;;  %v9823_v55 = vcombine.low %v2418_v42, %v2425_v24  ;;  %v9825_v62 = vcombine.low %v2544_v0, %v2551_v30  ;;  %v2656_v9 = vrot.slane %v12012_v38, %v8539_v47  ;;  %v2663_v53 = vrot.slane %v12012_v38, %v8542_v48  ;;  %v9855_v46 = vpop.xlane.xlu1 %484 }
 0x170   :  { %v2670_v14 = vrot.slane %v12012_v38, %v8557_v1  ;;  %v2677_v60 = vrot.slane %v12012_v38, %v8560_v6  ;;  %v5104_v8 = vrot.slane %v9527_v58, %v8582_v29  ;;  %v5111_v42 = vrot.slane %v9529_v11, %v8582_v29  ;;  %v12015_v38 = vld [vmem:[#allocation19_spill] sm:$0xff]  ;;  %v9857_v11 = vpop.xlane.xlu0 %481 }
 0x171   :  { %12011 = vst [vmem:[#allocation56_spill] sm:$0xff] %v9823_v55  ;;  %v9839_v24 = vcombine.low %v2558_v23, %v2565_v16  ;;  %v9841_v0 = vcombine.low %v2516_v34, %v2523_v2  ;;  %v9843_v30 = vcombine.low %v2530_v36, %v2537_v43  ;;  %v9845_v55 = vcombine.low %v2600_v20, %v2607_v19 }
 0x172   :  { %v9847_v44 = vcombine.low %v2614_v22, %v2621_v28  ;;  %v9849_v45 = vcombine.low %v2572_v10, %v2579_v27  ;;  %v9851_v63 = vcombine.low %v2586_v56, %v2593_v41  ;;  %v2628_v58 = vrot.slane %v12015_v38, %v8539_v47  ;;  %12016 = vst [vmem:[#allocation19_spill] sm:$0xff] %v9855_v46 }
 0x173   :  { %12013 = vst [vmem:[#allocation18_spill] sm:$0xff] %v9845_v55  ;;  %12017 = vst [vmem:[#allocation82_spill] sm:$0xff] %v9857_v11  ;;  %v9859_v23 = vcombine.low %v2656_v9, %v2663_v53  ;;  %v2635_v16 = vrot.slane %v12015_v38, %v8542_v48  ;;  %v2642_v34 = vrot.slane %v12015_v38, %v8557_v1  ;;  %v12020_v9 = vld [vmem:[#allocation20_spill] sm:$0xff]  ;;  %v491_v56 = vpop.xlane.xlu1 %490 }
 0x174   :  { %12014 = vst [vmem:[#allocation81_spill] sm:$0xff] %v9847_v44  ;;  %v2649_v2 = vrot.slane %v12015_v38, %v8560_v6  ;;  %v9867_v36 = vcombine.low %v2670_v14, %v2677_v60  ;;  %v9869_v43 = vcombine.low %v5104_v8, %v5111_v42  ;;  %v4832_v20 = vrot.slane %v9263_v57, %v8582_v29  ;;  %v488_v41 = vpop.xlane.xlu0 %487 }
 0x175   :  { %12018 = vst [vmem:[#allocation83_spill] sm:$0xff] %v9859_v23  ;;  %v4839_v53 = vrot.slane %v9265_v12, %v8582_v29  ;;  %v2712_v19 = vrot.slane %v12020_v9, %v8539_v47  ;;  %v2719_v22 = vrot.slane %v12020_v9, %v8542_v48  ;;  %v2726_v28 = vrot.slane %v12020_v9, %v8557_v1 }
 0x176   :  { %12019 = vst [vmem:[#allocation84_spill] sm:$0xff] %v9867_v36  ;;  %v2733_v14 = vrot.slane %v12020_v9, %v8560_v6  ;;  %v2684_v10 = vrot.slane %v9250_v7, %v8539_v47  ;;  %v2691_v57 = vrot.slane %v9250_v7, %v8542_v48  ;;  %v2698_v12 = vrot.slane %v9250_v7, %v8557_v1 }
 0x177   :  { %v2705_v27 = vrot.slane %v9250_v7, %v8560_v6  ;;  %v3832_v60 = vrot.slane %v491_v56, %v8539_v47  ;;  %v3839_v8 = vrot.slane %v491_v56, %v8542_v48  ;;  %v3846_v42 = vrot.slane %v491_v56, %v8557_v1  ;;  %v9907_v36 = vpop.xlane.xlu1 %496 }
 0x178   :  { %v3853_v38 = vrot.slane %v491_v56, %v8560_v6  ;;  %v3804_v9 = vrot.slane %v488_v41, %v8539_v47  ;;  %v3811_v11 = vrot.slane %v488_v41, %v8542_v48  ;;  %v3818_v46 = vrot.slane %v488_v41, %v8557_v1  ;;  %v494_v23 = vpop.xlane.xlu0 %493 }
 0x179   :  { %v3825_v35 = vrot.slane %v488_v41, %v8560_v6  ;;  %v9899_v37 = vcombine.low %v2628_v58, %v2635_v16  ;;  %v9901_v7 = vcombine.low %v2642_v34, %v2649_v2  ;;  %v6167_v25 = vcombine.low %v3832_v60, %v3839_v8 }
 0x17a   :  { %v6168_v54 = vcombine.low %v3846_v42, %v3853_v38  ;;  %v9903_v32 = vcombine.low %v2712_v19, %v2719_v22  ;;  %v9905_v4 = vcombine.low %v2726_v28, %v2733_v14  ;;  %v6150_v49 = vcombine.low %v3804_v9, %v3811_v11 }
 0x17b   :  { %v6151_v56 = vcombine.low %v3818_v46, %v3825_v35  ;;  %v9909_v44 = vcombine.low %v2684_v10, %v2691_v57  ;;  %v9911_v55 = vcombine.low %v2698_v12, %v2705_v27  ;;  %v4840_v41 = vcombine.low %v4832_v20, %v4839_v53  ;;  %v9927_v53 = vpop.xlane.xlu1 %502 }
 0x17c   :  { %12021 = vst [vmem:[#allocation20_spill] sm:$0xff] %v9905_v4  ;;  %v5376_v58 = vrot.slane %v9841_v0, %v8582_v29  ;;  %v2964_v16 = vrot.slane %v9433_v59, %v8539_v47  ;;  %v2971_v34 = vrot.slane %v9433_v59, %v8542_v48  ;;  %v2978_v35 = vrot.slane %v9433_v59, %v8557_v1  ;;  %v9933_v10 = vpop.xlane.xlu0 %499 }
 0x17d   :  { %v2985_v46 = vrot.slane %v9433_v59, %v8560_v6  ;;  %v3860_v11 = vrot.slane %v494_v23, %v8539_v47  ;;  %v3867_v2 = vrot.slane %v494_v23, %v8542_v48  ;;  %v6175_v20 = vrot.slane %v6167_v25, %v8582_v29 }
 0x17e   :  { %v6182_v0 = vrot.slane %v6168_v54, %v8582_v29  ;;  %v3874_v19 = vrot.slane %v494_v23, %v8557_v1  ;;  %v3881_v22 = vrot.slane %v494_v23, %v8560_v6  ;;  %v6158_v28 = vrot.slane %v6150_v49, %v8582_v29 }
 0x17f   :  { %v6165_v14 = vrot.slane %v6151_v56, %v8582_v29  ;;  %v3412_v59 = vrot.slane %v9665_v3, %v8539_v47  ;;  %v3419_v25 = vrot.slane %v9665_v3, %v8542_v48  ;;  %v3426_v54 = vrot.slane %v9665_v3, %v8557_v1 }
 0x180   :  { %v3433_v57 = vrot.slane %v9665_v3, %v8560_v6  ;;  %v5640_v12 = vcombine.low %v2964_v16, %v2971_v34  ;;  %v5641_v23 = vcombine.low %v2978_v35, %v2985_v46  ;;  %v6183_v27 = vcombine.low %v6175_v20, %v6182_v0  ;;  %v9953_v16 = vpop.xlane.xlu1 %508  ;;  %v9955_v34 = vpop.xlane.xlu0 %505 }
 0x181   :  { %v6166_v49 = vcombine.low %v6158_v28, %v6165_v14  ;;  %v2768_v60 = vrot.slane %v9285_v26, %v8539_v47  ;;  %v2775_v8 = vrot.slane %v9285_v26, %v8542_v48  ;;  %v5383_v42 = vrot.slane %v9843_v30, %v8582_v29 }
 0x182   :  { %v2782_v9 = vrot.slane %v9285_v26, %v8557_v1  ;;  %v6184_v3 = vcombine.low %v3860_v11, %v3867_v2  ;;  %v6185_v56 = vcombine.low %v3874_v19, %v3881_v22  ;;  %6762 = vperm.xlu0 %7982, %v6183_v27   ;;  %v2789_v35 = vrot.slane %v9285_v26, %v8560_v6 }
 0x183   :  { %6759 = vperm.xlu1 %7983, %v6166_v49   ;;  %v2740_v30 = vrot.slane %v9288_v61, %v8539_v47  ;;  %v5912_v46 = vcombine.low %v3412_v59, %v3419_v25  ;;  %v5913_v20 = vcombine.low %v3426_v54, %v3433_v57  ;;  %v2747_v0 = vrot.slane %v9288_v61, %v8542_v48 }
 0x184   :  { %v2754_v11 = vrot.slane %v9288_v61, %v8557_v1  ;;  %v5648_v2 = vrot.slane %v5640_v12, %v8582_v29  ;;  %v5655_v19 = vrot.slane %v5641_v23, %v8582_v29  ;;  %v2761_v22 = vrot.slane %v9288_v61, %v8560_v6  ;;  %v9978_v25 = vpop.xlane.xlu1 %514  ;;  %v9980_v54 = vpop.xlane.xlu0 %511 }
 0x185   :  { %v2992_v26 = vrot.slane %v9431_v13, %v8539_v47  ;;  %v2999_v28 = vrot.slane %v9431_v13, %v8542_v48  ;;  %v3006_v14 = vrot.slane %v9431_v13, %v8557_v1  ;;  %v3013_v59 = vrot.slane %v9431_v13, %v8560_v6 }
 0x186   :  { %6573 = vperm.xlu0 %7982, %v9869_v43   ;;  %v6192_v61 = vrot.slane %v6184_v3, %v8582_v29  ;;  %v6199_v57 = vrot.slane %v6185_v56, %v8582_v29  ;;  %v9984_v12 = vcombine.low %v2768_v60, %v2775_v8  ;;  %v9986_v23 = vcombine.low %v2782_v9, %v2789_v35 }
 0x187   :  { %6525 = vperm.xlu1 %7983, %v4840_v41   ;;  %v5920_v27 = vrot.slane %v5912_v46, %v8582_v29  ;;  %v5927_v49 = vrot.slane %v5913_v20, %v8582_v29  ;;  %v9990_v13 = vcombine.low %v2740_v30, %v2747_v0  ;;  %v5656_v43 = vcombine.low %v5648_v2, %v5655_v19 }
 0x188   :  { %v5384_v41 = vcombine.low %v5376_v58, %v5383_v42  ;;  %v4856_v38 = vrot.slane %v9260_v5, %v8582_v29  ;;  %v9994_v4 = vcombine.low %v2754_v11, %v2761_v22  ;;  %v5657_v3 = vcombine.low %v2992_v26, %v2999_v28  ;;  %v10002_v35 = vpop.xlane.xlu1 %520  ;;  %v10004_v42 = vpop.xlane.xlu0 %517 }
 0x189   :  { %v5121_v60 = vrot.slane %v9523_v39, %v8582_v29  ;;  %v5128_v8 = vrot.slane %v9525_v40, %v8582_v29  ;;  %v5658_v9 = vcombine.low %v3006_v14, %v3013_v59  ;;  %v3440_v56 = vrot.slane %v9663_v15, %v8539_v47 }
 0x18a   :  { %6669 = vperm.xlu0 %7982, %v5656_v43   ;;  %v6200_v58 = vcombine.low %v6192_v61, %v6199_v57  ;;  %v3447_v5 = vrot.slane %v9663_v15, %v8542_v48  ;;  %v3454_v39 = vrot.slane %v9663_v15, %v8557_v1  ;;  %v3461_v40 = vrot.slane %v9663_v15, %v8560_v6 }
 0x18b   :  { %6621 = vperm.xlu1 %7983, %v5384_v41   ;;  %v5928_v30 = vcombine.low %v5920_v27, %v5927_v49  ;;  %v3888_v46 = vrot.slane %v9907_v36, %v8539_v47  ;;  %v3895_v20 = vrot.slane %v9907_v36, %v8542_v48  ;;  %v3902_v0 = vrot.slane %v9907_v36, %v8557_v1 }
 0x18c   :  { %v3909_v11 = vrot.slane %v9907_v36, %v8560_v6  ;;  %v2824_v2 = vrot.slane %v9325_v52, %v8539_v47  ;;  %v2831_v19 = vrot.slane %v9325_v52, %v8542_v48  ;;  %v2838_v15 = vrot.slane %v9325_v52, %v8557_v1  ;;  %v10030_v28 = vpop.xlane.xlu1 %526  ;;  %v10032_v36 = vpop.xlane.xlu0 %523 }
 0x18d   :  { %v2845_v22 = vrot.slane %v9325_v52, %v8560_v6  ;;  %v2796_v26 = vrot.slane %v9328_v51, %v8539_v47  ;;  %12022 = vst [vmem:[#allocation85_spill] sm:$0xff] %v10030_v28  ;;  %v5393_v14 = vrot.slane %v9825_v62, %v8582_v29  ;;  %v5400_v59 = vrot.slane %v9839_v24, %v8582_v29 }
 0x18e   :  { %6765 = vperm.xlu0 %7982, %v6200_v58   ;;  %v12023_v61 = vrot.slane %v9258_v17, %v8582_v29  ;;  %v5129_v52 = vcombine.low %v5121_v60, %v5128_v8  ;;  %v5665_v27 = vrot.slane %v5657_v3, %v8582_v29  ;;  %v5672_v49 = vrot.slane %v5658_v9, %v8582_v29 }
 0x18f   :  { %6717 = vperm.xlu1 %7983, %v5928_v30   ;;  %v5929_v43 = vcombine.low %v3440_v56, %v3447_v5  ;;  %v5930_v41 = vcombine.low %v3454_v39, %v3461_v40  ;;  %v6201_v58 = vcombine.low %v3888_v46, %v3895_v20  ;;  %v6202_v30 = vcombine.low %v3902_v0, %v3909_v11 }
 0x190   :  { %v4857_v57 = vcombine.low %v12023_v61, %v4856_v38  ;;  %v10043_v28 = vcombine.low %v2824_v2, %v2831_v19  ;;  %v2803_v62 = vrot.slane %v9328_v51, %v8542_v48  ;;  %v2810_v24 = vrot.slane %v9328_v51, %v8557_v1  ;;  %v10055_v60 = vpop.xlane.xlu1 %532  ;;  %v10063_v39 = vpop.xlane.xlu0 %529 }
 0x191   :  { %v2817_v17 = vrot.slane %v9328_v51, %v8560_v6  ;;  %v3020_v38 = vrot.slane %v9463_v31, %v8539_v47  ;;  %v3027_v3 = vrot.slane %v9463_v31, %v8542_v48  ;;  %12025 = vst [vmem:[#allocation87_spill] sm:$0xff] %v10055_v60  ;;  %v5401_v8 = vcombine.low %v5393_v14, %v5400_v59 }
 0x192   :  { %12024 = vst [vmem:[#allocation86_spill] sm:$0xff] %v10043_v28  ;;  %6576 = vperm.xlu0 %7982, %v5129_v52   ;;  %v3034_v9 = vrot.slane %v9463_v31, %v8557_v1  ;;  %v3041_v56 = vrot.slane %v9463_v31, %v8560_v6  ;;  %v3468_v51 = vrot.slane %v9699_v21, %v8539_v47  ;;  %12026 = vst [vmem:[#allocation88_spill] sm:$0xff] %v10063_v39 }
 0x193   :  { %6528 = vperm.xlu1 %7983, %v4857_v57   ;;  %v5673_v5 = vcombine.low %v5665_v27, %v5672_v49  ;;  %v5937_v40 = vrot.slane %v5929_v43, %v8582_v29  ;;  %v5944_v46 = vrot.slane %v5930_v41, %v8582_v29  ;;  %v6209_v20 = vrot.slane %v6201_v58, %v8582_v29 }
 0x194   :  { %v6216_v0 = vrot.slane %v6202_v30, %v8582_v29  ;;  %v3475_v11 = vrot.slane %v9699_v21, %v8542_v48  ;;  %v3482_v31 = vrot.slane %v9699_v21, %v8557_v1  ;;  %v3489_v2 = vrot.slane %v9699_v21, %v8560_v6  ;;  %v10083_v57 = vpop.permute.xlu1 %6426  ;;  %v12028_v21 = vld [vmem:[#allocation59_spill] sm:$0xff]  ;;  %v10101_v39 = vpop.permute.xlu0 %6423 }
 0x195   :  { %v3916_v19 = vrot.slane %v9933_v10, %v8539_v47  ;;  %v3923_v14 = vrot.slane %v9933_v10, %v8542_v48  ;;  %v3930_v59 = vrot.slane %v9933_v10, %v8557_v1  ;;  %v3937_v61 = vrot.slane %v9933_v10, %v8560_v6  ;;  %12027 = vst [vmem:[#allocation89_spill] sm:$0xff] %v10083_v57 }
 0x196   :  { %6672 = vperm.xlu0 %7982, %v5673_v5   ;;  %v4866_v52 = vrot.slane %v9275_v18, %v8582_v29  ;;  %v4873_v27 = vrot.slane %v12028_v21, %v8582_v29  ;;  %v5138_v49 = vrot.slane %v9597_v33, %v8582_v29  ;;  %v5145_v43 = vrot.slane %v9603_v50, %v8582_v29  ;;  %v12034_v50 = vld [vmem:[#allocation34_spill] sm:$0xff] }
 0x197   :  { %6624 = vperm.xlu1 %7983, %v5401_v8   ;;  %v5674_v41 = vcombine.low %v3020_v38, %v3027_v3  ;;  %v5675_v58 = vcombine.low %v3034_v9, %v3041_v56  ;;  %v5945_v30 = vcombine.low %v5937_v40, %v5944_v46  ;;  %v6217_v10 = vcombine.low %v6209_v20, %v6216_v0  ;;  %v12035_v9 = vld [vmem:[#allocation63_spill] sm:$0xff] }
 0x198   :  { %v10093_v8 = vcombine.low %v2838_v15, %v2845_v22  ;;  %v10095_v5 = vcombine.low %v2796_v26, %v2803_v62  ;;  %v10097_v57 = vcombine.low %v2810_v24, %v2817_v17  ;;  %v5946_v18 = vcombine.low %v3468_v51, %v3475_v11  ;;  %v10099_v33 = vpop.permute.xlu1 %6429  ;;  %12033 = vst [vmem:[#allocation93_spill] sm:$0xff] %v10101_v39 }
 0x199   :  { %v5947_v28 = vcombine.low %v3482_v31, %v3489_v2  ;;  %v6218_v60 = vcombine.low %v3916_v19, %v3923_v14  ;;  %v6219_v21 = vcombine.low %v3930_v59, %v3937_v61  ;;  %12032 = vst [vmem:[#allocation92_spill] sm:$0xff] %v10099_v33  ;;  %v3048_v38 = vrot.slane %v12034_v50, %v8539_v47  ;;  %v12038_v14 = vld [vmem:[#allocation64_spill] sm:$0xff] }
 0x19a   :  { %12029 = vst [vmem:[#allocation59_spill] sm:$0xff] %v10093_v8  ;;  %12030 = vst [vmem:[#allocation90_spill] sm:$0xff] %v10095_v5  ;;  %6768 = vperm.xlu0 %7982, %v6217_v10   ;;  %v3055_v15 = vrot.slane %v12034_v50, %v8542_v48  ;;  %v4874_v22 = vcombine.low %v4866_v52, %v4873_v27  ;;  %v5146_v26 = vcombine.low %v5138_v49, %v5145_v43  ;;  %v12039_v49 = vld [vmem:[#allocation6_spill] sm:$0xff] }
 0x19b   :  { %12031 = vst [vmem:[#allocation91_spill] sm:$0xff] %v10097_v57  ;;  %6720 = vperm.xlu1 %7983, %v5945_v30   ;;  %v5410_v62 = vrot.slane %v9849_v45, %v8582_v29  ;;  %v5417_v24 = vrot.slane %v9851_v63, %v8582_v29  ;;  %v5682_v17 = vrot.slane %v5674_v41, %v8582_v29  ;;  %v10122_v63 = vpop.permute.xlu0 %6450 }
 0x19c   :  { %v5689_v3 = vrot.slane %v5675_v58, %v8582_v29  ;;  %v2880_v56 = vrot.slane %v12035_v9, %v8539_v47  ;;  %v3062_v51 = vrot.slane %v12034_v50, %v8557_v1  ;;  %v3069_v40 = vrot.slane %v12034_v50, %v8560_v6  ;;  %v10120_v45 = vpop.permute.xlu1 %6432  ;;  %12037 = vst [vmem:[#allocation63_spill] sm:$0xff] %v10122_v63 }
 0x19d   :  { %v5954_v46 = vrot.slane %v5946_v18, %v8582_v29  ;;  %12036 = vst [vmem:[#allocation34_spill] sm:$0xff] %v10120_v45  ;;  %v5961_v20 = vrot.slane %v5947_v28, %v8582_v29  ;;  %v6226_v0 = vrot.slane %v6218_v60, %v8582_v29  ;;  %v6233_v11 = vrot.slane %v6219_v21, %v8582_v29 }
 0x19e   :  { %6579 = vperm.xlu0 %7982, %v5146_v26   ;;  %v2887_v31 = vrot.slane %v12035_v9, %v8542_v48  ;;  %v2894_v2 = vrot.slane %v12035_v9, %v8557_v1  ;;  %v2901_v19 = vrot.slane %v12035_v9, %v8560_v6  ;;  %v2852_v59 = vrot.slane %v12038_v14, %v8539_v47 }
 0x19f   :  { %6531 = vperm.xlu1 %7983, %v4874_v22   ;;  %v2859_v61 = vrot.slane %v12038_v14, %v8542_v48  ;;  %v5691_v28 = vcombine.low %v3048_v38, %v3055_v15  ;;  %v5418_v52 = vcombine.low %v5410_v62, %v5417_v24  ;;  %v5690_v60 = vcombine.low %v5682_v17, %v5689_v3  ;;  %v10147_v18 = vpop.permute.xlu0 %6456  ;;  %v12042_v38 = vld [vmem:[#allocation21_spill] sm:$0xff]  ;;  %v12043_v22 = vld [vmem:[#allocation22_spill] sm:$0xff] }
 0x1a0   :  { %v5692_v27 = vcombine.low %v3062_v51, %v3069_v40  ;;  %v3496_v43 = vrot.slane %v12039_v49, %v8539_v47  ;;  %v3503_v41 = vrot.slane %v12039_v49, %v8542_v48  ;;  %v3510_v58 = vrot.slane %v12039_v49, %v8557_v1  ;;  %v10145_v10 = vpop.permute.xlu1 %6435  ;;  %12041 = vst [vmem:[#allocation6_spill] sm:$0xff] %v10147_v18  ;;  %v12044_v62 = vld [vmem:[#allocation37_spill] sm:$0xff]  ;;  %v12045_v17 = vld [vmem:[#allocation38_spill] sm:$0xff] }
 0x1a1   :  { %v3517_v30 = vrot.slane %v12039_v49, %v8560_v6  ;;  %12040 = vst [vmem:[#allocation64_spill] sm:$0xff] %v10145_v10  ;;  %v5962_v21 = vcombine.low %v5954_v46, %v5961_v20  ;;  %v6234_v50 = vcombine.low %v6226_v0, %v6233_v11  ;;  %v4883_v15 = vrot.slane %v12042_v38, %v8582_v29  ;;  %v12052_v10 = vld [vmem:[#allocation81_spill] sm:$0xff] }
 0x1a2   :  { %6675 = vperm.xlu0 %7982, %v5690_v60   ;;  %v4890_v26 = vrot.slane %v12043_v22, %v8582_v29  ;;  %v5155_v24 = vrot.slane %v12044_v62, %v8582_v29  ;;  %v5162_v3 = vrot.slane %v12045_v17, %v8582_v29  ;;  %v3944_v9 = vrot.slane %v9927_v53, %v8539_v47 }
 0x1a3   :  { %6627 = vperm.xlu1 %7983, %v5418_v52   ;;  %v3951_v51 = vrot.slane %v9927_v53, %v8542_v48  ;;  %v3958_v40 = vrot.slane %v9927_v53, %v8557_v1  ;;  %v3965_v46 = vrot.slane %v9927_v53, %v8560_v6  ;;  %v10165_v20 = vcombine.low %v2880_v56, %v2887_v31  ;;  %v12047_v52 = vld [vmem:[#allocation46_spill] sm:$0xff]  ;;  %v10180_v56 = vpop.permute.xlu0 %6462 }
 0x1a4   :  { %v2866_v0 = vrot.slane %v12038_v14, %v8557_v1  ;;  %v2873_v11 = vrot.slane %v12038_v14, %v8560_v6  ;;  %v3076_v60 = vrot.slane %v12047_v52, %v8539_v47  ;;  %v3083_v49 = vrot.slane %v12047_v52, %v8542_v48  ;;  %v10178_v53 = vpop.permute.xlu1 %6438  ;;  %12050 = vst [vmem:[#allocation37_spill] sm:$0xff] %v10180_v56  ;;  %v12051_v14 = vld [vmem:[#allocation18_spill] sm:$0xff] }
 0x1a5   :  { %12046 = vst [vmem:[#allocation21_spill] sm:$0xff] %v10165_v20  ;;  %v5963_v38 = vcombine.low %v3496_v43, %v3503_v41  ;;  %v5964_v22 = vcombine.low %v3510_v58, %v3517_v30  ;;  %v12048_v62 = vlaneseq  ;;  %12049 = vst [vmem:[#allocation22_spill] sm:$0xff] %v10178_v53  ;;  %v4891_v31 = vcombine.low %v4883_v15, %v4890_v26  ;;  %v12093_v20 = vld [vmem:[#allocation53_spill] sm:$0xff] }
 0x1a6   :  { %6771 = vperm.xlu0 %7982, %v6234_v50   ;;  %v5163_v18 = vcombine.low %v5155_v24, %v5162_v3  ;;  %v5427_v63 = vrot.slane %v12051_v14, %v8582_v29  ;;  %v5434_v45 = vrot.slane %v12052_v10, %v8582_v29  ;;  %v6235_v33 = vcombine.low %v3944_v9, %v3951_v51  ;;  %v12056_v10 = vld [vmem:[#allocation44_spill] sm:$0xff] }
 0x1a7   :  { %v10176_v17 = vand.u32 127, %v12048_v62  ;;  %6723 = vperm.xlu1 %7983, %v5962_v21   ;;  %v6236_v43 = vcombine.low %v3958_v40, %v3965_v46  ;;  %v5699_v41 = vrot.slane %v5691_v28, %v8582_v29  ;;  %v5706_v58 = vrot.slane %v5692_v27, %v8582_v29  ;;  %v12057_v3 = vld [vmem:[#allocation16_spill] sm:$0xff] }
 0x1a8   :  { %v10188_v30 = vcombine.low %v2894_v2, %v2901_v19  ;;  %v10190_v21 = vcombine.low %v2852_v59, %v2859_v61  ;;  %v3090_v50 = vrot.slane %v12047_v52, %v8557_v1  ;;  %v3097_v15 = vrot.slane %v12047_v52, %v8560_v6  ;;  %v10204_v2 = vpop.permute.xlu1 %6441  ;;  %v10206_v19 = vpop.permute.xlu0 %6468 }
 0x1a9   :  { %v10196_v26 = vcombine.low %v2866_v0, %v2873_v11  ;;  %v3104_v24 = vrot.slane %v12056_v10, %v8539_v47  ;;  %v10202_v28 = vsub.s32 %v10176_v17, %v12057_v3  ;;  %12058 = vst [vmem:[#allocation81_spill] sm:$0xff] %v10204_v2  ;;  %12059 = vst [vmem:[#allocation44_spill] sm:$0xff] %v10206_v19  ;;  %v12060_v11 = vld [vmem:[#allocation70_spill] sm:$0xff] }
 0x1aa   :  { %12053 = vst [vmem:[#allocation38_spill] sm:$0xff] %v10188_v30  ;;  %12054 = vst [vmem:[#allocation46_spill] sm:$0xff] %v10190_v21  ;;  %6582 = vperm.xlu0 %7982, %v5163_v18   ;;  %v3111_v59 = vrot.slane %v12056_v10, %v8542_v48  ;;  %v10210_v61 = vcombine.low %v3076_v60, %v3083_v49  ;;  %v5435_v27 = vcombine.low %v5427_v63, %v5434_v45  ;;  %v12066_v19 = vld [vmem:[#allocation42_spill] sm:$0xff]  ;;  %v12095_v21 = vld [vmem:[#allocation11_spill] sm:$0xff] }
 0x1ab   :  { %12055 = vst [vmem:[#allocation18_spill] sm:$0xff] %v10196_v26  ;;  %6534 = vperm.xlu1 %7983, %v4891_v31   ;;  %v5971_v9 = vrot.slane %v5963_v38, %v8582_v29  ;;  %v5707_v51 = vcombine.low %v5699_v41, %v5706_v58  ;;  %v5978_v40 = vrot.slane %v5964_v22, %v8582_v29  ;;  %v6812_v49 = vadd.s32 4294967288, %v10176_v17  ;;  %v12064_v58 = vld [vmem:[#allocation26_spill] sm:$0xff] }
 0x1ac   :  { %v6243_v46 = vrot.slane %v6235_v33, %v8582_v29  ;;  %v6250_v0 = vrot.slane %v6236_v43, %v8582_v29  ;;  %v5709_v18 = vcombine.low %v3090_v50, %v3097_v15  ;;  %v3524_v52 = vrot.slane %v12060_v11, %v8539_v47  ;;  %v10229_v38 = vpop.permute.xlu1 %6444  ;;  %v10231_v22 = vpop.permute.xlu0 %6474  ;;  %v12063_v43 = vld [vmem:[#allocation25_spill] sm:$0xff] }
 0x1ad   :  { %v3531_v62 = vrot.slane %v12060_v11, %v8542_v48  ;;  %v3538_v60 = vrot.slane %v12060_v11, %v8557_v1  ;;  %v3545_v45 = vrot.slane %v12060_v11, %v8560_v6  ;;  %v3972_v63 = vrot.slane %v9955_v34, %v8539_v47  ;;  %12061 = vst [vmem:[#allocation16_spill] sm:$0xff] %v10229_v38 }
 0x1ae   :  { %v3979_v33 = vrot.slane %v9955_v34, %v8542_v48  ;;  %6678 = vperm.xlu0 %7982, %v5707_v51   ;;  %12062 = vst [vmem:[#allocation70_spill] sm:$0xff] %v10231_v22  ;;  %v3986_v31 = vrot.slane %v9955_v34, %v8557_v1  ;;  %v3993_v14 = vrot.slane %v9955_v34, %v8560_v6 }
 0x1af   :  { %6630 = vperm.xlu1 %7983, %v5435_v27   ;;  %v4900_v41 = vrot.slane %v12063_v43, %v8582_v29  ;;  %v4907_v50 = vrot.slane %v12064_v58, %v8582_v29  ;;  %v5979_v15 = vcombine.low %v5971_v9, %v5978_v40  ;;  %v6251_v11 = vcombine.low %v6243_v46, %v6250_v0  ;;  %v12065_v27 = vld [vmem:[#allocation54_spill] sm:$0xff]  ;;  %v12067_v43 = vld [vmem:[#allocation36_spill] sm:$0xff] }
 0x1b0   :  { %v5172_v51 = vrot.slane %v12065_v27, %v8582_v29  ;;  %v5179_v56 = vrot.slane %v12066_v19, %v8582_v29  ;;  %v3118_v38 = vrot.slane %v12056_v10, %v8557_v1  ;;  %v3125_v34 = vrot.slane %v12056_v10, %v8560_v6  ;;  %v10255_v0 = vpop.permute.xlu1 %6447  ;;  %v10257_v19 = vpop.permute.xlu0 %6480 }
 0x1b1   :  { %v10249_v2 = vcombine.low %v3104_v24, %v3111_v59  ;;  %v3160_v53 = vrot.slane %v12067_v43, %v8539_v47  ;;  %v3167_v9 = vrot.slane %v12067_v43, %v8542_v48  ;;  %v5980_v40 = vcombine.low %v3524_v52, %v3531_v62  ;;  %12068 = vst [vmem:[#allocation25_spill] sm:$0xff] %v10255_v0 }
 0x1b2   :  { %v5981_v46 = vcombine.low %v3538_v60, %v3545_v45  ;;  %6774 = vperm.xlu0 %7982, %v6251_v11   ;;  %12069 = vst [vmem:[#allocation26_spill] sm:$0xff] %v10257_v19  ;;  %v6252_v58 = vcombine.low %v3972_v63, %v3979_v33  ;;  %v6253_v27 = vcombine.low %v3986_v31, %v3993_v14 }
 0x1b3   :  { %6726 = vperm.xlu1 %7983, %v5979_v15   ;;  %v4908_v22 = vcombine.low %v4900_v41, %v4907_v50  ;;  %v5444_v10 = vrot.slane %v9899_v37, %v8582_v29  ;;  %v5180_v24 = vcombine.low %v5172_v51, %v5179_v56  ;;  %v5451_v59 = vrot.slane %v9901_v7, %v8582_v29  ;;  %v12070_v37 = vld [vmem:[#allocation47_spill] sm:$0xff] }
 0x1b4   :  { %v5716_v52 = vrot.slane %v10210_v61, %v8582_v29  ;;  %v5723_v62 = vrot.slane %v5709_v18, %v8582_v29  ;;  %v10266_v60 = vcombine.low %v3118_v38, %v3125_v34  ;;  %v3174_v45 = vrot.slane %v12067_v43, %v8557_v1  ;;  %v10282_v38 = vpop.permute.xlu1 %6453  ;;  %v10290_v50 = vpop.permute.xlu0 %6486 }
 0x1b5   :  { %v3181_v63 = vrot.slane %v12067_v43, %v8560_v6  ;;  %v10273_v33 = vsub.s32 %v6812_v49, %v12057_v3  ;;  %v3132_v56 = vrot.slane %v12070_v37, %v8539_v47  ;;  %v3139_v7 = vrot.slane %v12070_v37, %v8542_v48  ;;  %12071 = vst [vmem:[#allocation54_spill] sm:$0xff] %v10282_v38  ;;  %v12077_v38 = vld [vmem:[#allocation50_spill] sm:$0xff] }
 0x1b6   :  { %v3146_v61 = vrot.slane %v12070_v37, %v8557_v1  ;;  %v6819_v18 = vadd.s32 4294967280, %v10176_v17  ;;  %6585 = vperm.xlu0 %7982, %v5180_v24   ;;  %v10284_v31 = vcombine.low %v3160_v53, %v3167_v9  ;;  %v3153_v49 = vrot.slane %v12070_v37, %v8560_v6  ;;  %12072 = vst [vmem:[#allocation42_spill] sm:$0xff] %v10290_v50  ;;  %v12073_v53 = vld [vmem:[#allocation7_spill] sm:$0xff]  ;;  %v12076_v37 = vld [vmem:[#allocation24_spill] sm:$0xff] }
 0x1b7   :  { %6537 = vperm.xlu1 %7983, %v4908_v22   ;;  %v5988_v14 = vrot.slane %v5980_v40, %v8582_v29  ;;  %v5995_v41 = vrot.slane %v5981_v46, %v8582_v29  ;;  %v5452_v15 = vcombine.low %v5444_v10, %v5451_v59  ;;  %v5724_v11 = vcombine.low %v5716_v52, %v5723_v62  ;;  %v12075_v62 = vld [vmem:[#allocation23_spill] sm:$0xff] }
 0x1b8   :  { %v6260_v51 = vrot.slane %v6252_v58, %v8582_v29  ;;  %v6267_v22 = vrot.slane %v6253_v27, %v8582_v29  ;;  %v10294_v34 = vcombine.low %v3174_v45, %v3181_v63  ;;  %v3552_v43 = vrot.slane %v12073_v53, %v8539_v47  ;;  %v10308_v27 = vpop.permute.xlu1 %6459 }
 0x1b9   :  { %v3559_v9 = vrot.slane %v12073_v53, %v8542_v48  ;;  %v3566_v40 = vrot.slane %v12073_v53, %v8557_v1  ;;  %v3573_v46 = vrot.slane %v12073_v53, %v8560_v6  ;;  %v4000_v10 = vrot.slane %v9953_v16, %v8539_v47  ;;  %12074 = vst [vmem:[#allocation36_spill] sm:$0xff] %v10308_v27 }
 0x1ba   :  { %v4007_v58 = vrot.slane %v9953_v16, %v8542_v48  ;;  %6681 = vperm.xlu0 %7982, %v5724_v11   ;;  %v4014_v24 = vrot.slane %v9953_v16, %v8557_v1  ;;  %v4021_v59 = vrot.slane %v9953_v16, %v8560_v6  ;;  %v5996_v52 = vcombine.low %v5988_v14, %v5995_v41  ;;  %v12078_v11 = vld [vmem:[#allocation51_spill] sm:$0xff]  ;;  %v12079_v16 = vld [vmem:[#allocation48_spill] sm:$0xff] }
 0x1bb   :  { %6633 = vperm.xlu1 %7983, %v5452_v15   ;;  %v4917_v45 = vrot.slane %v12075_v62, %v8582_v29  ;;  %v6268_v63 = vcombine.low %v6260_v51, %v6267_v22  ;;  %v4924_v53 = vrot.slane %v12076_v37, %v8582_v29  ;;  %v5189_v15 = vrot.slane %v12077_v38, %v8582_v29  ;;  %v10333_v37 = vpop.permute.xlu0 %6492 }
 0x1bc   :  { %v5196_v27 = vrot.slane %v12078_v11, %v8582_v29  ;;  %v10322_v50 = vcombine.low %v3132_v56, %v3139_v7  ;;  %v10324_v0 = vcombine.low %v3146_v61, %v3153_v49  ;;  %v3216_v14 = vrot.slane %v12079_v16, %v8539_v47  ;;  %12081 = vst [vmem:[#allocation7_spill] sm:$0xff] %v10333_v37  ;;  %v10335_v38 = vpop.permute.xlu1 %6465  ;;  %v12083_v61 = vld [vmem:[#allocation83_spill] sm:$0xff]  ;;  %v12084_v11 = vld [vmem:[#allocation84_spill] sm:$0xff] }
 0x1bd   :  { %v10329_v41 = vsub.s32 %v6819_v18, %v12057_v3  ;;  %v3223_v51 = vrot.slane %v12079_v16, %v8542_v48  ;;  %v5997_v22 = vcombine.low %v3552_v43, %v3559_v9  ;;  %v5998_v62 = vcombine.low %v3566_v40, %v3573_v46  ;;  %12082 = vst [vmem:[#allocation23_spill] sm:$0xff] %v10335_v38  ;;  %v12091_v38 = vld [vmem:[#allocation61_spill] sm:$0xff] }
 0x1be   :  { %6777 = vperm.xlu0 %7982, %v6268_v63   ;;  %v6269_v56 = vcombine.low %v4000_v10, %v4007_v58  ;;  %v6270_v7 = vcombine.low %v4014_v24, %v4021_v59  ;;  %v5461_v49 = vrot.slane %v12083_v61, %v8582_v29  ;;  %v5468_v18 = vrot.slane %v12084_v11, %v8582_v29  ;;  %v12085_v10 = vld [vmem:[#allocation52_spill] sm:$0xff] }
 0x1bf   :  { %12080 = vst [vmem:[#allocation47_spill] sm:$0xff] %v10329_v41  ;;  %6729 = vperm.xlu1 %7983, %v5996_v52   ;;  %v4925_v19 = vcombine.low %v4917_v45, %v4924_v53  ;;  %v5197_v39 = vcombine.low %v5189_v15, %v5196_v27  ;;  %v5733_v43 = vrot.slane %v10249_v2, %v8582_v29  ;;  %v12087_v52 = vld [vmem:[#allocation10_spill] sm:$0xff]  ;;  %v12089_v11 = vld [vmem:[#allocation8_spill] sm:$0xff] }
 0x1c0   :  { %v5740_v9 = vrot.slane %v10266_v60, %v8582_v29  ;;  %v3230_v40 = vrot.slane %v12079_v16, %v8557_v1  ;;  %v3237_v46 = vrot.slane %v12079_v16, %v8560_v6  ;;  %v3188_v58 = vrot.slane %v12085_v10, %v8539_v47  ;;  %v10359_v27 = vpop.permute.xlu1 %6471  ;;  %v10366_v16 = vpop.permute.xlu0 %6498 }
 0x1c1   :  { %v3195_v24 = vrot.slane %v12085_v10, %v8542_v48  ;;  %v10353_v59 = vcombine.low %v3216_v14, %v3223_v51  ;;  %v3202_v2 = vrot.slane %v12085_v10, %v8557_v1  ;;  %v3209_v60 = vrot.slane %v12085_v10, %v8560_v6  ;;  %12086 = vst [vmem:[#allocation24_spill] sm:$0xff] %v10359_v27 }
 0x1c2   :  { %6588 = vperm.xlu0 %7982, %v5197_v39   ;;  %v3272_v45 = vrot.slane %v12087_v52, %v8539_v47  ;;  %v3279_v63 = vrot.slane %v12087_v52, %v8542_v48  ;;  %v5469_v53 = vcombine.low %v5461_v49, %v5468_v18  ;;  %v6005_v15 = vrot.slane %v5997_v22, %v8582_v29 }
 0x1c3   :  { %6540 = vperm.xlu1 %7983, %v4925_v19   ;;  %12088 = vst [vmem:[#allocation50_spill] sm:$0xff] %v10366_v16  ;;  %v5741_v14 = vcombine.low %v5733_v43, %v5740_v9  ;;  %v6012_v51 = vrot.slane %v5998_v62, %v8582_v29  ;;  %v6277_v61 = vrot.slane %v6269_v56, %v8582_v29 }
 0x1c4   :  { %v6284_v39 = vrot.slane %v6270_v7, %v8582_v29  ;;  %v3286_v19 = vrot.slane %v12087_v52, %v8557_v1  ;;  %v3580_v10 = vrot.slane %v12089_v11, %v8539_v47  ;;  %v3587_v49 = vrot.slane %v12089_v11, %v8542_v48  ;;  %v10385_v7 = vpop.permute.xlu1 %6477 }
 0x1c5   :  { %v3594_v22 = vrot.slane %v12089_v11, %v8557_v1  ;;  %v3601_v18 = vrot.slane %v12089_v11, %v8560_v6  ;;  %v4028_v62 = vrot.slane %v9980_v54, %v8539_v47  ;;  %v4035_v56 = vrot.slane %v9980_v54, %v8542_v48  ;;  %12090 = vst [vmem:[#allocation51_spill] sm:$0xff] %v10385_v7  ;;  %v12092_v11 = vld [vmem:[#allocation62_spill] sm:$0xff] }
 0x1c6   :  { %6684 = vperm.xlu0 %7982, %v5741_v14   ;;  %v4042_v43 = vrot.slane %v9980_v54, %v8557_v1  ;;  %v4049_v9 = vrot.slane %v9980_v54, %v8560_v6  ;;  %v4934_v16 = vrot.slane %v12091_v38, %v8582_v29  ;;  %v4941_v37 = vrot.slane %v12092_v11, %v8582_v29  ;;  %v12094_v14 = vld [vmem:[#allocation69_spill] sm:$0xff] }
 0x1c7   :  { %6636 = vperm.xlu1 %7983, %v5469_v53   ;;  %v6013_v27 = vcombine.low %v6005_v15, %v6012_v51  ;;  %v6285_v30 = vcombine.low %v6277_v61, %v6284_v39  ;;  %v5206_v53 = vrot.slane %v12093_v20, %v8582_v29  ;;  %v5213_v7 = vrot.slane %v12094_v14, %v8582_v29  ;;  %v10410_v39 = vpop.permute.xlu0 %6504 }
 0x1c8   :  { %v3293_v26 = vrot.slane %v12087_v52, %v8560_v6  ;;  %v3244_v54 = vrot.slane %v12095_v21, %v8539_v47  ;;  %v3251_v38 = vrot.slane %v12095_v21, %v8542_v48  ;;  %v3258_v11 = vrot.slane %v12095_v21, %v8557_v1  ;;  %12096 = vst [vmem:[#allocation48_spill] sm:$0xff] %v10410_v39  ;;  %v10412_v52 = vpop.permute.xlu1 %6483 }
 0x1c9   :  { %v3265_v15 = vrot.slane %v12095_v21, %v8560_v6  ;;  %v6014_v51 = vcombine.low %v3580_v10, %v3587_v49  ;;  %v6015_v20 = vcombine.low %v3594_v22, %v3601_v18  ;;  %v6826_v61 = vadd.s32 4294967272, %v10176_v17  ;;  %12097 = vst [vmem:[#allocation83_spill] sm:$0xff] %v10412_v52 }
 0x1ca   :  { %6780 = vperm.xlu0 %7982, %v6285_v30   ;;  %v6286_v14 = vcombine.low %v4028_v62, %v4035_v56  ;;  %v6287_v41 = vcombine.low %v4042_v43, %v4049_v9  ;;  %v4942_v8 = vcombine.low %v4934_v16, %v4941_v37  ;;  %v5478_v57 = vrot.slane %v9909_v44, %v8582_v29 }
 0x1cb   :  { %6732 = vperm.xlu1 %7983, %v6013_v27   ;;  %v5214_v5 = vcombine.low %v5206_v53, %v5213_v7  ;;  %v5485_v21 = vrot.slane %v9911_v55, %v8582_v29  ;;  %v5750_v10 = vrot.slane %v10322_v50, %v8582_v29  ;;  %v5757_v49 = vrot.slane %v10324_v0, %v8582_v29 }
 0x1cc   :  { %v10422_v27 = vcombine.low %v3230_v40, %v3237_v46  ;;  %v10424_v30 = vcombine.low %v3188_v58, %v3195_v24  ;;  %v10426_v22 = vcombine.low %v3202_v2, %v3209_v60  ;;  %v10428_v37 = vcombine.low %v3272_v45, %v3279_v63  ;;  %v10437_v50 = vpop.permute.xlu1 %6489  ;;  %v12099_v40 = vld [vmem:[#allocation39_spill] sm:$0xff]  ;;  %v12101_v63 = vld [vmem:[#allocation49_spill] sm:$0xff] }
 0x1cd   :  { %v10430_v16 = vcombine.low %v3286_v19, %v3293_v26  ;;  %v10432_v44 = vcombine.low %v3244_v54, %v3251_v38  ;;  %v10435_v55 = vsub.s32 %v6826_v61, %v12057_v3  ;;  %12098 = vst [vmem:[#allocation84_spill] sm:$0xff] %v10437_v50  ;;  %v10439_v0 = vcombine.low %v3258_v11, %v3265_v15  ;;  %v10445_v26 = vpop.permute.xlu0 %6510  ;;  %v12103_v54 = vld [vmem:[#allocation27_spill] sm:$0xff]  ;;  %v12104_v15 = vld [vmem:[#allocation60_spill] sm:$0xff]  ;;  %v12118_v50 = vld [vmem:[#allocation13_spill] sm:$0xff] }
 0x1ce   :  { %6591 = vperm.xlu0 %7982, %v5214_v5   ;;  %v3328_v46 = vrot.slane %v12099_v40, %v8539_v47  ;;  %v6022_v58 = vrot.slane %v6014_v51, %v8582_v29  ;;  %v6029_v24 = vrot.slane %v6015_v20, %v8582_v29  ;;  %12100 = vst [vmem:[#allocation52_spill] sm:$0xff] %v10445_v26  ;;  %v12105_v20 = vld [vmem:[#allocation14_spill] sm:$0xff] }
 0x1cf   :  { %6543 = vperm.xlu1 %7983, %v4942_v8   ;;  %v5486_v2 = vcombine.low %v5478_v57, %v5485_v21  ;;  %v5758_v60 = vcombine.low %v5750_v10, %v5757_v49  ;;  %v6294_v45 = vrot.slane %v6286_v14, %v8582_v29  ;;  %v6301_v8 = vrot.slane %v6287_v41, %v8582_v29  ;;  %v12106_v14 = vld [vmem:[#allocation43_spill] sm:$0xff]  ;;  %v12107_v49 = vld [vmem:[#allocation40_spill] sm:$0xff] }
 0x1d0   :  { %v3335_v5 = vrot.slane %v12099_v40, %v8542_v48  ;;  %v3608_v19 = vrot.slane %v12101_v63, %v8539_v47  ;;  %v3615_v18 = vrot.slane %v12101_v63, %v8542_v48  ;;  %v3622_v62 = vrot.slane %v12101_v63, %v8557_v1  ;;  %v10463_v7 = vpop.permute.xlu1 %6495 }
 0x1d1   :  { %v3629_v57 = vrot.slane %v12101_v63, %v8560_v6  ;;  %v4056_v56 = vrot.slane %v9978_v25, %v8539_v47  ;;  %v4063_v41 = vrot.slane %v9978_v25, %v8542_v48  ;;  %12102 = vst [vmem:[#allocation10_spill] sm:$0xff] %v10463_v7  ;;  %v4070_v43 = vrot.slane %v9978_v25, %v8557_v1 }
 0x1d2   :  { %6687 = vperm.xlu0 %7982, %v5758_v60   ;;  %v4077_v9 = vrot.slane %v9978_v25, %v8560_v6  ;;  %v6030_v53 = vcombine.low %v6022_v58, %v6029_v24  ;;  %v4951_v38 = vrot.slane %v12103_v54, %v8582_v29  ;;  %v6302_v11 = vcombine.low %v6294_v45, %v6301_v8  ;;  %v10487_v8 = vpop.permute.xlu0 %6522 }
 0x1d3   :  { %6639 = vperm.xlu1 %7983, %v5486_v2   ;;  %v4958_v51 = vrot.slane %v12104_v15, %v8582_v29  ;;  %v5223_v61 = vrot.slane %v12105_v20, %v8582_v29  ;;  %v5230_v21 = vrot.slane %v12106_v14, %v8582_v29  ;;  %v3342_v10 = vrot.slane %v12099_v40, %v8557_v1  ;;  %v12109_v20 = vld [vmem:[#allocation20_spill] sm:$0xff] }
 0x1d4   :  { %v3349_v25 = vrot.slane %v12099_v40, %v8560_v6  ;;  %v3300_v58 = vrot.slane %v12107_v49, %v8539_v47  ;;  %v3307_v24 = vrot.slane %v12107_v49, %v8542_v48  ;;  %v3314_v2 = vrot.slane %v12107_v49, %v8557_v1  ;;  %v10489_v63 = vpop.permute.xlu1 %6501 }
 0x1d5   :  { %v6031_v60 = vcombine.low %v3608_v19, %v3615_v18  ;;  %v6032_v45 = vcombine.low %v3622_v62, %v3629_v57  ;;  %12108 = vst [vmem:[#allocation8_spill] sm:$0xff] %v10489_v63  ;;  %v6303_v54 = vcombine.low %v4056_v56, %v4063_v41  ;;  %v6304_v15 = vcombine.low %v4070_v43, %v4077_v9  ;;  %v12116_v63 = vld [vmem:[#allocation71_spill] sm:$0xff] }
 0x1d6   :  { %6783 = vperm.xlu0 %7982, %v6302_v11   ;;  %v5495_v40 = vrot.slane %v9903_v32, %v8582_v29  ;;  %v5502_v14 = vrot.slane %v12109_v20, %v8582_v29  ;;  %v4959_v26 = vcombine.low %v4951_v38, %v4958_v51  ;;  %v5231_v39 = vcombine.low %v5223_v61, %v5230_v21  ;;  %v12111_v32 = vld [vmem:[#allocation12_spill] sm:$0xff]  ;;  %v6571_v61 = vpop.permute.xlu0 %6570 }
 0x1d7   :  { %6735 = vperm.xlu1 %7983, %v6030_v53   ;;  %v5767_v19 = vrot.slane %v10284_v31, %v8582_v29  ;;  %v5774_v18 = vrot.slane %v10294_v34, %v8582_v29  ;;  %v10499_v62 = vcombine.low %v3328_v46, %v3335_v5  ;;  %v10501_v57 = vcombine.low %v3342_v10, %v3349_v25  ;;  %v12113_v53 = vld [vmem:[#allocation80_spill] sm:$0xff] }
 0x1d8   :  { %v3321_v56 = vrot.slane %v12107_v49, %v8560_v6  ;;  %v10505_v41 = vcombine.low %v3300_v58, %v3307_v24  ;;  %v3664_v43 = vrot.slane %v12111_v32, %v8539_v47  ;;  %v3671_v9 = vrot.slane %v12111_v32, %v8542_v48  ;;  %v10514_v46 = vpop.permute.xlu1 %6507 }
 0x1d9   :  { %12110 = vst [vmem:[#allocation61_spill] sm:$0xff] %v10501_v57  ;;  %v3678_v31 = vrot.slane %v12111_v32, %v8557_v1  ;;  %v6833_v34 = vadd.s32 4294967264, %v10176_v17  ;;  %12112 = vst [vmem:[#allocation62_spill] sm:$0xff] %v10514_v46  ;;  %v3685_v5 = vrot.slane %v12111_v32, %v8560_v6  ;;  %v3636_v38 = vrot.slane %v12113_v53, %v8539_v47 }
 0x1da   :  { %6594 = vperm.xlu0 %7982, %v5231_v39   ;;  %v5503_v11 = vcombine.low %v5495_v40, %v5502_v14  ;;  %v6039_v51 = vrot.slane %v6031_v60, %v8582_v29  ;;  %v5775_v21 = vcombine.low %v5767_v19, %v5774_v18  ;;  %v6046_v10 = vrot.slane %v6032_v45, %v8582_v29  ;;  %v12114_v14 = vld [vmem:[#allocation30_spill] sm:$0xff]  ;;  %v12115_v18 = vld [vmem:[#allocation65_spill] sm:$0xff] }
 0x1db   :  { %6546 = vperm.xlu1 %7983, %v4959_v26   ;;  %v6311_v25 = vrot.slane %v6303_v54, %v8582_v29  ;;  %v6318_v26 = vrot.slane %v6304_v15, %v8582_v29  ;;  %v3643_v39 = vrot.slane %v12113_v53, %v8542_v48  ;;  %v3650_v49 = vrot.slane %v12113_v53, %v8557_v1 }
 0x1dc   :  { %v3657_v58 = vrot.slane %v12113_v53, %v8560_v6  ;;  %v4084_v24 = vrot.slane %v10004_v42, %v8539_v47  ;;  %v4091_v60 = vrot.slane %v10004_v42, %v8542_v48  ;;  %v4098_v45 = vrot.slane %v10004_v42, %v8557_v1  ;;  %v10538_v15 = vpop.permute.xlu1 %6519 }
 0x1dd   :  { %v4105_v54 = vrot.slane %v10004_v42, %v8560_v6  ;;  %v10540_v40 = vcombine.low %v3314_v2, %v3321_v56  ;;  %v10543_v20 = vsub.s32 %v6833_v34, %v12057_v3  ;;  %v4968_v19 = vrot.slane %v12114_v14, %v8582_v29 }
 0x1de   :  { %6690 = vperm.xlu0 %7982, %v5775_v21   ;;  %v4975_v32 = vrot.slane %v12115_v18, %v8582_v29  ;;  %v6047_v53 = vcombine.low %v6039_v51, %v6046_v10  ;;  %v6319_v46 = vcombine.low %v6311_v25, %v6318_v26  ;;  %v5240_v42 = vrot.slane %v12116_v63, %v8582_v29  ;;  %v6619_v51 = vpop.permute.xlu0 %6618 }
 0x1df   :  { %6642 = vperm.xlu1 %7983, %v5503_v11   ;;  %v12117_v11 = vld [vmem:[#allocation72_spill] sm:$0xff]  ;;  %v10553_v7 = vcombine.low %v3664_v43, %v3671_v9  ;;  %v10555_v2 = vcombine.low %v3678_v31, %v3685_v5  ;;  %v6048_v56 = vcombine.low %v3636_v38, %v3643_v39  ;;  %v6049_v34 = vcombine.low %v3650_v49, %v3657_v58 }
 0x1e0   :  { %v5247_v21 = vrot.slane %v12117_v11, %v8582_v29  ;;  %v3720_v14 = vrot.slane %v12118_v50, %v8539_v47  ;;  %v6320_v52 = vcombine.low %v4084_v24, %v4091_v60  ;;  %v6321_v57 = vcombine.low %v4098_v45, %v4105_v54  ;;  %v6568_v10 = vpop.permute.xlu1 %6567 }
 0x1e1   :  { %v7082_v63 = vrot.slane %v6571_v61, %v10273_v33  ;;  %v7078_v25 = vrot.slane %v6568_v10, %v10202_v28  ;;  %v4976_v43 = vcombine.low %v4968_v19, %v4975_v32  ;;  %v5512_v9 = vrot.slane %v9990_v13, %v8582_v29 }
 0x1e2   :  { %6786 = vperm.xlu0 %7982, %v6319_v46   ;;  %v5248_v31 = vcombine.low %v5240_v42, %v5247_v21  ;;  %v5519_v5 = vrot.slane %v9994_v4, %v8582_v29  ;;  %v5784_v38 = vrot.slane %v10424_v30, %v8582_v29  ;;  %v5791_v26 = vrot.slane %v10426_v22, %v8582_v29  ;;  %v12119_v4 = vld [vmem:[#allocation55_spill] sm:$0xff]  ;;  %v6667_v32 = vpop.permute.xlu0 %6666 }
 0x1e3   :  { %6738 = vperm.xlu1 %7983, %v6047_v53   ;;  %v3727_v46 = vrot.slane %v12118_v50, %v8542_v48  ;;  %v3734_v61 = vrot.slane %v12118_v50, %v8557_v1  ;;  %v3741_v39 = vrot.slane %v12118_v50, %v8560_v6  ;;  %v10576_v13 = vsel %vm6817_vm1, %v7082_v63, %v7078_v25 }
 0x1e4   :  { %v3692_v49 = vrot.slane %v12119_v4, %v8539_v47  ;;  %v6840_v30 = vadd.s32 4294967256, %v10176_v17  ;;  %v6616_v22 = vpop.permute.xlu1 %6615  ;;  %v6056_v58 = vrot.slane %v6048_v56, %v8582_v29  ;;  %v6063_v24 = vrot.slane %v6049_v34, %v8582_v29 }
 0x1e5   :  { %v7161_v60 = vrot.slane %v6619_v51, %v10273_v33  ;;  %v7157_v45 = vrot.slane %v6616_v22, %v10202_v28  ;;  %v6328_v50 = vrot.slane %v6320_v52, %v8582_v29  ;;  %v6335_v54 = vrot.slane %v6321_v57, %v8582_v29 }
 0x1e6   :  { %6597 = vperm.xlu0 %7982, %v5248_v31   ;;  %v3699_v19 = vrot.slane %v12119_v4, %v8542_v48  ;;  %v3706_v18 = vrot.slane %v12119_v4, %v8557_v1  ;;  %v5520_v53 = vcombine.low %v5512_v9, %v5519_v5  ;;  %v5792_v42 = vcombine.low %v5784_v38, %v5791_v26  ;;  %v6715_v9 = vpop.permute.xlu0 %6714  ;;  %v12120_v31 = vld [vmem:[#allocation28_spill] sm:$0xff]  ;;  %v12121_v38 = vld [vmem:[#allocation29_spill] sm:$0xff] }
 0x1e7   :  { %6549 = vperm.xlu1 %7983, %v4976_v43   ;;  %v10591_v11 = vcombine.low %v3720_v14, %v3727_v46  ;;  %v3713_v21 = vrot.slane %v12119_v4, %v8560_v6  ;;  %v4112_v56 = vrot.slane %v10002_v35, %v8539_v47  ;;  %v10598_v52 = vsel %vm6817_vm1, %v7161_v60, %v7157_v45  ;;  %v12122_v46 = vld [vmem:[#allocation45_spill] sm:$0xff] }
 0x1e8   :  { %v4119_v57 = vrot.slane %v10002_v35, %v8542_v48  ;;  %v4126_v34 = vrot.slane %v10002_v35, %v8557_v1  ;;  %v4133_v51 = vrot.slane %v10002_v35, %v8560_v6  ;;  %v6664_v14 = vpop.permute.xlu1 %6663  ;;  %v7240_v10 = vrot.slane %v6667_v32, %v10273_v33  ;;  %v12123_v35 = vld [vmem:[#allocation9_spill] sm:$0xff] }
 0x1e9   :  { %v7236_v63 = vrot.slane %v6664_v14, %v10202_v28  ;;  %v6064_v25 = vcombine.low %v6056_v58, %v6063_v24  ;;  %v6336_v43 = vcombine.low %v6328_v50, %v6335_v54  ;;  %v4985_v5 = vrot.slane %v12120_v31, %v8582_v29  ;;  %v12124_v14 = vld [vmem:[#allocation19_spill] sm:$0xff] }
 0x1ea   :  { %6693 = vperm.xlu0 %7982, %v5792_v42   ;;  %v4992_v26 = vrot.slane %v12121_v38, %v8582_v29  ;;  %v5257_v4 = vrot.slane %v12122_v46, %v8582_v29  ;;  %v5264_v22 = vrot.slane %v12123_v35, %v8582_v29  ;;  %v10616_v60 = vcombine.low %v3734_v61, %v3741_v39 }
 0x1eb   :  { %6645 = vperm.xlu1 %7983, %v5520_v53   ;;  %v10618_v45 = vcombine.low %v3692_v49, %v3699_v19  ;;  %v10621_v58 = vsub.s32 %v6840_v30, %v12057_v3  ;;  %v10624_v24 = vsel %vm6817_vm1, %v7240_v10, %v7236_v63  ;;  %v10626_v50 = vcombine.low %v3706_v18, %v3713_v21 }
 0x1ec   :  { %v5529_v32 = vrot.slane %v9984_v12, %v8582_v29  ;;  %v5536_v61 = vrot.slane %v9986_v23, %v8582_v29  ;;  %v7319_v39 = vrot.slane %v6715_v9, %v10273_v33  ;;  %v5801_v30 = vrot.slane %v10353_v59, %v8582_v29 }
 0x1ed   :  { %v6712_v54 = vpop.permute.xlu1 %6711  ;;  %v5808_v19 = vrot.slane %v10422_v27, %v8582_v29  ;;  %v6337_v18 = vcombine.low %v4112_v56, %v4119_v57  ;;  %v6338_v53 = vcombine.low %v4126_v34, %v4133_v51  ;;  %v4993_v42 = vcombine.low %v4985_v5, %v4992_v26  ;;  %v12125_v27 = vld [vmem:[#allocation82_spill] sm:$0xff] }
 0x1ee   :  { %6789 = vperm.xlu0 %7982, %v6336_v43   ;;  %v7315_v49 = vrot.slane %v6712_v54, %v10202_v28  ;;  %v5265_v21 = vcombine.low %v5257_v4, %v5264_v22  ;;  %v3776_v12 = vrot.slane %v12124_v14, %v8539_v47  ;;  %v3783_v23 = vrot.slane %v12124_v14, %v8542_v48 }
 0x1ef   :  { %6741 = vperm.xlu1 %7983, %v6064_v25   ;;  %v3790_v10 = vrot.slane %v12124_v14, %v8557_v1  ;;  %v3797_v59 = vrot.slane %v12124_v14, %v8560_v6  ;;  %v3748_v56 = vrot.slane %v12125_v27, %v8539_v47  ;;  %v3755_v57 = vrot.slane %v12125_v27, %v8542_v48 }
 0x1f0   :  { %v10645_v63 = vsel %vm6817_vm1, %v7319_v39, %v7315_v49  ;;  %v3762_v34 = vrot.slane %v12125_v27, %v8557_v1  ;;  %v3769_v51 = vrot.slane %v12125_v27, %v8560_v6  ;;  %v5537_v25 = vcombine.low %v5529_v32, %v5536_v61  ;;  %v12126_v32 = vld [vmem:[#allocation85_spill] sm:$0xff] }
 0x1f1   :  { %v5809_v43 = vcombine.low %v5801_v30, %v5808_v19  ;;  %v6073_v9 = vrot.slane %v10553_v7, %v8582_v29  ;;  %v6080_v31 = vrot.slane %v10555_v2, %v8582_v29  ;;  %v6345_v5 = vrot.slane %v6337_v18, %v8582_v29  ;;  %v12127_v39 = vld [vmem:[#allocation41_spill] sm:$0xff]  ;;  %v12128_v30 = vld [vmem:[#allocation32_spill] sm:$0xff] }
 0x1f2   :  { %6600 = vperm.xlu0 %7982, %v5265_v21   ;;  %v6352_v38 = vrot.slane %v6338_v53, %v8582_v29  ;;  %v4140_v26 = vrot.slane %v10032_v36, %v8539_v47  ;;  %v4147_v46 = vrot.slane %v10032_v36, %v8542_v48  ;;  %v4154_v4 = vrot.slane %v10032_v36, %v8557_v1  ;;  %v12129_v53 = vld [vmem:[#allocation75_spill] sm:$0xff]  ;;  %v12130_v21 = vld [vmem:[#allocation76_spill] sm:$0xff] }
 0x1f3   :  { %6552 = vperm.xlu1 %7983, %v4993_v42   ;;  %v4161_v35 = vrot.slane %v10032_v36, %v8560_v6  ;;  %v10671_v7 = vcombine.low %v3776_v12, %v3783_v23  ;;  %v10673_v22 = vcombine.low %v3790_v10, %v3797_v59  ;;  %v10675_v2 = vcombine.low %v3748_v56, %v3755_v57  ;;  %v12131_v56 = vld [vmem:[#allocation88_spill] sm:$0xff] }
 0x1f4   :  { %v10677_v54 = vcombine.low %v3762_v34, %v3769_v51  ;;  %v4168_v61 = vrot.slane %v12126_v32, %v8539_v47  ;;  %v5002_v49 = vrot.slane %v12127_v39, %v8582_v29  ;;  %v5009_v19 = vrot.slane %v12128_v30, %v8582_v29  ;;  %v12132_v51 = vld [vmem:[#allocation90_spill] sm:$0xff] }
 0x1f5   :  { %v6081_v36 = vcombine.low %v6073_v9, %v6080_v31  ;;  %v6353_v18 = vcombine.low %v6345_v5, %v6352_v38  ;;  %v5274_v42 = vrot.slane %v12129_v53, %v8582_v29  ;;  %v5281_v14 = vrot.slane %v12130_v21, %v8582_v29  ;;  %v12135_v53 = vld [vmem:[#allocation66_spill] sm:$0xff] }
 0x1f6   :  { %6696 = vperm.xlu0 %7982, %v5809_v43   ;;  %v4175_v12 = vrot.slane %v12126_v32, %v8542_v48  ;;  %v4182_v23 = vrot.slane %v12126_v32, %v8557_v1  ;;  %v6354_v10 = vcombine.low %v4140_v26, %v4147_v46  ;;  %v6355_v59 = vcombine.low %v4154_v4, %v4161_v35  ;;  %v12133_v43 = vld [vmem:[#allocation91_spill] sm:$0xff] }
 0x1f7   :  { %6648 = vperm.xlu1 %7983, %v5537_v25   ;;  %v4189_v27 = vrot.slane %v12126_v32, %v8560_v6  ;;  %v4196_v57 = vrot.slane %v12131_v56, %v8539_v47  ;;  %v4203_v34 = vrot.slane %v12131_v56, %v8542_v48  ;;  %v5546_v25 = vrot.slane %v12132_v51, %v8582_v29 }
 0x1f8   :  { %v5553_v9 = vrot.slane %v12133_v43, %v8582_v29  ;;  %v5818_v31 = vrot.slane %v10432_v44, %v8582_v29  ;;  %v5825_v5 = vrot.slane %v10439_v0, %v8582_v29  ;;  %v4210_v38 = vrot.slane %v12131_v56, %v8557_v1 }
 0x1f9   :  { %v4217_v26 = vrot.slane %v12131_v56, %v8560_v6  ;;  %v5010_v46 = vcombine.low %v5002_v49, %v5009_v19  ;;  %v5282_v4 = vcombine.low %v5274_v42, %v5281_v14  ;;  %v6090_v35 = vrot.slane %v10618_v45, %v8582_v29  ;;  %v12137_v14 = vld [vmem:[#allocation73_spill] sm:$0xff] }
 0x1fa   :  { %6792 = vperm.xlu0 %7982, %v6353_v18   ;;  %v6097_v32 = vrot.slane %v10626_v50, %v8582_v29  ;;  %v6362_v39 = vrot.slane %v6354_v10, %v8582_v29  ;;  %v6369_v44 = vrot.slane %v6355_v59, %v8582_v29  ;;  %v10717_v30 = vcombine.low %v4168_v61, %v4175_v12  ;;  %v12136_v61 = vld [vmem:[#allocation31_spill] sm:$0xff]  ;;  %v7500_v56 = vld [vmem:[%s11734_s1] sm:$0xff] }
 0x1fb   :  { %6744 = vperm.xlu1 %7983, %v6081_v36   ;;  %v10719_v0 = vcombine.low %v4182_v23, %v4189_v27  ;;  %v12134_v36 = vld [vmem:[#allocation87_spill] sm:$0xff]  ;;  %v10725_v45 = vcombine.low %v4196_v57, %v4203_v34  ;;  %v5554_v19 = vcombine.low %v5546_v25, %v5553_v9  ;;  %v5826_v50 = vcombine.low %v5818_v31, %v5825_v5  ;;  %v12138_v23 = vld [vmem:[#allocation74_spill] sm:$0xff]  ;;  %v7503_v27 = vld [vmem:[%s11734_s1 + $0x18] sm:$0xff] }
 0x1fc   :  { %v4224_v18 = vrot.slane %v12134_v36, %v8539_v47  ;;  %v4231_v49 = vrot.slane %v12134_v36, %v8542_v48  ;;  %v5019_v42 = vrot.slane %v12135_v53, %v8582_v29  ;;  %v5026_v21 = vrot.slane %v12136_v61, %v8582_v29  ;;  %v7501_v59 = vld [vmem:[%s11734_s1 + $0x8] sm:$0xff]  ;;  %v7502_v31 = vld [vmem:[%s11734_s1 + $0x10] sm:$0xff] }
 0x1fd   :  { %v5291_v12 = vrot.slane %v12137_v14, %v8582_v29  ;;  %v5298_v10 = vrot.slane %v12138_v23, %v8582_v29  ;;  %v10744_v57 = vcombine.low %v4210_v38, %v4217_v26  ;;  %v6098_v25 = vcombine.low %v6090_v35, %v6097_v32  ;;  %v7565_v5 = vld [vmem:[%s11734_s1 + $0x208] sm:$0xff] }
 0x1fe   :  { %6603 = vperm.xlu0 %7982, %v5282_v4   ;;  %v6370_v43 = vcombine.low %v6362_v39, %v6369_v44  ;;  %v7843_v9 = vpack.c.bf16 %v7503_v27, %v7501_v59  ;;  %v7845_v4 = vpack.c.bf16 %v7502_v31, %v7500_v56  ;;  %v6999_v35 = vrot.slane %v10538_v15, %v10202_v28  ;;  %v12139_v32 = vld [vmem:[#allocation86_spill] sm:$0xff]  ;;  %v12140_v44 = vld [vmem:[#allocation59_spill] sm:$0xff] }
 0x1ff   :  { %6555 = vperm.xlu1 %7983, %v5010_v46   ;;  %v7567_v46 = vld [vmem:[%s11734_s1 + $0x218] sm:$0xff]  ;;  %v5563_v39 = vrot.slane %v12139_v32, %v8582_v29  ;;  %v5570_v53 = vrot.slane %v12140_v44, %v8582_v29  ;;  %v7003_v14 = vrot.slane %v10487_v8, %v10273_v33  ;;  %v7564_v15 = vld [vmem:[%s11734_s1 + $0x200] sm:$0xff]  ;;  %v7566_v59 = vld [vmem:[%s11734_s1 + $0x210] sm:$0xff]  ;;  %v6379_v44 = vrot.slane %v10717_v30, %v8582_v29 }
 0x200   :  { %7844 = vmatprep.subr.bf16.mxu1 %v7843_v9  ;;  %v7907_v61 = vpack.c.bf16 %v7567_v46, %v7565_v5  ;;  %v7505_v27 = vld [vmem:[%s11734_s1 + $0x28] sm:$0xff]  ;;  %v7571_v46 = vld [vmem:[%s11734_s1 + $0x238] sm:$0xff] }
 0x201   :  { %v6763_v51 = vpop.permute.xlu0 %6762  ;;  %7846 = vmatpush1.bf16.msra.mxu1 %v7845_v4  ;;  %v12141_v9 = vld [vmem:[#allocation47_spill] sm:$0xff]  ;;  %v12142_v30 = vld [vmem:[#allocation57_spill] sm:$0xff] }
 0x202   :  { %v6760_v34 = vpop.permute.xlu1 %6759  ;;  %v7398_v26 = vrot.slane %v6763_v51, %v10273_v33  ;;  %6699 = vperm.xlu0 %7982, %v5826_v50   ;;  %v5299_v50 = vcombine.low %v5291_v12, %v5298_v10  ;;  %7908 = vmatprep.subr.bf16.mxu0 %v7907_v61  ;;  %v7909_v12 = vpack.c.bf16 %v7566_v59, %v7564_v15  ;;  %v7507_v10 = vld [vmem:[%s11734_s1 + $0x38] sm:$0xff]  ;;  %v7504_v51 = vld [vmem:[%s11734_s1 + $0x20] sm:$0xff]  ;;  %v7569_v5 = vld [vmem:[%s11734_s1 + $0x228] sm:$0xff] }
 0x203   :  { %v7394_v38 = vrot.slane %v6760_v34, %v10202_v28  ;;  %6651 = vperm.xlu1 %7983, %v5554_v19   ;;  %v5027_v19 = vcombine.low %v5019_v42, %v5026_v21  ;;  %v5835_v34 = vrot.slane %v10428_v37, %v8582_v29  ;;  %v5842_v42 = vrot.slane %v10430_v16, %v8582_v29  ;;  %v7506_v37 = vld [vmem:[%s11734_s1 + $0x30] sm:$0xff] }
 0x204   :  { %v6107_v21 = vrot.slane %v10591_v11, %v8582_v29  ;;  %v7847_v11 = vpack.c.bf16 %v7507_v10, %v7505_v27  ;;  %7910 = vmatpush1.bf16.msra.mxu0 %v7909_v12  ;;  %v7849_v4 = vpack.c.bf16 %v7506_v37, %v7504_v51  ;;  %v7911_v32 = vpack.c.bf16 %v7571_v46, %v7569_v5  ;;  %v7510_v12 = vld [vmem:[%s11734_s1 + $0x50] sm:$0xff]  ;;  %v7573_v51 = vld [vmem:[%s11734_s1 + $0x248] sm:$0xff]  ;;  %v7575_v37 = vld [vmem:[%s11734_s1 + $0x258] sm:$0xff] }
 0x205   :  { %v10766_v23 = vsel %vm6817_vm1, %v7398_v26, %v7394_v38  ;;  %v6574_v8 = vpop.permute.xlu0 %6573  ;;  %v7004_v38 = vsel %vm6817_vm1, %v7003_v14, %v6999_v35  ;;  %v6114_v26 = vrot.slane %v10616_v60, %v8582_v29  ;;  %v6386_v61 = vrot.slane %v10719_v0, %v8582_v29  ;;  %v7568_v60 = vld [vmem:[%s11734_s1 + $0x220] sm:$0xff]  ;;  %v7570_v35 = vld [vmem:[%s11734_s1 + $0x230] sm:$0xff] }
 0x206   :  { %v6526_v56 = vpop.permute.xlu1 %6525  ;;  %v7087_v31 = vrot.slane %v6574_v8, %v12141_v9  ;;  %6795 = vperm.xlu0 %7982, %v6370_v43   ;;  %7848 = vmatprep.subr.bf16.mxu1 %v7847_v11  ;;  %v5571_v59 = vcombine.low %v5563_v39, %v5570_v53  ;;  %v4764_v27 = vrot.slane %v12142_v30, %v8582_v29  ;;  %v7508_v8 = vld [vmem:[%s11734_s1 + $0x40] sm:$0xff] }
 0x207   :  { %v7008_v16 = vrot.slane %v6526_v56, %v12141_v9  ;;  %6747 = vperm.xlu1 %7983, %v6098_v25   ;;  %7850 = vmatpush1.bf16.msra.mxu1 %v7849_v4  ;;  %v7913_v0 = vpack.c.bf16 %v7570_v35, %v7568_v60  ;;  %v7511_v56 = vld [vmem:[%s11734_s1 + $0x58] sm:$0xff]  ;;  %v7853_v5 = vpack.c.bf16 %v7510_v12, %v7508_v8  ;;  %v12146_v12 = vld [vmem:[#allocation79_spill] sm:$0xff] }
 0x208   :  { %v10808_v43 = vsel %vm6824_vm2, %v7087_v31, %v10576_v13  ;;  %v7509_v13 = vld [vmem:[%s11734_s1 + $0x48] sm:$0xff]  ;;  %7912 = vmatprep.subr.bf16.mxu0 %v7911_v32  ;;  %v7915_v46 = vpack.c.bf16 %v7575_v37, %v7573_v51  ;;  %v6387_v4 = vcombine.low %v6379_v44, %v6386_v61  ;;  %v7515_v61 = vld [vmem:[%s11734_s1 + $0x78] sm:$0xff] }
 0x209   :  { %v10804_v25 = vsel %vm6824_vm2, %v7008_v16, %v7004_v38  ;;  %v6670_v15 = vpop.permute.xlu0 %6669  ;;  %v7851_v10 = vpack.c.bf16 %v7511_v56, %v7509_v13  ;;  %v5843_v16 = vcombine.low %v5835_v34, %v5842_v42  ;;  %v12143_v31 = vld [vmem:[#allocation58_spill] sm:$0xff]  ;;  %7914 = vmatpush1.bf16.msra.mxu0 %v7913_v0  ;;  %v6115_v38 = vcombine.low %v6107_v21, %v6114_v26  ;;  %v7574_v42 = vld [vmem:[%s11734_s1 + $0x250] sm:$0xff]  ;;  %v7579_v8 = vld [vmem:[%s11734_s1 + $0x278] sm:$0xff] }
 0x20a   :  { %v6622_v14 = vpop.permute.xlu1 %6621  ;;  %v7245_v53 = vrot.slane %v6670_v15, %v12141_v9  ;;  %6606 = vperm.xlu0 %7982, %v5299_v50   ;;  %v4771_v11 = vrot.slane %v12143_v31, %v8582_v29  ;;  %v7572_v34 = vld [vmem:[%s11734_s1 + $0x240] sm:$0xff]  ;;  %v12145_v21 = vld [vmem:[#allocation35_spill] sm:$0xff]  ;;  %7916 = vmatprep.subr.bf16.mxu0 %v7915_v46 }
 0x20b   :  { %v7166_v39 = vrot.slane %v6622_v14, %v12141_v9  ;;  %6558 = vperm.xlu1 %7983, %v5027_v19   ;;  %7852 = vmatprep.subr.bf16.mxu1 %v7851_v10  ;;  %v5043_v26 = vrot.slane %v12145_v21, %v8582_v29  ;;  %v7917_v44 = vpack.c.bf16 %v7574_v42, %v7572_v34  ;;  %v7512_v13 = vld [vmem:[%s11734_s1 + $0x60] sm:$0xff]  ;;  %v7514_v14 = vld [vmem:[%s11734_s1 + $0x70] sm:$0xff]  ;;  %v7577_v56 = vld [vmem:[%s11734_s1 + $0x268] sm:$0xff] }
 0x20c   :  { %v10850_v50 = vsel %vm6824_vm2, %v7245_v53, %v10624_v24  ;;  %v12144_v24 = vld [vmem:[#allocation68_spill] sm:$0xff]  ;;  %7854 = vmatpush1.bf16.msra.mxu1 %v7853_v5  ;;  %v7857_v51 = vpack.c.bf16 %v7514_v14, %v7512_v13  ;;  %v7919_v37 = vpack.c.bf16 %v7579_v8, %v7577_v56  ;;  %v12148_v31 = vld [vmem:[#allocation46_spill] sm:$0xff] }
 0x20d   :  { %v10846_v19 = vsel %vm6824_vm2, %v7166_v39, %v10598_v52  ;;  %v7513_v52 = vld [vmem:[%s11734_s1 + $0x68] sm:$0xff]  ;;  %v6766_v60 = vpop.permute.xlu0 %6765  ;;  %v5036_v35 = vrot.slane %v12144_v24, %v8582_v29  ;;  %v5308_v39 = vrot.slane %v12146_v12, %v8582_v29  ;;  %v12147_v53 = vld [vmem:[#allocation56_spill] sm:$0xff]  ;;  %7918 = vmatpush1.bf16.msra.mxu0 %v7917_v44  ;;  %v5580_v5 = vrot.slane %v12148_v31, %v8582_v29  ;;  %v7576_v42 = vld [vmem:[%s11734_s1 + $0x260] sm:$0xff] }
 0x20e   :  { %v6718_v32 = vpop.permute.xlu1 %6717  ;;  %v7403_v30 = vrot.slane %v6766_v60, %v12141_v9  ;;  %6702 = vperm.xlu0 %7982, %v5843_v16   ;;  %v7855_v0 = vpack.c.bf16 %v7515_v61, %v7513_v52  ;;  %v5315_v10 = vrot.slane %v12147_v53, %v8582_v29  ;;  %v12149_v46 = vld [vmem:[#allocation18_spill] sm:$0xff]  ;;  %v4772_v60 = vcombine.low %v4764_v27, %v4771_v11  ;;  %v7519_v44 = vld [vmem:[%s11734_s1 + $0x98] sm:$0xff]  ;;  %v7518_v13 = vld [vmem:[%s11734_s1 + $0x90] sm:$0xff] }
 0x20f   :  { %v7324_v15 = vrot.slane %v6718_v32, %v12141_v9  ;;  %6654 = vperm.xlu1 %7983, %v5571_v59   ;;  %v5587_v34 = vrot.slane %v12149_v46, %v8582_v29  ;;  %v5852_v24 = vrot.slane %v10505_v41, %v8582_v29  ;;  %7920 = vmatprep.subr.bf16.mxu0 %v7919_v37  ;;  %v7516_v61 = vld [vmem:[%s11734_s1 + $0x80] sm:$0xff]  ;;  %v7523_v31 = vld [vmem:[%s11734_s1 + $0xb8] sm:$0xff]  ;;  %v7522_v46 = vld [vmem:[%s11734_s1 + $0xb0] sm:$0xff] }
 0x210   :  { %v10892_v16 = vsel %vm6824_vm2, %v7403_v30, %v10766_v23  ;;  %7856 = vmatprep.subr.bf16.mxu1 %v7855_v0  ;;  %v7517_v23 = vld [vmem:[%s11734_s1 + $0x88] sm:$0xff]  ;;  %v7583_v30 = vld [vmem:[%s11734_s1 + $0x298] sm:$0xff]  ;;  %v5044_v0 = vcombine.low %v5036_v35, %v5043_v26  ;;  %v5316_v56 = vcombine.low %v5308_v39, %v5315_v10  ;;  %v7861_v8 = vpack.c.bf16 %v7518_v13, %v7516_v61  ;;  %v7580_v35 = vld [vmem:[%s11734_s1 + $0x280] sm:$0xff] }
 0x211   :  { %v10888_v59 = vsel %vm6824_vm2, %v7324_v15, %v10645_v63  ;;  %v7578_v63 = vld [vmem:[%s11734_s1 + $0x270] sm:$0xff]  ;;  %v6577_v32 = vpop.permute.xlu0 %6576  ;;  %7858 = vmatpush1.bf16.msra.mxu1 %v7857_v51  ;;  %v7859_v14 = vpack.c.bf16 %v7519_v44, %v7517_v23  ;;  %v7581_v15 = vld [vmem:[%s11734_s1 + $0x288] sm:$0xff]  ;;  %v5859_v51 = vrot.slane %v10540_v40, %v8582_v29  ;;  %v6124_v10 = vrot.slane %v10675_v2, %v8582_v29  ;;  %v7588_v41 = vld [vmem:[%s11734_s1 + $0x2c0] sm:$0xff] }
 0x212   :  { %v6529_v52 = vpop.permute.xlu1 %6528  ;;  %v7921_v21 = vpack.c.bf16 %v7578_v63, %v7576_v42  ;;  %v7092_v11 = vrot.slane %v6577_v32, %v10435_v55  ;;  %6798 = vperm.xlu0 %7982, %v6387_v4   ;;  %v7923_v12 = vpack.c.bf16 %v7583_v30, %v7581_v15  ;;  %v5588_v4 = vcombine.low %v5580_v5, %v5587_v34  ;;  %v7582_v26 = vld [vmem:[%s11734_s1 + $0x290] sm:$0xff]  ;;  %v7520_v5 = vld [vmem:[%s11734_s1 + $0xa0] sm:$0xff]  ;;  %v7585_v42 = vld [vmem:[%s11734_s1 + $0x2a8] sm:$0xff] }
 0x213   :  { %v7013_v27 = vrot.slane %v6529_v52, %v10435_v55  ;;  %6750 = vperm.xlu1 %7983, %v6115_v38   ;;  %7860 = vmatprep.subr.bf16.mxu1 %v7859_v14  ;;  %v6131_v40 = vrot.slane %v10677_v54, %v8582_v29  ;;  %v7925_v37 = vpack.c.bf16 %v7582_v26, %v7580_v35  ;;  %v7587_v63 = vld [vmem:[%s11734_s1 + $0x2b8] sm:$0xff]  ;;  %v12150_v61 = vld [vmem:[#allocation15_spill] sm:$0xff] }
 0x214   :  { %7922 = vmatpush1.bf16.msra.mxu0 %v7921_v21  ;;  %v10932_v38 = vsel %vm6831_vm3, %v7092_v11, %v10808_v43  ;;  %v6396_v23 = vrot.slane %v10725_v45, %v8582_v29  ;;  %v6403_v52 = vrot.slane %v10744_v57, %v8582_v29  ;;  %v7865_v32 = vpack.c.bf16 %v7522_v46, %v7520_v5  ;;  %v7584_v57 = vld [vmem:[%s11734_s1 + $0x2a0] sm:$0xff]  ;;  %v7526_v35 = vld [vmem:[%s11734_s1 + $0xd0] sm:$0xff] }
 0x215   :  { %v10928_v53 = vsel %vm6831_vm3, %v7013_v27, %v10804_v25  ;;  %v7521_v25 = vld [vmem:[%s11734_s1 + $0xa8] sm:$0xff]  ;;  %v6673_v43 = vpop.permute.xlu0 %6672  ;;  %7862 = vmatpush1.bf16.msra.mxu1 %v7861_v8  ;;  %7924 = vmatprep.subr.bf16.mxu0 %v7923_v12  ;;  %v7927_v21 = vpack.c.bf16 %v7587_v63, %v7585_v42  ;;  %v4781_v13 = vrot.slane %v12150_v61, %v8582_v29  ;;  %v12151_v27 = vld [vmem:[#allocation17_spill] sm:$0xff] }
 0x216   :  { %v6625_v39 = vpop.permute.xlu1 %6624  ;;  %v7250_v34 = vrot.slane %v6673_v43, %v10435_v55  ;;  %6561 = vperm.xlu0 %7982, %v5044_v0   ;;  %v7863_v54 = vpack.c.bf16 %v7523_v31, %v7521_v25  ;;  %v4788_v45 = vrot.slane %v12151_v27, %v8582_v29  ;;  %v4238_v11 = vrot.slane %v12134_v36, %v8557_v1  ;;  %v7527_v8 = vld [vmem:[%s11734_s1 + $0xd8] sm:$0xff]  ;;  %v7524_v12 = vld [vmem:[%s11734_s1 + $0xc0] sm:$0xff]  ;;  %v7589_v43 = vld [vmem:[%s11734_s1 + $0x2c8] sm:$0xff] }
 0x217   :  { %v7171_v2 = vrot.slane %v6625_v39, %v10435_v55  ;;  %6513 = vperm.xlu1 %7983, %v4772_v60   ;;  %v4245_v14 = vrot.slane %v12134_v36, %v8560_v6  ;;  %v5860_v31 = vcombine.low %v5852_v24, %v5859_v51  ;;  %v6132_v5 = vcombine.low %v6124_v10, %v6131_v40  ;;  %v7590_v24 = vld [vmem:[%s11734_s1 + $0x2d0] sm:$0xff]  ;;  %v7596_v1 = vld [vmem:[%s11734_s1 + $0x300] sm:$0xff]  ;;  %v7537_v36 = vld [vmem:[%s11734_s1 + $0x128] sm:$0xff] }
 0x218   :  { %7926 = vmatpush1.bf16.msra.mxu0 %v7925_v37  ;;  %v10976_v44 = vsel %vm6831_vm3, %v7250_v34, %v10850_v50  ;;  %7864 = vmatprep.subr.bf16.mxu1 %v7863_v54  ;;  %v7525_v50 = vld [vmem:[%s11734_s1 + $0xc8] sm:$0xff]  ;;  %v7591_v37 = vld [vmem:[%s11734_s1 + $0x2d8] sm:$0xff]  ;;  %v7869_v46 = vpack.c.bf16 %v7526_v35, %v7524_v12  ;;  %v6404_v34 = vcombine.low %v6396_v23, %v6403_v52  ;;  %v7598_v6 = vld [vmem:[%s11734_s1 + $0x310] sm:$0xff] }
 0x219   :  { %v10972_v60 = vsel %vm6831_vm3, %v7171_v2, %v10846_v19  ;;  %v7586_v19 = vld [vmem:[%s11734_s1 + $0x2b0] sm:$0xff]  ;;  %v6769_v30 = vpop.permute.xlu0 %6768  ;;  %7866 = vmatpush1.bf16.msra.mxu1 %v7865_v32  ;;  %7928 = vmatprep.subr.bf16.mxu0 %v7927_v21  ;;  %v7867_v39 = vpack.c.bf16 %v7527_v8, %v7525_v50  ;;  %v7931_v2 = vpack.c.bf16 %v7591_v37, %v7589_v43  ;;  %v7531_v52 = vld [vmem:[%s11734_s1 + $0xf8] sm:$0xff]  ;;  %v7528_v32 = vld [vmem:[%s11734_s1 + $0xe0] sm:$0xff] }
 0x21a   :  { %v6721_v15 = vpop.permute.xlu1 %6720  ;;  %v7929_v0 = vpack.c.bf16 %v7586_v19, %v7584_v57  ;;  %v7408_v25 = vrot.slane %v6769_v30, %v10435_v55  ;;  %6657 = vperm.xlu0 %7982, %v5588_v4   ;;  %v4789_v54 = vcombine.low %v4781_v13, %v4788_v45  ;;  %v12153_v42 = vld [vmem:[#allocation67_spill] sm:$0xff]  ;;  %v7933_v23 = vpack.c.bf16 %v7590_v24, %v7588_v41  ;;  %v7595_v57 = vld [vmem:[%s11734_s1 + $0x2f8] sm:$0xff]  ;;  %v7592_v37 = vld [vmem:[%s11734_s1 + $0x2e0] sm:$0xff] }
 0x21b   :  { %v7329_v26 = vrot.slane %v6721_v15, %v10435_v55  ;;  %6609 = vperm.xlu1 %7983, %v5316_v56   ;;  %7868 = vmatprep.subr.bf16.mxu1 %v7867_v39  ;;  %v5060_v63 = vrot.slane %v12153_v42, %v8582_v29  ;;  %v7530_v21 = vld [vmem:[%s11734_s1 + $0xf0] sm:$0xff]  ;;  %v7593_v45 = vld [vmem:[%s11734_s1 + $0x2e8] sm:$0xff]  ;;  %v12154_v19 = vld [vmem:[#allocation77_spill] sm:$0xff] }
 0x21c   :  { %7930 = vmatpush1.bf16.msra.mxu0 %v7929_v0  ;;  %v11021_v4 = vsel %vm6831_vm3, %v7408_v25, %v10892_v16  ;;  %v12152_v16 = vld [vmem:[#allocation33_spill] sm:$0xff]  ;;  %v5325_v50 = vrot.slane %v12154_v19, %v8582_v29  ;;  %v12155_v15 = vld [vmem:[#allocation78_spill] sm:$0xff]  ;;  %v7873_v0 = vpack.c.bf16 %v7530_v21, %v7528_v32  ;;  %v7935_v8 = vpack.c.bf16 %v7595_v57, %v7593_v45 }
 0x21d   :  { %v11017_v56 = vsel %vm6831_vm3, %v7329_v26, %v10888_v59  ;;  %v7529_v59 = vld [vmem:[%s11734_s1 + $0xe8] sm:$0xff]  ;;  %v6580_v10 = vpop.permute.xlu0 %6579  ;;  %v5053_v40 = vrot.slane %v12152_v16, %v8582_v29  ;;  %7870 = vmatpush1.bf16.msra.mxu1 %v7869_v46  ;;  %7932 = vmatprep.subr.bf16.mxu0 %v7931_v2  ;;  %v5332_v30 = vrot.slane %v12155_v15, %v8582_v29  ;;  %v12156_v26 = vld [vmem:[#allocation21_spill] sm:$0xff] }
 0x21e   :  { %v6532_v51 = vpop.permute.xlu1 %6531  ;;  %v7097_v13 = vrot.slane %v6580_v10, %v10543_v20  ;;  %6753 = vperm.xlu0 %7982, %v6132_v5   ;;  %v7871_v27 = vpack.c.bf16 %v7531_v52, %v7529_v59  ;;  %v5597_v25 = vrot.slane %v12156_v26, %v8582_v29  ;;  %v12157_v39 = vld [vmem:[#allocation38_spill] sm:$0xff]  ;;  %v5869_v46 = vrot.slane %v10499_v62, %v8582_v29  ;;  %v12158_v2 = vld [vmem:[#allocation61_spill] sm:$0xff]  ;;  %v7534_v10 = vld [vmem:[%s11734_s1 + $0x110] sm:$0xff] }
 0x21f   :  { %v7018_v61 = vrot.slane %v6532_v51, %v10543_v20  ;;  %6705 = vperm.xlu1 %7983, %v5860_v31   ;;  %v5604_v43 = vrot.slane %v12157_v39, %v8582_v29  ;;  %v5876_v41 = vrot.slane %v12158_v2, %v8582_v29  ;;  %v7535_v59 = vld [vmem:[%s11734_s1 + $0x118] sm:$0xff]  ;;  %v7532_v51 = vld [vmem:[%s11734_s1 + $0x100] sm:$0xff]  ;;  %v11105_v32 = vcombine.low %v4224_v18, %v4231_v49  ;;  %v7601_v19 = vld [vmem:[%s11734_s1 + $0x328] sm:$0xff] }
 0x220   :  { %7934 = vmatpush1.bf16.msra.mxu0 %v7933_v23  ;;  %v11063_v35 = vsel %vm6838_vm4, %v7097_v13, %v10932_v38  ;;  %7872 = vmatprep.subr.bf16.mxu1 %v7871_v27  ;;  %v7533_v38 = vld [vmem:[%s11734_s1 + $0x108] sm:$0xff]  ;;  %v7599_v52 = vld [vmem:[%s11734_s1 + $0x318] sm:$0xff]  ;;  %v5061_v48 = vcombine.low %v5053_v40, %v5060_v63  ;;  %v5333_v18 = vcombine.low %v5325_v50, %v5332_v30  ;;  %v7536_v63 = vld [vmem:[%s11734_s1 + $0x120] sm:$0xff] }
 0x221   :  { %v11059_v12 = vsel %vm6838_vm4, %v7018_v61, %v10928_v53  ;;  %v7594_v53 = vld [vmem:[%s11734_s1 + $0x2f0] sm:$0xff]  ;;  %v6676_v5 = vpop.permute.xlu0 %6675  ;;  %7874 = vmatpush1.bf16.msra.mxu1 %v7873_v0  ;;  %7936 = vmatprep.subr.bf16.mxu0 %v7935_v8  ;;  %v7875_v42 = vpack.c.bf16 %v7535_v59, %v7533_v38  ;;  %v7597_v23 = vld [vmem:[%s11734_s1 + $0x308] sm:$0xff]  ;;  %v7539_v40 = vld [vmem:[%s11734_s1 + $0x138] sm:$0xff]  ;;  %v6141_v15 = vrot.slane %v10671_v7, %v8582_v29 }
 0x222   :  { %v6628_v31 = vpop.permute.xlu1 %6627  ;;  %v7937_v24 = vpack.c.bf16 %v7594_v53, %v7592_v37  ;;  %v7255_v16 = vrot.slane %v6676_v5, %v10543_v20  ;;  %6516 = vperm.xlu0 %7982, %v4789_v54   ;;  %v7877_v54 = vpack.c.bf16 %v7534_v10, %v7532_v51  ;;  %v7939_v21 = vpack.c.bf16 %v7599_v52, %v7597_v23  ;;  %v7538_v13 = vld [vmem:[%s11734_s1 + $0x130] sm:$0xff]  ;;  %v7603_v50 = vld [vmem:[%s11734_s1 + $0x338] sm:$0xff] }
 0x223   :  { %v7176_v62 = vrot.slane %v6628_v31, %v10543_v20  ;;  %6801 = vperm.xlu1 %7983, %v6404_v34   ;;  %v11113_v34 = vcombine.low %v4238_v11, %v4245_v14  ;;  %7876 = vmatprep.subr.bf16.mxu1 %v7875_v42  ;;  %v5605_v11 = vcombine.low %v5597_v25, %v5604_v43  ;;  %v7543_v38 = vld [vmem:[%s11734_s1 + $0x158] sm:$0xff]  ;;  %v7540_v31 = vld [vmem:[%s11734_s1 + $0x140] sm:$0xff]  ;;  %v7542_v5 = vld [vmem:[%s11734_s1 + $0x150] sm:$0xff] }
 0x224   :  { %7938 = vmatpush1.bf16.msra.mxu0 %v7937_v24  ;;  %v11121_v47 = vsel %vm6838_vm4, %v7255_v16, %v10976_v44  ;;  %v5877_v44 = vcombine.low %v5869_v46, %v5876_v41  ;;  %v7941_v14 = vpack.c.bf16 %v7598_v6, %v7596_v1  ;;  %v7879_v57 = vpack.c.bf16 %v7539_v40, %v7537_v36  ;;  %v7605_v24 = vld [vmem:[%s11734_s1 + $0x348] sm:$0xff]  ;;  %v7607_v59 = vld [vmem:[%s11734_s1 + $0x358] sm:$0xff]  ;;  %v7544_v6 = vld [vmem:[%s11734_s1 + $0x160] sm:$0xff] }
 0x225   :  { %v11117_v61 = vsel %vm6838_vm4, %v7176_v62, %v10972_v60  ;;  %v6772_v60 = vpop.permute.xlu0 %6771  ;;  %7878 = vmatpush1.bf16.msra.mxu1 %v7877_v54  ;;  %7940 = vmatprep.subr.bf16.mxu0 %v7939_v21  ;;  %v6148_v30 = vrot.slane %v10673_v22, %v8582_v29  ;;  %v7881_v0 = vpack.c.bf16 %v7538_v13, %v7536_v63  ;;  %v7600_v22 = vld [vmem:[%s11734_s1 + $0x320] sm:$0xff]  ;;  %v7545_v21 = vld [vmem:[%s11734_s1 + $0x168] sm:$0xff]  ;;  %v7547_v1 = vld [vmem:[%s11734_s1 + $0x178] sm:$0xff] }
 0x226   :  { %v6724_v49 = vpop.permute.xlu1 %6723  ;;  %v7413_v45 = vrot.slane %v6772_v60, %v10543_v20  ;;  %6612 = vperm.xlu0 %7982, %v5333_v18   ;;  %v7943_v8 = vpack.c.bf16 %v7603_v50, %v7601_v19  ;;  %v6413_v39 = vrot.slane %v11105_v32, %v8582_v29  ;;  %v6420_v7 = vrot.slane %v11113_v34, %v8582_v29  ;;  %v7546_v36 = vld [vmem:[%s11734_s1 + $0x170] sm:$0xff]  ;;  %v7611_v40 = vld [vmem:[%s11734_s1 + $0x378] sm:$0xff]  ;;  %v7549_v19 = vld [vmem:[%s11734_s1 + $0x188] sm:$0xff] }
 0x227   :  { %v7334_v27 = vrot.slane %v6724_v49, %v10543_v20  ;;  %6564 = vperm.xlu1 %7983, %v5061_v48   ;;  %7880 = vmatprep.subr.bf16.mxu1 %v7879_v57  ;;  %v7885_v51 = vpack.c.bf16 %v7542_v5, %v7540_v31  ;;  %v7947_v10 = vpack.c.bf16 %v7607_v59, %v7605_v24  ;;  %v6847_v48 = vadd.s32 4294967248, %v10176_v17  ;;  %v7610_v57 = vld [vmem:[%s11734_s1 + $0x370] sm:$0xff]  ;;  %v7553_v31 = vld [vmem:[%s11734_s1 + $0x1a8] sm:$0xff]  ;;  %v7555_v5 = vld [vmem:[%s11734_s1 + $0x1b8] sm:$0xff] }
 0x228   :  { %7942 = vmatpush1.bf16.msra.mxu0 %v7941_v14  ;;  %v11159_v25 = vsel %vm6838_vm4, %v7413_v45, %v11021_v4  ;;  %v7541_v4 = vld [vmem:[%s11734_s1 + $0x148] sm:$0xff]  ;;  %v6149_v42 = vcombine.low %v6141_v15, %v6148_v30  ;;  %v6421_v23 = vcombine.low %v6413_v39, %v6420_v7  ;;  %v7551_v30 = vld [vmem:[%s11734_s1 + $0x198] sm:$0xff]  ;;  %v7895_v24 = vpack.c.bf16 %v7555_v5, %v7553_v31  ;;  %v7552_v59 = vld [vmem:[%s11734_s1 + $0x1a0] sm:$0xff] }
 0x229   :  { %v11155_v26 = vsel %vm6838_vm4, %v7334_v27, %v11017_v56  ;;  %v7602_v56 = vld [vmem:[%s11734_s1 + $0x330] sm:$0xff]  ;;  %v6583_v37 = vpop.permute.xlu0 %6582  ;;  %7882 = vmatpush1.bf16.msra.mxu1 %v7881_v0  ;;  %7944 = vmatprep.subr.bf16.mxu0 %v7943_v8  ;;  %v7883_v41 = vpack.c.bf16 %v7543_v38, %v7541_v4  ;;  %v7609_v14 = vld [vmem:[%s11734_s1 + $0x368] sm:$0xff]  ;;  %v11246_v50 = vsub.s32 %v6847_v48, %v12057_v3  ;;  %v7548_v0 = vld [vmem:[%s11734_s1 + $0x180] sm:$0xff] }
 0x22a   :  { %v6535_v43 = vpop.permute.xlu1 %6534  ;;  %v7945_v53 = vpack.c.bf16 %v7602_v56, %v7600_v22  ;;  %v7102_v2 = vrot.slane %v6583_v37, %v10621_v58  ;;  %6708 = vperm.xlu0 %7982, %v5877_v44   ;;  %v7889_v44 = vpack.c.bf16 %v7546_v36, %v7544_v6  ;;  %v7951_v27 = vpack.c.bf16 %v7611_v40, %v7609_v14  ;;  %v7550_v8 = vld [vmem:[%s11734_s1 + $0x190] sm:$0xff]  ;;  %v7613_v4 = vld [vmem:[%s11734_s1 + $0x388] sm:$0xff]  ;;  %v7612_v37 = vld [vmem:[%s11734_s1 + $0x380] sm:$0xff] }
 0x22b   :  { %v7023_v46 = vrot.slane %v6535_v43, %v10621_v58  ;;  %6660 = vperm.xlu1 %7983, %v5605_v11   ;;  %7884 = vmatprep.subr.bf16.mxu1 %v7883_v41  ;;  %v7887_v11 = vpack.c.bf16 %v7547_v1, %v7545_v21  ;;  %v7891_v22 = vpack.c.bf16 %v7551_v30, %v7549_v19  ;;  %v7615_v43 = vld [vmem:[%s11734_s1 + $0x398] sm:$0xff]  ;;  %v7556_v48 = vld [vmem:[%s11734_s1 + $0x1c0] sm:$0xff]  ;;  %v7621_v36 = vld [vmem:[%s11734_s1 + $0x3c8] sm:$0xff] }
 0x22c   :  { %7946 = vmatpush1.bf16.msra.mxu0 %v7945_v53  ;;  %v11197_v16 = vsel %vm6845_vm5, %v7102_v2, %v11063_v35  ;;  %v7606_v35 = vld [vmem:[%s11734_s1 + $0x350] sm:$0xff]  ;;  %v7893_v56 = vpack.c.bf16 %v7550_v8, %v7548_v0  ;;  %v7955_v38 = vpack.c.bf16 %v7615_v43, %v7613_v4  ;;  %v7559_v21 = vld [vmem:[%s11734_s1 + $0x1d8] sm:$0xff]  ;;  %v7625_v8 = vld [vmem:[%s11734_s1 + $0x3e8] sm:$0xff] }
 0x22d   :  { %v11193_v62 = vsel %vm6845_vm5, %v7023_v46, %v11059_v12  ;;  %v6679_v32 = vpop.permute.xlu0 %6678  ;;  %7886 = vmatpush1.bf16.msra.mxu1 %v7885_v51  ;;  %7948 = vmatprep.subr.bf16.mxu0 %v7947_v10  ;;  %v7604_v12 = vld [vmem:[%s11734_s1 + $0x340] sm:$0xff]  ;;  %v7554_v51 = vld [vmem:[%s11734_s1 + $0x1b0] sm:$0xff]  ;;  %v7617_v10 = vld [vmem:[%s11734_s1 + $0x3a8] sm:$0xff] }
 0x22e   :  { %v6631_v52 = vpop.permute.xlu1 %6630  ;;  %v7260_v54 = vrot.slane %v6679_v32, %v10621_v58  ;;  %6804 = vperm.xlu0 %7982, %v6421_v23   ;;  %v7949_v18 = vpack.c.bf16 %v7606_v35, %v7604_v12  ;;  %7888 = vmatprep.subr.bf16.mxu1 %v7887_v11  ;;  %v7619_v23 = vld [vmem:[%s11734_s1 + $0x3b8] sm:$0xff]  ;;  %v7618_v32 = vld [vmem:[%s11734_s1 + $0x3b0] sm:$0xff]  ;;  %v7557_v35 = vld [vmem:[%s11734_s1 + $0x1c8] sm:$0xff] }
 0x22f   :  { %v7181_v34 = vrot.slane %v6631_v52, %v10621_v58  ;;  %6756 = vperm.xlu1 %7983, %v6149_v42   ;;  %v7897_v42 = vpack.c.bf16 %v7554_v51, %v7552_v59  ;;  %v7616_v52 = vld [vmem:[%s11734_s1 + $0x3a0] sm:$0xff]  ;;  %v7959_v12 = vpack.c.bf16 %v7619_v23, %v7617_v10  ;;  %v7899_v6 = vpack.c.bf16 %v7559_v21, %v7557_v35  ;;  %v7623_v11 = vld [vmem:[%s11734_s1 + $0x3d8] sm:$0xff]  ;;  %v7562_v0 = vld [vmem:[%s11734_s1 + $0x1f0] sm:$0xff] }
 0x230   :  { %v11226_v60 = vsel %vm6845_vm5, %v7260_v54, %v11121_v47  ;;  %7950 = vmatpush1.bf16.msra.mxu0 %v7949_v18  ;;  %v7608_v47 = vld [vmem:[%s11734_s1 + $0x360] sm:$0xff]  ;;  %v7963_v40 = vpack.c.bf16 %v7623_v11, %v7621_v36 }
 0x231   :  { %v11222_v49 = vsel %vm6845_vm5, %v7181_v34, %v11117_v61  ;;  %v6775_v13 = vpop.permute.xlu0 %6774  ;;  %7890 = vmatpush1.bf16.msra.mxu1 %v7889_v44  ;;  %7952 = vmatprep.subr.bf16.mxu0 %v7951_v27  ;;  %v7953_v15 = vpack.c.bf16 %v7610_v57, %v7608_v47  ;;  %v7561_v27 = vld [vmem:[%s11734_s1 + $0x1e8] sm:$0xff]  ;;  %v7560_v47 = vld [vmem:[%s11734_s1 + $0x1e0] sm:$0xff]  ;;  %v6854_v57 = vadd.s32 4294967240, %v10176_v17 }
 0x232   :  { %v6727_v63 = vpop.permute.xlu1 %6726  ;;  %v7418_v45 = vrot.slane %v6775_v13, %v10621_v58  ;;  %7892 = vmatprep.subr.bf16.mxu1 %v7891_v22  ;;  %v7622_v13 = vld [vmem:[%s11734_s1 + $0x3d0] sm:$0xff]  ;;  %v7627_v22 = vld [vmem:[%s11734_s1 + $0x3f8] sm:$0xff] }
 0x233   :  { %v7339_v61 = vrot.slane %v6727_v63, %v10621_v58  ;;  %v7620_v63 = vld [vmem:[%s11734_s1 + $0x3c0] sm:$0xff] }
 0x234   :  { %v11263_v7 = vsel %vm6845_vm5, %v7418_v45, %v11159_v25  ;;  %7954 = vmatpush1.bf16.msra.mxu0 %v7953_v15  ;;  %v7614_v25 = vld [vmem:[%s11734_s1 + $0x390] sm:$0xff]  ;;  %v7563_v45 = vld [vmem:[%s11734_s1 + $0x1f8] sm:$0xff] }
 0x235   :  { %v11259_v39 = vsel %vm6845_vm5, %v7339_v61, %v11155_v26  ;;  %v6586_v53 = vpop.permute.xlu0 %6585  ;;  %v7957_v41 = vpack.c.bf16 %v7614_v25, %v7612_v37  ;;  %7894 = vmatpush1.bf16.msra.mxu1 %v7893_v56  ;;  %7956 = vmatprep.subr.bf16.mxu0 %v7955_v38  ;;  %v7903_v30 = vpack.c.bf16 %v7563_v45, %v7561_v27  ;;  %v6868_v27 = vadd.s32 4294967224, %v10176_v17 }
 0x236   :  { %v6538_v26 = vpop.permute.xlu1 %6537  ;;  %v7107_v2 = vrot.slane %v6586_v53, %v11246_v50  ;;  %7896 = vmatprep.subr.bf16.mxu1 %v7895_v24  ;;  %v7967_v37 = vpack.c.bf16 %v7627_v22, %v7625_v8  ;;  %v7626_v53 = vld [vmem:[%s11734_s1 + $0x3f0] sm:$0xff]  ;;  %v7905_v38 = vpack.c.bf16 %v7562_v0, %v7560_v47  ;;  %v11365_v25 = vsub.s32 %v6854_v57, %v12057_v3 }
 0x237   :  { %v7028_v46 = vrot.slane %v6538_v26, %v11246_v50  ;;  %v7624_v26 = vld [vmem:[%s11734_s1 + $0x3e0] sm:$0xff] }
 0x238   :  { %v7108_v54 = vsel %vm6852_vm6, %v7107_v2, %v11197_v16  ;;  %7958 = vmatpush1.bf16.msra.mxu0 %v7957_v41  ;;  %v7558_v16 = vld [vmem:[%s11734_s1 + $0x1d0] sm:$0xff]  ;;  %v7969_v41 = vpack.c.bf16 %v7626_v53, %v7624_v26 }
 0x239   :  { %v7029_v34 = vsel %vm6852_vm6, %v7028_v46, %v11193_v62  ;;  %v6682_v1 = vpop.permute.xlu0 %6681  ;;  %v7961_v62 = vpack.c.bf16 %v7618_v32, %v7616_v52  ;;  %7960 = vmatprep.subr.bf16.mxu0 %v7959_v12  ;;  %7898 = vmatpush1.bf16.msra.mxu1 %v7897_v42  ;;  %v7901_v61 = vpack.c.bf16 %v7558_v16, %v7556_v48  ;;  %v6861_v52 = vadd.s32 4294967232, %v10176_v17 }
 0x23a   :  { %v6634_v18 = vpop.permute.xlu1 %6633  ;;  %v7265_v14 = vrot.slane %v6682_v1, %v11246_v50  ;;  %7900 = vmatprep.subr.bf16.mxu1 %v7899_v6 }
 0x23b   :  { %v7186_v44 = vrot.slane %v6634_v18, %v11246_v50 }
 0x23c   :  { %v7266_v15 = vsel %vm6852_vm6, %v7265_v14, %v11226_v60  ;;  %7962 = vmatpush1.bf16.msra.mxu0 %v7961_v62 }
 0x23d   :  { %v7187_v19 = vsel %vm6852_vm6, %v7186_v44, %v11222_v49  ;;  %v6778_v4 = vpop.permute.xlu0 %6777  ;;  %v7965_v49 = vpack.c.bf16 %v7622_v13, %v7620_v63  ;;  %7964 = vmatprep.subr.bf16.mxu0 %v7963_v40  ;;  %7902 = vmatpush1.bf16.msra.mxu1 %v7901_v61 }
 0x23e   :  { %v6730_v56 = vpop.permute.xlu1 %6729  ;;  %v7423_v43 = vrot.slane %v6778_v4, %v11246_v50  ;;  %7904 = vmatprep.subr.bf16.mxu1 %v7903_v30  ;;  %v11399_v30 = vsub.s32 %v6868_v27, %v12057_v3  ;;  %v12160_v27 = vld [vmem:[#allocation24_spill] sm:$0xff] }
 0x23f   :  { %v7344_v60 = vrot.slane %v6730_v56, %v11246_v50 }
 0x240   :  { %v7424_v5 = vsel %vm6852_vm6, %v7423_v43, %v11263_v7  ;;  %7966 = vmatpush1.bf16.msra.mxu0 %v7965_v49 }
 0x241   :  { %v7345_v31 = vsel %vm6852_vm6, %v7344_v60, %v11259_v39  ;;  %v6589_v2 = vpop.permute.xlu0 %6588  ;;  %7968 = vmatprep.subr.bf16.mxu0 %v7967_v37  ;;  %7906 = vmatpush1.bf16.msra.mxu1 %v7905_v38 }
 0x242   :  { %v6541_v46 = vpop.permute.xlu1 %6540  ;;  %v7112_v59 = vrot.slane %v6589_v2, %v11365_v25 }
 0x243   :  { %v7033_v24 = vrot.slane %v6541_v46, %v11365_v25 }
 0x244   :  { %v7113_v10 = vsel %vm6859_vm7, %v7112_v59, %v7108_v54  ;;  %7970 = vmatpush1.bf16.msra.mxu0 %v7969_v41  ;;  %v11383_v54 = vsub.s32 %v6861_v52, %v12057_v3 }
 0x245   :  { %v7034_v51 = vsel %vm6859_vm7, %v7033_v24, %v7029_v34  ;;  %v6685_v42 = vpop.permute.xlu0 %6684 }
 0x246   :  { %v6637_v39 = vpop.permute.xlu1 %6636  ;;  %v7270_v23 = vrot.slane %v6685_v42, %v11365_v25 }
 0x247   :  { %v7191_v7 = vrot.slane %v6637_v39, %v11365_v25 }
 0x248   :  { %v7271_v12 = vsel %vm6859_vm7, %v7270_v23, %v7266_v15 }
 0x249   :  { %v7192_v32 = vsel %vm6859_vm7, %v7191_v7, %v7187_v19  ;;  %v6781_v21 = vpop.permute.xlu0 %6780 }
 0x24a   :  { %v6733_v35 = vpop.permute.xlu1 %6732  ;;  %v7428_v34 = vrot.slane %v6781_v21, %v11365_v25 }
 0x24b   :  { %v7349_v48 = vrot.slane %v6733_v35, %v11365_v25 }
 0x24c   :  { %v7429_v1 = vsel %vm6859_vm7, %v7428_v34, %v7424_v5 }
 0x24d   :  { %v7350_v18 = vsel %vm6859_vm7, %v7349_v48, %v7345_v31  ;;  %v6592_v6 = vpop.permute.xlu0 %6591  ;;  %v6875_v31 = vadd.s32 4294967216, %v10176_v17 }
 0x24e   :  { %v6544_v62 = vpop.permute.xlu1 %6543  ;;  %v7117_v36 = vrot.slane %v6592_v6, %v11383_v54 }
 0x24f   :  { %v7038_v16 = vrot.slane %v6544_v62, %v11383_v54 }
 0x250   :  { %v7118_v44 = vsel %vm6866_vm8, %v7117_v36, %v7113_v10 }
 0x251   :  { %v7039_v11 = vsel %vm6866_vm8, %v7038_v16, %v7034_v51  ;;  %v6688_v40 = vpop.permute.xlu0 %6687  ;;  %v11419_v51 = vsub.s32 %v6875_v31, %v12057_v3 }
 0x252   :  { %v6640_v14 = vpop.permute.xlu1 %6639  ;;  %v7275_v13 = vrot.slane %v6688_v40, %v11383_v54 }
 0x253   :  { %v7196_v63 = vrot.slane %v6640_v14, %v11383_v54 }
 0x254   :  { %v7276_v45 = vsel %vm6866_vm8, %v7275_v13, %v7271_v12 }
 0x255   :  { %v7197_v61 = vsel %vm6866_vm8, %v7196_v63, %v7192_v32  ;;  %v6784_v57 = vpop.permute.xlu0 %6783  ;;  %v12159_v63 = vld [vmem:[#allocation93_spill] sm:$0xff] }
 0x256   :  { %v6736_v47 = vpop.permute.xlu1 %6735  ;;  %v7433_v15 = vrot.slane %v6784_v57, %v11383_v54  ;;  %v6811_v13 = vrot.slane %v12159_v63, %v10202_v28  ;;  %v12162_v57 = vld [vmem:[#allocation51_spill] sm:$0xff]  ;;  %v12171_v63 = vld [vmem:[#allocation16_spill] sm:$0xff] }
 0x257   :  { %v7354_v19 = vrot.slane %v6736_v47, %v11383_v54 }
 0x258   :  { %v7434_v8 = vsel %vm6866_vm8, %v7433_v15, %v7429_v1  ;;  %v12163_v15 = vld [vmem:[#allocation92_spill] sm:$0xff] }
 0x259   :  { %v7355_v0 = vsel %vm6866_vm8, %v7354_v19, %v7350_v18  ;;  %v6595_v56 = vpop.permute.xlu0 %6594  ;;  %v6929_v19 = vrot.slane %v12162_v57, %v12141_v9 }
 0x25a   :  { %v6547_v22 = vpop.permute.xlu1 %6546  ;;  %v7122_v49 = vrot.slane %v6595_v56, %v11399_v30 }
 0x25b   :  { %v7043_v4 = vrot.slane %v6547_v22, %v11399_v30 }
 0x25c   :  { %v7123_v43 = vsel %vm6873_vm9, %v7122_v49, %v7118_v44 }
 0x25d   :  { %v7044_v60 = vsel %vm6873_vm9, %v7043_v4, %v7039_v11  ;;  %v6691_v26 = vpop.permute.xlu0 %6690 }
 0x25e   :  { %v6643_v37 = vpop.permute.xlu1 %6642  ;;  %v7280_v38 = vrot.slane %v6691_v26, %v11399_v30 }
 0x25f   :  { %v7201_v53 = vrot.slane %v6643_v37, %v11399_v30 }
 0x260   :  { %v11414_v46 = vsel %vm6873_vm9, %v7280_v38, %v7276_v45  ;;  %v12161_v45 = vld [vmem:[#allocation89_spill] sm:$0xff] }
 0x261   :  { %v11411_v5 = vsel %vm6873_vm9, %v7201_v53, %v7197_v61  ;;  %v6787_v41 = vpop.permute.xlu0 %6786  ;;  %v6920_v61 = vrot.slane %v12160_v27, %v10202_v28  ;;  %v6816_v47 = vrot.slane %v12161_v45, %v10273_v33  ;;  %v12165_v28 = vld [vmem:[#allocation34_spill] sm:$0xff]  ;;  %v6889_v27 = vadd.s32 4294967200, %v10176_v17 }
 0x262   :  { %v6739_v2 = vpop.permute.xlu1 %6738  ;;  %v7438_v59 = vrot.slane %v6787_v41, %v11399_v30  ;;  %v12167_v53 = vld [vmem:[#allocation22_spill] sm:$0xff]  ;;  %v12169_v41 = vld [vmem:[#allocation81_spill] sm:$0xff] }
 0x263   :  { %v7359_v24 = vrot.slane %v6739_v2, %v11399_v30  ;;  %v6818_v49 = vsel %vm6817_vm1, %v6816_v47, %v6811_v13  ;;  %v6858_v13 = vrot.slane %v12171_v63, %v11365_v25 }
 0x264   :  { %v11425_v39 = vsel %vm6873_vm9, %v7438_v59, %v7434_v8  ;;  %v12164_v8 = vld [vmem:[#allocation70_spill] sm:$0xff] }
 0x265   :  { %v11422_v10 = vsel %vm6873_vm9, %v7359_v24, %v7355_v0  ;;  %v6598_v7 = vpop.permute.xlu0 %6597  ;;  %v6823_v0 = vrot.slane %v12163_v15, %v12141_v9  ;;  %v6924_v22 = vrot.slane %v12164_v8, %v10273_v33  ;;  %v6844_v9 = vrot.slane %v12167_v53, %v10621_v58  ;;  %v12168_v33 = vld [vmem:[#allocation83_spill] sm:$0xff]  ;;  %v12170_v59 = vld [vmem:[#allocation26_spill] sm:$0xff]  ;;  %v12173_v15 = vld [vmem:[#allocation84_spill] sm:$0xff] }
 0x266   :  { %v6550_v42 = vpop.permute.xlu1 %6549  ;;  %v7127_v52 = vrot.slane %v6598_v7, %v11419_v51  ;;  %v6939_v31 = vrot.slane %v12168_v33, %v10543_v20  ;;  %v6851_v24 = vrot.slane %v12169_v41, %v11246_v50  ;;  %v12176_v33 = vld [vmem:[#allocation63_spill] sm:$0xff] }
 0x267   :  { %v7048_v23 = vrot.slane %v6550_v42, %v11419_v51  ;;  %v6925_v26 = vsel %vm6817_vm1, %v6924_v22, %v6920_v61  ;;  %v6825_v2 = vsel %vm6824_vm2, %v6823_v0, %v6818_v49  ;;  %v6934_v42 = vrot.slane %v12170_v59, %v10435_v55  ;;  %v12172_v61 = vld [vmem:[#allocation25_spill] sm:$0xff]  ;;  %v12174_v22 = vld [vmem:[#allocation42_spill] sm:$0xff] }
 0x268   :  { %v11433_v12 = vsel %vm6880_vm10, %v7127_v52, %v7123_v43  ;;  %v12166_v43 = vld [vmem:[#allocation64_spill] sm:$0xff]  ;;  %v6930_v38 = vsel %vm6824_vm2, %v6929_v19, %v6925_v26  ;;  %v6865_v45 = vrot.slane %v12172_v61, %v11383_v54  ;;  %v6949_v0 = vrot.slane %v12173_v15, %v11246_v50  ;;  %v12175_v50 = vld [vmem:[#allocation54_spill] sm:$0xff] }
 0x269   :  { %v11430_v32 = vsel %vm6880_vm10, %v7048_v23, %v7044_v60  ;;  %v11437_v21 = vpop.permute.xlu0 %6693  ;;  %v6830_v60 = vrot.slane %v12165_v28, %v10435_v55  ;;  %v6837_v37 = vrot.slane %v12166_v43, %v10543_v20  ;;  %v6935_v47 = vsel %vm6831_vm3, %v6934_v42, %v6930_v38  ;;  %v12178_v42 = vld [vmem:[#allocation7_spill] sm:$0xff]  ;;  %v12181_v15 = vld [vmem:[#allocation8_spill] sm:$0xff] }
 0x26a   :  { %v11435_v35 = vpop.permute.xlu1 %6645  ;;  %v6882_v55 = vadd.s32 4294967208, %v10176_v17  ;;  %v6940_v19 = vsel %vm6838_vm4, %v6939_v31, %v6935_v47  ;;  %v6944_v49 = vrot.slane %v12174_v22, %v10621_v58  ;;  %v6896_v43 = vadd.s32 4294967192, %v10176_v17  ;;  %v12182_v22 = vld [vmem:[#allocation50_spill] sm:$0xff] }
 0x26b   :  { %v6832_v52 = vsel %vm6831_vm3, %v6830_v60, %v6825_v2  ;;  %v11522_v26 = vsub.s32 %v6889_v27, %v12057_v3  ;;  %v6903_v38 = vadd.s32 4294967184, %v10176_v17  ;;  %v6872_v31 = vrot.slane %v12176_v33, %v11399_v30  ;;  %v12184_v33 = vld [vmem:[#allocation37_spill] sm:$0xff] }
 0x26c   :  { %v6839_v20 = vsel %vm6838_vm4, %v6837_v37, %v6832_v52  ;;  %v6945_v58 = vsel %vm6845_vm5, %v6944_v49, %v6940_v19  ;;  %v11532_v2 = vsub.s32 %v6882_v55, %v12057_v3  ;;  %v6954_v52 = vrot.slane %v12178_v42, %v11365_v25  ;;  %v12180_v55 = vld [vmem:[#allocation6_spill] sm:$0xff] }
 0x26d   :  { %v11441_v34 = vpop.permute.xlu0 %6789  ;;  %v6846_v57 = vsel %vm6845_vm5, %v6844_v9, %v6839_v20  ;;  %v6879_v9 = vrot.slane %v12175_v50, %v11419_v51  ;;  %v6950_v41 = vsel %vm6852_vm6, %v6949_v0, %v6945_v58  ;;  %v11544_v27 = vsub.s32 %v6896_v43, %v12057_v3 }
 0x26e   :  { %v11439_v48 = vpop.permute.xlu1 %6741  ;;  %v6853_v8 = vsel %vm6852_vm6, %v6851_v24, %v6846_v57  ;;  %v12177_v24 = vld [vmem:[#allocation10_spill] sm:$0xff]  ;;  %v6955_v25 = vsel %vm6859_vm7, %v6954_v52, %v6950_v41  ;;  %v6886_v57 = vrot.slane %v12180_v55, %v11532_v2  ;;  %v6969_v0 = vrot.slane %v12181_v15, %v11419_v51  ;;  %v12187_v15 = vld [vmem:[#allocation44_spill] sm:$0xff] }
 0x26f   :  { %v6860_v37 = vsel %vm6859_vm7, %v6858_v13, %v6853_v8  ;;  %v6959_v59 = vrot.slane %v12177_v24, %v11383_v54  ;;  %v11551_v54 = vsub.s32 %v6903_v38, %v12057_v3  ;;  %v6910_v8 = vadd.s32 4294967176, %v10176_v17 }
 0x270   :  { %v6867_v53 = vsel %vm6866_vm8, %v6865_v45, %v6860_v37  ;;  %v12179_v45 = vld [vmem:[#allocation36_spill] sm:$0xff]  ;;  %v6964_v49 = vrot.slane %v12182_v22, %v11399_v30  ;;  %v6900_v17 = vrot.slane %v12184_v33, %v11544_v27  ;;  %v7206_v55 = vrot.slane %v11435_v35, %v11419_v51 }
 0x271   :  { %v11445_v1 = vpop.permute.xlu0 %6600  ;;  %v6874_v20 = vsel %vm6873_vm9, %v6872_v31, %v6867_v53  ;;  %v6893_v47 = vrot.slane %v12179_v45, %v11522_v26  ;;  %v6960_v19 = vsel %vm6866_vm8, %v6959_v59, %v6955_v25  ;;  %v12185_v31 = vld [vmem:[#allocation62_spill] sm:$0xff]  ;;  %v11577_v24 = vsub.s32 %v6910_v8, %v12057_v3  ;;  %v12186_v59 = vld [vmem:[#allocation48_spill] sm:$0xff] }
 0x272   :  { %v11443_v18 = vpop.permute.xlu1 %6552  ;;  %v6881_v61 = vsel %vm6880_vm10, %v6879_v9, %v6874_v20  ;;  %v12183_v9 = vld [vmem:[#allocation23_spill] sm:$0xff]  ;;  %v6965_v58 = vsel %vm6873_vm9, %v6964_v49, %v6960_v19  ;;  %v6979_v41 = vrot.slane %v12185_v31, %v11522_v26  ;;  %v6974_v42 = vrot.slane %v12186_v59, %v11532_v2  ;;  %v12188_v8 = vld [vmem:[#allocation52_spill] sm:$0xff] }
 0x273   :  { %v6888_v53 = vsel %vm6887_vm11, %v6886_v57, %v6881_v61  ;;  %v6907_v38 = vrot.slane %v12183_v9, %v11551_v54  ;;  %v6970_v30 = vsel %vm6880_vm10, %v6969_v0, %v6965_v58  ;;  %v7285_v57 = vrot.slane %v11437_v21, %v11419_v51 }
 0x274   :  { %v6895_v50 = vsel %vm6894_vm12, %v6893_v47, %v6888_v53  ;;  %v6975_v47 = vsel %vm6887_vm11, %v6974_v42, %v6970_v30  ;;  %v7364_v19 = vrot.slane %v11439_v48, %v11419_v51  ;;  %v6914_v0 = vrot.slane %v12187_v15, %v11577_v24 }
 0x275   :  { %v11449_v6 = vpop.permute.xlu0 %6696  ;;  %v6902_v61 = vsel %vm6901_vm13, %v6900_v17, %v6895_v50  ;;  %v6980_v25 = vsel %vm6894_vm12, %v6979_v41, %v6975_v47  ;;  %v6984_v22 = vrot.slane %v12188_v8, %v11544_v27  ;;  %v7443_v49 = vrot.slane %v11441_v34, %v11419_v51 }
 0x276   :  { %v11447_v62 = vpop.permute.xlu1 %6648  ;;  %v6909_v45 = vsel %vm6908_vm14, %v6907_v38, %v6902_v61  ;;  %v7053_v35 = vrot.slane %v11443_v18, %v11532_v2  ;;  %v7132_v48 = vrot.slane %v11445_v1, %v11532_v2  ;;  %v7207_v51 = vsel %vm6880_vm10, %v7206_v55, %v11411_v5 }
 0x277   :  { %v11606_v21 = vsel %vm6915_vm15, %v6914_v0, %v6909_v45  ;;  %v7211_v9 = vrot.slane %v11447_v62, %v11532_v2  ;;  %v6985_v38 = vsel %vm6901_vm13, %v6984_v22, %v6980_v25  ;;  %v7286_v34 = vsel %vm6880_vm10, %v7285_v57, %v11414_v46 }
 0x278   :  { %v7365_v18 = vsel %vm6880_vm10, %v7364_v19, %v11422_v10  ;;  %v7290_v58 = vrot.slane %v11449_v6, %v11532_v2  ;;  %v7444_v1 = vsel %vm6880_vm10, %v7443_v49, %v11425_v39  ;;  %v7054_v10 = vsel %vm6887_vm11, %v7053_v35, %v11430_v32 }
 0x279   :  { %v11453_v36 = vpop.permute.xlu0 %6792  ;;  %vm7806_vm1 = vcmask 1041408  }
 0x27a   :  { %v11451_v16 = vpop.permute.xlu1 %6744  ;;  %v7448_v33 = vrot.slane %v11453_v36, %v11532_v2  ;;  %v7133_v36 = vsel %vm6887_vm11, %v7132_v48, %v11433_v12 }
 0x27b   :  { %v7369_v62 = vrot.slane %v11451_v16, %v11532_v2 }
 0x27c   :  { %v7449_v31 = vsel %vm6887_vm11, %v7448_v33, %v7444_v1 }
 0x27d   :  { %v11457_v44 = vpop.permute.xlu0 %6603  ;;  %v7370_v12 = vsel %vm6887_vm11, %v7369_v62, %v7365_v18 }
 0x27e   :  { %v11455_v11 = vpop.permute.xlu1 %6555  ;;  %v7137_v6 = vrot.slane %v11457_v44, %v11522_v26  ;;  %v7291_v44 = vsel %vm6887_vm11, %v7290_v58, %v7286_v34 }
 0x27f   :  { %v7058_v5 = vrot.slane %v11455_v11, %v11522_v26  ;;  %v7212_v11 = vsel %vm6887_vm11, %v7211_v9, %v7207_v51 }
 0x280   :  { %v7138_v59 = vsel %vm6894_vm12, %v7137_v6, %v7133_v36 }
 0x281   :  { %v11461_v40 = vpop.permute.xlu0 %6699 }
 0x282   :  { %v11459_v14 = vpop.permute.xlu1 %6651  ;;  %v7295_v16 = vrot.slane %v11461_v40, %v11522_v26 }
 0x283   :  { %v7216_v39 = vrot.slane %v11459_v14, %v11522_v26 }
 0x285   :  { %v11477_v4 = vpop.permute.xlu0 %6795 }
 0x286   :  { %v11475_v56 = vpop.permute.xlu1 %6747  ;;  %v7453_v32 = vrot.slane %v11477_v4, %v11522_v26 }
 0x287   :  { %v7374_v2 = vrot.slane %v11475_v56, %v11522_v26  ;;  %v7059_v56 = vsel %vm6894_vm12, %v7058_v5, %v7054_v10 }
 0x288   :  { %v7454_v61 = vsel %vm6894_vm12, %v7453_v32, %v7449_v31 }
 0x289   :  { %v11497_v23 = vpop.permute.xlu0 %6606  ;;  %v7375_v42 = vsel %vm6894_vm12, %v7374_v2, %v7370_v12 }
 0x28a   :  { %v11495_v7 = vpop.permute.xlu1 %6558  ;;  %v7142_v25 = vrot.slane %v11497_v23, %v11544_v27 }
 0x28b   :  { %v7063_v14 = vrot.slane %v11495_v7, %v11544_v27  ;;  %v7217_v7 = vsel %vm6894_vm12, %v7216_v39, %v7212_v11 }
 0x28c   :  { %v7143_v51 = vsel %vm6901_vm13, %v7142_v25, %v7138_v59  ;;  %v7636_v59 = vsub.s32 1, %v12057_v3 }
 0x28d   :  { %v11517_v60 = vpop.permute.xlu0 %6702 }
 0x28e   :  { %v11515_v28 = vpop.permute.xlu1 %6654  ;;  %v7300_v30 = vrot.slane %v11517_v60, %v11544_v27 }
 0x28f   :  { %v7221_v40 = vrot.slane %v11515_v28, %v11544_v27  ;;  %v7296_v28 = vsel %vm6894_vm12, %v7295_v16, %v7291_v44 }
 0x290   :  { %v7301_v57 = vsel %vm6901_vm13, %v7300_v30, %v7296_v28 }
 0x291   :  { %v11541_v13 = vpop.permute.xlu0 %6798  ;;  %v7222_v55 = vsel %vm6901_vm13, %v7221_v40, %v7217_v7 }
 0x292   :  { %v11539_v63 = vpop.permute.xlu1 %6750  ;;  %v7458_v19 = vrot.slane %v11541_v13, %v11544_v27 }
 0x294   :  { %v7459_v1 = vsel %vm6901_vm13, %v7458_v19, %v7454_v61 }
 0x295   :  { %v11564_v37 = vpop.permute.xlu0 %6561 }
 0x296   :  { %v11562_v43 = vpop.permute.xlu1 %6513  ;;  %v7068_v0 = vrot.slane %v11564_v37, %v11551_v54 }
 0x297   :  { %v6989_v4 = vrot.slane %v11562_v43, %v11551_v54  ;;  %v7064_v43 = vsel %vm6901_vm13, %v7063_v14, %v7059_v56 }
 0x299   :  { %v11583_v20 = vpop.permute.xlu0 %6657  ;;  %v6990_v15 = vsel %vm6908_vm14, %v6989_v4, %v6985_v38 }
 0x29a   :  { %v11581_v52 = vpop.permute.xlu1 %6609  ;;  %v7226_v60 = vrot.slane %v11583_v20, %v11551_v54  ;;  %v7379_v20 = vrot.slane %v11539_v63, %v11544_v27 }
 0x29b   :  { %v7147_v23 = vrot.slane %v11581_v52, %v11551_v54 }
 0x29c   :  { %v7227_v49 = vsel %vm6908_vm14, %v7226_v60, %v7222_v55  ;;  %v7380_v34 = vsel %vm6901_vm13, %v7379_v20, %v7375_v42 }
 0x29d   :  { %v11601_v50 = vpop.permute.xlu0 %6753 }
 0x29e   :  { %v6706_v53 = vpop.permute.xlu1 %6705  ;;  %v7384_v13 = vrot.slane %v11601_v50, %v11551_v54 }
 0x29f   :  { %v7305_v45 = vrot.slane %v6706_v53, %v11551_v54 }
 0x2a0   :  { %v7385_v10 = vsel %vm6908_vm14, %v7384_v13, %v7380_v34 }
 0x2a1   :  { %v6517_v46 = vpop.permute.xlu0 %6516  ;;  %v7306_v63 = vsel %vm6908_vm14, %v7305_v45, %v7301_v57 }
 0x2a2   :  { %v11629_v17 = vpop.permute.xlu1 %6801  ;;  %v6994_v47 = vrot.slane %v6517_v46, %v11577_v24  ;;  %v7148_v46 = vsel %vm6908_vm14, %v7147_v23, %v7143_v51 }
 0x2a3   :  { %v7463_v27 = vrot.slane %v11629_v17, %v11551_v54  ;;  %v7069_v17 = vsel %vm6908_vm14, %v7068_v0, %v7064_v43 }
 0x2a4   :  { %v6995_v37 = vsel %vm6915_vm15, %v6994_v47, %v6990_v15 }
 0x2a5   :  { %v6613_v41 = vpop.permute.xlu0 %6612  ;;  %v7464_v6 = vsel %vm6908_vm14, %v7463_v27, %v7459_v1 }
 0x2a6   :  { %v6565_v26 = vpop.permute.xlu1 %6564  ;;  %v7152_v52 = vrot.slane %v6613_v41, %v11577_v24  ;;  %v7628_v41 = vld [vmem:[%s11735_s2] sm:$0x3]  ;;  %s8016_s2 = smov [#allocation3]  }
 0x2a7   :  { %v7073_v48 = vrot.slane %v6565_v26, %v11577_v24  ;;  %v7632_v26 = vsub.s32 0, %v12057_v3  ;;  %v7637_v28 = vrot.slane %v7628_v41, %v7636_v59  ;;  %s7834_s29 = sshll.u32 %s8016_s2, 4  ;;  %s7835_s29 = int_to_ptr.vmem [resolvable:$true] %s7834_s29 }
 0x2a8   :  { %v7153_v39 = vsel %vm6915_vm15, %v7152_v52, %v7148_v46  ;;  %s7986_s30 = scalar_lea.vmem %s7835_s29, 64  ;;  %p7991_p1 = scmp.lt.s32.totalorder %s7835_s29, %s7835_s29 }
 0x2a9   :  { %v6709_v22 = vpop.permute.xlu0 %6708  ;;  %v7633_v7 = vrot.slane %v7628_v41, %v7632_v26  ;;  %p7987_p0 = scmp.ne.s32.totalorder %s7835_s29, %s7986_s30  ;;  %p7992_p2 = scmp.lt.s32.totalorder %s7986_s30, %s7986_s30 }
 0x2aa   :  { %v6661_v8 = vpop.permute.xlu1 %6660  ;;  %v7310_v35 = vrot.slane %v6709_v22, %v11577_v24 }
 0x2ab   :  { %v7231_v53 = vrot.slane %v6661_v8, %v11577_v24  ;;  %p7993_p3 = por %p7992_p2, %p7991_p1 }
 0x2ac   :  { %v7311_v38 = vsel %vm6915_vm15, %v7310_v35, %v7306_v63 }
 0x2ad   :  { %v7232_v9 = vsel %vm6915_vm15, %v7231_v53, %v7227_v49  ;;  %v7472_v18 = vsel %vm7470_vm0, %v7311_v38, %v6995_v37  ;;  %v6805_v58 = vpop.permute.xlu0 %6804  ;;  %p7994_p4 = pnand %p7993_p3, %p7987_p0 }
 0x2ae   :  { %v7471_v50 = vsel %vm7470_vm0, %v7232_v9, %v11606_v21  ;;  %v6757_v54 = vpop.permute.xlu1 %6756  ;;  %v7468_v5 = vrot.slane %v6805_v58, %v11577_v24  ;;  %v7074_v21 = vsel %vm6915_vm15, %v7073_v48, %v7069_v17 }
 0x2af   :  { %v7475_v62 = vcombine.low %v7471_v50, %v7472_v18  ;;  %v7389_v33 = vrot.slane %v6757_v54, %v11577_v24 }
 0x2b0   :  { %v7469_v36 = vsel %vm6915_vm15, %v7468_v5, %v7464_v6 }
 0x2b1   :  { %v7390_v16 = vsel %vm6915_vm15, %v7389_v33, %v7385_v10  ;;  %v7474_v24 = vsel %vm7470_vm0, %v7469_v36, %v7153_v39  ;;  %v7483_v32 = vrot.slane %v7475_v62, %v8582_v29 }
 0x2b2   :  { %v7473_v11 = vsel %vm7470_vm0, %v7390_v16, %v7074_v21 }
 0x2b3   :  { %v7476_v2 = vcombine.low %v7473_v11, %v7474_v24 }
 0x2b5   :  { %v7490_v44 = vrot.slane %v7476_v2, %v8582_v29 }
 0x2b7   :  { %v7491_v14 = vcombine.low %v7483_v32, %v7490_v44 }
 0x2b9   :  { %v7499_v40 = vmul.f32 0.0625, %v7491_v14 }
 0x2bb   :  { %v7648_v30 = vrot.slane %v7499_v40, %v8582_v29  ;;  %v7641_v12 = vcombine.high %v7499_v40, %v7499_v40 }
 0x2bd   :  { %v7656_v31 = vcombine.high %v7648_v30, %v7648_v30  ;;  %v7655_v56 = vrot.slane %v7641_v12, %v8582_v29 }
 0x2bf   :  { %7726 = vmatprep.mubr.f32.mxu1 %v7656_v31  ;;  %v7657_v4 = vcombine.high %v7655_v56, %v7655_v56 }
 0x2c0   :  { %7727 = vmatmul.mubr.f32.vlgmr.msra.gmra.mrb[0].mxu1 %v7648_v30 }
 0x2c1   :  { %7797 = vmatprep.mubr.f32.mxu0 %v7657_v4 }
 0x2c2   :  { %7798 = vmatmul.mubr.f32.vlgmr.msra.gmra.mrb[0].mxu0 %v7655_v56 }
 0x393   :  { %v7728_v60 = vpop.f32.mrb[0].mxu1 }
 0x394   :  { %v7729_v42 = vadd.f32 %v7728_v60, %v7633_v7  ;;  %v7730_v61 = vpop.f32.mrb[1].mxu1 }
 0x395   :  { %v7731_v45 = vadd.f32 %v7730_v61, %v7637_v28  ;;  %v7799_v29 = vpop.f32.mrb[0].mxu0 }
 0x396   :  { %v7800_v47 = vadd.f32 %v7799_v29, %v7729_v42  ;;  %v7801_v43 = vpop.f32.mrb[1].mxu0 }
 0x397   :  { %v7802_v25 = vadd.f32 %v7801_v43, %v7731_v45 }
 0x398   :  { %v7804_v55 = vmul.f32 %v7800_v47, %v7800_v47 }
 0x399   :  { %v7805_v57 = vmul.f32 %v7802_v25, %v7802_v25 }
 0x39a   :  { %v7807_v20 = vsel %vm7806_vm1, %v7804_v55, 0.0 }
 0x39b   :  { %v7808_v19 = vsel %vm7806_vm1, %v7805_v57, 0.0 }
 0x39c   :  { %v7809_v15 = vadd.f32 %v7808_v19, %v7807_v20 }
 0x39e   :  { %7810 = vadd.xlane.f32.xlu1 %v7809_v15 }
 0x42b   :  { %v7811_v0 = vpop.xlane.xlu1 %7810 }
 0x42c   :  { %v7812_v8 = vmax.f32 %v7811_v0, 1e-24 }
 0x42e   :  { %7984 = vrsqrt.f32 %v7812_v8 }
 0x438   :  { %v7985_v3 = vpop.eup %7984 }
 0x439   :  { %v7814_v22 = vmul.f32 %v7985_v3, %v7800_v47  ;;  %v7815_v23 = vmul.f32 %v7985_v3, %v7802_v25 }
 0x43b   :  { %v7818_v49 = vcombine.low %v7814_v22, %v7815_v23 }
 0x43d   :  { %7842 = vst.sshfl [vmem:[#allocation3] sm:$0x33 pattern:$0x76325410] %v7818_v49 }
 0x43e   :  { %7997 = shalt.err (!%p7994_p4)
}
 0x43f   :  { %s7998_s6 = scalar_lea.hbm %s11736_s3, 64 }
 0x440   :  { %p7999_p5 = scmp.ne.s32.totalorder %s11736_s3, %s7998_s6  ;;  %p8002_p6 = scmp.lt.u32.totalorder %s7998_s6, %s11736_s3 }
 0x442   :  { %p8004_p7 = pnand %p8002_p6, %p7999_p5 }
 0x444   :  { %8007 = shalt.err (!%p8004_p7)
}
 0x445   :  { %7837 = dma.vmem_to_hbm [thread:$0]  %s7835_s29, 64, %s11736_s3, [#allocation4]  }
 0x446   :  { %8008 = dma.done.wait [#allocation4], 64  }
 0x447   :  { %8009 = vsyncadd [#allocation4], 4294967232 }
 0x448   :  { %7841 = vsyncpa [#allocation4], 1 }

</bundles_post_ra>
